<compile_context>
chip_gen: v7x
topology: tpu7x:2x2x1
jax: 0.10.0
libtpu: 0.0.40
codegen_flags: <defaults>
</compile_context>

<pallas_src>
import functools
import numpy as np
import jax
import jax.numpy as jnp
from jax.experimental import pallas as pl
from jax.experimental.pallas import tpu as pltpu

BN_EPS = 1e-5


# --------------------------- shared BN+ReLU epilogue -------------------------

def _bn_relu(y, gamma, beta):
    # Train-mode BatchNorm over the row axis: one-pass stats, gamma folded into
    # the scale so the per-element work is a single fma + max.
    m = jnp.mean(y, axis=0, keepdims=True)
    v = jnp.maximum(jnp.mean(y * y, axis=0, keepdims=True) - m * m, 0.0)
    scale = gamma * jax.lax.rsqrt(v + BN_EPS)
    shift = beta - m * scale
    return jnp.maximum(y * scale + shift, 0.0)


# --------------------------- Pallas kernels ----------------------------------

def conv12_kernel(x_ref, w1_ref, g1_ref, b1_ref, w2_ref, g2_ref, b2_ref, o_ref):
    # conv1 (k->64) + BN1 + ReLU + conv2 (64->128) + BN2 + ReLU, 64-wide
    # intermediate never leaves VMEM; only the lane-dense 128-wide result is stored.
    y1 = jnp.dot(x_ref[...], w1_ref[...], preferred_element_type=jnp.float32)
    h1 = _bn_relu(y1, g1_ref[...], b1_ref[...])
    y2 = jnp.dot(h1.astype(jnp.bfloat16), w2_ref[...],
                 preferred_element_type=jnp.float32)
    o_ref[...] = _bn_relu(y2, g2_ref[...], b2_ref[...]).astype(jnp.bfloat16)


def conv3_amax_kernel(h_ref, w3_ref, g3_ref, b3_ref, o_ref, *, batch, npts):
    # conv3 (128->1024 channel tile) + BN3 + ReLU + max over the points axis.
    y = jnp.dot(h_ref[...], w3_ref[...], preferred_element_type=jnp.float32)
    r = _bn_relu(y, g3_ref[...], b3_ref[...])                    # (B*N, tile)
    # reshape keeps the lane dim and splits sublanes on an 8-aligned boundary.
    o_ref[...] = jnp.max(r.reshape(batch, npts, r.shape[-1]), axis=1)


def fc_fused_kernel(g_ref, fw1_ref, g4_ref, b4_ref, fw2_ref, g5_ref, b5_ref,
                    fw3_ref, fb3i_ref, o_ref):
    # fc1+BN4+ReLU -> fc2+BN5+ReLU -> fc3 + (bias + flattened identity), one body.
    h = _bn_relu(jnp.dot(g_ref[...].astype(jnp.bfloat16), fw1_ref[...],
                         preferred_element_type=jnp.float32),
                 g4_ref[...], b4_ref[...])
    h = _bn_relu(jnp.dot(h.astype(jnp.bfloat16), fw2_ref[...],
                         preferred_element_type=jnp.float32),
                 g5_ref[...], b5_ref[...])
    o_ref[...] = (jnp.dot(h, fw3_ref[...], preferred_element_type=jnp.float32)
                  + fb3i_ref[...])


# --------------------------- pallas_call wrappers -----------------------------

def conv12(x_cl, p):
    M, k = x_cl.shape
    return pl.pallas_call(
        conv12_kernel,
        out_shape=jax.ShapeDtypeStruct((M, 128), jnp.bfloat16),
        grid=(1,),
        in_specs=[
            pl.BlockSpec((M, k), lambda i: (0, 0)),
            pl.BlockSpec((k, 64), lambda i: (0, 0)),
            pl.BlockSpec((1, 64), lambda i: (0, 0)),
            pl.BlockSpec((1, 64), lambda i: (0, 0)),
            pl.BlockSpec((64, 128), lambda i: (0, 0)),
            pl.BlockSpec((1, 128), lambda i: (0, 0)),
            pl.BlockSpec((1, 128), lambda i: (0, 0)),
        ],
        out_specs=pl.BlockSpec((M, 128), lambda i: (0, 0)),
    )(x_cl, p['w1'], *p['bn1'], p['w2'], *p['bn2'])


def conv3_amax(h2, p, batch, npts, cout_tile=512):
    M, cin = h2.shape
    cout = p['w3'].shape[1]
    tile = min(cout_tile, cout)
    assert cout % tile == 0
    kern = functools.partial(conv3_amax_kernel, batch=batch, npts=npts)
    return pl.pallas_call(
        kern,
        out_shape=jax.ShapeDtypeStruct((batch, cout), jnp.float32),
        grid=(cout // tile,),
        in_specs=[
            pl.BlockSpec((M, cin), lambda j: (0, 0)),
            pl.BlockSpec((cin, tile), lambda j: (0, j)),
            pl.BlockSpec((1, tile), lambda j: (0, j)),
            pl.BlockSpec((1, tile), lambda j: (0, j)),
        ],
        out_specs=pl.BlockSpec((batch, tile), lambda j: (0, j)),
        compiler_params=pltpu.CompilerParams(dimension_semantics=("parallel",)),
    )(h2, p['w3'], *p['bn3'])


def fc_fused(g, p, k):
    B = g.shape[0]
    kk = k * k
    return pl.pallas_call(
        fc_fused_kernel,
        out_shape=jax.ShapeDtypeStruct((B, kk), jnp.float32),
        grid=(1,),
        in_specs=[
            pl.BlockSpec((B, 1024), lambda i: (0, 0)),
            pl.BlockSpec((1024, 512), lambda i: (0, 0)),
            pl.BlockSpec((1, 512), lambda i: (0, 0)),
            pl.BlockSpec((1, 512), lambda i: (0, 0)),
            pl.BlockSpec((512, 256), lambda i: (0, 0)),
            pl.BlockSpec((1, 256), lambda i: (0, 0)),
            pl.BlockSpec((1, 256), lambda i: (0, 0)),
            pl.BlockSpec((256, kk), lambda i: (0, 0)),
            pl.BlockSpec((1, kk), lambda i: (0, 0)),
        ],
        out_specs=pl.BlockSpec((B, kk), lambda i: (0, 0)),
    )(g, p['fw1'], *p['bn4'], p['fw2'], *p['bn5'], p['fw3'], p['fb3_plus_iden'])


# --------------------------- parameter init (deterministic) -------------------

def _uniform(key, shape, fan_in):
    bound = 1.0 / np.sqrt(fan_in)
    return jax.random.uniform(key, shape, jnp.float32, -bound, bound)


def _init_bn(key, c):
    kg, kb = jax.random.split(key)
    gamma = 1.0 + 0.1 * jax.random.normal(kg, (1, c), jnp.float32)
    beta = 0.1 * jax.random.normal(kb, (1, c), jnp.float32)
    return gamma, beta


def init_tnet(key, k=3):
    ks = jax.random.split(key, 12)
    iden = jnp.eye(k, dtype=jnp.float32).reshape(1, k * k)
    return dict(
        # Weights stored pre-transposed (Cin, Cout); big ones in bf16.
        # Conv/fc1/fc2 biases are omitted: exactly cancelled by batch-stat BN.
        w1=_uniform(ks[0], (k, 64), k),
        w2=_uniform(ks[1], (64, 128), 64).astype(jnp.bfloat16),
        w3=_uniform(ks[2], (128, 1024), 128).astype(jnp.bfloat16),
        fw1=_uniform(ks[3], (1024, 512), 1024).astype(jnp.bfloat16),
        fw2=_uniform(ks[4], (512, 256), 512).astype(jnp.bfloat16),
        fw3=_uniform(ks[5], (256, k * k), 256),
        fb3_plus_iden=_uniform(ks[6], (1, k * k), 256) + iden,  # bias + identity folded
        bn1=_init_bn(ks[7], 64),
        bn2=_init_bn(ks[8], 128),
        bn3=_init_bn(ks[9], 1024),
        bn4=_init_bn(ks[10], 512),
        bn5=_init_bn(ks[11], 256),
    )


# --------------------------- forward pass -------------------------------------

def tnet_forward(p, x):
    """x: (B, k, N) PyTorch NCL layout -> (B, k, k) transform matrix."""
    B, k, N = x.shape
    x_cl = jnp.transpose(x, (0, 2, 1)).reshape(B * N, k).astype(jnp.float32)
    h2 = conv12(x_cl, p)                    # (B*N, 128) bf16, one fused kernel
    g = conv3_amax(h2, p, B, N)             # (B, 1024); (B*N,1024) never hits HBM
    t = fc_fused(g, p, k)                   # (B, k*k), fc chain in one kernel
    return t.reshape(B, k, k)


if __name__ == "__main__":
    key = jax.random.PRNGKey(0)
    kp, kx = jax.random.split(key)

    K = 3
    B, N = 2, 256
    params = init_tnet(kp, K)
    x = jax.random.normal(kx, (B, K, N), jnp.float32)

    fwd = jax.jit(tnet_forward)
    t = fwd(params, x)
    jax.block_until_ready(t)

    assert t.shape == (B, K, K)
    assert np.isfinite(np.asarray(t)).all()
    print("KERNEL_OK")
</pallas_src>

<mosaic_0001>
module attributes {stable_mosaic.version = 11 : i64} {
  func.func @conv12_kernel(%arg0: i32, %arg1: memref<512x3xf32, #tpu.memory_space<vmem>>, %arg2: memref<3x64xf32, #tpu.memory_space<vmem>>, %arg3: memref<1x64xf32, #tpu.memory_space<vmem>>, %arg4: memref<1x64xf32, #tpu.memory_space<vmem>>, %arg5: memref<64x128xbf16, #tpu.memory_space<vmem>>, %arg6: memref<1x128xf32, #tpu.memory_space<vmem>>, %arg7: memref<1x128xf32, #tpu.memory_space<vmem>>, %arg8: memref<512x128xbf16, #tpu.memory_space<vmem>>) attributes {dimension_semantics = [#tpu.dimension_semantics<arbitrary>], iteration_bounds = array<i64: 1>, scalar_prefetch = 0 : i64, scratch_operands = 0 : i64, tpu.core_type = #tpu.core_type<tc>, window_params = [{pipeline_mode = #tpu.pipeline_mode<synchronous>, transform_indices = @transform_0, window_bounds = array<i64: 512, 3>}, {pipeline_mode = #tpu.pipeline_mode<synchronous>, transform_indices = @transform_1, window_bounds = array<i64: 3, 64>}, {pipeline_mode = #tpu.pipeline_mode<synchronous>, transform_indices = @transform_2, window_bounds = array<i64: 1, 64>}, {pipeline_mode = #tpu.pipeline_mode<synchronous>, transform_indices = @transform_3, window_bounds = array<i64: 1, 64>}, {pipeline_mode = #tpu.pipeline_mode<synchronous>, transform_indices = @transform_4, window_bounds = array<i64: 64, 128>}, {pipeline_mode = #tpu.pipeline_mode<synchronous>, transform_indices = @transform_5, window_bounds = array<i64: 1, 128>}, {pipeline_mode = #tpu.pipeline_mode<synchronous>, transform_indices = @transform_6, window_bounds = array<i64: 1, 128>}, {pipeline_mode = #tpu.pipeline_mode<synchronous>, transform_indices = @transform_7, window_bounds = array<i64: 512, 128>}]} {
    %c0 = arith.constant 0 : index
    %c0_0 = arith.constant 0 : index
    %0 = vector.load %arg1[%c0, %c0_0] : memref<512x3xf32, #tpu.memory_space<vmem>>, vector<512x3xf32>
    %c0_1 = arith.constant 0 : index
    %c0_2 = arith.constant 0 : index
    %1 = vector.load %arg2[%c0_1, %c0_2] : memref<3x64xf32, #tpu.memory_space<vmem>>, vector<3x64xf32>
    %cst = arith.constant dense<0.000000e+00> : vector<512x64xf32>
    %2 = tpu.matmul %0, %1, %cst {dimension_numbers = #tpu.dot_dimension_numbers<[1], [0], [0], [1], [0, 0, 1, 1], [], []>} : vector<512x3xf32>, vector<3x64xf32>, vector<512x64xf32> -> vector<512x64xf32>
    %c0_3 = arith.constant 0 : index
    %c0_4 = arith.constant 0 : index
    %3 = vector.load %arg3[%c0_3, %c0_4] : memref<1x64xf32, #tpu.memory_space<vmem>>, vector<1x64xf32>
    %c0_5 = arith.constant 0 : index
    %c0_6 = arith.constant 0 : index
    %4 = vector.load %arg4[%c0_5, %c0_6] : memref<1x64xf32, #tpu.memory_space<vmem>>, vector<1x64xf32>
    %cst_7 = arith.constant dense<0.000000e+00> : vector<64xf32>
    %5 = vector.multi_reduction <add>, %2, %cst_7 [0] : vector<512x64xf32> to vector<64xf32>
    %6 = vector.shape_cast %5 : vector<64xf32> to vector<1x64xf32>
    %cst_8 = arith.constant 5.120000e+02 : f32
    %7 = vector.broadcast %cst_8 : f32 to vector<1x64xf32>
    %8 = arith.divf %6, %7 : vector<1x64xf32>
    %9 = arith.mulf %2, %2 : vector<512x64xf32>
    %cst_9 = arith.constant dense<0.000000e+00> : vector<64xf32>
    %10 = vector.multi_reduction <add>, %9, %cst_9 [0] : vector<512x64xf32> to vector<64xf32>
    %11 = vector.shape_cast %10 : vector<64xf32> to vector<1x64xf32>
    %cst_10 = arith.constant 5.120000e+02 : f32
    %12 = vector.broadcast %cst_10 : f32 to vector<1x64xf32>
    %13 = arith.divf %11, %12 : vector<1x64xf32>
    %14 = arith.mulf %8, %8 : vector<1x64xf32>
    %15 = arith.subf %13, %14 : vector<1x64xf32>
    %cst_11 = arith.constant 0.000000e+00 : f32
    %16 = vector.broadcast %cst_11 : f32 to vector<1x64xf32>
    %17 = arith.maximumf %15, %16 : vector<1x64xf32>
    %cst_12 = arith.constant 9.99999974E-6 : f32
    %18 = vector.broadcast %cst_12 : f32 to vector<1x64xf32>
    %19 = arith.addf %17, %18 : vector<1x64xf32>
    %20 = math.rsqrt %19 : vector<1x64xf32>
    %21 = arith.mulf %3, %20 : vector<1x64xf32>
    %22 = arith.mulf %8, %21 : vector<1x64xf32>
    %23 = arith.subf %4, %22 : vector<1x64xf32>
    %24 = vector.broadcast %21 : vector<1x64xf32> to vector<512x64xf32>
    %25 = arith.mulf %2, %24 : vector<512x64xf32>
    %26 = vector.broadcast %23 : vector<1x64xf32> to vector<512x64xf32>
    %27 = arith.addf %25, %26 : vector<512x64xf32>
    %cst_13 = arith.constant 0.000000e+00 : f32
    %28 = vector.broadcast %cst_13 : f32 to vector<512x64xf32>
    %29 = arith.maximumf %27, %28 : vector<512x64xf32>
    %30 = arith.truncf %29 : vector<512x64xf32> to vector<512x64xbf16>
    %c0_14 = arith.constant 0 : index
    %c0_15 = arith.constant 0 : index
    %31 = vector.load %arg5[%c0_14, %c0_15] : memref<64x128xbf16, #tpu.memory_space<vmem>>, vector<64x128xbf16>
    %cst_16 = arith.constant dense<0.000000e+00> : vector<512x128xf32>
    %32 = tpu.matmul %30, %31, %cst_16 {dimension_numbers = #tpu.dot_dimension_numbers<[1], [0], [0], [1], [0, 0, 1, 1], [], []>} : vector<512x64xbf16>, vector<64x128xbf16>, vector<512x128xf32> -> vector<512x128xf32>
    %c0_17 = arith.constant 0 : index
    %c0_18 = arith.constant 0 : index
    %33 = vector.load %arg6[%c0_17, %c0_18] : memref<1x128xf32, #tpu.memory_space<vmem>>, vector<1x128xf32>
    %c0_19 = arith.constant 0 : index
    %c0_20 = arith.constant 0 : index
    %34 = vector.load %arg7[%c0_19, %c0_20] : memref<1x128xf32, #tpu.memory_space<vmem>>, vector<1x128xf32>
    %cst_21 = arith.constant dense<0.000000e+00> : vector<128xf32>
    %35 = vector.multi_reduction <add>, %32, %cst_21 [0] : vector<512x128xf32> to vector<128xf32>
    %36 = vector.shape_cast %35 : vector<128xf32> to vector<1x128xf32>
    %cst_22 = arith.constant 5.120000e+02 : f32
    %37 = vector.broadcast %cst_22 : f32 to vector<1x128xf32>
    %38 = arith.divf %36, %37 : vector<1x128xf32>
    %39 = arith.mulf %32, %32 : vector<512x128xf32>
    %cst_23 = arith.constant dense<0.000000e+00> : vector<128xf32>
    %40 = vector.multi_reduction <add>, %39, %cst_23 [0] : vector<512x128xf32> to vector<128xf32>
    %41 = vector.shape_cast %40 : vector<128xf32> to vector<1x128xf32>
    %cst_24 = arith.constant 5.120000e+02 : f32
    %42 = vector.broadcast %cst_24 : f32 to vector<1x128xf32>
    %43 = arith.divf %41, %42 : vector<1x128xf32>
    %44 = arith.mulf %38, %38 : vector<1x128xf32>
    %45 = arith.subf %43, %44 : vector<1x128xf32>
    %cst_25 = arith.constant 0.000000e+00 : f32
    %46 = vector.broadcast %cst_25 : f32 to vector<1x128xf32>
    %47 = arith.maximumf %45, %46 : vector<1x128xf32>
    %cst_26 = arith.constant 9.99999974E-6 : f32
    %48 = vector.broadcast %cst_26 : f32 to vector<1x128xf32>
    %49 = arith.addf %47, %48 : vector<1x128xf32>
    %50 = math.rsqrt %49 : vector<1x128xf32>
    %51 = arith.mulf %33, %50 : vector<1x128xf32>
    %52 = arith.mulf %38, %51 : vector<1x128xf32>
    %53 = arith.subf %34, %52 : vector<1x128xf32>
    %54 = vector.broadcast %51 : vector<1x128xf32> to vector<512x128xf32>
    %55 = arith.mulf %32, %54 : vector<512x128xf32>
    %56 = vector.broadcast %53 : vector<1x128xf32> to vector<512x128xf32>
    %57 = arith.addf %55, %56 : vector<512x128xf32>
    %cst_27 = arith.constant 0.000000e+00 : f32
    %58 = vector.broadcast %cst_27 : f32 to vector<512x128xf32>
    %59 = arith.maximumf %57, %58 : vector<512x128xf32>
    %60 = arith.truncf %59 : vector<512x128xf32> to vector<512x128xbf16>
    %c0_28 = arith.constant 0 : index
    %c0_29 = arith.constant 0 : index
    %61 = vector.load %arg8[%c0_28, %c0_29] : memref<512x128xbf16, #tpu.memory_space<vmem>>, vector<512x128xbf16>
    tpu.vector_store %arg8[%c0_28, %c0_29], %60 {strides = array<i32>} : memref<512x128xbf16, #tpu.memory_space<vmem>>, vector<512x128xbf16>,
    return
  }
  func.func @transform_0(%arg0: i32) -> (i32, i32) {
    %c0_i32 = arith.constant 0 : i32
    %c0_i32_0 = arith.constant 0 : i32
    %c0_i32_1 = arith.constant 0 : i32
    return %c0_i32, %c0_i32_0 : i32, i32
  }
  func.func @transform_1(%arg0: i32) -> (i32, i32) {
    %c0_i32 = arith.constant 0 : i32
    %c0_i32_0 = arith.constant 0 : i32
    %c0_i32_1 = arith.constant 0 : i32
    return %c0_i32, %c0_i32_0 : i32, i32
  }
  func.func @transform_2(%arg0: i32) -> (i32, i32) {
    %c0_i32 = arith.constant 0 : i32
    %c0_i32_0 = arith.constant 0 : i32
    %c0_i32_1 = arith.constant 0 : i32
    return %c0_i32, %c0_i32_0 : i32, i32
  }
  func.func @transform_3(%arg0: i32) -> (i32, i32) {
    %c0_i32 = arith.constant 0 : i32
    %c0_i32_0 = arith.constant 0 : i32
    %c0_i32_1 = arith.constant 0 : i32
    return %c0_i32, %c0_i32_0 : i32, i32
  }
  func.func @transform_4(%arg0: i32) -> (i32, i32) {
    %c0_i32 = arith.constant 0 : i32
    %c0_i32_0 = arith.constant 0 : i32
    %c0_i32_1 = arith.constant 0 : i32
    return %c0_i32, %c0_i32_0 : i32, i32
  }
  func.func @transform_5(%arg0: i32) -> (i32, i32) {
    %c0_i32 = arith.constant 0 : i32
    %c0_i32_0 = arith.constant 0 : i32
    %c0_i32_1 = arith.constant 0 : i32
    return %c0_i32, %c0_i32_0 : i32, i32
  }
  func.func @transform_6(%arg0: i32) -> (i32, i32) {
    %c0_i32 = arith.constant 0 : i32
    %c0_i32_0 = arith.constant 0 : i32
    %c0_i32_1 = arith.constant 0 : i32
    return %c0_i32, %c0_i32_0 : i32, i32
  }
  func.func @transform_7(%arg0: i32) -> (i32, i32) {
    %c0_i32 = arith.constant 0 : i32
    %c0_i32_0 = arith.constant 0 : i32
    %c0_i32_1 = arith.constant 0 : i32
    return %c0_i32, %c0_i32_0 : i32, i32
  }
}

module attributes {stable_mosaic.version = 11 : i64} {
  func.func @conv3_amax_kernel(%arg0: i32, %arg1: memref<512x128xbf16, #tpu.memory_space<vmem>>, %arg2: memref<128x512xbf16, #tpu.memory_space<vmem>>, %arg3: memref<1x512xf32, #tpu.memory_space<vmem>>, %arg4: memref<1x512xf32, #tpu.memory_space<vmem>>, %arg5: memref<2x512xf32, #tpu.memory_space<vmem>>) attributes {dimension_semantics = [#tpu.dimension_semantics<parallel>], iteration_bounds = array<i64: 2>, scalar_prefetch = 0 : i64, scratch_operands = 0 : i64, tpu.core_type = #tpu.core_type<tc>, window_params = [{pipeline_mode = #tpu.pipeline_mode<synchronous>, transform_indices = @transform_0, window_bounds = array<i64: 512, 128>}, {transform_indices = @transform_1, window_bounds = array<i64: 128, 512>}, {transform_indices = @transform_2, window_bounds = array<i64: 1, 512>}, {transform_indices = @transform_3, window_bounds = array<i64: 1, 512>}, {transform_indices = @transform_4, window_bounds = array<i64: 2, 512>}]} {
    %c0 = arith.constant 0 : index
    %c0_0 = arith.constant 0 : index
    %0 = vector.load %arg1[%c0, %c0_0] : memref<512x128xbf16, #tpu.memory_space<vmem>>, vector<512x128xbf16>
    %c0_1 = arith.constant 0 : index
    %c0_2 = arith.constant 0 : index
    %1 = vector.load %arg2[%c0_1, %c0_2] : memref<128x512xbf16, #tpu.memory_space<vmem>>, vector<128x512xbf16>
    %cst = arith.constant dense<0.000000e+00> : vector<512x512xf32>
    %2 = tpu.matmul %0, %1, %cst {dimension_numbers = #tpu.dot_dimension_numbers<[1], [0], [0], [1], [0, 0, 1, 1], [], []>} : vector<512x128xbf16>, vector<128x512xbf16>, vector<512x512xf32> -> vector<512x512xf32>
    %c0_3 = arith.constant 0 : index
    %c0_4 = arith.constant 0 : index
    %3 = vector.load %arg3[%c0_3, %c0_4] : memref<1x512xf32, #tpu.memory_space<vmem>>, vector<1x512xf32>
    %c0_5 = arith.constant 0 : index
    %c0_6 = arith.constant 0 : index
    %4 = vector.load %arg4[%c0_5, %c0_6] : memref<1x512xf32, #tpu.memory_space<vmem>>, vector<1x512xf32>
    %cst_7 = arith.constant dense<0.000000e+00> : vector<512xf32>
    %5 = vector.multi_reduction <add>, %2, %cst_7 [0] : vector<512x512xf32> to vector<512xf32>
    %6 = vector.shape_cast %5 : vector<512xf32> to vector<1x512xf32>
    %cst_8 = arith.constant 5.120000e+02 : f32
    %7 = vector.broadcast %cst_8 : f32 to vector<1x512xf32>
    %8 = arith.divf %6, %7 : vector<1x512xf32>
    %9 = arith.mulf %2, %2 : vector<512x512xf32>
    %cst_9 = arith.constant dense<0.000000e+00> : vector<512xf32>
    %10 = vector.multi_reduction <add>, %9, %cst_9 [0] : vector<512x512xf32> to vector<512xf32>
    %11 = vector.shape_cast %10 : vector<512xf32> to vector<1x512xf32>
    %cst_10 = arith.constant 5.120000e+02 : f32
    %12 = vector.broadcast %cst_10 : f32 to vector<1x512xf32>
    %13 = arith.divf %11, %12 : vector<1x512xf32>
    %14 = arith.mulf %8, %8 : vector<1x512xf32>
    %15 = arith.subf %13, %14 : vector<1x512xf32>
    %cst_11 = arith.constant 0.000000e+00 : f32
    %16 = vector.broadcast %cst_11 : f32 to vector<1x512xf32>
    %17 = arith.maximumf %15, %16 : vector<1x512xf32>
    %cst_12 = arith.constant 9.99999974E-6 : f32
    %18 = vector.broadcast %cst_12 : f32 to vector<1x512xf32>
    %19 = arith.addf %17, %18 : vector<1x512xf32>
    %20 = math.rsqrt %19 : vector<1x512xf32>
    %21 = arith.mulf %3, %20 : vector<1x512xf32>
    %22 = arith.mulf %8, %21 : vector<1x512xf32>
    %23 = arith.subf %4, %22 : vector<1x512xf32>
    %24 = vector.broadcast %21 : vector<1x512xf32> to vector<512x512xf32>
    %25 = arith.mulf %2, %24 : vector<512x512xf32>
    %26 = vector.broadcast %23 : vector<1x512xf32> to vector<512x512xf32>
    %27 = arith.addf %25, %26 : vector<512x512xf32>
    %cst_13 = arith.constant 0.000000e+00 : f32
    %28 = vector.broadcast %cst_13 : f32 to vector<512x512xf32>
    %29 = arith.maximumf %27, %28 : vector<512x512xf32>
    %30 = vector.shape_cast %29 : vector<512x512xf32> to vector<2x256x512xf32>
    %cst_14 = arith.constant dense<0xFF800000> : vector<2x512xf32>
    %31 = vector.multi_reduction <maximumf>, %30, %cst_14 [1] : vector<2x256x512xf32> to vector<2x512xf32>
    %c0_15 = arith.constant 0 : index
    %c0_16 = arith.constant 0 : index
    %32 = vector.load %arg5[%c0_15, %c0_16] : memref<2x512xf32, #tpu.memory_space<vmem>>, vector<2x512xf32>
    tpu.vector_store %arg5[%c0_15, %c0_16], %31 {strides = array<i32>} : memref<2x512xf32, #tpu.memory_space<vmem>>, vector<2x512xf32>,
    return
  }
  func.func @transform_0(%arg0: i32) -> (i32, i32) {
    %c0_i32 = arith.constant 0 : i32
    %c0_i32_0 = arith.constant 0 : i32
    %c0_i32_1 = arith.constant 0 : i32
    return %c0_i32, %c0_i32_0 : i32, i32
  }
  func.func @transform_1(%arg0: i32) -> (i32, i32) {
    %c0_i32 = arith.constant 0 : i32
    %c0_i32_0 = arith.constant 0 : i32
    return %c0_i32, %arg0 : i32, i32
  }
  func.func @transform_2(%arg0: i32) -> (i32, i32) {
    %c0_i32 = arith.constant 0 : i32
    %c0_i32_0 = arith.constant 0 : i32
    return %c0_i32, %arg0 : i32, i32
  }
  func.func @transform_3(%arg0: i32) -> (i32, i32) {
    %c0_i32 = arith.constant 0 : i32
    %c0_i32_0 = arith.constant 0 : i32
    return %c0_i32, %arg0 : i32, i32
  }
  func.func @transform_4(%arg0: i32) -> (i32, i32) {
    %c0_i32 = arith.constant 0 : i32
    %c0_i32_0 = arith.constant 0 : i32
    return %c0_i32, %arg0 : i32, i32
  }
}

module attributes {stable_mosaic.version = 11 : i64} {
  func.func @fc_fused_kernel(%arg0: i32, %arg1: memref<2x1024xf32, #tpu.memory_space<vmem>>, %arg2: memref<1024x512xbf16, #tpu.memory_space<vmem>>, %arg3: memref<1x512xf32, #tpu.memory_space<vmem>>, %arg4: memref<1x512xf32, #tpu.memory_space<vmem>>, %arg5: memref<512x256xbf16, #tpu.memory_space<vmem>>, %arg6: memref<1x256xf32, #tpu.memory_space<vmem>>, %arg7: memref<1x256xf32, #tpu.memory_space<vmem>>, %arg8: memref<256x9xf32, #tpu.memory_space<vmem>>, %arg9: memref<1x9xf32, #tpu.memory_space<vmem>>, %arg10: memref<2x9xf32, #tpu.memory_space<vmem>>) attributes {dimension_semantics = [#tpu.dimension_semantics<arbitrary>], iteration_bounds = array<i64: 1>, scalar_prefetch = 0 : i64, scratch_operands = 0 : i64, tpu.core_type = #tpu.core_type<tc>, window_params = [{pipeline_mode = #tpu.pipeline_mode<synchronous>, transform_indices = @transform_0, window_bounds = array<i64: 2, 1024>}, {pipeline_mode = #tpu.pipeline_mode<synchronous>, transform_indices = @transform_1, window_bounds = array<i64: 1024, 512>}, {pipeline_mode = #tpu.pipeline_mode<synchronous>, transform_indices = @transform_2, window_bounds = array<i64: 1, 512>}, {pipeline_mode = #tpu.pipeline_mode<synchronous>, transform_indices = @transform_3, window_bounds = array<i64: 1, 512>}, {pipeline_mode = #tpu.pipeline_mode<synchronous>, transform_indices = @transform_4, window_bounds = array<i64: 512, 256>}, {pipeline_mode = #tpu.pipeline_mode<synchronous>, transform_indices = @transform_5, window_bounds = array<i64: 1, 256>}, {pipeline_mode = #tpu.pipeline_mode<synchronous>, transform_indices = @transform_6, window_bounds = array<i64: 1, 256>}, {pipeline_mode = #tpu.pipeline_mode<synchronous>, transform_indices = @transform_7, window_bounds = array<i64: 256, 9>}, {pipeline_mode = #tpu.pipeline_mode<synchronous>, transform_indices = @transform_8, window_bounds = array<i64: 1, 9>}, {pipeline_mode = #tpu.pipeline_mode<synchronous>, transform_indices = @transform_9, window_bounds = array<i64: 2, 9>}]} {
    %c0 = arith.constant 0 : index
    %c0_0 = arith.constant 0 : index
    %0 = vector.load %arg1[%c0, %c0_0] : memref<2x1024xf32, #tpu.memory_space<vmem>>, vector<2x1024xf32>
    %1 = arith.truncf %0 : vector<2x1024xf32> to vector<2x1024xbf16>
    %c0_1 = arith.constant 0 : index
    %c0_2 = arith.constant 0 : index
    %2 = vector.load %arg2[%c0_1, %c0_2] : memref<1024x512xbf16, #tpu.memory_space<vmem>>, vector<1024x512xbf16>
    %cst = arith.constant dense<0.000000e+00> : vector<2x512xf32>
    %3 = tpu.matmul %1, %2, %cst {dimension_numbers = #tpu.dot_dimension_numbers<[1], [0], [0], [1], [0, 0, 1, 1], [], []>} : vector<2x1024xbf16>, vector<1024x512xbf16>, vector<2x512xf32> -> vector<2x512xf32>
    %c0_3 = arith.constant 0 : index
    %c0_4 = arith.constant 0 : index
    %4 = vector.load %arg3[%c0_3, %c0_4] : memref<1x512xf32, #tpu.memory_space<vmem>>, vector<1x512xf32>
    %c0_5 = arith.constant 0 : index
    %c0_6 = arith.constant 0 : index
    %5 = vector.load %arg4[%c0_5, %c0_6] : memref<1x512xf32, #tpu.memory_space<vmem>>, vector<1x512xf32>
    %cst_7 = arith.constant dense<0.000000e+00> : vector<512xf32>
    %6 = vector.multi_reduction <add>, %3, %cst_7 [0] : vector<2x512xf32> to vector<512xf32>
    %7 = vector.shape_cast %6 : vector<512xf32> to vector<1x512xf32>
    %cst_8 = arith.constant 2.000000e+00 : f32
    %8 = vector.broadcast %cst_8 : f32 to vector<1x512xf32>
    %9 = arith.divf %7, %8 : vector<1x512xf32>
    %10 = arith.mulf %3, %3 : vector<2x512xf32>
    %cst_9 = arith.constant dense<0.000000e+00> : vector<512xf32>
    %11 = vector.multi_reduction <add>, %10, %cst_9 [0] : vector<2x512xf32> to vector<512xf32>
    %12 = vector.shape_cast %11 : vector<512xf32> to vector<1x512xf32>
    %cst_10 = arith.constant 2.000000e+00 : f32
    %13 = vector.broadcast %cst_10 : f32 to vector<1x512xf32>
    %14 = arith.divf %12, %13 : vector<1x512xf32>
    %15 = arith.mulf %9, %9 : vector<1x512xf32>
    %16 = arith.subf %14, %15 : vector<1x512xf32>
    %cst_11 = arith.constant 0.000000e+00 : f32
    %17 = vector.broadcast %cst_11 : f32 to vector<1x512xf32>
    %18 = arith.maximumf %16, %17 : vector<1x512xf32>
    %cst_12 = arith.constant 9.99999974E-6 : f32
    %19 = vector.broadcast %cst_12 : f32 to vector<1x512xf32>
    %20 = arith.addf %18, %19 : vector<1x512xf32>
    %21 = math.rsqrt %20 : vector<1x512xf32>
    %22 = arith.mulf %4, %21 : vector<1x512xf32>
    %23 = arith.mulf %9, %22 : vector<1x512xf32>
    %24 = arith.subf %5, %23 : vector<1x512xf32>
    %25 = vector.broadcast %22 : vector<1x512xf32> to vector<2x512xf32>
    %26 = arith.mulf %3, %25 : vector<2x512xf32>
    %27 = vector.broadcast %24 : vector<1x512xf32> to vector<2x512xf32>
    %28 = arith.addf %26, %27 : vector<2x512xf32>
    %cst_13 = arith.constant 0.000000e+00 : f32
    %29 = vector.broadcast %cst_13 : f32 to vector<2x512xf32>
    %30 = arith.maximumf %28, %29 : vector<2x512xf32>
    %31 = arith.truncf %30 : vector<2x512xf32> to vector<2x512xbf16>
    %c0_14 = arith.constant 0 : index
    %c0_15 = arith.constant 0 : index
    %32 = vector.load %arg5[%c0_14, %c0_15] : memref<512x256xbf16, #tpu.memory_space<vmem>>, vector<512x256xbf16>
    %cst_16 = arith.constant dense<0.000000e+00> : vector<2x256xf32>
    %33 = tpu.matmul %31, %32, %cst_16 {dimension_numbers = #tpu.dot_dimension_numbers<[1], [0], [0], [1], [0, 0, 1, 1], [], []>} : vector<2x512xbf16>, vector<512x256xbf16>, vector<2x256xf32> -> vector<2x256xf32>
    %c0_17 = arith.constant 0 : index
    %c0_18 = arith.constant 0 : index
    %34 = vector.load %arg6[%c0_17, %c0_18] : memref<1x256xf32, #tpu.memory_space<vmem>>, vector<1x256xf32>
    %c0_19 = arith.constant 0 : index
    %c0_20 = arith.constant 0 : index
    %35 = vector.load %arg7[%c0_19, %c0_20] : memref<1x256xf32, #tpu.memory_space<vmem>>, vector<1x256xf32>
    %cst_21 = arith.constant dense<0.000000e+00> : vector<256xf32>
    %36 = vector.multi_reduction <add>, %33, %cst_21 [0] : vector<2x256xf32> to vector<256xf32>
    %37 = vector.shape_cast %36 : vector<256xf32> to vector<1x256xf32>
    %cst_22 = arith.constant 2.000000e+00 : f32
    %38 = vector.broadcast %cst_22 : f32 to vector<1x256xf32>
    %39 = arith.divf %37, %38 : vector<1x256xf32>
    %40 = arith.mulf %33, %33 : vector<2x256xf32>
    %cst_23 = arith.constant dense<0.000000e+00> : vector<256xf32>
    %41 = vector.multi_reduction <add>, %40, %cst_23 [0] : vector<2x256xf32> to vector<256xf32>
    %42 = vector.shape_cast %41 : vector<256xf32> to vector<1x256xf32>
    %cst_24 = arith.constant 2.000000e+00 : f32
    %43 = vector.broadcast %cst_24 : f32 to vector<1x256xf32>
    %44 = arith.divf %42, %43 : vector<1x256xf32>
    %45 = arith.mulf %39, %39 : vector<1x256xf32>
    %46 = arith.subf %44, %45 : vector<1x256xf32>
    %cst_25 = arith.constant 0.000000e+00 : f32
    %47 = vector.broadcast %cst_25 : f32 to vector<1x256xf32>
    %48 = arith.maximumf %46, %47 : vector<1x256xf32>
    %cst_26 = arith.constant 9.99999974E-6 : f32
    %49 = vector.broadcast %cst_26 : f32 to vector<1x256xf32>
    %50 = arith.addf %48, %49 : vector<1x256xf32>
    %51 = math.rsqrt %50 : vector<1x256xf32>
    %52 = arith.mulf %34, %51 : vector<1x256xf32>
    %53 = arith.mulf %39, %52 : vector<1x256xf32>
    %54 = arith.subf %35, %53 : vector<1x256xf32>
    %55 = vector.broadcast %52 : vector<1x256xf32> to vector<2x256xf32>
    %56 = arith.mulf %33, %55 : vector<2x256xf32>
    %57 = vector.broadcast %54 : vector<1x256xf32> to vector<2x256xf32>
    %58 = arith.addf %56, %57 : vector<2x256xf32>
    %cst_27 = arith.constant 0.000000e+00 : f32
    %59 = vector.broadcast %cst_27 : f32 to vector<2x256xf32>
    %60 = arith.maximumf %58, %59 : vector<2x256xf32>
    %c0_28 = arith.constant 0 : index
    %c0_29 = arith.constant 0 : index
    %61 = vector.load %arg8[%c0_28, %c0_29] : memref<256x9xf32, #tpu.memory_space<vmem>>, vector<256x9xf32>
    %cst_30 = arith.constant dense<0.000000e+00> : vector<2x9xf32>
    %62 = tpu.matmul %60, %61, %cst_30 {dimension_numbers = #tpu.dot_dimension_numbers<[1], [0], [0], [1], [0, 0, 1, 1], [], []>} : vector<2x256xf32>, vector<256x9xf32>, vector<2x9xf32> -> vector<2x9xf32>
    %c0_31 = arith.constant 0 : index
    %c0_32 = arith.constant 0 : index
    %63 = vector.load %arg9[%c0_31, %c0_32] : memref<1x9xf32, #tpu.memory_space<vmem>>, vector<1x9xf32>
    %64 = vector.broadcast %63 : vector<1x9xf32> to vector<2x9xf32>
    %65 = arith.addf %62, %64 : vector<2x9xf32>
    %c0_33 = arith.constant 0 : index
    %c0_34 = arith.constant 0 : index
    %66 = vector.load %arg10[%c0_33, %c0_34] : memref<2x9xf32, #tpu.memory_space<vmem>>, vector<2x9xf32>
    tpu.vector_store %arg10[%c0_33, %c0_34], %65 {strides = array<i32>} : memref<2x9xf32, #tpu.memory_space<vmem>>, vector<2x9xf32>,
    return
  }
  func.func @transform_0(%arg0: i32) -> (i32, i32) {
    %c0_i32 = arith.constant 0 : i32
    %c0_i32_0 = arith.constant 0 : i32
    %c0_i32_1 = arith.constant 0 : i32
    return %c0_i32, %c0_i32_0 : i32, i32
  }
  func.func @transform_1(%arg0: i32) -> (i32, i32) {
    %c0_i32 = arith.constant 0 : i32
    %c0_i32_0 = arith.constant 0 : i32
    %c0_i32_1 = arith.constant 0 : i32
    return %c0_i32, %c0_i32_0 : i32, i32
  }
  func.func @transform_2(%arg0: i32) -> (i32, i32) {
    %c0_i32 = arith.constant 0 : i32
    %c0_i32_0 = arith.constant 0 : i32
    %c0_i32_1 = arith.constant 0 : i32
    return %c0_i32, %c0_i32_0 : i32, i32
  }
  func.func @transform_3(%arg0: i32) -> (i32, i32) {
    %c0_i32 = arith.constant 0 : i32
    %c0_i32_0 = arith.constant 0 : i32
    %c0_i32_1 = arith.constant 0 : i32
    return %c0_i32, %c0_i32_0 : i32, i32
  }
  func.func @transform_4(%arg0: i32) -> (i32, i32) {
    %c0_i32 = arith.constant 0 : i32
    %c0_i32_0 = arith.constant 0 : i32
    %c0_i32_1 = arith.constant 0 : i32
    return %c0_i32, %c0_i32_0 : i32, i32
  }
  func.func @transform_5(%arg0: i32) -> (i32, i32) {
    %c0_i32 = arith.constant 0 : i32
    %c0_i32_0 = arith.constant 0 : i32
    %c0_i32_1 = arith.constant 0 : i32
    return %c0_i32, %c0_i32_0 : i32, i32
  }
  func.func @transform_6(%arg0: i32) -> (i32, i32) {
    %c0_i32 = arith.constant 0 : i32
    %c0_i32_0 = arith.constant 0 : i32
    %c0_i32_1 = arith.constant 0 : i32
    return %c0_i32, %c0_i32_0 : i32, i32
  }
  func.func @transform_7(%arg0: i32) -> (i32, i32) {
    %c0_i32 = arith.constant 0 : i32
    %c0_i32_0 = arith.constant 0 : i32
    %c0_i32_1 = arith.constant 0 : i32
    return %c0_i32, %c0_i32_0 : i32, i32
  }
  func.func @transform_8(%arg0: i32) -> (i32, i32) {
    %c0_i32 = arith.constant 0 : i32
    %c0_i32_0 = arith.constant 0 : i32
    %c0_i32_1 = arith.constant 0 : i32
    return %c0_i32, %c0_i32_0 : i32, i32
  }
  func.func @transform_9(%arg0: i32) -> (i32, i32) {
    %c0_i32 = arith.constant 0 : i32
    %c0_i32_0 = arith.constant 0 : i32
    %c0_i32_1 = arith.constant 0 : i32
    return %c0_i32, %c0_i32_0 : i32, i32
  }
}

</mosaic_0001>

<bundles_post_ra>
// kernel: tnet_forward.3
= control target key start
LH: loop header
LB: loop body
LE: loop exit
PB: predicated region body
PF: predicated region fallthrough
CT: control target
= control target key end

     0   :  { %vm285_vm0 = vcmask 1042432   ;;  %vm92_vm1 = vcmask 23552   ;;  %vm676_vm2 = vcmask 523264   ;;  %s5357_s1 = inlined_call_operand.vmem [shape: f32[3,64], index: 1, kind: input, shape index: {}]   ;;  %s5358_s0 = inlined_call_operand.vmem [shape: f32[512,3], index: 0, kind: input, shape index: {}]   ;;  %s5359_s4 = inlined_call_operand.vmem [shape: bf16[64,128], index: 4, kind: input, shape index: {}]   ;;  %s5360_s2 = inlined_call_operand.vmem [shape: f32[1,64], index: 2, kind: input, shape index: {}]   ;;  %s5361_s3 = inlined_call_operand.vmem [shape: f32[1,64], index: 3, kind: input, shape index: {}]   ;;  %s5362_s5 = inlined_call_operand.vmem [shape: f32[1,128], index: 5, kind: input, shape index: {}]   ;;  %s5363_s6 = inlined_call_operand.vmem [shape: f32[1,128], index: 6, kind: input, shape index: {}]   ;;  %s5364_s7 = inlined_call_operand.vmem [shape: bf16[512,128], index: 7, kind: output, shape index: {}]  }
   0x1   :  { %v91_v0 = vld [vmem:[%s5357_s1] sm:$0x7]  ;;  %v28_v2 = vld [vmem:[%s5358_s0 + $0x8] sm:$0xff]  ;;  %v29_v3 = vld [vmem:[%s5358_s0 + $0x10] sm:$0xff] }
   0x2   :  { %v27_v1 = vld [vmem:[%s5358_s0] sm:$0xff]  ;;  %2934 = vmatprep.subr.msk.mxu0 %vm285_vm0, %v91_v0  ;;  %v30_v4 = vld [vmem:[%s5358_s0 + $0x18] sm:$0xff]  ;;  %v32_v6 = vld [vmem:[%s5358_s0 + $0x28] sm:$0xff] }
   0x3   :  { %2936 = vmatprep.mubr.msk.f32.mxu0 %vm92_vm1, %v27_v1  ;;  %2935 = vmatpush3.msk.msra.mxu0 %vm285_vm0, %v91_v0  ;;  %v31_v5 = vld [vmem:[%s5358_s0 + $0x20] sm:$0xff]  ;;  %v33_v7 = vld [vmem:[%s5358_s0 + $0x30] sm:$0xff]  ;;  %v34_v8 = vld [vmem:[%s5358_s0 + $0x38] sm:$0xff] }
   0x4   :  { %2937 = vmatmul.mubr.msk.f32.vlgmr.msra.gmra.mrb[0].mxu0 %vm92_vm1, %v28_v2  ;;  %v35_v9 = vld [vmem:[%s5358_s0 + $0x40] sm:$0xff]  ;;  %v36_v10 = vld [vmem:[%s5358_s0 + $0x48] sm:$0xff]  ;;  %v37_v11 = vld [vmem:[%s5358_s0 + $0x50] sm:$0xff] }
   0x5   :  { %2939 = vmatprep.mubr.msk.f32.mxu0 %vm92_vm1, %v29_v3  ;;  %v38_v12 = vld [vmem:[%s5358_s0 + $0x58] sm:$0xff]  ;;  %v39_v13 = vld [vmem:[%s5358_s0 + $0x60] sm:$0xff]  ;;  %v40_v14 = vld [vmem:[%s5358_s0 + $0x68] sm:$0xff] }
   0x6   :  { %v41_v15 = vld [vmem:[%s5358_s0 + $0x70] sm:$0xff]  ;;  %v42_v16 = vld [vmem:[%s5358_s0 + $0x78] sm:$0xff]  ;;  %v43_v17 = vld [vmem:[%s5358_s0 + $0x80] sm:$0xff] }
   0x7   :  { %v44_v18 = vld [vmem:[%s5358_s0 + $0x88] sm:$0xff]  ;;  %v45_v19 = vld [vmem:[%s5358_s0 + $0x90] sm:$0xff]  ;;  %v46_v20 = vld [vmem:[%s5358_s0 + $0x98] sm:$0xff] }
   0x8   :  { %2940 = vmatmul.mubr.msk.f32.gmra.mrb[2].mxu0 %vm92_vm1, %v30_v4  ;;  %v47_v21 = vld [vmem:[%s5358_s0 + $0xa0] sm:$0xff]  ;;  %v48_v22 = vld [vmem:[%s5358_s0 + $0xa8] sm:$0xff]  ;;  %v49_v23 = vld [vmem:[%s5358_s0 + $0xb0] sm:$0xff] }
   0x9   :  { %2942 = vmatprep.mubr.msk.f32.mxu0 %vm92_vm1, %v31_v5  ;;  %v50_v24 = vld [vmem:[%s5358_s0 + $0xb8] sm:$0xff]  ;;  %v51_v25 = vld [vmem:[%s5358_s0 + $0xc0] sm:$0xff]  ;;  %v52_v26 = vld [vmem:[%s5358_s0 + $0xc8] sm:$0xff] }
   0xa   :  { %v53_v27 = vld [vmem:[%s5358_s0 + $0xd0] sm:$0xff]  ;;  %v54_v28 = vld [vmem:[%s5358_s0 + $0xd8] sm:$0xff]  ;;  %v55_v29 = vld [vmem:[%s5358_s0 + $0xe0] sm:$0xff] }
   0xb   :  { %v56_v30 = vld [vmem:[%s5358_s0 + $0xe8] sm:$0xff]  ;;  %v57_v31 = vld [vmem:[%s5358_s0 + $0xf0] sm:$0xff]  ;;  %v58_v32 = vld [vmem:[%s5358_s0 + $0xf8] sm:$0xff] }
   0xc   :  { %2943 = vmatmul.mubr.msk.f32.gmra.mrb[4].mxu0 %vm92_vm1, %v32_v6  ;;  %v59_v33 = vld [vmem:[%s5358_s0 + $0x100] sm:$0xff]  ;;  %v60_v34 = vld [vmem:[%s5358_s0 + $0x108] sm:$0xff]  ;;  %v61_v35 = vld [vmem:[%s5358_s0 + $0x110] sm:$0xff] }
   0xd   :  { %2945 = vmatprep.mubr.msk.f32.mxu0 %vm92_vm1, %v33_v7  ;;  %v62_v36 = vld [vmem:[%s5358_s0 + $0x118] sm:$0xff]  ;;  %v63_v37 = vld [vmem:[%s5358_s0 + $0x120] sm:$0xff]  ;;  %v64_v38 = vld [vmem:[%s5358_s0 + $0x128] sm:$0xff] }
   0xe   :  { %v65_v39 = vld [vmem:[%s5358_s0 + $0x130] sm:$0xff]  ;;  %v66_v40 = vld [vmem:[%s5358_s0 + $0x138] sm:$0xff]  ;;  %v67_v41 = vld [vmem:[%s5358_s0 + $0x140] sm:$0xff] }
   0xf   :  { %v68_v42 = vld [vmem:[%s5358_s0 + $0x148] sm:$0xff]  ;;  %v69_v43 = vld [vmem:[%s5358_s0 + $0x150] sm:$0xff]  ;;  %v70_v44 = vld [vmem:[%s5358_s0 + $0x158] sm:$0xff] }
  0x10   :  { %2946 = vmatmul.mubr.msk.f32.gmra.mrb[6].mxu0 %vm92_vm1, %v34_v8  ;;  %v71_v45 = vld [vmem:[%s5358_s0 + $0x160] sm:$0xff]  ;;  %v72_v46 = vld [vmem:[%s5358_s0 + $0x168] sm:$0xff]  ;;  %v73_v47 = vld [vmem:[%s5358_s0 + $0x170] sm:$0xff] }
  0x11   :  { %2948 = vmatprep.mubr.msk.f32.mxu0 %vm92_vm1, %v35_v9  ;;  %v74_v48 = vld [vmem:[%s5358_s0 + $0x178] sm:$0xff]  ;;  %v75_v49 = vld [vmem:[%s5358_s0 + $0x180] sm:$0xff]  ;;  %v76_v50 = vld [vmem:[%s5358_s0 + $0x188] sm:$0xff] }
  0x12   :  { %v77_v51 = vld [vmem:[%s5358_s0 + $0x190] sm:$0xff]  ;;  %v78_v52 = vld [vmem:[%s5358_s0 + $0x198] sm:$0xff]  ;;  %v79_v53 = vld [vmem:[%s5358_s0 + $0x1a0] sm:$0xff] }
  0x13   :  { %v80_v54 = vld [vmem:[%s5358_s0 + $0x1a8] sm:$0xff]  ;;  %v81_v55 = vld [vmem:[%s5358_s0 + $0x1b0] sm:$0xff]  ;;  %v82_v56 = vld [vmem:[%s5358_s0 + $0x1b8] sm:$0xff] }
  0x14   :  { %2949 = vmatmul.mubr.msk.f32.gmra.mrb[8].mxu0 %vm92_vm1, %v36_v10  ;;  %v83_v57 = vld [vmem:[%s5358_s0 + $0x1c0] sm:$0xff]  ;;  %v84_v58 = vld [vmem:[%s5358_s0 + $0x1c8] sm:$0xff]  ;;  %v85_v59 = vld [vmem:[%s5358_s0 + $0x1d0] sm:$0xff] }
  0x15   :  { %2951 = vmatprep.mubr.msk.f32.mxu0 %vm92_vm1, %v37_v11  ;;  %v86_v60 = vld [vmem:[%s5358_s0 + $0x1d8] sm:$0xff]  ;;  %v87_v61 = vld [vmem:[%s5358_s0 + $0x1e0] sm:$0xff]  ;;  %v88_v62 = vld [vmem:[%s5358_s0 + $0x1e8] sm:$0xff] }
  0x16   :  { %v89_v63 = vld [vmem:[%s5358_s0 + $0x1f0] sm:$0xff]  ;;  %v90_v0 = vld [vmem:[%s5358_s0 + $0x1f8] sm:$0xff] }
  0x18   :  { %2952 = vmatmul.mubr.msk.f32.gmra.mrb[10].mxu0 %vm92_vm1, %v38_v12 }
  0x19   :  { %2954 = vmatprep.mubr.msk.f32.mxu0 %vm92_vm1, %v39_v13 }
  0x1c   :  { %2955 = vmatmul.mubr.msk.f32.gmra.mrb[12].mxu0 %vm92_vm1, %v40_v14 }
  0x1d   :  { %2957 = vmatprep.mubr.msk.f32.mxu0 %vm92_vm1, %v41_v15 }
  0x20   :  { %2958 = vmatmul.mubr.msk.f32.gmra.mrb[14].mxu0 %vm92_vm1, %v42_v16 }
  0x21   :  { %2960 = vmatprep.mubr.msk.f32.mxu0 %vm92_vm1, %v43_v17 }
  0x24   :  { %2961 = vmatmul.mubr.msk.f32.gmra.mrb[16].mxu0 %vm92_vm1, %v44_v18 }
  0x25   :  { %2963 = vmatprep.mubr.msk.f32.mxu0 %vm92_vm1, %v45_v19 }
  0x28   :  { %2964 = vmatmul.mubr.msk.f32.gmra.mrb[18].mxu0 %vm92_vm1, %v46_v20 }
  0x29   :  { %2966 = vmatprep.mubr.msk.f32.mxu0 %vm92_vm1, %v47_v21 }
  0x2c   :  { %2967 = vmatmul.mubr.msk.f32.gmra.mrb[20].mxu0 %vm92_vm1, %v48_v22 }
  0x2d   :  { %2969 = vmatprep.mubr.msk.f32.mxu0 %vm92_vm1, %v49_v23 }
  0x30   :  { %2970 = vmatmul.mubr.msk.f32.gmra.mrb[22].mxu0 %vm92_vm1, %v50_v24 }
  0x31   :  { %2972 = vmatprep.mubr.msk.f32.mxu0 %vm92_vm1, %v51_v25 }
  0x34   :  { %2973 = vmatmul.mubr.msk.f32.gmra.mrb[24].mxu0 %vm92_vm1, %v52_v26 }
  0x35   :  { %2975 = vmatprep.mubr.msk.f32.mxu0 %vm92_vm1, %v53_v27 }
  0x38   :  { %2976 = vmatmul.mubr.msk.f32.gmra.mrb[26].mxu0 %vm92_vm1, %v54_v28 }
  0x39   :  { %2978 = vmatprep.mubr.msk.f32.mxu0 %vm92_vm1, %v55_v29 }
  0x3c   :  { %2979 = vmatmul.mubr.msk.f32.gmra.mrb[28].mxu0 %vm92_vm1, %v56_v30 }
  0x3d   :  { %2981 = vmatprep.mubr.msk.f32.mxu0 %vm92_vm1, %v57_v31 }
  0x40   :  { %2982 = vmatmul.mubr.msk.f32.gmra.mrb[30].mxu0 %vm92_vm1, %v58_v32 }
  0x41   :  { %2984 = vmatprep.mubr.msk.f32.mxu0 %vm92_vm1, %v59_v33 }
  0x44   :  { %2985 = vmatmul.mubr.msk.f32.gmra.mrb[32].mxu0 %vm92_vm1, %v60_v34 }
  0x45   :  { %2987 = vmatprep.mubr.msk.f32.mxu0 %vm92_vm1, %v61_v35 }
  0x48   :  { %2988 = vmatmul.mubr.msk.f32.gmra.mrb[34].mxu0 %vm92_vm1, %v62_v36 }
  0x49   :  { %2990 = vmatprep.mubr.msk.f32.mxu0 %vm92_vm1, %v63_v37 }
  0x4c   :  { %2991 = vmatmul.mubr.msk.f32.gmra.mrb[36].mxu0 %vm92_vm1, %v64_v38 }
  0x4d   :  { %2993 = vmatprep.mubr.msk.f32.mxu0 %vm92_vm1, %v65_v39 }
  0x50   :  { %2994 = vmatmul.mubr.msk.f32.gmra.mrb[38].mxu0 %vm92_vm1, %v66_v40 }
  0x51   :  { %2996 = vmatprep.mubr.msk.f32.mxu0 %vm92_vm1, %v67_v41 }
  0x54   :  { %2997 = vmatmul.mubr.msk.f32.gmra.mrb[40].mxu0 %vm92_vm1, %v68_v42 }
  0x55   :  { %2999 = vmatprep.mubr.msk.f32.mxu0 %vm92_vm1, %v69_v43 }
  0x58   :  { %3000 = vmatmul.mubr.msk.f32.gmra.mrb[42].mxu0 %vm92_vm1, %v70_v44 }
  0x59   :  { %3002 = vmatprep.mubr.msk.f32.mxu0 %vm92_vm1, %v71_v45 }
  0x5c   :  { %3003 = vmatmul.mubr.msk.f32.gmra.mrb[44].mxu0 %vm92_vm1, %v72_v46 }
  0x5d   :  { %3005 = vmatprep.mubr.msk.f32.mxu0 %vm92_vm1, %v73_v47 }
  0x60   :  { %3006 = vmatmul.mubr.msk.f32.gmra.mrb[46].mxu0 %vm92_vm1, %v74_v48 }
  0x61   :  { %3008 = vmatprep.mubr.msk.f32.mxu0 %vm92_vm1, %v75_v49 }
  0x64   :  { %3009 = vmatmul.mubr.msk.f32.gmra.mrb[48].mxu0 %vm92_vm1, %v76_v50 }
  0x65   :  { %3011 = vmatprep.mubr.msk.f32.mxu0 %vm92_vm1, %v77_v51 }
  0x68   :  { %3012 = vmatmul.mubr.msk.f32.gmra.mrb[50].mxu0 %vm92_vm1, %v78_v52 }
  0x69   :  { %3014 = vmatprep.mubr.msk.f32.mxu0 %vm92_vm1, %v79_v53 }
  0x6c   :  { %3015 = vmatmul.mubr.msk.f32.gmra.mrb[52].mxu0 %vm92_vm1, %v80_v54 }
  0x6d   :  { %3017 = vmatprep.mubr.msk.f32.mxu0 %vm92_vm1, %v81_v55 }
  0x70   :  { %3018 = vmatmul.mubr.msk.f32.gmra.mrb[54].mxu0 %vm92_vm1, %v82_v56 }
  0x71   :  { %3020 = vmatprep.mubr.msk.f32.mxu0 %vm92_vm1, %v83_v57 }
  0x74   :  { %3021 = vmatmul.mubr.msk.f32.gmra.mrb[56].mxu0 %vm92_vm1, %v84_v58 }
  0x75   :  { %3023 = vmatprep.mubr.msk.f32.mxu0 %vm92_vm1, %v85_v59 }
  0x78   :  { %3024 = vmatmul.mubr.msk.f32.gmra.mrb[58].mxu0 %vm92_vm1, %v86_v60 }
  0x79   :  { %3026 = vmatprep.mubr.msk.f32.mxu0 %vm92_vm1, %v87_v61 }
  0x7c   :  { %3027 = vmatmul.mubr.msk.f32.gmra.mrb[60].mxu0 %vm92_vm1, %v88_v62 }
  0x7d   :  { %3029 = vmatprep.mubr.msk.f32.mxu0 %vm92_vm1, %v89_v63 }
  0x80   :  { %3030 = vmatmul.mubr.msk.f32.gmra.mrb[62].mxu0 %vm92_vm1, %v90_v0 }
  0xd7   :  { %v3411_v1 = vpop.f32.mrb[0].mxu0 }
  0xd8   :  { %v678_v2 = vsel %vm676_vm2, %v3411_v1, 0.0  ;;  %v813_v3 = vmul.f32 %v3411_v1, %v3411_v1  ;;  %v3417_v4 = vpop.f32.mrb[1].mxu0 }
  0xd9   :  { %v677_v5 = vsel %vm676_vm2, %v3417_v4, 0.0  ;;  %v812_v6 = vmul.f32 %v3417_v4, %v3417_v4 }
  0xda   :  { %v877_v7 = vsel %vm676_vm2, %v813_v3, 0.0  ;;  %v679_v8 = vadd.f32 %v678_v2, %v677_v5 }
  0xdb   :  { %v876_v9 = vsel %vm676_vm2, %v812_v6, 0.0  ;;  %v3425_v10 = vpop.f32.mrb[2].mxu0 }
  0xdc   :  { %v878_v11 = vadd.f32 %v877_v7, %v876_v9  ;;  %v3427_v12 = vpop.f32.mrb[3].mxu0  ;;  %v815_v13 = vmul.f32 %v3425_v10, %v3425_v10  ;;  %v682_v17 = vsel %vm676_vm2, %v3425_v10, 0.0 }
  0xdd   :  { %v680_v14 = vsel %vm676_vm2, %v3427_v12, 0.0  ;;  %v814_v15 = vmul.f32 %v3427_v12, %v3427_v12 }
  0xde   :  { %v681_v16 = vadd.f32 %v680_v14, %v679_v8  ;;  %v881_v23 = vsel %vm676_vm2, %v815_v13, 0.0 }
  0xdf   :  { %v879_v18 = vsel %vm676_vm2, %v814_v15, 0.0  ;;  %v3438_v19 = vpop.f32.mrb[4].mxu0 }
  0xe0   :  { %v683_v20 = vadd.f32 %v682_v17, %v681_v16  ;;  %v880_v21 = vadd.f32 %v879_v18, %v878_v11  ;;  %v3440_v22 = vpop.f32.mrb[5].mxu0  ;;  %v817_v24 = vmul.f32 %v3438_v19, %v3438_v19  ;;  %v686_v29 = vsel %vm676_vm2, %v3438_v19, 0.0 }
  0xe1   :  { %v684_v25 = vsel %vm676_vm2, %v3440_v22, 0.0  ;;  %v816_v26 = vmul.f32 %v3440_v22, %v3440_v22 }
  0xe2   :  { %v882_v27 = vadd.f32 %v881_v23, %v880_v21  ;;  %v685_v28 = vadd.f32 %v684_v25, %v683_v20  ;;  %v885_v35 = vsel %vm676_vm2, %v817_v24, 0.0 }
  0xe3   :  { %v883_v30 = vsel %vm676_vm2, %v816_v26, 0.0  ;;  %v3452_v31 = vpop.f32.mrb[6].mxu0 }
  0xe4   :  { %v884_v32 = vadd.f32 %v883_v30, %v882_v27  ;;  %v3454_v33 = vpop.f32.mrb[7].mxu0  ;;  %v687_v34 = vadd.f32 %v686_v29, %v685_v28  ;;  %v819_v36 = vmul.f32 %v3452_v31, %v3452_v31  ;;  %v690_v41 = vsel %vm676_vm2, %v3452_v31, 0.0 }
  0xe5   :  { %v688_v37 = vsel %vm676_vm2, %v3454_v33, 0.0  ;;  %v818_v38 = vmul.f32 %v3454_v33, %v3454_v33 }
  0xe6   :  { %v689_v39 = vadd.f32 %v688_v37, %v687_v34  ;;  %v886_v40 = vadd.f32 %v885_v35, %v884_v32  ;;  %v889_v47 = vsel %vm676_vm2, %v819_v36, 0.0 }
  0xe7   :  { %v887_v42 = vsel %vm676_vm2, %v818_v38, 0.0  ;;  %v3466_v43 = vpop.f32.mrb[8].mxu0 }
  0xe8   :  { %v888_v44 = vadd.f32 %v887_v42, %v886_v40  ;;  %v3468_v45 = vpop.f32.mrb[9].mxu0  ;;  %v691_v46 = vadd.f32 %v690_v41, %v689_v39  ;;  %v821_v48 = vmul.f32 %v3466_v43, %v3466_v43  ;;  %v694_v53 = vsel %vm676_vm2, %v3466_v43, 0.0 }
  0xe9   :  { %v692_v49 = vsel %vm676_vm2, %v3468_v45, 0.0  ;;  %v820_v50 = vmul.f32 %v3468_v45, %v3468_v45 }
  0xea   :  { %v693_v51 = vadd.f32 %v692_v49, %v691_v46  ;;  %v890_v52 = vadd.f32 %v889_v47, %v888_v44  ;;  %v893_v59 = vsel %vm676_vm2, %v821_v48, 0.0 }
  0xeb   :  { %v891_v54 = vsel %vm676_vm2, %v820_v50, 0.0  ;;  %v3480_v55 = vpop.f32.mrb[10].mxu0 }
  0xec   :  { %v892_v56 = vadd.f32 %v891_v54, %v890_v52  ;;  %v3482_v57 = vpop.f32.mrb[11].mxu0  ;;  %v695_v58 = vadd.f32 %v694_v53, %v693_v51  ;;  %v823_v60 = vmul.f32 %v3480_v55, %v3480_v55  ;;  %v698_v2 = vsel %vm676_vm2, %v3480_v55, 0.0 }
  0xed   :  { %v696_v61 = vsel %vm676_vm2, %v3482_v57, 0.0  ;;  %v822_v62 = vmul.f32 %v3482_v57, %v3482_v57 }
  0xee   :  { %v697_v63 = vadd.f32 %v696_v61, %v695_v58  ;;  %v894_v0 = vadd.f32 %v893_v59, %v892_v56  ;;  %v897_v9 = vsel %vm676_vm2, %v823_v60, 0.0 }
  0xef   :  { %v895_v3 = vsel %vm676_vm2, %v822_v62, 0.0  ;;  %v3494_v5 = vpop.f32.mrb[12].mxu0 }
  0xf0   :  { %v896_v6 = vadd.f32 %v895_v3, %v894_v0  ;;  %v3496_v7 = vpop.f32.mrb[13].mxu0  ;;  %v699_v8 = vadd.f32 %v698_v2, %v697_v63  ;;  %v825_v11 = vmul.f32 %v3494_v5, %v3494_v5  ;;  %v702_v17 = vsel %vm676_vm2, %v3494_v5, 0.0 }
  0xf1   :  { %v700_v13 = vsel %vm676_vm2, %v3496_v7, 0.0  ;;  %v824_v14 = vmul.f32 %v3496_v7, %v3496_v7 }
  0xf2   :  { %v701_v15 = vadd.f32 %v700_v13, %v699_v8  ;;  %v898_v16 = vadd.f32 %v897_v9, %v896_v6  ;;  %v901_v25 = vsel %vm676_vm2, %v825_v11, 0.0 }
  0xf3   :  { %v899_v18 = vsel %vm676_vm2, %v824_v14, 0.0  ;;  %v3508_v20 = vpop.f32.mrb[14].mxu0 }
  0xf4   :  { %v900_v21 = vadd.f32 %v899_v18, %v898_v16  ;;  %v3510_v23 = vpop.f32.mrb[15].mxu0  ;;  %v703_v24 = vadd.f32 %v702_v17, %v701_v15  ;;  %v827_v26 = vmul.f32 %v3508_v20, %v3508_v20  ;;  %v706_v32 = vsel %vm676_vm2, %v3508_v20, 0.0 }
  0xf5   :  { %v704_v27 = vsel %vm676_vm2, %v3510_v23, 0.0  ;;  %v826_v28 = vmul.f32 %v3510_v23, %v3510_v23 }
  0xf6   :  { %v705_v29 = vadd.f32 %v704_v27, %v703_v24  ;;  %v902_v30 = vadd.f32 %v901_v25, %v900_v21  ;;  %v905_v39 = vsel %vm676_vm2, %v827_v26, 0.0 }
  0xf7   :  { %v903_v34 = vsel %vm676_vm2, %v826_v28, 0.0  ;;  %v3522_v35 = vpop.f32.mrb[16].mxu0 }
  0xf8   :  { %v904_v36 = vadd.f32 %v903_v34, %v902_v30  ;;  %v3524_v37 = vpop.f32.mrb[17].mxu0  ;;  %v707_v38 = vadd.f32 %v706_v32, %v705_v29  ;;  %v829_v40 = vmul.f32 %v3522_v35, %v3522_v35  ;;  %v710_v47 = vsel %vm676_vm2, %v3522_v35, 0.0 }
  0xf9   :  { %v708_v41 = vsel %vm676_vm2, %v3524_v37, 0.0  ;;  %v828_v42 = vmul.f32 %v3524_v37, %v3524_v37 }
  0xfa   :  { %v709_v44 = vadd.f32 %v708_v41, %v707_v38  ;;  %v906_v46 = vadd.f32 %v905_v39, %v904_v36  ;;  %v909_v53 = vsel %vm676_vm2, %v829_v40, 0.0 }
  0xfb   :  { %v907_v48 = vsel %vm676_vm2, %v828_v42, 0.0  ;;  %v3536_v49 = vpop.f32.mrb[18].mxu0 }
  0xfc   :  { %v908_v50 = vadd.f32 %v907_v48, %v906_v46  ;;  %v3538_v51 = vpop.f32.mrb[19].mxu0  ;;  %v711_v52 = vadd.f32 %v710_v47, %v709_v44  ;;  %v831_v54 = vmul.f32 %v3536_v49, %v3536_v49  ;;  %v714_v61 = vsel %vm676_vm2, %v3536_v49, 0.0 }
  0xfd   :  { %v712_v56 = vsel %vm676_vm2, %v3538_v51, 0.0  ;;  %v830_v58 = vmul.f32 %v3538_v51, %v3538_v51 }
  0xfe   :  { %v713_v59 = vadd.f32 %v712_v56, %v711_v52  ;;  %v910_v60 = vadd.f32 %v909_v53, %v908_v50  ;;  %v913_v6 = vsel %vm676_vm2, %v831_v54, 0.0 }
  0xff   :  { %v911_v62 = vsel %vm676_vm2, %v830_v58, 0.0  ;;  %v3550_v63 = vpop.f32.mrb[20].mxu0 }
 0x100   :  { %v912_v0 = vadd.f32 %v911_v62, %v910_v60  ;;  %v3552_v2 = vpop.f32.mrb[21].mxu0  ;;  %v715_v3 = vadd.f32 %v714_v61, %v713_v59  ;;  %v833_v8 = vmul.f32 %v3550_v63, %v3550_v63  ;;  %v718_v15 = vsel %vm676_vm2, %v3550_v63, 0.0 }
 0x101   :  { %v716_v9 = vsel %vm676_vm2, %v3552_v2, 0.0  ;;  %v832_v11 = vmul.f32 %v3552_v2, %v3552_v2 }
 0x102   :  { %v717_v13 = vadd.f32 %v716_v9, %v715_v3  ;;  %v914_v14 = vadd.f32 %v913_v6, %v912_v0  ;;  %v917_v25 = vsel %vm676_vm2, %v833_v8, 0.0 }
 0x103   :  { %v915_v16 = vsel %vm676_vm2, %v832_v11, 0.0  ;;  %v3564_v17 = vpop.f32.mrb[22].mxu0 }
 0x104   :  { %v916_v18 = vadd.f32 %v915_v16, %v914_v14  ;;  %v3566_v21 = vpop.f32.mrb[23].mxu0  ;;  %v719_v24 = vadd.f32 %v718_v15, %v717_v13  ;;  %v835_v26 = vmul.f32 %v3564_v17, %v3564_v17  ;;  %v722_v32 = vsel %vm676_vm2, %v3564_v17, 0.0 }
 0x105   :  { %v720_v27 = vsel %vm676_vm2, %v3566_v21, 0.0  ;;  %v834_v28 = vmul.f32 %v3566_v21, %v3566_v21 }
 0x106   :  { %v721_v29 = vadd.f32 %v720_v27, %v719_v24  ;;  %v918_v30 = vadd.f32 %v917_v25, %v916_v18  ;;  %v921_v41 = vsel %vm676_vm2, %v835_v26, 0.0 }
 0x107   :  { %v919_v34 = vsel %vm676_vm2, %v834_v28, 0.0  ;;  %v3578_v36 = vpop.f32.mrb[24].mxu0 }
 0x108   :  { %v920_v38 = vadd.f32 %v919_v34, %v918_v30  ;;  %v3580_v39 = vpop.f32.mrb[25].mxu0  ;;  %v723_v40 = vadd.f32 %v722_v32, %v721_v29  ;;  %v837_v42 = vmul.f32 %v3578_v36, %v3578_v36  ;;  %v726_v47 = vsel %vm676_vm2, %v3578_v36, 0.0 }
 0x109   :  { %v724_v44 = vsel %vm676_vm2, %v3580_v39, 0.0  ;;  %v836_v46 = vmul.f32 %v3580_v39, %v3580_v39 }
 0x10a   :  { %v725_v48 = vadd.f32 %v724_v44, %v723_v40  ;;  %v922_v50 = vadd.f32 %v921_v41, %v920_v38  ;;  %v925_v59 = vsel %vm676_vm2, %v837_v42, 0.0 }
 0x10b   :  { %v923_v52 = vsel %vm676_vm2, %v836_v46, 0.0  ;;  %v3592_v53 = vpop.f32.mrb[26].mxu0 }
 0x10c   :  { %v924_v54 = vadd.f32 %v923_v52, %v922_v50  ;;  %v3594_v56 = vpop.f32.mrb[27].mxu0  ;;  %v727_v58 = vadd.f32 %v726_v47, %v725_v48  ;;  %v839_v60 = vmul.f32 %v3592_v53, %v3592_v53  ;;  %v730_v6 = vsel %vm676_vm2, %v3592_v53, 0.0 }
 0x10d   :  { %v728_v61 = vsel %vm676_vm2, %v3594_v56, 0.0  ;;  %v838_v62 = vmul.f32 %v3594_v56, %v3594_v56 }
 0x10e   :  { %v729_v0 = vadd.f32 %v728_v61, %v727_v58  ;;  %v926_v3 = vadd.f32 %v925_v59, %v924_v54  ;;  %v929_v15 = vsel %vm676_vm2, %v839_v60, 0.0 }
 0x10f   :  { %v927_v8 = vsel %vm676_vm2, %v838_v62, 0.0  ;;  %v3606_v9 = vpop.f32.mrb[28].mxu0 }
 0x110   :  { %v928_v11 = vadd.f32 %v927_v8, %v926_v3  ;;  %v3608_v13 = vpop.f32.mrb[29].mxu0  ;;  %v731_v14 = vadd.f32 %v730_v6, %v729_v0  ;;  %v841_v16 = vmul.f32 %v3606_v9, %v3606_v9  ;;  %v734_v27 = vsel %vm676_vm2, %v3606_v9, 0.0 }
 0x111   :  { %v732_v18 = vsel %vm676_vm2, %v3608_v13, 0.0  ;;  %v840_v24 = vmul.f32 %v3608_v13, %v3608_v13 }
 0x112   :  { %v733_v25 = vadd.f32 %v732_v18, %v731_v14  ;;  %v930_v26 = vadd.f32 %v929_v15, %v928_v11  ;;  %v933_v38 = vsel %vm676_vm2, %v841_v16, 0.0 }
 0x113   :  { %v931_v28 = vsel %vm676_vm2, %v840_v24, 0.0  ;;  %v3620_v29 = vpop.f32.mrb[30].mxu0 }
 0x114   :  { %v932_v30 = vadd.f32 %v931_v28, %v930_v26  ;;  %v3622_v32 = vpop.f32.mrb[31].mxu0  ;;  %v735_v34 = vadd.f32 %v734_v27, %v733_v25  ;;  %v843_v40 = vmul.f32 %v3620_v29, %v3620_v29  ;;  %v738_v47 = vsel %vm676_vm2, %v3620_v29, 0.0 }
 0x115   :  { %v736_v41 = vsel %vm676_vm2, %v3622_v32, 0.0  ;;  %v842_v42 = vmul.f32 %v3622_v32, %v3622_v32 }
 0x116   :  { %v737_v44 = vadd.f32 %v736_v41, %v735_v34  ;;  %v934_v46 = vadd.f32 %v933_v38, %v932_v30  ;;  %v937_v59 = vsel %vm676_vm2, %v843_v40, 0.0 }
 0x117   :  { %v935_v48 = vsel %vm676_vm2, %v842_v42, 0.0  ;;  %v3634_v50 = vpop.f32.mrb[32].mxu0 }
 0x118   :  { %v936_v52 = vadd.f32 %v935_v48, %v934_v46  ;;  %v3636_v54 = vpop.f32.mrb[33].mxu0  ;;  %v739_v58 = vadd.f32 %v738_v47, %v737_v44  ;;  %v845_v60 = vmul.f32 %v3634_v50, %v3634_v50  ;;  %v742_v6 = vsel %vm676_vm2, %v3634_v50, 0.0 }
 0x119   :  { %v740_v61 = vsel %vm676_vm2, %v3636_v54, 0.0  ;;  %v844_v62 = vmul.f32 %v3636_v54, %v3636_v54 }
 0x11a   :  { %v741_v0 = vadd.f32 %v740_v61, %v739_v58  ;;  %v938_v3 = vadd.f32 %v937_v59, %v936_v52  ;;  %v941_v18 = vsel %vm676_vm2, %v845_v60, 0.0  ;;  %v3104_v52 = vld [vmem:[%s5359_s4] sm:$0xff]  }
 0x11b   :  { %v939_v8 = vsel %vm676_vm2, %v844_v62, 0.0  ;;  %v3648_v11 = vpop.f32.mrb[34].mxu0  ;;  %3032 = vmatprep.subr.bf16.mxu1 %v3104_v52 }
 0x11c   :  { %v940_v14 = vadd.f32 %v939_v8, %v938_v3  ;;  %v3650_v15 = vpop.f32.mrb[35].mxu0  ;;  %v743_v16 = vadd.f32 %v742_v6, %v741_v0  ;;  %v847_v24 = vmul.f32 %v3648_v11, %v3648_v11  ;;  %v746_v30 = vsel %vm676_vm2, %v3648_v11, 0.0  ;;  %3033 = vmatpush3.bf16.msra.mxu1 %v3104_v52  ;;  %v3106_v52 = vld [vmem:[%s5359_s4 + $0x10] sm:$0xff]  }
 0x11d   :  { %v744_v25 = vsel %vm676_vm2, %v3650_v15, 0.0  ;;  %v846_v26 = vmul.f32 %v3650_v15, %v3650_v15 }
 0x11e   :  { %v745_v27 = vadd.f32 %v744_v25, %v743_v16  ;;  %v942_v28 = vadd.f32 %v941_v18, %v940_v14  ;;  %v945_v44 = vsel %vm676_vm2, %v847_v24, 0.0  ;;  %v3105_v24 = vld [vmem:[%s5359_s4 + $0x8] sm:$0xff]  }
 0x11f   :  { %v943_v34 = vsel %vm676_vm2, %v846_v26, 0.0  ;;  %v3662_v38 = vpop.f32.mrb[36].mxu0  ;;  %3034 = vmatprep.subr.bf16.mxu1 %v3105_v24 }
 0x120   :  { %v944_v40 = vadd.f32 %v943_v34, %v942_v28  ;;  %v3664_v41 = vpop.f32.mrb[37].mxu0  ;;  %v747_v42 = vadd.f32 %v746_v30, %v745_v27  ;;  %v849_v46 = vmul.f32 %v3662_v38, %v3662_v38  ;;  %v750_v60 = vsel %vm676_vm2, %v3662_v38, 0.0  ;;  %3035 = vmatpush3.bf16.msra.mxu1 %v3105_v24 }
 0x121   :  { %v748_v47 = vsel %vm676_vm2, %v3664_v41, 0.0  ;;  %v848_v48 = vmul.f32 %v3664_v41, %v3664_v41  ;;  %3036 = vmatprep.subr.bf16.mxu1 %v3106_v52 }
 0x122   :  { %v749_v58 = vadd.f32 %v748_v47, %v747_v42  ;;  %v946_v59 = vadd.f32 %v945_v44, %v944_v40  ;;  %v949_v8 = vsel %vm676_vm2, %v849_v46, 0.0 }
 0x123   :  { %v947_v61 = vsel %vm676_vm2, %v848_v48, 0.0  ;;  %v3679_v62 = vpop.f32.mrb[38].mxu0 }
 0x124   :  { %5422 = vst [vmem:[#allocation2_spill] sm:$0xff] %v3679_v62  ;;  %v948_v0 = vadd.f32 %v947_v61, %v946_v59  ;;  %v3681_v3 = vpop.f32.mrb[39].mxu0  ;;  %v751_v6 = vadd.f32 %v750_v60, %v749_v58  ;;  %v851_v14 = vmul.f32 %v3679_v62, %v3679_v62  ;;  %v754_v27 = vsel %vm676_vm2, %v3679_v62, 0.0  ;;  %3037 = vmatpush3.bf16.msra.mxu1 %v3106_v52 }
 0x125   :  { %5423 = vst [vmem:[#allocation3_spill] sm:$0xff] %v3681_v3  ;;  %v752_v16 = vsel %vm676_vm2, %v3681_v3, 0.0  ;;  %v850_v18 = vmul.f32 %v3681_v3, %v3681_v3 }
 0x126   :  { %v753_v25 = vadd.f32 %v752_v16, %v751_v6  ;;  %v950_v26 = vadd.f32 %v949_v8, %v948_v0  ;;  %v953_v44 = vsel %vm676_vm2, %v851_v14, 0.0 }
 0x127   :  { %v951_v28 = vsel %vm676_vm2, %v850_v18, 0.0  ;;  %v3696_v30 = vpop.f32.mrb[40].mxu0 }
 0x128   :  { %5424 = vst [vmem:[#allocation4_spill] sm:$0xff] %v3696_v30  ;;  %v952_v34 = vadd.f32 %v951_v28, %v950_v26  ;;  %v3698_v40 = vpop.f32.mrb[41].mxu0  ;;  %v755_v42 = vadd.f32 %v754_v27, %v753_v25  ;;  %v853_v46 = vmul.f32 %v3696_v30, %v3696_v30  ;;  %v758_v60 = vsel %vm676_vm2, %v3696_v30, 0.0  ;;  %v3107_v26 = vld [vmem:[%s5359_s4 + $0x18] sm:$0xff]  }
 0x129   :  { %5425 = vst [vmem:[#allocation5_spill] sm:$0xff] %v3698_v40  ;;  %v756_v47 = vsel %vm676_vm2, %v3698_v40, 0.0  ;;  %v852_v48 = vmul.f32 %v3698_v40, %v3698_v40  ;;  %3038 = vmatprep.subr.bf16.mxu1 %v3107_v26 }
 0x12a   :  { %v757_v58 = vadd.f32 %v756_v47, %v755_v42  ;;  %v954_v59 = vadd.f32 %v953_v44, %v952_v34  ;;  %v957_v16 = vsel %vm676_vm2, %v853_v46, 0.0  ;;  %3039 = vmatpush3.bf16.msra.mxu1 %v3107_v26 }
 0x12b   :  { %v955_v61 = vsel %vm676_vm2, %v852_v48, 0.0  ;;  %v3713_v0 = vpop.f32.mrb[42].mxu0 }
 0x12c   :  { %5426 = vst [vmem:[#allocation6_spill] sm:$0xff] %v3713_v0  ;;  %v956_v6 = vadd.f32 %v955_v61, %v954_v59  ;;  %v3715_v8 = vpop.f32.mrb[43].mxu0  ;;  %v759_v14 = vadd.f32 %v758_v60, %v757_v58  ;;  %v855_v18 = vmul.f32 %v3713_v0, %v3713_v0  ;;  %v762_v34 = vsel %vm676_vm2, %v3713_v0, 0.0 }
 0x12d   :  { %5427 = vst [vmem:[#allocation7_spill] sm:$0xff] %v3715_v8  ;;  %v760_v24 = vsel %vm676_vm2, %v3715_v8, 0.0  ;;  %v854_v25 = vmul.f32 %v3715_v8, %v3715_v8 }
 0x12e   :  { %v761_v27 = vadd.f32 %v760_v24, %v759_v14  ;;  %v958_v28 = vadd.f32 %v957_v16, %v956_v6  ;;  %v961_v52 = vsel %vm676_vm2, %v855_v18, 0.0 }
 0x12f   :  { %v959_v42 = vsel %vm676_vm2, %v854_v25, 0.0  ;;  %v3730_v44 = vpop.f32.mrb[44].mxu0 }
 0x130   :  { %5428 = vst [vmem:[#allocation8_spill] sm:$0xff] %v3730_v44  ;;  %v960_v46 = vadd.f32 %v959_v42, %v958_v28  ;;  %v3732_v47 = vpop.f32.mrb[45].mxu0  ;;  %v763_v48 = vadd.f32 %v762_v34, %v761_v27  ;;  %v857_v58 = vmul.f32 %v3730_v44, %v3730_v44  ;;  %v766_v14 = vsel %vm676_vm2, %v3730_v44, 0.0 }
 0x131   :  { %5429 = vst [vmem:[#allocation9_spill] sm:$0xff] %v3732_v47  ;;  %v764_v59 = vsel %vm676_vm2, %v3732_v47, 0.0  ;;  %v856_v60 = vmul.f32 %v3732_v47, %v3732_v47 }
 0x132   :  { %v765_v61 = vadd.f32 %v764_v59, %v763_v48  ;;  %v962_v6 = vadd.f32 %v961_v52, %v960_v46  ;;  %v965_v27 = vsel %vm676_vm2, %v857_v58, 0.0 }
 0x133   :  { %v963_v16 = vsel %vm676_vm2, %v856_v60, 0.0  ;;  %v3744_v24 = vpop.f32.mrb[46].mxu0 }
 0x134   :  { %5430 = vst [vmem:[#allocation10_spill] sm:$0xff] %v3744_v24  ;;  %v964_v25 = vadd.f32 %v963_v16, %v962_v6  ;;  %v3746_v18 = vpop.f32.mrb[47].mxu0  ;;  %v767_v26 = vadd.f32 %v766_v14, %v765_v61  ;;  %v859_v28 = vmul.f32 %v3744_v24, %v3744_v24  ;;  %v770_v52 = vsel %vm676_vm2, %v3744_v24, 0.0 }
 0x135   :  { %5431 = vst [vmem:[#allocation11_spill] sm:$0xff] %v3746_v18  ;;  %v768_v34 = vsel %vm676_vm2, %v3746_v18, 0.0  ;;  %v858_v42 = vmul.f32 %v3746_v18, %v3746_v18 }
 0x136   :  { %v769_v46 = vadd.f32 %v768_v34, %v767_v26  ;;  %v966_v48 = vadd.f32 %v965_v27, %v964_v25  ;;  %v969_v14 = vsel %vm676_vm2, %v859_v28, 0.0 }
 0x137   :  { %v967_v59 = vsel %vm676_vm2, %v858_v42, 0.0  ;;  %v3758_v60 = vpop.f32.mrb[48].mxu0 }
 0x138   :  { %5432 = vst [vmem:[#allocation12_spill] sm:$0xff] %v3758_v60  ;;  %v968_v61 = vadd.f32 %v967_v59, %v966_v48  ;;  %v3760_v58 = vpop.f32.mrb[49].mxu0  ;;  %v771_v6 = vadd.f32 %v770_v52, %v769_v46  ;;  %v861_v16 = vmul.f32 %v3758_v60, %v3758_v60  ;;  %v774_v42 = vsel %vm676_vm2, %v3758_v60, 0.0 }
 0x139   :  { %5433 = vst [vmem:[#allocation13_spill] sm:$0xff] %v3760_v58  ;;  %v772_v26 = vsel %vm676_vm2, %v3760_v58, 0.0  ;;  %v860_v25 = vmul.f32 %v3760_v58, %v3760_v58 }
 0x13a   :  { %v773_v27 = vadd.f32 %v772_v26, %v771_v6  ;;  %v970_v34 = vadd.f32 %v969_v14, %v968_v61  ;;  %v973_v24 = vsel %vm676_vm2, %v861_v16, 0.0 }
 0x13b   :  { %v971_v48 = vsel %vm676_vm2, %v860_v25, 0.0  ;;  %v3772_v59 = vpop.f32.mrb[50].mxu0 }
 0x13c   :  { %5434 = vst [vmem:[#allocation14_spill] sm:$0xff] %v3772_v59  ;;  %v972_v46 = vadd.f32 %v971_v48, %v970_v34  ;;  %v3774_v28 = vpop.f32.mrb[51].mxu0  ;;  %v775_v52 = vadd.f32 %v774_v42, %v773_v27  ;;  %v863_v18 = vmul.f32 %v3772_v59, %v3772_v59  ;;  %v778_v25 = vsel %vm676_vm2, %v3772_v59, 0.0 }
 0x13d   :  { %5435 = vst [vmem:[#allocation15_spill] sm:$0xff] %v3774_v28  ;;  %v776_v6 = vsel %vm676_vm2, %v3774_v28, 0.0  ;;  %v862_v61 = vmul.f32 %v3774_v28, %v3774_v28 }
 0x13e   :  { %v777_v14 = vadd.f32 %v776_v6, %v775_v52  ;;  %v974_v26 = vadd.f32 %v973_v24, %v972_v46  ;;  %v977_v60 = vsel %vm676_vm2, %v863_v18, 0.0 }
 0x13f   :  { %v975_v34 = vsel %vm676_vm2, %v862_v61, 0.0  ;;  %v3786_v48 = vpop.f32.mrb[52].mxu0 }
 0x140   :  { %5436 = vst [vmem:[#allocation16_spill] sm:$0xff] %v3786_v48  ;;  %v976_v27 = vadd.f32 %v975_v34, %v974_v26  ;;  %v3788_v16 = vpop.f32.mrb[53].mxu0  ;;  %v779_v42 = vadd.f32 %v778_v25, %v777_v14  ;;  %v865_v58 = vmul.f32 %v3786_v48, %v3786_v48  ;;  %v782_v61 = vsel %vm676_vm2, %v3786_v48, 0.0 }
 0x141   :  { %5437 = vst [vmem:[#allocation17_spill] sm:$0xff] %v3788_v16  ;;  %v780_v52 = vsel %vm676_vm2, %v3788_v16, 0.0  ;;  %v864_v24 = vmul.f32 %v3788_v16, %v3788_v16 }
 0x142   :  { %v781_v46 = vadd.f32 %v780_v52, %v779_v42  ;;  %v978_v6 = vadd.f32 %v977_v60, %v976_v27  ;;  %v981_v59 = vsel %vm676_vm2, %v865_v58, 0.0 }
 0x143   :  { %v979_v26 = vsel %vm676_vm2, %v864_v24, 0.0  ;;  %v3800_v34 = vpop.f32.mrb[54].mxu0 }
 0x144   :  { %5438 = vst [vmem:[#allocation18_spill] sm:$0xff] %v3800_v34  ;;  %v980_v14 = vadd.f32 %v979_v26, %v978_v6  ;;  %v3802_v18 = vpop.f32.mrb[55].mxu0  ;;  %v783_v25 = vadd.f32 %v782_v61, %v781_v46  ;;  %v867_v28 = vmul.f32 %v3800_v34, %v3800_v34  ;;  %v786_v24 = vsel %vm676_vm2, %v3800_v34, 0.0 }
 0x145   :  { %5439 = vst [vmem:[#allocation19_spill] sm:$0xff] %v3802_v18  ;;  %v784_v42 = vsel %vm676_vm2, %v3802_v18, 0.0  ;;  %v866_v60 = vmul.f32 %v3802_v18, %v3802_v18 }
 0x146   :  { %v785_v27 = vadd.f32 %v784_v42, %v783_v25  ;;  %v982_v52 = vadd.f32 %v981_v59, %v980_v14  ;;  %v985_v48 = vsel %vm676_vm2, %v867_v28, 0.0 }
 0x147   :  { %v983_v6 = vsel %vm676_vm2, %v866_v60, 0.0  ;;  %v3814_v26 = vpop.f32.mrb[56].mxu0 }
 0x148   :  { %5440 = vst [vmem:[#allocation20_spill] sm:$0xff] %v3814_v26  ;;  %v984_v46 = vadd.f32 %v983_v6, %v982_v52  ;;  %v3816_v58 = vpop.f32.mrb[57].mxu0  ;;  %v787_v61 = vadd.f32 %v786_v24, %v785_v27  ;;  %v869_v16 = vmul.f32 %v3814_v26, %v3814_v26  ;;  %v790_v60 = vsel %vm676_vm2, %v3814_v26, 0.0 }
 0x149   :  { %5441 = vst [vmem:[#allocation21_spill] sm:$0xff] %v3816_v58  ;;  %v788_v25 = vsel %vm676_vm2, %v3816_v58, 0.0  ;;  %v868_v59 = vmul.f32 %v3816_v58, %v3816_v58 }
 0x14a   :  { %v789_v14 = vadd.f32 %v788_v25, %v787_v61  ;;  %v986_v42 = vadd.f32 %v985_v48, %v984_v46  ;;  %v989_v34 = vsel %vm676_vm2, %v869_v16, 0.0 }
 0x14b   :  { %v987_v52 = vsel %vm676_vm2, %v868_v59, 0.0  ;;  %v3828_v6 = vpop.f32.mrb[58].mxu0 }
 0x14c   :  { %5442 = vst [vmem:[#allocation22_spill] sm:$0xff] %v3828_v6  ;;  %v988_v27 = vadd.f32 %v987_v52, %v986_v42  ;;  %v3830_v28 = vpop.f32.mrb[59].mxu0  ;;  %v791_v24 = vadd.f32 %v790_v60, %v789_v14  ;;  %v871_v18 = vmul.f32 %v3828_v6, %v3828_v6  ;;  %v794_v59 = vsel %vm676_vm2, %v3828_v6, 0.0 }
 0x14d   :  { %5443 = vst [vmem:[#allocation23_spill] sm:$0xff] %v3830_v28  ;;  %v792_v61 = vsel %vm676_vm2, %v3830_v28, 0.0  ;;  %v870_v48 = vmul.f32 %v3830_v28, %v3830_v28 }
 0x14e   :  { %v793_v46 = vadd.f32 %v792_v61, %v791_v24  ;;  %v990_v25 = vadd.f32 %v989_v34, %v988_v27  ;;  %v993_v26 = vsel %vm676_vm2, %v871_v18, 0.0 }
 0x14f   :  { %v991_v42 = vsel %vm676_vm2, %v870_v48, 0.0  ;;  %v3842_v52 = vpop.f32.mrb[60].mxu0 }
 0x150   :  { %5444 = vst [vmem:[#allocation24_spill] sm:$0xff] %v3842_v52  ;;  %v992_v14 = vadd.f32 %v991_v42, %v990_v25  ;;  %v3844_v16 = vpop.f32.mrb[61].mxu0  ;;  %v795_v60 = vadd.f32 %v794_v59, %v793_v46  ;;  %v873_v58 = vmul.f32 %v3842_v52, %v3842_v52  ;;  %v798_v48 = vsel %vm676_vm2, %v3842_v52, 0.0 }
 0x151   :  { %5445 = vst [vmem:[#allocation25_spill] sm:$0xff] %v3844_v16  ;;  %v796_v24 = vsel %vm676_vm2, %v3844_v16, 0.0  ;;  %v872_v34 = vmul.f32 %v3844_v16, %v3844_v16 }
 0x152   :  { %v797_v27 = vadd.f32 %v796_v24, %v795_v60  ;;  %v994_v61 = vadd.f32 %v993_v26, %v992_v14  ;;  %v997_v6 = vsel %vm676_vm2, %v873_v58, 0.0 }
 0x153   :  { %v995_v25 = vsel %vm676_vm2, %v872_v34, 0.0  ;;  %v3031_v42 = vpop.f32.mrb[62].mxu0 }
 0x154   :  { %v996_v46 = vadd.f32 %v995_v25, %v994_v61  ;;  %v665_v59 = vpop.f32.mrb[63].mxu0  ;;  %v799_v18 = vadd.f32 %v798_v48, %v797_v27  ;;  %v875_v28 = vmul.f32 %v3031_v42, %v3031_v42  ;;  %v802_v60 = vsel %vm676_vm2, %v3031_v42, 0.0 }
 0x155   :  { %v800_v44 = vsel %vm676_vm2, %v665_v59, 0.0  ;;  %v874_v47 = vmul.f32 %v665_v59, %v665_v59 }
 0x156   :  { %v801_v0 = vadd.f32 %v800_v44, %v799_v18  ;;  %v998_v8 = vadd.f32 %v997_v6, %v996_v46  ;;  %v1001_v34 = vsel %vm676_vm2, %v875_v28, 0.0  ;;  %v1019_v28 = vlaneseq }
 0x157   :  { %v999_v26 = vsel %vm676_vm2, %v874_v47, 0.0 }
 0x158   :  { %v803_v14 = vadd.f32 %v802_v60, %v801_v0  ;;  %v1000_v24 = vadd.f32 %v999_v26, %v998_v8  ;;  %v1020_v26 = vshrl.u32 %v1019_v28, 7 }
 0x15a   :  { %v804_v52 = vrot.slane %v803_v14, 4  ;;  %v1002_v61 = vadd.f32 %v1001_v34, %v1000_v24 }
 0x15c   :  { %v805_v25 = vadd.f32 %v804_v52, %v803_v14  ;;  %v1003_v27 = vrot.slane %v1002_v61, 4  ;;  %v674_v52 = vld [vmem:[%s5360_s2] sm:$0x1]  ;;  %v3864_v14 = vsub.s32 0, %v1020_v26  ;;  %v5458_v26 = vld [vmem:[#allocation5_spill] sm:$0xff] }
 0x15e   :  { %v806_v48 = vrot.slane %v805_v25, 2  ;;  %v1004_v58 = vadd.f32 %v1003_v27, %v1002_v61  ;;  %5446 = vst [vmem:[#allocation26_spill] sm:$0xff] %v3864_v14 }
 0x160   :  { %v807_v16 = vadd.f32 %v806_v48, %v805_v25  ;;  %v1005_v30 = vrot.slane %v1004_v58, 2 }
 0x162   :  { %v808_v40 = vrot.slane %v807_v16, 1  ;;  %v1006_v62 = vadd.f32 %v1005_v30, %v1004_v58 }
 0x164   :  { %v809_v44 = vadd.f32 %v808_v40, %v807_v16  ;;  %v1007_v6 = vrot.slane %v1006_v62, 1 }
 0x166   :  { %v811_v46 = vmul.f32 0.001953125, %v809_v44  ;;  %v1008_v18 = vadd.f32 %v1007_v6, %v1006_v62  ;;  %v675_v62 = vld [vmem:[%s5361_s3] sm:$0x1] }
 0x168   :  { %v1009_v3 = vmul.f32 0.001953125, %v1008_v18  ;;  %v1010_v47 = vmul.f32 %v811_v46, %v811_v46 }
 0x16a   :  { %v1011_v0 = vsub.f32 %v1009_v3, %v1010_v47 }
 0x16c   :  { %v1012_v8 = vmax.f32 %v1011_v0, 0.0 }
 0x16e   :  { %v1013_v60 = vadd.f32 1e-05, %v1012_v8 }
 0x170   :  { %3108 = vrsqrt.f32 %v1013_v60  ;;  %v5456_v60 = vld [vmem:[#allocation3_spill] sm:$0xff] }
 0x17a   :  { %v3109_v24 = vpop.eup %3108 }
 0x17b   :  { %v1015_v30 = vmul.f32 %v3109_v24, %v674_v52  ;;  %v5460_v24 = vld [vmem:[#allocation7_spill] sm:$0xff] }
 0x17d   :  { %v1016_v40 = vmul.f32 %v1015_v30, %v811_v46  ;;  %v3870_v3 = vrot.slane %v1015_v30, %v3864_v14 }
 0x17f   :  { %v1017_v16 = vsub.f32 %v675_v62, %v1016_v40  ;;  %v1086_v34 = vmul.f32 %v3870_v3, %v665_v59  ;;  %v1087_v61 = vmul.f32 %v3031_v42, %v3870_v3  ;;  %v3876_v25 = vmul.f32 %v3870_v3, %v3417_v4  ;;  %v5462_v62 = vld [vmem:[#allocation9_spill] sm:$0xff]  ;;  %v5463_v40 = vld [vmem:[#allocation8_spill] sm:$0xff] }
 0x180   :  { %v3880_v27 = vmul.f32 %v3411_v1, %v3870_v3  ;;  %v3884_v48 = vmul.f32 %v3870_v3, %v3427_v12  ;;  %v3888_v58 = vmul.f32 %v3425_v10, %v3870_v3  ;;  %v3892_v59 = vmul.f32 %v3870_v3, %v3440_v22 }
 0x181   :  { %5447 = vst [vmem:[#allocation27_spill] sm:$0xff] %v3876_v25  ;;  %v3895_v42 = vrot.slane %v1017_v16, %v3864_v14  ;;  %v3899_v4 = vmul.f32 %v3438_v19, %v3870_v3  ;;  %v3903_v1 = vmul.f32 %v3870_v3, %v3454_v33  ;;  %v3907_v12 = vmul.f32 %v3452_v31, %v3870_v3  ;;  %v5474_v25 = vld [vmem:[#allocation21_spill] sm:$0xff] }
 0x182   :  { %5448 = vst [vmem:[#allocation28_spill] sm:$0xff] %v3880_v27  ;;  %v3911_v10 = vmul.f32 %v3870_v3, %v3468_v45  ;;  %v3915_v22 = vmul.f32 %v3466_v43, %v3870_v3  ;;  %v3919_v19 = vmul.f32 %v3870_v3, %v3482_v57  ;;  %v3923_v33 = vmul.f32 %v3480_v55, %v3870_v3 }
 0x183   :  { %5449 = vst [vmem:[#allocation29_spill] sm:$0xff] %v3895_v42  ;;  %v1156_v44 = vadd.f32 %v3895_v42, %v1086_v34  ;;  %v1157_v31 = vadd.f32 %v3895_v42, %v1087_v61  ;;  %v3929_v45 = vmul.f32 %v3870_v3, %v3496_v7  ;;  %v3933_v43 = vmul.f32 %v3494_v5, %v3870_v3  ;;  %v5464_v34 = vld [vmem:[#allocation11_spill] sm:$0xff] }
 0x184   :  { %v3937_v57 = vmul.f32 %v3870_v3, %v3510_v23  ;;  %v3941_v55 = vmul.f32 %v3508_v20, %v3870_v3  ;;  %v3945_v6 = vmul.f32 %v3870_v3, %v3524_v37  ;;  %v3949_v7 = vmul.f32 %v3522_v35, %v3870_v3 }
 0x185   :  { %5450 = vst [vmem:[#allocation30_spill] sm:$0xff] %v3933_v43  ;;  %v1220_v46 = vmax.f32 %v1156_v44, 0.0  ;;  %v1221_v18 = vmax.f32 %v1157_v31, 0.0  ;;  %v1042_v5 = vmul.f32 %v3870_v3, %v3538_v51  ;;  %v1043_v23 = vmul.f32 %v3536_v49, %v3870_v3  ;;  %v5465_v44 = vld [vmem:[#allocation10_spill] sm:$0xff] }
 0x186   :  { %5451 = vst [vmem:[#allocation31_spill] sm:$0xff] %v3937_v57  ;;  %5452 = vst [vmem:[#allocation32_spill] sm:$0xff] %v3941_v55  ;;  %v1044_v20 = vmul.f32 %v3870_v3, %v3552_v2  ;;  %v1045_v47 = vmul.f32 %v3550_v63, %v3870_v3  ;;  %v1046_v37 = vmul.f32 %v3870_v3, %v3566_v21  ;;  %v5478_v57 = vld [vmem:[#allocation25_spill] sm:$0xff] }
 0x187   :  { %5453 = vst [vmem:[#allocation33_spill] sm:$0xff] %v3945_v6  ;;  %5454 = vst [vmem:[#allocation34_spill] sm:$0xff] %v3949_v7  ;;  %v1047_v35 = vmul.f32 %v3564_v17, %v3870_v3  ;;  %v3963_v0 = vpack.c.bf16 %v1221_v18, %v1220_v46  ;;  %v1048_v51 = vmul.f32 %v3870_v3, %v3580_v39  ;;  %v5466_v46 = vld [vmem:[#allocation13_spill] sm:$0xff]  ;;  %v5476_v6 = vld [vmem:[#allocation23_spill] sm:$0xff] }
 0x188   :  { %v1049_v49 = vmul.f32 %v3578_v36, %v3870_v3  ;;  %v1050_v2 = vmul.f32 %v3870_v3, %v3594_v56  ;;  %v1051_v63 = vmul.f32 %v3592_v53, %v3870_v3  ;;  %v1052_v21 = vmul.f32 %v3870_v3, %v3608_v13 }
 0x189   :  { %5455 = vst [vmem:[#allocation35_spill] sm:$0xff] %v3963_v0  ;;  %v1053_v17 = vmul.f32 %v3606_v9, %v3870_v3  ;;  %v1054_v8 = vmul.f32 %v3870_v3, %v3622_v32  ;;  %v1055_v39 = vmul.f32 %v3620_v29, %v3870_v3  ;;  %v1056_v36 = vmul.f32 %v3870_v3, %v3636_v54  ;;  %v5457_v54 = vld [vmem:[#allocation2_spill] sm:$0xff]  ;;  %v5472_v0 = vld [vmem:[#allocation19_spill] sm:$0xff] }
 0x18a   :  { %v1057_v56 = vmul.f32 %v3634_v50, %v3870_v3  ;;  %v1058_v53 = vmul.f32 %v3870_v3, %v3650_v15  ;;  %v1059_v13 = vmul.f32 %v3648_v11, %v3870_v3  ;;  %v1060_v9 = vmul.f32 %v3870_v3, %v3664_v41  ;;  %v5459_v15 = vld [vmem:[#allocation4_spill] sm:$0xff]  ;;  %v5461_v41 = vld [vmem:[#allocation6_spill] sm:$0xff] }
 0x18b   :  { %v1061_v32 = vmul.f32 %v3662_v38, %v3870_v3  ;;  %v1062_v29 = vmul.f32 %v3870_v3, %v5456_v60  ;;  %v1063_v28 = vmul.f32 %v5457_v54, %v3870_v3  ;;  %v1064_v50 = vmul.f32 %v3870_v3, %v5458_v26  ;;  %v5467_v60 = vld [vmem:[#allocation12_spill] sm:$0xff]  ;;  %v5468_v26 = vld [vmem:[#allocation15_spill] sm:$0xff] }
 0x18c   :  { %v1065_v52 = vmul.f32 %v5459_v15, %v3870_v3  ;;  %v1066_v11 = vmul.f32 %v3870_v3, %v5460_v24  ;;  %v1067_v30 = vmul.f32 %v5461_v41, %v3870_v3  ;;  %v1068_v38 = vmul.f32 %v3870_v3, %v5462_v62  ;;  %v5469_v24 = vld [vmem:[#allocation14_spill] sm:$0xff]  ;;  %v5470_v62 = vld [vmem:[#allocation17_spill] sm:$0xff] }
 0x18d   :  { %v1069_v16 = vmul.f32 %v5463_v40, %v3870_v3  ;;  %v1070_v61 = vmul.f32 %v3870_v3, %v5464_v34  ;;  %v1071_v31 = vmul.f32 %v5465_v44, %v3870_v3  ;;  %v1072_v18 = vmul.f32 %v3870_v3, %v5466_v46  ;;  %v5471_v34 = vld [vmem:[#allocation16_spill] sm:$0xff]  ;;  %v5473_v46 = vld [vmem:[#allocation18_spill] sm:$0xff] }
 0x18e   :  { %v1073_v54 = vmul.f32 %v5467_v60, %v3870_v3  ;;  %v1074_v15 = vmul.f32 %v3870_v3, %v5468_v26  ;;  %v1075_v41 = vmul.f32 %v5469_v24, %v3870_v3  ;;  %v1076_v40 = vmul.f32 %v3870_v3, %v5470_v62  ;;  %v5475_v26 = vld [vmem:[#allocation20_spill] sm:$0xff]  ;;  %v5477_v62 = vld [vmem:[#allocation22_spill] sm:$0xff] }
 0x18f   :  { %v1077_v14 = vmul.f32 %v5471_v34, %v3870_v3  ;;  %v1078_v44 = vmul.f32 %v3870_v3, %v5472_v0  ;;  %v1079_v27 = vmul.f32 %v5473_v46, %v3870_v3  ;;  %v1080_v60 = vmul.f32 %v3870_v3, %v5474_v25  ;;  %v5479_v0 = vld [vmem:[#allocation24_spill] sm:$0xff] }
 0x190   :  { %v1081_v7 = vmul.f32 %v5475_v26, %v3870_v3  ;;  %v1082_v24 = vmul.f32 %v3870_v3, %v5476_v6  ;;  %v1083_v55 = vmul.f32 %v5477_v62, %v3870_v3  ;;  %v1084_v34 = vmul.f32 %v3870_v3, %v5478_v57  ;;  %v5484_v62 = vld [vmem:[#allocation31_spill] sm:$0xff] }
 0x191   :  { %v1085_v43 = vmul.f32 %v5479_v0, %v3870_v3  ;;  %v4043_v46 = vadd.f32 %v3895_v42, %v3884_v48  ;;  %v4047_v25 = vadd.f32 %v3895_v42, %v3888_v58  ;;  %v4051_v6 = vadd.f32 %v3895_v42, %v3892_v59  ;;  %v5485_v0 = vld [vmem:[#allocation32_spill] sm:$0xff] }
 0x192   :  { %v4055_v26 = vadd.f32 %v3895_v42, %v3899_v4  ;;  %v4059_v57 = vadd.f32 %v3895_v42, %v3903_v1  ;;  %v4063_v3 = vadd.f32 %v3895_v42, %v3907_v12  ;;  %v4067_v48 = vadd.f32 %v3895_v42, %v3911_v10  ;;  %v5483_v12 = vld [vmem:[#allocation30_spill] sm:$0xff] }
 0x193   :  { %v4071_v58 = vadd.f32 %v3895_v42, %v3915_v22  ;;  %v4075_v59 = vadd.f32 %v3895_v42, %v3919_v19  ;;  %v4079_v4 = vadd.f32 %v3895_v42, %v3923_v33  ;;  %v4083_v1 = vadd.f32 %v3895_v42, %v3929_v45 }
 0x194   :  { %v4087_v10 = vadd.f32 %v3895_v42, %v5483_v12  ;;  %v4091_v22 = vadd.f32 %v3895_v42, %v5484_v62  ;;  %v4095_v19 = vadd.f32 %v3895_v42, %v5485_v0  ;;  %v4109_v12 = vadd.f32 %v3895_v42, %v1043_v23 }
 0x195   :  { %5480 = vst [vmem:[#allocation3_spill] sm:$0xff] %v4075_v59  ;;  %5481 = vst [vmem:[#allocation2_spill] sm:$0xff] %v4079_v4  ;;  %v5487_v59 = vld [vmem:[#allocation33_spill] sm:$0xff]  ;;  %v5488_v4 = vld [vmem:[#allocation34_spill] sm:$0xff]  ;;  %v4112_v62 = vadd.f32 %v3895_v42, %v1044_v20  ;;  %v4115_v0 = vadd.f32 %v3895_v42, %v1045_v47  ;;  %v4130_v23 = vadd.f32 %v3895_v42, %v1050_v2 }
 0x196   :  { %5482 = vst [vmem:[#allocation5_spill] sm:$0xff] %v4083_v1  ;;  %5486 = vst [vmem:[#allocation4_spill] sm:$0xff] %v4095_v19  ;;  %v4099_v33 = vadd.f32 %v3895_v42, %v5487_v59  ;;  %v4103_v45 = vadd.f32 %v3895_v42, %v5488_v4  ;;  %v4106_v1 = vadd.f32 %v3895_v42, %v1042_v5 }
 0x197   :  { %v4118_v19 = vadd.f32 %v3895_v42, %v1046_v37  ;;  %v4121_v59 = vadd.f32 %v3895_v42, %v1047_v35  ;;  %v4124_v4 = vadd.f32 %v3895_v42, %v1048_v51  ;;  %v4127_v5 = vadd.f32 %v3895_v42, %v1049_v49 }
 0x198   :  { %v4133_v20 = vadd.f32 %v3895_v42, %v1051_v63  ;;  %v4136_v47 = vadd.f32 %v3895_v42, %v1052_v21  ;;  %v4139_v37 = vadd.f32 %v3895_v42, %v1053_v17  ;;  %v4142_v35 = vadd.f32 %v3895_v42, %v1054_v8 }
 0x199   :  { %v4145_v51 = vadd.f32 %v3895_v42, %v1055_v39  ;;  %v4148_v49 = vadd.f32 %v3895_v42, %v1056_v36  ;;  %v4151_v2 = vadd.f32 %v3895_v42, %v1057_v56  ;;  %v4154_v63 = vadd.f32 %v3895_v42, %v1058_v53 }
 0x19a   :  { %v4157_v21 = vadd.f32 %v3895_v42, %v1059_v13  ;;  %v4160_v17 = vadd.f32 %v3895_v42, %v1060_v9  ;;  %v4163_v8 = vadd.f32 %v3895_v42, %v1061_v32  ;;  %v4166_v39 = vadd.f32 %v3895_v42, %v1062_v29 }
 0x19b   :  { %v4169_v36 = vadd.f32 %v3895_v42, %v1063_v28  ;;  %v4172_v56 = vadd.f32 %v3895_v42, %v1064_v50  ;;  %v4175_v53 = vadd.f32 %v3895_v42, %v1065_v52  ;;  %v4178_v13 = vadd.f32 %v3895_v42, %v1066_v11 }
 0x19c   :  { %v4181_v9 = vadd.f32 %v3895_v42, %v1067_v30  ;;  %v4184_v32 = vadd.f32 %v3895_v42, %v1068_v38  ;;  %v4187_v29 = vadd.f32 %v3895_v42, %v1069_v16  ;;  %v4190_v28 = vadd.f32 %v3895_v42, %v1070_v61 }
 0x19d   :  { %v4193_v50 = vadd.f32 %v3895_v42, %v1071_v31  ;;  %v4196_v52 = vadd.f32 %v3895_v42, %v1072_v18  ;;  %v4199_v11 = vadd.f32 %v3895_v42, %v1073_v54  ;;  %v4202_v30 = vadd.f32 %v3895_v42, %v1074_v15 }
 0x19e   :  { %v4205_v38 = vadd.f32 %v3895_v42, %v1075_v41  ;;  %v4208_v16 = vadd.f32 %v3895_v42, %v1076_v40  ;;  %v4211_v61 = vadd.f32 %v3895_v42, %v1077_v14  ;;  %v4214_v31 = vadd.f32 %v3895_v42, %v1078_v44 }
 0x19f   :  { %v4217_v18 = vadd.f32 %v3895_v42, %v1079_v27  ;;  %v4220_v54 = vadd.f32 %v3895_v42, %v1080_v60  ;;  %v4223_v15 = vadd.f32 %v3895_v42, %v1081_v7  ;;  %v4226_v41 = vadd.f32 %v3895_v42, %v1082_v24 }
 0x1a0   :  { %v4229_v40 = vadd.f32 %v3895_v42, %v1083_v55  ;;  %v4232_v14 = vadd.f32 %v3895_v42, %v1084_v34  ;;  %v4235_v44 = vadd.f32 %v3895_v42, %v1085_v43  ;;  %v1160_v27 = vmax.f32 %v4043_v46, 0.0  ;;  %v5496_v43 = vld [vmem:[#allocation2_spill] sm:$0xff] }
 0x1a1   :  { %5489 = vst [vmem:[#allocation7_spill] sm:$0xff] %v4220_v54  ;;  %5490 = vst [vmem:[#allocation6_spill] sm:$0xff] %v4223_v15  ;;  %v1161_v60 = vmax.f32 %v4047_v25, 0.0  ;;  %v1162_v54 = vmax.f32 %v4051_v6, 0.0  ;;  %v1163_v7 = vmax.f32 %v4055_v26, 0.0  ;;  %v1164_v24 = vmax.f32 %v4059_v57, 0.0 }
 0x1a2   :  { %5491 = vst [vmem:[#allocation9_spill] sm:$0xff] %v4226_v41  ;;  %5492 = vst [vmem:[#allocation8_spill] sm:$0xff] %v4229_v40  ;;  %v1165_v41 = vmax.f32 %v4063_v3, 0.0  ;;  %v1166_v55 = vmax.f32 %v4067_v48, 0.0  ;;  %v1167_v34 = vmax.f32 %v4071_v58, 0.0  ;;  %v1169_v42 = vmax.f32 %v5496_v43, 0.0 }
 0x1a3   :  { %5493 = vst [vmem:[#allocation11_spill] sm:$0xff] %v4232_v14  ;;  %5494 = vst [vmem:[#allocation10_spill] sm:$0xff] %v4235_v44  ;;  %v5495_v14 = vld [vmem:[#allocation3_spill] sm:$0xff]  ;;  %v5497_v44 = vld [vmem:[#allocation5_spill] sm:$0xff]  ;;  %v1171_v25 = vmax.f32 %v4087_v10, 0.0  ;;  %v1172_v6 = vmax.f32 %v4091_v22, 0.0 }
 0x1a4   :  { %v1168_v40 = vmax.f32 %v5495_v14, 0.0  ;;  %v1170_v46 = vmax.f32 %v5497_v44, 0.0  ;;  %v5498_v15 = vld [vmem:[#allocation4_spill] sm:$0xff]  ;;  %v1174_v57 = vmax.f32 %v4099_v33, 0.0  ;;  %v1175_v3 = vmax.f32 %v4103_v45, 0.0 }
 0x1a5   :  { %v1173_v26 = vmax.f32 %v5498_v15, 0.0  ;;  %v1176_v48 = vmax.f32 %v4106_v1, 0.0  ;;  %v1177_v58 = vmax.f32 %v4109_v12, 0.0  ;;  %v1178_v14 = vmax.f32 %v4112_v62, 0.0 }
 0x1a6   :  { %v1179_v43 = vmax.f32 %v4115_v0, 0.0  ;;  %v1180_v44 = vmax.f32 %v4118_v19, 0.0  ;;  %v1181_v10 = vmax.f32 %v4121_v59, 0.0  ;;  %v1182_v22 = vmax.f32 %v4124_v4, 0.0 }
 0x1a7   :  { %v1183_v15 = vmax.f32 %v4127_v5, 0.0  ;;  %v1184_v33 = vmax.f32 %v4130_v23, 0.0  ;;  %v1185_v45 = vmax.f32 %v4133_v20, 0.0  ;;  %v1186_v1 = vmax.f32 %v4136_v47, 0.0 }
 0x1a8   :  { %v1187_v12 = vmax.f32 %v4139_v37, 0.0  ;;  %v1188_v62 = vmax.f32 %v4142_v35, 0.0  ;;  %v1189_v0 = vmax.f32 %v4145_v51, 0.0  ;;  %v1190_v19 = vmax.f32 %v4148_v49, 0.0 }
 0x1a9   :  { %v1191_v59 = vmax.f32 %v4151_v2, 0.0  ;;  %v1192_v4 = vmax.f32 %v4154_v63, 0.0  ;;  %v1193_v5 = vmax.f32 %v4157_v21, 0.0  ;;  %v1194_v23 = vmax.f32 %v4160_v17, 0.0 }
 0x1aa   :  { %v1195_v20 = vmax.f32 %v4163_v8, 0.0  ;;  %v1196_v47 = vmax.f32 %v4166_v39, 0.0  ;;  %v1197_v37 = vmax.f32 %v4169_v36, 0.0  ;;  %v1198_v35 = vmax.f32 %v4172_v56, 0.0 }
 0x1ab   :  { %v1199_v51 = vmax.f32 %v4175_v53, 0.0  ;;  %v1200_v49 = vmax.f32 %v4178_v13, 0.0  ;;  %v1201_v2 = vmax.f32 %v4181_v9, 0.0  ;;  %v1202_v63 = vmax.f32 %v4184_v32, 0.0 }
 0x1ac   :  { %v1203_v21 = vmax.f32 %v4187_v29, 0.0  ;;  %v1204_v17 = vmax.f32 %v4190_v28, 0.0  ;;  %v1205_v8 = vmax.f32 %v4193_v50, 0.0  ;;  %v1206_v39 = vmax.f32 %v4196_v52, 0.0  ;;  %v5499_v28 = vld [vmem:[#allocation7_spill] sm:$0xff]  ;;  %v5500_v52 = vld [vmem:[#allocation6_spill] sm:$0xff] }
 0x1ad   :  { %v1207_v36 = vmax.f32 %v4199_v11, 0.0  ;;  %v1208_v56 = vmax.f32 %v4202_v30, 0.0  ;;  %v1209_v53 = vmax.f32 %v4205_v38, 0.0  ;;  %v1210_v13 = vmax.f32 %v4208_v16, 0.0  ;;  %v5501_v30 = vld [vmem:[#allocation9_spill] sm:$0xff]  ;;  %v5502_v16 = vld [vmem:[#allocation8_spill] sm:$0xff] }
 0x1ae   :  { %v1211_v9 = vmax.f32 %v4211_v61, 0.0  ;;  %v1212_v32 = vmax.f32 %v4214_v31, 0.0  ;;  %v1213_v29 = vmax.f32 %v4217_v18, 0.0  ;;  %v1214_v50 = vmax.f32 %v5499_v28, 0.0  ;;  %v5503_v31 = vld [vmem:[#allocation11_spill] sm:$0xff]  ;;  %v5504_v28 = vld [vmem:[#allocation10_spill] sm:$0xff] }
 0x1af   :  { %v1215_v11 = vmax.f32 %v5500_v52, 0.0  ;;  %v1216_v38 = vmax.f32 %v5501_v30, 0.0  ;;  %v1217_v61 = vmax.f32 %v5502_v16, 0.0  ;;  %v1218_v18 = vmax.f32 %v5503_v31, 0.0  ;;  %v5505_v30 = vld [vmem:[#allocation27_spill] sm:$0xff]  ;;  %v5506_v16 = vld [vmem:[#allocation29_spill] sm:$0xff] }
 0x1b0   :  { %v1219_v52 = vmax.f32 %v5504_v28, 0.0  ;;  %v1094_v31 = vadd.f32 %v5506_v16, %v5505_v30  ;;  %v5507_v28 = vld [vmem:[#allocation28_spill] sm:$0xff] }
 0x1b1   :  { %v1095_v30 = vadd.f32 %v5506_v16, %v5507_v28  ;;  %v1223_v16 = vpack.c.bf16 %v1161_v60, %v1160_v27  ;;  %v1224_v28 = vpack.c.bf16 %v1163_v7, %v1162_v54  ;;  %v1225_v27 = vpack.c.bf16 %v1165_v41, %v1164_v24 }
 0x1b2   :  { %v1158_v60 = vmax.f32 %v1094_v31, 0.0  ;;  %v1226_v7 = vpack.c.bf16 %v1167_v34, %v1166_v55  ;;  %v1227_v54 = vpack.c.bf16 %v1169_v42, %v1168_v40  ;;  %v1228_v24 = vpack.c.bf16 %v1171_v25, %v1170_v46 }
 0x1b3   :  { %v1159_v41 = vmax.f32 %v1095_v30, 0.0  ;;  %v1229_v31 = vpack.c.bf16 %v1173_v26, %v1172_v6  ;;  %v1230_v34 = vpack.c.bf16 %v1175_v3, %v1174_v57  ;;  %v1231_v55 = vpack.c.bf16 %v1177_v58, %v1176_v48 }
 0x1b4   :  { %v1232_v40 = vpack.c.bf16 %v1179_v43, %v1178_v14  ;;  %v1233_v42 = vpack.c.bf16 %v1181_v10, %v1180_v44  ;;  %v1234_v25 = vpack.c.bf16 %v1183_v15, %v1182_v22  ;;  %v1235_v46 = vpack.c.bf16 %v1185_v45, %v1184_v33 }
 0x1b5   :  { %v1222_v30 = vpack.c.bf16 %v1159_v41, %v1158_v60  ;;  %v1236_v6 = vpack.c.bf16 %v1187_v12, %v1186_v1  ;;  %v1237_v26 = vpack.c.bf16 %v1189_v0, %v1188_v62  ;;  %v1238_v3 = vpack.c.bf16 %v1191_v59, %v1190_v19  ;;  %v5508_v62 = vld [vmem:[#allocation35_spill] sm:$0xff] }
 0x1b6   :  { %v1239_v57 = vpack.c.bf16 %v1193_v5, %v1192_v4  ;;  %v1240_v48 = vpack.c.bf16 %v1195_v20, %v1194_v23  ;;  %v1241_v58 = vpack.c.bf16 %v1197_v37, %v1196_v47  ;;  %v1242_v14 = vpack.c.bf16 %v1199_v51, %v1198_v35 }
 0x1b7   :  { %3040 = vmatprep.mubr.msk.bf16.mxu1 %vm676_vm2, %v1222_v30  ;;  %v1243_v43 = vpack.c.bf16 %v1201_v2, %v1200_v49  ;;  %v1244_v10 = vpack.c.bf16 %v1203_v21, %v1202_v63  ;;  %v1245_v44 = vpack.c.bf16 %v1205_v8, %v1204_v17  ;;  %v1246_v15 = vpack.c.bf16 %v1207_v36, %v1206_v39 }
 0x1b8   :  { %3041 = vmatmul.mubr.msk.bf16.vlgmr.msra.gmra.mrb[0].mxu1 %vm676_vm2, %v1223_v16  ;;  %v1247_v22 = vpack.c.bf16 %v1209_v53, %v1208_v56  ;;  %v1248_v33 = vpack.c.bf16 %v1211_v9, %v1210_v13  ;;  %v1249_v45 = vpack.c.bf16 %v1213_v29, %v1212_v32  ;;  %v1250_v41 = vpack.c.bf16 %v1215_v11, %v1214_v50 }
 0x1b9   :  { %3044 = vmatprep.mubr.msk.bf16.mxu1 %vm676_vm2, %v1224_v28  ;;  %v1251_v1 = vpack.c.bf16 %v1217_v61, %v1216_v38  ;;  %v1252_v12 = vpack.c.bf16 %v1219_v52, %v1218_v18 }
 0x1c0   :  { %3045 = vmatmul.mubr.msk.bf16.gmra.mrb[4].mxu1 %vm676_vm2, %v1225_v27 }
 0x1c1   :  { %3048 = vmatprep.mubr.msk.bf16.mxu1 %vm676_vm2, %v1226_v7 }
 0x1c8   :  { %3049 = vmatmul.mubr.msk.bf16.gmra.mrb[8].mxu1 %vm676_vm2, %v1227_v54 }
 0x1c9   :  { %3052 = vmatprep.mubr.msk.bf16.mxu1 %vm676_vm2, %v1228_v24 }
 0x1d0   :  { %3053 = vmatmul.mubr.msk.bf16.gmra.mrb[12].mxu1 %vm676_vm2, %v1229_v31 }
 0x1d1   :  { %3056 = vmatprep.mubr.msk.bf16.mxu1 %vm676_vm2, %v1230_v34 }
 0x1d8   :  { %3057 = vmatmul.mubr.msk.bf16.gmra.mrb[16].mxu1 %vm676_vm2, %v1231_v55 }
 0x1d9   :  { %3060 = vmatprep.mubr.msk.bf16.mxu1 %vm676_vm2, %v1232_v40 }
 0x1e0   :  { %3061 = vmatmul.mubr.msk.bf16.gmra.mrb[20].mxu1 %vm676_vm2, %v1233_v42 }
 0x1e1   :  { %3064 = vmatprep.mubr.msk.bf16.mxu1 %vm676_vm2, %v1234_v25 }
 0x1e8   :  { %3065 = vmatmul.mubr.msk.bf16.gmra.mrb[24].mxu1 %vm676_vm2, %v1235_v46 }
 0x1e9   :  { %3068 = vmatprep.mubr.msk.bf16.mxu1 %vm676_vm2, %v1236_v6 }
 0x1f0   :  { %3069 = vmatmul.mubr.msk.bf16.gmra.mrb[28].mxu1 %vm676_vm2, %v1237_v26 }
 0x1f1   :  { %3072 = vmatprep.mubr.msk.bf16.mxu1 %vm676_vm2, %v1238_v3 }
 0x1f8   :  { %3073 = vmatmul.mubr.msk.bf16.gmra.mrb[32].mxu1 %vm676_vm2, %v1239_v57 }
 0x1f9   :  { %3076 = vmatprep.mubr.msk.bf16.mxu1 %vm676_vm2, %v1240_v48 }
 0x200   :  { %3077 = vmatmul.mubr.msk.bf16.gmra.mrb[36].mxu1 %vm676_vm2, %v1241_v58 }
 0x201   :  { %3080 = vmatprep.mubr.msk.bf16.mxu1 %vm676_vm2, %v1242_v14 }
 0x208   :  { %3081 = vmatmul.mubr.msk.bf16.gmra.mrb[40].mxu1 %vm676_vm2, %v1243_v43 }
 0x209   :  { %3084 = vmatprep.mubr.msk.bf16.mxu1 %vm676_vm2, %v1244_v10 }
 0x210   :  { %3085 = vmatmul.mubr.msk.bf16.gmra.mrb[44].mxu1 %vm676_vm2, %v1245_v44 }
 0x211   :  { %3088 = vmatprep.mubr.msk.bf16.mxu1 %vm676_vm2, %v1246_v15 }
 0x218   :  { %3089 = vmatmul.mubr.msk.bf16.gmra.mrb[48].mxu1 %vm676_vm2, %v1247_v22 }
 0x219   :  { %3092 = vmatprep.mubr.msk.bf16.mxu1 %vm676_vm2, %v1248_v33 }
 0x220   :  { %3093 = vmatmul.mubr.msk.bf16.gmra.mrb[52].mxu1 %vm676_vm2, %v1249_v45 }
 0x221   :  { %3096 = vmatprep.mubr.msk.bf16.mxu1 %vm676_vm2, %v1250_v41 }
 0x228   :  { %3097 = vmatmul.mubr.msk.bf16.gmra.mrb[56].mxu1 %vm676_vm2, %v1251_v1 }
 0x229   :  { %3100 = vmatprep.mubr.msk.bf16.mxu1 %vm676_vm2, %v1252_v12 }
 0x230   :  { %3101 = vmatmul.mubr.msk.bf16.gmra.mrb[60].mxu1 %vm676_vm2, %v5508_v62 }
 0x28b   :  { %v4334_v0 = vpop.f32.mrb[0].mxu1 }
 0x28c   :  { %v4336_v19 = vpop.f32.mrb[1].mxu1  ;;  %v1745_v47 = vmul.f32 %v4334_v0, %v4334_v0 }
 0x28d   :  { %v4338_v59 = vpop.f32.mrb[2].mxu1  ;;  %v1743_v5 = vmul.f32 %v4336_v19, %v4336_v19 }
 0x28e   :  { %v4340_v4 = vpop.f32.mrb[3].mxu1  ;;  %v1746_v51 = vmul.f32 %v4338_v59, %v4338_v59 }
 0x28f   :  { %v1673_v23 = vadd.f32 %v4340_v4, %v4336_v19  ;;  %v1744_v20 = vmul.f32 %v4340_v4, %v4340_v4 }
 0x291   :  { %v1674_v37 = vadd.f32 %v4334_v0, %v1673_v23  ;;  %v1807_v35 = vadd.f32 %v1744_v20, %v1743_v5 }
 0x293   :  { %v1808_v49 = vadd.f32 %v1807_v35, %v1745_v47  ;;  %v4353_v2 = vpop.f32.mrb[4].mxu1  ;;  %v1675_v63 = vadd.f32 %v4338_v59, %v1674_v37 }
 0x294   :  { %v4356_v21 = vpop.f32.mrb[5].mxu1  ;;  %v1749_v32 = vmul.f32 %v4353_v2, %v4353_v2 }
 0x295   :  { %v1676_v17 = vadd.f32 %v1675_v63, %v4356_v21  ;;  %v1747_v8 = vmul.f32 %v4356_v21, %v4356_v21  ;;  %v1809_v39 = vadd.f32 %v1808_v49, %v1746_v51  ;;  %v4361_v36 = vpop.f32.mrb[6].mxu1 }
 0x296   :  { %v4363_v56 = vpop.f32.mrb[7].mxu1  ;;  %v1750_v11 = vmul.f32 %v4361_v36, %v4361_v36 }
 0x297   :  { %v1810_v53 = vadd.f32 %v1809_v39, %v1747_v8  ;;  %v1677_v13 = vadd.f32 %v1676_v17, %v4363_v56  ;;  %v1748_v9 = vmul.f32 %v4363_v56, %v4363_v56 }
 0x299   :  { %v1678_v29 = vadd.f32 %v4353_v2, %v1677_v13  ;;  %v1811_v50 = vadd.f32 %v1810_v53, %v1748_v9 }
 0x29b   :  { %v1812_v38 = vadd.f32 %v1811_v50, %v1749_v32  ;;  %v4373_v61 = vpop.f32.mrb[8].mxu1  ;;  %v1679_v18 = vadd.f32 %v4361_v36, %v1678_v29 }
 0x29c   :  { %v4376_v52 = vpop.f32.mrb[9].mxu1  ;;  %v1753_v34 = vmul.f32 %v4373_v61, %v4373_v61 }
 0x29d   :  { %v1680_v16 = vadd.f32 %v1679_v18, %v4376_v52  ;;  %v1751_v28 = vmul.f32 %v4376_v52, %v4376_v52  ;;  %v1813_v27 = vadd.f32 %v1812_v38, %v1750_v11  ;;  %v4381_v60 = vpop.f32.mrb[10].mxu1 }
 0x29e   :  { %v4383_v7 = vpop.f32.mrb[11].mxu1  ;;  %v1754_v42 = vmul.f32 %v4381_v60, %v4381_v60 }
 0x29f   :  { %v1814_v54 = vadd.f32 %v1813_v27, %v1751_v28  ;;  %v1681_v24 = vadd.f32 %v1680_v16, %v4383_v7  ;;  %v1752_v31 = vmul.f32 %v4383_v7, %v4383_v7 }
 0x2a1   :  { %v1682_v55 = vadd.f32 %v4373_v61, %v1681_v24  ;;  %v1815_v40 = vadd.f32 %v1814_v54, %v1752_v31 }
 0x2a3   :  { %v1816_v25 = vadd.f32 %v1815_v40, %v1753_v34  ;;  %v4393_v46 = vpop.f32.mrb[12].mxu1  ;;  %v1683_v30 = vadd.f32 %v4381_v60, %v1682_v55 }
 0x2a4   :  { %v4396_v6 = vpop.f32.mrb[13].mxu1  ;;  %v1757_v44 = vmul.f32 %v4393_v46, %v4393_v46 }
 0x2a5   :  { %v1684_v26 = vadd.f32 %v1683_v30, %v4396_v6  ;;  %v1755_v3 = vmul.f32 %v4396_v6, %v4396_v6  ;;  %v1817_v57 = vadd.f32 %v1816_v25, %v1754_v42  ;;  %v4401_v48 = vpop.f32.mrb[14].mxu1 }
 0x2a6   :  { %v4403_v58 = vpop.f32.mrb[15].mxu1  ;;  %v1758_v33 = vmul.f32 %v4401_v48, %v4401_v48 }
 0x2a7   :  { %v1818_v14 = vadd.f32 %v1817_v57, %v1755_v3  ;;  %v1685_v43 = vadd.f32 %v1684_v26, %v4403_v58  ;;  %v1756_v10 = vmul.f32 %v4403_v58, %v4403_v58 }
 0x2a9   :  { %v1686_v15 = vadd.f32 %v4393_v46, %v1685_v43  ;;  %v1819_v22 = vadd.f32 %v1818_v14, %v1756_v10 }
 0x2ab   :  { %v1820_v45 = vadd.f32 %v1819_v22, %v1757_v44  ;;  %v4413_v41 = vpop.f32.mrb[16].mxu1  ;;  %v1687_v1 = vadd.f32 %v4401_v48, %v1686_v15 }
 0x2ac   :  { %v4416_v12 = vpop.f32.mrb[17].mxu1  ;;  %v1761_v49 = vmul.f32 %v4413_v41, %v4413_v41 }
 0x2ad   :  { %v1688_v62 = vadd.f32 %v1687_v1, %v4416_v12  ;;  %v1759_v5 = vmul.f32 %v4416_v12, %v4416_v12  ;;  %v1821_v23 = vadd.f32 %v1820_v45, %v1758_v33  ;;  %v4421_v20 = vpop.f32.mrb[18].mxu1 }
 0x2ae   :  { %v4423_v47 = vpop.f32.mrb[19].mxu1  ;;  %v1762_v8 = vmul.f32 %v4421_v20, %v4421_v20 }
 0x2af   :  { %v1822_v37 = vadd.f32 %v1821_v23, %v1759_v5  ;;  %v1689_v35 = vadd.f32 %v1688_v62, %v4423_v47  ;;  %v1760_v51 = vmul.f32 %v4423_v47, %v4423_v47 }
 0x2b1   :  { %v1690_v63 = vadd.f32 %v4413_v41, %v1689_v35  ;;  %v1823_v17 = vadd.f32 %v1822_v37, %v1760_v51 }
 0x2b3   :  { %v1824_v39 = vadd.f32 %v1823_v17, %v1761_v49  ;;  %v4433_v53 = vpop.f32.mrb[20].mxu1  ;;  %v1691_v13 = vadd.f32 %v4421_v20, %v1690_v63 }
 0x2b4   :  { %v4436_v9 = vpop.f32.mrb[21].mxu1  ;;  %v1765_v27 = vmul.f32 %v4433_v53, %v4433_v53 }
 0x2b5   :  { %v1692_v32 = vadd.f32 %v1691_v13, %v4436_v9  ;;  %v1763_v29 = vmul.f32 %v4436_v9, %v4436_v9  ;;  %v1825_v50 = vadd.f32 %v1824_v39, %v1762_v8  ;;  %v4441_v11 = vpop.f32.mrb[22].mxu1 }
 0x2b6   :  { %v4443_v38 = vpop.f32.mrb[23].mxu1  ;;  %v1766_v31 = vmul.f32 %v4441_v11, %v4441_v11 }
 0x2b7   :  { %v1826_v18 = vadd.f32 %v1825_v50, %v1763_v29  ;;  %v1693_v16 = vadd.f32 %v1692_v32, %v4443_v38  ;;  %v1764_v28 = vmul.f32 %v4443_v38, %v4443_v38 }
 0x2b9   :  { %v1694_v54 = vadd.f32 %v4433_v53, %v1693_v16  ;;  %v1827_v24 = vadd.f32 %v1826_v18, %v1764_v28 }
 0x2bb   :  { %v1828_v34 = vadd.f32 %v1827_v24, %v1765_v27  ;;  %v4453_v55 = vpop.f32.mrb[24].mxu1  ;;  %v1695_v40 = vadd.f32 %v4441_v11, %v1694_v54 }
 0x2bc   :  { %v4456_v42 = vpop.f32.mrb[25].mxu1  ;;  %v1769_v44 = vmul.f32 %v4453_v55, %v4453_v55 }
 0x2bd   :  { %v1696_v25 = vadd.f32 %v1695_v40, %v4456_v42  ;;  %v1767_v30 = vmul.f32 %v4456_v42, %v4456_v42  ;;  %v1829_v26 = vadd.f32 %v1828_v34, %v1766_v31  ;;  %v4461_v3 = vpop.f32.mrb[26].mxu1 }
 0x2be   :  { %v4463_v57 = vpop.f32.mrb[27].mxu1  ;;  %v1770_v33 = vmul.f32 %v4461_v3, %v4461_v3 }
 0x2bf   :  { %v1830_v14 = vadd.f32 %v1829_v26, %v1767_v30  ;;  %v1697_v43 = vadd.f32 %v1696_v25, %v4463_v57  ;;  %v1768_v10 = vmul.f32 %v4463_v57, %v4463_v57 }
 0x2c1   :  { %v1698_v15 = vadd.f32 %v4453_v55, %v1697_v43  ;;  %v1831_v22 = vadd.f32 %v1830_v14, %v1768_v10 }
 0x2c3   :  { %v1832_v45 = vadd.f32 %v1831_v22, %v1769_v44  ;;  %v4473_v1 = vpop.f32.mrb[28].mxu1  ;;  %v1699_v62 = vadd.f32 %v4461_v3, %v1698_v15 }
 0x2c4   :  { %v4476_v5 = vpop.f32.mrb[29].mxu1  ;;  %v1773_v39 = vmul.f32 %v4473_v1, %v4473_v1 }
 0x2c5   :  { %v1700_v23 = vadd.f32 %v1699_v62, %v4476_v5  ;;  %v1771_v37 = vmul.f32 %v4476_v5, %v4476_v5  ;;  %v1833_v35 = vadd.f32 %v1832_v45, %v1770_v33  ;;  %v4481_v51 = vpop.f32.mrb[30].mxu1 }
 0x2c6   :  { %v4483_v49 = vpop.f32.mrb[31].mxu1  ;;  %v1774_v29 = vmul.f32 %v4481_v51, %v4481_v51 }
 0x2c7   :  { %v1834_v63 = vadd.f32 %v1833_v35, %v1771_v37  ;;  %v1701_v17 = vadd.f32 %v1700_v23, %v4483_v49  ;;  %v1772_v8 = vmul.f32 %v4483_v49, %v4483_v49 }
 0x2c9   :  { %v1702_v13 = vadd.f32 %v4473_v1, %v1701_v17  ;;  %v1835_v32 = vadd.f32 %v1834_v63, %v1772_v8 }
 0x2cb   :  { %v1836_v50 = vadd.f32 %v1835_v32, %v1773_v39  ;;  %v4493_v18 = vpop.f32.mrb[32].mxu1  ;;  %v1703_v16 = vadd.f32 %v4481_v51, %v1702_v13 }
 0x2cc   :  { %v4496_v28 = vpop.f32.mrb[33].mxu1  ;;  %v1777_v26 = vmul.f32 %v4493_v18, %v4493_v18 }
 0x2cd   :  { %v1704_v27 = vadd.f32 %v1703_v16, %v4496_v28  ;;  %v1775_v54 = vmul.f32 %v4496_v28, %v4496_v28  ;;  %v1837_v24 = vadd.f32 %v1836_v50, %v1774_v29  ;;  %v4501_v31 = vpop.f32.mrb[34].mxu1 }
 0x2ce   :  { %v4503_v34 = vpop.f32.mrb[35].mxu1  ;;  %v1778_v10 = vmul.f32 %v4501_v31, %v4501_v31 }
 0x2cf   :  { %v1838_v40 = vadd.f32 %v1837_v24, %v1775_v54  ;;  %v1705_v25 = vadd.f32 %v1704_v27, %v4503_v34  ;;  %v1776_v30 = vmul.f32 %v4503_v34, %v4503_v34 }
 0x2d1   :  { %v1706_v14 = vadd.f32 %v4493_v18, %v1705_v25  ;;  %v1839_v43 = vadd.f32 %v1838_v40, %v1776_v30 }
 0x2d3   :  { %v1840_v44 = vadd.f32 %v1839_v43, %v1777_v26  ;;  %v4513_v15 = vpop.f32.mrb[36].mxu1  ;;  %v1707_v22 = vadd.f32 %v4501_v31, %v1706_v14 }
 0x2d4   :  { %v4516_v33 = vpop.f32.mrb[37].mxu1  ;;  %v1781_v39 = vmul.f32 %v4513_v15, %v4513_v15 }
 0x2d5   :  { %v1708_v45 = vadd.f32 %v1707_v22, %v4516_v33  ;;  %v1779_v62 = vmul.f32 %v4516_v33, %v4516_v33  ;;  %v1841_v23 = vadd.f32 %v1840_v44, %v1778_v10  ;;  %v4521_v37 = vpop.f32.mrb[38].mxu1 }
 0x2d6   :  { %5509 = vst [vmem:[#allocation13_spill] sm:$0xff] %v4521_v37  ;;  %v4523_v35 = vpop.f32.mrb[39].mxu1  ;;  %v1782_v29 = vmul.f32 %v4521_v37, %v4521_v37 }
 0x2d7   :  { %v1842_v63 = vadd.f32 %v1841_v23, %v1779_v62  ;;  %v1709_v17 = vadd.f32 %v1708_v45, %v4523_v35  ;;  %v1780_v8 = vmul.f32 %v4523_v35, %v4523_v35 }
 0x2d9   :  { %v1710_v13 = vadd.f32 %v4513_v15, %v1709_v17  ;;  %v1843_v32 = vadd.f32 %v1842_v63, %v1780_v8 }
 0x2db   :  { %v1844_v50 = vadd.f32 %v1843_v32, %v1781_v39  ;;  %v4533_v16 = vpop.f32.mrb[40].mxu1  ;;  %v1711_v27 = vadd.f32 %v4521_v37, %v1710_v13 }
 0x2dc   :  { %5510 = vst [vmem:[#allocation12_spill] sm:$0xff] %v4533_v16  ;;  %v4536_v54 = vpop.f32.mrb[41].mxu1  ;;  %v1785_v44 = vmul.f32 %v4533_v16, %v4533_v16 }
 0x2dd   :  { %5511 = vst [vmem:[#allocation15_spill] sm:$0xff] %v4536_v54  ;;  %v1712_v24 = vadd.f32 %v1711_v27, %v4536_v54  ;;  %v1783_v40 = vmul.f32 %v4536_v54, %v4536_v54  ;;  %v1845_v25 = vadd.f32 %v1844_v50, %v1782_v29  ;;  %v4541_v30 = vpop.f32.mrb[42].mxu1 }
 0x2de   :  { %5512 = vst [vmem:[#allocation14_spill] sm:$0xff] %v4541_v30  ;;  %v4543_v26 = vpop.f32.mrb[43].mxu1  ;;  %v1786_v62 = vmul.f32 %v4541_v30, %v4541_v30 }
 0x2df   :  { %5513 = vst [vmem:[#allocation17_spill] sm:$0xff] %v4543_v26  ;;  %v1846_v14 = vadd.f32 %v1845_v25, %v1783_v40  ;;  %v1713_v43 = vadd.f32 %v1712_v24, %v4543_v26  ;;  %v1784_v10 = vmul.f32 %v4543_v26, %v4543_v26 }
 0x2e1   :  { %v1714_v22 = vadd.f32 %v4533_v16, %v1713_v43  ;;  %v1847_v45 = vadd.f32 %v1846_v14, %v1784_v10 }
 0x2e3   :  { %v1848_v23 = vadd.f32 %v1847_v45, %v1785_v44  ;;  %v4553_v63 = vpop.f32.mrb[44].mxu1  ;;  %v1715_v17 = vadd.f32 %v4541_v30, %v1714_v22 }
 0x2e4   :  { %5514 = vst [vmem:[#allocation16_spill] sm:$0xff] %v4553_v63  ;;  %v4556_v8 = vpop.f32.mrb[45].mxu1  ;;  %v1789_v25 = vmul.f32 %v4553_v63, %v4553_v63 }
 0x2e5   :  { %5515 = vst [vmem:[#allocation19_spill] sm:$0xff] %v4556_v8  ;;  %v1716_v39 = vadd.f32 %v1715_v17, %v4556_v8  ;;  %v1787_v13 = vmul.f32 %v4556_v8, %v4556_v8  ;;  %v1849_v32 = vadd.f32 %v1848_v23, %v1786_v62  ;;  %v4561_v29 = vpop.f32.mrb[46].mxu1 }
 0x2e6   :  { %5516 = vst [vmem:[#allocation18_spill] sm:$0xff] %v4561_v29  ;;  %v4563_v50 = vpop.f32.mrb[47].mxu1  ;;  %v1790_v10 = vmul.f32 %v4561_v29, %v4561_v29 }
 0x2e7   :  { %5517 = vst [vmem:[#allocation21_spill] sm:$0xff] %v4563_v50  ;;  %v1850_v27 = vadd.f32 %v1849_v32, %v1787_v13  ;;  %v1717_v24 = vadd.f32 %v1716_v39, %v4563_v50  ;;  %v1788_v40 = vmul.f32 %v4563_v50, %v4563_v50 }
 0x2e9   :  { %v1718_v14 = vadd.f32 %v4553_v63, %v1717_v24  ;;  %v1851_v43 = vadd.f32 %v1850_v27, %v1788_v40 }
 0x2eb   :  { %v1852_v44 = vadd.f32 %v1851_v43, %v1789_v25  ;;  %v4573_v22 = vpop.f32.mrb[48].mxu1  ;;  %v1719_v45 = vadd.f32 %v4561_v29, %v1718_v14 }
 0x2ec   :  { %5518 = vst [vmem:[#allocation20_spill] sm:$0xff] %v4573_v22  ;;  %v4576_v62 = vpop.f32.mrb[49].mxu1  ;;  %v1793_v25 = vmul.f32 %v4573_v22, %v4573_v22 }
 0x2ed   :  { %5519 = vst [vmem:[#allocation23_spill] sm:$0xff] %v4576_v62  ;;  %v1720_v23 = vadd.f32 %v1719_v45, %v4576_v62  ;;  %v1791_v17 = vmul.f32 %v4576_v62, %v4576_v62  ;;  %v1853_v39 = vadd.f32 %v1852_v44, %v1790_v10  ;;  %v4581_v13 = vpop.f32.mrb[50].mxu1 }
 0x2ee   :  { %5520 = vst [vmem:[#allocation22_spill] sm:$0xff] %v4581_v13  ;;  %v4583_v32 = vpop.f32.mrb[51].mxu1  ;;  %v1794_v45 = vmul.f32 %v4581_v13, %v4581_v13 }
 0x2ef   :  { %5521 = vst [vmem:[#allocation25_spill] sm:$0xff] %v4583_v32  ;;  %v1854_v27 = vadd.f32 %v1853_v39, %v1791_v17  ;;  %v1721_v24 = vadd.f32 %v1720_v23, %v4583_v32  ;;  %v1792_v40 = vmul.f32 %v4583_v32, %v4583_v32 }
 0x2f1   :  { %v1722_v14 = vadd.f32 %v4573_v22, %v1721_v24  ;;  %v1855_v43 = vadd.f32 %v1854_v27, %v1792_v40 }
 0x2f3   :  { %v1856_v10 = vadd.f32 %v1855_v43, %v1793_v25  ;;  %v4593_v44 = vpop.f32.mrb[52].mxu1  ;;  %v1723_v62 = vadd.f32 %v4581_v13, %v1722_v14 }
 0x2f4   :  { %5522 = vst [vmem:[#allocation24_spill] sm:$0xff] %v4593_v44  ;;  %v4596_v17 = vpop.f32.mrb[53].mxu1  ;;  %v1797_v14 = vmul.f32 %v4593_v44, %v4593_v44 }
 0x2f5   :  { %5523 = vst [vmem:[#allocation30_spill] sm:$0xff] %v4596_v17  ;;  %v1724_v23 = vadd.f32 %v1723_v62, %v4596_v17  ;;  %v1795_v39 = vmul.f32 %v4596_v17, %v4596_v17  ;;  %v1857_v32 = vadd.f32 %v1856_v10, %v1794_v45  ;;  %v4601_v29 = vpop.f32.mrb[54].mxu1 }
 0x2f6   :  { %5524 = vst [vmem:[#allocation31_spill] sm:$0xff] %v4601_v29  ;;  %v4603_v24 = vpop.f32.mrb[55].mxu1  ;;  %v1798_v17 = vmul.f32 %v4601_v29, %v4601_v29 }
 0x2f7   :  { %5525 = vst [vmem:[#allocation32_spill] sm:$0xff] %v4603_v24  ;;  %v1858_v27 = vadd.f32 %v1857_v32, %v1795_v39  ;;  %v1725_v40 = vadd.f32 %v1724_v23, %v4603_v24  ;;  %v1796_v25 = vmul.f32 %v4603_v24, %v4603_v24 }
 0x2f9   :  { %v1726_v43 = vadd.f32 %v4593_v44, %v1725_v40  ;;  %v1859_v62 = vadd.f32 %v1858_v27, %v1796_v25 }
 0x2fb   :  { %v1860_v45 = vadd.f32 %v1859_v62, %v1797_v14  ;;  %v4613_v10 = vpop.f32.mrb[56].mxu1  ;;  %v1727_v13 = vadd.f32 %v4601_v29, %v1726_v43 }
 0x2fc   :  { %5526 = vst [vmem:[#allocation33_spill] sm:$0xff] %v4613_v10  ;;  %v4616_v32 = vpop.f32.mrb[57].mxu1  ;;  %v1801_v43 = vmul.f32 %v4613_v10, %v4613_v10 }
 0x2fd   :  { %5527 = vst [vmem:[#allocation34_spill] sm:$0xff] %v4616_v32  ;;  %v1728_v23 = vadd.f32 %v1727_v13, %v4616_v32  ;;  %v1799_v39 = vmul.f32 %v4616_v32, %v4616_v32  ;;  %v1861_v24 = vadd.f32 %v1860_v45, %v1798_v17  ;;  %v4621_v22 = vpop.f32.mrb[58].mxu1 }
 0x2fe   :  { %5528 = vst [vmem:[#allocation3_spill] sm:$0xff] %v4621_v22  ;;  %v4623_v40 = vpop.f32.mrb[59].mxu1  ;;  %v1802_v32 = vmul.f32 %v4621_v22, %v4621_v22 }
 0x2ff   :  { %5529 = vst [vmem:[#allocation2_spill] sm:$0xff] %v4623_v40  ;;  %v1862_v27 = vadd.f32 %v1861_v24, %v1799_v39  ;;  %v1729_v25 = vadd.f32 %v1728_v23, %v4623_v40  ;;  %v1800_v14 = vmul.f32 %v4623_v40, %v4623_v40 }
 0x301   :  { %v1730_v62 = vadd.f32 %v4613_v10, %v1729_v25  ;;  %v1863_v13 = vadd.f32 %v1862_v27, %v1800_v14 }
 0x303   :  { %v1864_v17 = vadd.f32 %v1863_v13, %v1801_v43  ;;  %v4633_v45 = vpop.f32.mrb[60].mxu1  ;;  %v1731_v29 = vadd.f32 %v4621_v22, %v1730_v62 }
 0x304   :  { %5530 = vst [vmem:[#allocation5_spill] sm:$0xff] %v4633_v45  ;;  %v4636_v24 = vpop.f32.mrb[61].mxu1  ;;  %v1805_v62 = vmul.f32 %v4633_v45, %v4633_v45 }
 0x305   :  { %5531 = vst [vmem:[#allocation4_spill] sm:$0xff] %v4636_v24  ;;  %v1732_v23 = vadd.f32 %v1731_v29, %v4636_v24  ;;  %v1803_v39 = vmul.f32 %v4636_v24, %v4636_v24  ;;  %v1865_v40 = vadd.f32 %v1864_v17, %v1802_v32  ;;  %v4641_v44 = vpop.f32.mrb[62].mxu1 }
 0x306   :  { %v4643_v25 = vpop.f32.mrb[63].mxu1  ;;  %v1806_v24 = vmul.f32 %v4641_v44, %v4641_v44 }
 0x307   :  { %5532 = vst [vmem:[#allocation7_spill] sm:$0xff] %v4643_v25  ;;  %v1866_v27 = vadd.f32 %v1865_v40, %v1803_v39  ;;  %v1733_v14 = vadd.f32 %v1732_v23, %v4643_v25  ;;  %v1804_v43 = vmul.f32 %v4643_v25, %v4643_v25 }
 0x309   :  { %v1734_v13 = vadd.f32 %v4633_v45, %v1733_v14  ;;  %v1867_v29 = vadd.f32 %v1866_v27, %v1804_v43 }
 0x30b   :  { %v1735_v32 = vadd.f32 %v4641_v44, %v1734_v13  ;;  %v1868_v17 = vadd.f32 %v1867_v29, %v1805_v62  ;;  %v5534_v62 = vld [vmem:[#allocation13_spill] sm:$0xff]  ;;  %v5535_v29 = vld [vmem:[#allocation15_spill] sm:$0xff] }
 0x30d   :  { %v1736_v22 = vrot.slane %v1735_v32, 4  ;;  %v1869_v10 = vadd.f32 %v1868_v17, %v1806_v24  ;;  %v5537_v17 = vld [vmem:[#allocation12_spill] sm:$0xff] }
 0x30f   :  { %v1737_v40 = vadd.f32 %v1736_v22, %v1735_v32  ;;  %v1870_v39 = vrot.slane %v1869_v10, 4  ;;  %v1671_v22 = vld [vmem:[%s5362_s5] sm:$0x1]  ;;  %v5536_v32 = vld [vmem:[#allocation17_spill] sm:$0xff] }
 0x311   :  { %v1738_v23 = vrot.slane %v1737_v40, 2  ;;  %v1871_v63 = vadd.f32 %v1870_v39, %v1869_v10  ;;  %v5539_v39 = vld [vmem:[#allocation19_spill] sm:$0xff] }
 0x313   :  { %v1739_v50 = vadd.f32 %v1738_v23, %v1737_v40  ;;  %v1872_v25 = vrot.slane %v1871_v63, 2  ;;  %v5538_v40 = vld [vmem:[#allocation14_spill] sm:$0xff] }
 0x315   :  { %v1740_v8 = vrot.slane %v1739_v50, 1  ;;  %v1873_v30 = vadd.f32 %v1872_v25, %v1871_v63  ;;  %v4660_v63 = vld [vmem:[%s5363_s6] sm:$0x1] }
 0x317   :  { %v1741_v16 = vadd.f32 %v1740_v8, %v1739_v50  ;;  %v1874_v26 = vrot.slane %v1873_v30, 1 }
 0x319   :  { %v1742_v14 = vmul.f32 0.001953125, %v1741_v16  ;;  %v1875_v27 = vadd.f32 %v1874_v26, %v1873_v30  ;;  %v5533_v16 = vld [vmem:[#allocation26_spill] sm:$0xff] }
 0x31b   :  { %v1876_v43 = vmul.f32 0.001953125, %v1875_v27  ;;  %v1877_v45 = vmul.f32 %v1742_v14, %v1742_v14 }
 0x31d   :  { %v1878_v54 = vsub.f32 %v1876_v43, %v1877_v45  ;;  %v5541_v43 = vld [vmem:[#allocation16_spill] sm:$0xff] }
 0x31f   :  { %v1879_v37 = vmax.f32 %v1878_v54, 0.0 }
 0x321   :  { %v1880_v13 = vadd.f32 1e-05, %v1879_v37  ;;  %v5553_v37 = vld [vmem:[#allocation32_spill] sm:$0xff] }
 0x323   :  { %3110 = vrsqrt.f32 %v1880_v13 }
 0x32d   :  { %v3111_v24 = vpop.eup %3110 }
 0x32e   :  { %v1882_v10 = vmul.f32 %v3111_v24, %v1671_v22  ;;  %v5542_v22 = vld [vmem:[#allocation18_spill] sm:$0xff] }
 0x330   :  { %v4662_v8 = vmul.f32 %v1882_v10, %v1742_v14  ;;  %v4665_v30 = vrot.slane %v1882_v10, %v5533_v16  ;;  %v5540_v14 = vld [vmem:[#allocation21_spill] sm:$0xff]  ;;  %v5543_v10 = vld [vmem:[#allocation23_spill] sm:$0xff] }
 0x332   :  { %v4671_v54 = vmul.f32 %v4665_v30, %v4336_v19  ;;  %v4675_v26 = vmul.f32 %v4665_v30, %v4340_v4  ;;  %v4679_v50 = vmul.f32 %v4334_v0, %v4665_v30  ;;  %v4683_v45 = vmul.f32 %v4338_v59, %v4665_v30 }
 0x333   :  { %v4687_v25 = vmul.f32 %v4665_v30, %v4356_v21  ;;  %v4691_v19 = vmul.f32 %v4665_v30, %v4363_v56  ;;  %v4695_v4 = vmul.f32 %v4353_v2, %v4665_v30  ;;  %v4699_v0 = vmul.f32 %v4361_v36, %v4665_v30 }
 0x334   :  { %v4703_v59 = vmul.f32 %v4665_v30, %v4376_v52  ;;  %v4707_v21 = vmul.f32 %v4665_v30, %v4383_v7  ;;  %v4711_v56 = vmul.f32 %v4373_v61, %v4665_v30  ;;  %v4715_v2 = vmul.f32 %v4381_v60, %v4665_v30 }
 0x335   :  { %v4719_v36 = vmul.f32 %v4665_v30, %v4396_v6  ;;  %v4723_v52 = vmul.f32 %v4665_v30, %v4403_v58  ;;  %v4727_v7 = vmul.f32 %v4393_v46, %v4665_v30  ;;  %v4731_v61 = vmul.f32 %v4401_v48, %v4665_v30 }
 0x336   :  { %v4735_v60 = vmul.f32 %v4665_v30, %v4416_v12  ;;  %v4739_v6 = vmul.f32 %v4665_v30, %v4423_v47  ;;  %v4743_v58 = vmul.f32 %v4413_v41, %v4665_v30  ;;  %v4747_v46 = vmul.f32 %v4421_v20, %v4665_v30 }
 0x337   :  { %v4751_v48 = vmul.f32 %v4665_v30, %v4436_v9  ;;  %v4755_v12 = vmul.f32 %v4665_v30, %v4443_v38  ;;  %v4759_v47 = vmul.f32 %v4433_v53, %v4665_v30  ;;  %v4763_v41 = vmul.f32 %v4441_v11, %v4665_v30 }
 0x338   :  { %v4767_v20 = vmul.f32 %v4665_v30, %v4456_v42  ;;  %v4771_v9 = vmul.f32 %v4665_v30, %v4463_v57  ;;  %v4775_v38 = vmul.f32 %v4453_v55, %v4665_v30  ;;  %v4779_v53 = vmul.f32 %v4461_v3, %v4665_v30 }
 0x339   :  { %v4783_v11 = vmul.f32 %v4665_v30, %v4476_v5  ;;  %v4787_v42 = vmul.f32 %v4665_v30, %v4483_v49  ;;  %v4791_v57 = vmul.f32 %v4473_v1, %v4665_v30  ;;  %v4795_v55 = vmul.f32 %v4481_v51, %v4665_v30 }
 0x33a   :  { %v4799_v3 = vmul.f32 %v4665_v30, %v4496_v28  ;;  %v4803_v5 = vmul.f32 %v4665_v30, %v4503_v34  ;;  %v4807_v49 = vmul.f32 %v4493_v18, %v4665_v30  ;;  %v4811_v1 = vmul.f32 %v4501_v31, %v4665_v30 }
 0x33b   :  { %v4815_v51 = vmul.f32 %v4665_v30, %v4516_v33  ;;  %v4819_v28 = vmul.f32 %v4665_v30, %v4523_v35  ;;  %v4823_v34 = vmul.f32 %v4513_v15, %v4665_v30  ;;  %v4827_v18 = vmul.f32 %v5534_v62, %v4665_v30 }
 0x33c   :  { %v4831_v31 = vmul.f32 %v4665_v30, %v5535_v29  ;;  %v4835_v33 = vmul.f32 %v4665_v30, %v5536_v32  ;;  %v4839_v35 = vmul.f32 %v5537_v17, %v4665_v30  ;;  %v4843_v15 = vmul.f32 %v5538_v40, %v4665_v30  ;;  %v5545_v29 = vld [vmem:[#allocation25_spill] sm:$0xff]  ;;  %v5547_v17 = vld [vmem:[#allocation20_spill] sm:$0xff] }
 0x33d   :  { %v4847_v23 = vmul.f32 %v4665_v30, %v5539_v39  ;;  %v4851_v27 = vmul.f32 %v4665_v30, %v5540_v14  ;;  %v4855_v13 = vmul.f32 %v5541_v43, %v4665_v30  ;;  %v4859_v24 = vmul.f32 %v5542_v22, %v4665_v30  ;;  %v5549_v39 = vld [vmem:[#allocation22_spill] sm:$0xff] }
 0x33e   :  { %v4863_v62 = vmul.f32 %v4665_v30, %v5543_v10  ;;  %v4867_v32 = vmul.f32 %v4665_v30, %v5545_v29  ;;  %v4871_v40 = vmul.f32 %v5547_v17, %v4665_v30  ;;  %v4875_v14 = vmul.f32 %v5549_v39, %v4665_v30  ;;  %v5551_v43 = vld [vmem:[#allocation30_spill] sm:$0xff] }
 0x33f   :  { %v4879_v22 = vmul.f32 %v4665_v30, %v5551_v43  ;;  %v4883_v10 = vmul.f32 %v4665_v30, %v5553_v37 }
 0x340   :  { %5544 = vst [vmem:[#allocation6_spill] sm:$0xff] %v4863_v62  ;;  %5546 = vst [vmem:[#allocation9_spill] sm:$0xff] %v4867_v32  ;;  %v5555_v62 = vld [vmem:[#allocation24_spill] sm:$0xff]  ;;  %v5557_v32 = vld [vmem:[#allocation31_spill] sm:$0xff] }
 0x341   :  { %5548 = vst [vmem:[#allocation8_spill] sm:$0xff] %v4871_v40  ;;  %5550 = vst [vmem:[#allocation11_spill] sm:$0xff] %v4875_v14  ;;  %v4887_v29 = vmul.f32 %v5555_v62, %v4665_v30  ;;  %v4891_v17 = vmul.f32 %v5557_v32, %v4665_v30  ;;  %v5559_v40 = vld [vmem:[#allocation34_spill] sm:$0xff] }
 0x342   :  { %5552 = vst [vmem:[#allocation10_spill] sm:$0xff] %v4879_v22  ;;  %5554 = vst [vmem:[#allocation27_spill] sm:$0xff] %v4883_v10  ;;  %v4895_v39 = vmul.f32 %v4665_v30, %v5559_v40  ;;  %v5561_v14 = vld [vmem:[#allocation2_spill] sm:$0xff]  ;;  %v5562_v22 = vld [vmem:[#allocation33_spill] sm:$0xff] }
 0x343   :  { %5556 = vst [vmem:[#allocation29_spill] sm:$0xff] %v4887_v29  ;;  %5558 = vst [vmem:[#allocation28_spill] sm:$0xff] %v4891_v17  ;;  %v4899_v43 = vmul.f32 %v4665_v30, %v5561_v14  ;;  %v4903_v37 = vmul.f32 %v5562_v22, %v4665_v30  ;;  %v5563_v10 = vld [vmem:[#allocation3_spill] sm:$0xff]  ;;  %v5565_v29 = vld [vmem:[#allocation4_spill] sm:$0xff]  ;;  %v4923_v22 = vmul.f32 %v4641_v44, %v4665_v30 }
 0x344   :  { %5560 = vst [vmem:[#allocation35_spill] sm:$0xff] %v4895_v39  ;;  %v4907_v62 = vmul.f32 %v5563_v10, %v4665_v30  ;;  %v4911_v32 = vmul.f32 %v4665_v30, %v5565_v29  ;;  %v5566_v17 = vld [vmem:[#allocation7_spill] sm:$0xff]  ;;  %v5567_v39 = vld [vmem:[#allocation5_spill] sm:$0xff]  ;;  %v5568_v10 = vsub.f32 %v4660_v63, %v4662_v8 }
 0x345   :  { %v4915_v40 = vmul.f32 %v4665_v30, %v5566_v17  ;;  %v4919_v14 = vmul.f32 %v5567_v39, %v4665_v30 }
 0x346   :  { %5564 = vst [vmem:[#allocation26_spill] sm:$0xff] %v4907_v62  ;;  %v4929_v62 = vrot.slane %v5568_v10, %v5533_v16 }
 0x348   :  { %v4933_v29 = vadd.f32 %v4929_v62, %v4671_v54  ;;  %v4937_v17 = vadd.f32 %v4929_v62, %v4675_v26  ;;  %v4941_v39 = vadd.f32 %v4929_v62, %v4679_v50  ;;  %v4945_v44 = vadd.f32 %v4929_v62, %v4683_v45  ;;  %v5582_v10 = vld [vmem:[#allocation11_spill] sm:$0xff] }
 0x349   :  { %v4949_v63 = vadd.f32 %v4929_v62, %v4687_v25  ;;  %v4953_v8 = vadd.f32 %v4929_v62, %v4691_v19  ;;  %v4957_v16 = vadd.f32 %v4929_v62, %v4695_v4  ;;  %v4961_v30 = vadd.f32 %v4929_v62, %v4699_v0 }
 0x34a   :  { %5569 = vst [vmem:[#allocation13_spill] sm:$0xff] %v4933_v29  ;;  %5570 = vst [vmem:[#allocation15_spill] sm:$0xff] %v4937_v17  ;;  %v4965_v54 = vadd.f32 %v4929_v62, %v4703_v59  ;;  %v4969_v26 = vadd.f32 %v4929_v62, %v4707_v21  ;;  %v4973_v50 = vadd.f32 %v4929_v62, %v4711_v56 }
 0x34b   :  { %5571 = vst [vmem:[#allocation17_spill] sm:$0xff] %v4941_v39  ;;  %5572 = vst [vmem:[#allocation12_spill] sm:$0xff] %v4945_v44  ;;  %v4977_v45 = vadd.f32 %v4929_v62, %v4715_v2  ;;  %v4981_v25 = vadd.f32 %v4929_v62, %v4719_v36  ;;  %v4985_v19 = vadd.f32 %v4929_v62, %v4723_v52 }
 0x34c   :  { %5573 = vst [vmem:[#allocation14_spill] sm:$0xff] %v4949_v63  ;;  %v4989_v4 = vadd.f32 %v4929_v62, %v4727_v7  ;;  %v4993_v0 = vadd.f32 %v4929_v62, %v4731_v61  ;;  %v4997_v59 = vadd.f32 %v4929_v62, %v4735_v60  ;;  %v5001_v21 = vadd.f32 %v4929_v62, %v4739_v6 }
 0x34d   :  { %v5005_v56 = vadd.f32 %v4929_v62, %v4743_v58  ;;  %v5009_v2 = vadd.f32 %v4929_v62, %v4747_v46  ;;  %v5013_v36 = vadd.f32 %v4929_v62, %v4751_v48  ;;  %v5017_v52 = vadd.f32 %v4929_v62, %v4755_v12 }
 0x34e   :  { %v5021_v7 = vadd.f32 %v4929_v62, %v4759_v47  ;;  %v5025_v61 = vadd.f32 %v4929_v62, %v4763_v41  ;;  %v5029_v60 = vadd.f32 %v4929_v62, %v4767_v20  ;;  %v5033_v6 = vadd.f32 %v4929_v62, %v4771_v9 }
 0x34f   :  { %v5037_v58 = vadd.f32 %v4929_v62, %v4775_v38  ;;  %v5041_v46 = vadd.f32 %v4929_v62, %v4779_v53  ;;  %v5045_v48 = vadd.f32 %v4929_v62, %v4783_v11  ;;  %v5049_v12 = vadd.f32 %v4929_v62, %v4787_v42 }
 0x350   :  { %v5053_v47 = vadd.f32 %v4929_v62, %v4791_v57  ;;  %v5057_v41 = vadd.f32 %v4929_v62, %v4795_v55  ;;  %v5061_v20 = vadd.f32 %v4929_v62, %v4799_v3  ;;  %v5065_v9 = vadd.f32 %v4929_v62, %v4803_v5 }
 0x351   :  { %v5069_v38 = vadd.f32 %v4929_v62, %v4807_v49  ;;  %v5073_v53 = vadd.f32 %v4929_v62, %v4811_v1  ;;  %v5077_v11 = vadd.f32 %v4929_v62, %v4815_v51  ;;  %v5081_v42 = vadd.f32 %v4929_v62, %v4819_v28 }
 0x352   :  { %v5085_v57 = vadd.f32 %v4929_v62, %v4823_v34  ;;  %v5089_v55 = vadd.f32 %v4929_v62, %v4827_v18  ;;  %v5093_v3 = vadd.f32 %v4929_v62, %v4831_v31  ;;  %v5097_v5 = vadd.f32 %v4929_v62, %v4835_v33  ;;  %v5576_v31 = vld [vmem:[#allocation6_spill] sm:$0xff] }
 0x353   :  { %v5101_v49 = vadd.f32 %v4929_v62, %v4839_v35  ;;  %v5105_v1 = vadd.f32 %v4929_v62, %v4843_v15  ;;  %v5109_v51 = vadd.f32 %v4929_v62, %v4847_v23  ;;  %v5113_v28 = vadd.f32 %v4929_v62, %v4851_v27  ;;  %v5578_v35 = vld [vmem:[#allocation9_spill] sm:$0xff]  ;;  %v5580_v23 = vld [vmem:[#allocation8_spill] sm:$0xff] }
 0x354   :  { %v5117_v34 = vadd.f32 %v4929_v62, %v4855_v13  ;;  %v5121_v18 = vadd.f32 %v4929_v62, %v4859_v24  ;;  %v5125_v33 = vadd.f32 %v4929_v62, %v5576_v31  ;;  %v5129_v15 = vadd.f32 %v4929_v62, %v5578_v35 }
 0x355   :  { %v5133_v27 = vadd.f32 %v4929_v62, %v5580_v23  ;;  %v5137_v13 = vadd.f32 %v4929_v62, %v5582_v10 }
 0x356   :  { %5574 = vst [vmem:[#allocation19_spill] sm:$0xff] %v5117_v34  ;;  %5575 = vst [vmem:[#allocation21_spill] sm:$0xff] %v5121_v18  ;;  %v5583_v34 = vld [vmem:[#allocation10_spill] sm:$0xff]  ;;  %v5584_v18 = vld [vmem:[#allocation27_spill] sm:$0xff] }
 0x357   :  { %5577 = vst [vmem:[#allocation16_spill] sm:$0xff] %v5125_v33  ;;  %5579 = vst [vmem:[#allocation18_spill] sm:$0xff] %v5129_v15  ;;  %v5141_v24 = vadd.f32 %v4929_v62, %v5583_v34  ;;  %v5145_v31 = vadd.f32 %v4929_v62, %v5584_v18  ;;  %v5586_v33 = vld [vmem:[#allocation29_spill] sm:$0xff]  ;;  %v5587_v15 = vld [vmem:[#allocation28_spill] sm:$0xff]  ;;  %v5161_v34 = vadd.f32 %v4929_v62, %v4899_v43 }
 0x358   :  { %5581 = vst [vmem:[#allocation23_spill] sm:$0xff] %v5133_v27  ;;  %v5149_v35 = vadd.f32 %v4929_v62, %v5586_v33  ;;  %v5153_v23 = vadd.f32 %v4929_v62, %v5587_v15  ;;  %v5588_v27 = vld [vmem:[#allocation35_spill] sm:$0xff]  ;;  %v5165_v18 = vadd.f32 %v4929_v62, %v4903_v37  ;;  %v5173_v15 = vadd.f32 %v4929_v62, %v4911_v32 }
 0x359   :  { %5585 = vst [vmem:[#allocation25_spill] sm:$0xff] %v5145_v31  ;;  %v5157_v10 = vadd.f32 %v4929_v62, %v5588_v27  ;;  %v5590_v31 = vld [vmem:[#allocation26_spill] sm:$0xff]  ;;  %v5177_v27 = vadd.f32 %v4929_v62, %v4915_v40  ;;  %v5181_v43 = vadd.f32 %v4929_v62, %v4919_v14  ;;  %v5185_v37 = vadd.f32 %v4929_v62, %v4923_v22 }
 0x35a   :  { %5589 = vst [vmem:[#allocation20_spill] sm:$0xff] %v5165_v18  ;;  %v5169_v33 = vadd.f32 %v4929_v62, %v5590_v31  ;;  %5592 = vst [vmem:[#allocation30_spill] sm:$0xff] %v5173_v15  ;;  %v2030_v40 = vmax.f32 %v4953_v8, 0.0  ;;  %v2032_v14 = vmax.f32 %v4961_v30, 0.0  ;;  %v2034_v62 = vmax.f32 %v4969_v26, 0.0 }
 0x35b   :  { %5593 = vst [vmem:[#allocation32_spill] sm:$0xff] %v5177_v27  ;;  %5594 = vst [vmem:[#allocation24_spill] sm:$0xff] %v5181_v43  ;;  %v2031_v27 = vmax.f32 %v4957_v16, 0.0  ;;  %v2033_v43 = vmax.f32 %v4965_v54, 0.0  ;;  %v2035_v22 = vmax.f32 %v4973_v50, 0.0  ;;  %v2036_v31 = vmax.f32 %v4977_v45, 0.0 }
 0x35c   :  { %5591 = vst [vmem:[#allocation22_spill] sm:$0xff] %v5169_v33  ;;  %5595 = vst [vmem:[#allocation31_spill] sm:$0xff] %v5185_v37  ;;  %v2037_v33 = vmax.f32 %v4981_v25, 0.0  ;;  %v2038_v32 = vmax.f32 %v4985_v19, 0.0  ;;  %v2039_v15 = vmax.f32 %v4989_v4, 0.0  ;;  %v2040_v8 = vmax.f32 %v4993_v0, 0.0 }
 0x35d   :  { %v2041_v16 = vmax.f32 %v4997_v59, 0.0  ;;  %v2042_v30 = vmax.f32 %v5001_v21, 0.0  ;;  %v2043_v54 = vmax.f32 %v5005_v56, 0.0  ;;  %v2044_v26 = vmax.f32 %v5009_v2, 0.0  ;;  %v5596_v18 = vld [vmem:[#allocation19_spill] sm:$0xff]  ;;  %v5597_v63 = vld [vmem:[#allocation21_spill] sm:$0xff] }
 0x35e   :  { %v2045_v50 = vmax.f32 %v5013_v36, 0.0  ;;  %v2046_v45 = vmax.f32 %v5017_v52, 0.0  ;;  %v2047_v25 = vmax.f32 %v5021_v7, 0.0  ;;  %v2048_v19 = vmax.f32 %v5025_v61, 0.0  ;;  %v5598_v44 = vld [vmem:[#allocation16_spill] sm:$0xff]  ;;  %v5599_v39 = vld [vmem:[#allocation18_spill] sm:$0xff] }
 0x35f   :  { %v2049_v4 = vmax.f32 %v5029_v60, 0.0  ;;  %v2050_v0 = vmax.f32 %v5033_v6, 0.0  ;;  %v2051_v59 = vmax.f32 %v5037_v58, 0.0  ;;  %v2052_v21 = vmax.f32 %v5041_v46, 0.0  ;;  %v5600_v17 = vld [vmem:[#allocation23_spill] sm:$0xff] }
 0x360   :  { %v2053_v56 = vmax.f32 %v5045_v48, 0.0  ;;  %v2054_v2 = vmax.f32 %v5049_v12, 0.0  ;;  %v2055_v36 = vmax.f32 %v5053_v47, 0.0  ;;  %v2056_v52 = vmax.f32 %v5057_v41, 0.0  ;;  %v5601_v29 = vld [vmem:[#allocation25_spill] sm:$0xff] }
 0x361   :  { %v2057_v7 = vmax.f32 %v5061_v20, 0.0  ;;  %v2058_v61 = vmax.f32 %v5065_v9, 0.0  ;;  %v2059_v60 = vmax.f32 %v5069_v38, 0.0  ;;  %v2060_v6 = vmax.f32 %v5073_v53, 0.0  ;;  %v5602_v37 = vld [vmem:[#allocation20_spill] sm:$0xff] }
 0x362   :  { %v2061_v58 = vmax.f32 %v5077_v11, 0.0  ;;  %v2062_v46 = vmax.f32 %v5081_v42, 0.0  ;;  %v2063_v48 = vmax.f32 %v5085_v57, 0.0  ;;  %v2064_v12 = vmax.f32 %v5089_v55, 0.0 }
 0x363   :  { %v2065_v47 = vmax.f32 %v5093_v3, 0.0  ;;  %v2066_v41 = vmax.f32 %v5097_v5, 0.0  ;;  %v2067_v20 = vmax.f32 %v5101_v49, 0.0  ;;  %v2068_v9 = vmax.f32 %v5105_v1, 0.0 }
 0x364   :  { %v2069_v38 = vmax.f32 %v5109_v51, 0.0  ;;  %v2070_v53 = vmax.f32 %v5113_v28, 0.0  ;;  %v2071_v11 = vmax.f32 %v5596_v18, 0.0  ;;  %v2072_v42 = vmax.f32 %v5597_v63, 0.0 }
 0x365   :  { %v2073_v57 = vmax.f32 %v5598_v44, 0.0  ;;  %v2074_v55 = vmax.f32 %v5599_v39, 0.0  ;;  %v2075_v3 = vmax.f32 %v5600_v17, 0.0  ;;  %v2076_v5 = vmax.f32 %v5137_v13, 0.0  ;;  %v5603_v39 = vld [vmem:[#allocation22_spill] sm:$0xff] }
 0x366   :  { %v2077_v49 = vmax.f32 %v5141_v24, 0.0  ;;  %v2078_v1 = vmax.f32 %v5601_v29, 0.0  ;;  %v2079_v51 = vmax.f32 %v5149_v35, 0.0  ;;  %v2080_v28 = vmax.f32 %v5153_v23, 0.0  ;;  %v5604_v13 = vld [vmem:[#allocation30_spill] sm:$0xff]  ;;  %v5605_v29 = vld [vmem:[#allocation32_spill] sm:$0xff] }
 0x367   :  { %v2081_v18 = vmax.f32 %v5157_v10, 0.0  ;;  %v2082_v63 = vmax.f32 %v5161_v34, 0.0  ;;  %v2083_v44 = vmax.f32 %v5602_v37, 0.0  ;;  %v2084_v17 = vmax.f32 %v5603_v39, 0.0  ;;  %v5606_v23 = vld [vmem:[#allocation24_spill] sm:$0xff]  ;;  %v5607_v34 = vld [vmem:[#allocation31_spill] sm:$0xff] }
 0x368   :  { %v2085_v24 = vmax.f32 %v5604_v13, 0.0  ;;  %v2086_v35 = vmax.f32 %v5605_v29, 0.0  ;;  %v2087_v10 = vmax.f32 %v5606_v23, 0.0  ;;  %v2088_v37 = vmax.f32 %v5607_v34, 0.0  ;;  %v5608_v39 = vld [vmem:[#allocation13_spill] sm:$0xff]  ;;  %v5610_v29 = vld [vmem:[#allocation15_spill] sm:$0xff] }
 0x369   :  { %v5609_v13 = vmax.f32 %v5608_v39, 0.0  ;;  %v5611_v23 = vmax.f32 %v5610_v29, 0.0  ;;  %v5612_v39 = vld [vmem:[#allocation17_spill] sm:$0xff] }
 0x36a   :  { %v5613_v29 = vmax.f32 %v5612_v39, 0.0 }
 0x36b   :  { %v2645_v34 = vpack.c.bf16 %v5611_v23, %v5609_v13  ;;  %v5614_v13 = vld [vmem:[#allocation12_spill] sm:$0xff] }
 0x36c   :  { %v5615_v23 = vmax.f32 %v5614_v13, 0.0  ;;  %v5616_v13 = vld [vmem:[#allocation14_spill] sm:$0xff] }
 0x36d   :  { %2646 = vst [vmem:[%s5364_s7] sm:$0xff] %v2645_v34  }
 0x36e   :  { %v2650_v39 = vpack.c.bf16 %v5615_v23, %v5613_v29  ;;  %v5617_v23 = vmax.f32 %v5616_v13, 0.0  ;;  %v2660_v13 = vpack.c.bf16 %v2032_v14, %v2031_v27  ;;  %v2675_v14 = vpack.c.bf16 %v2038_v32, %v2037_v33 }
 0x36f   :  { %v2680_v27 = vpack.c.bf16 %v2040_v8, %v2039_v15  ;;  %v2695_v33 = vpack.c.bf16 %v2046_v45, %v2045_v50  ;;  %v2700_v15 = vpack.c.bf16 %v2048_v19, %v2047_v25  ;;  %v2705_v32 = vpack.c.bf16 %v2050_v0, %v2049_v4 }
 0x370   :  { %v2655_v29 = vpack.c.bf16 %v2030_v40, %v5617_v23  ;;  %v2665_v23 = vpack.c.bf16 %v2034_v62, %v2033_v43  ;;  %v2670_v40 = vpack.c.bf16 %v2036_v31, %v2035_v22  ;;  %2802 = vst [vmem:[%s5364_s7 + $0x8] sm:$0xff] %v2650_v39   ;;  %2804 = vst [vmem:[%s5364_s7 + $0x18] sm:$0xff] %v2660_v13  }
 0x371   :  { %v2685_v43 = vpack.c.bf16 %v2042_v30, %v2041_v16  ;;  %v2690_v31 = vpack.c.bf16 %v2044_v26, %v2043_v54  ;;  %2807 = vst [vmem:[%s5364_s7 + $0x30] sm:$0xff] %v2675_v14   ;;  %2808 = vst [vmem:[%s5364_s7 + $0x38] sm:$0xff] %v2680_v27   ;;  %v2710_v62 = vpack.c.bf16 %v2052_v21, %v2051_v59 }
 0x372   :  { %2803 = vst [vmem:[%s5364_s7 + $0x10] sm:$0xff] %v2655_v29   ;;  %2805 = vst [vmem:[%s5364_s7 + $0x20] sm:$0xff] %v2665_v23   ;;  %v2715_v22 = vpack.c.bf16 %v2054_v2, %v2053_v56  ;;  %v2720_v8 = vpack.c.bf16 %v2056_v52, %v2055_v36  ;;  %v2725_v16 = vpack.c.bf16 %v2058_v61, %v2057_v7 }
 0x373   :  { %2806 = vst [vmem:[%s5364_s7 + $0x28] sm:$0xff] %v2670_v40   ;;  %2809 = vst [vmem:[%s5364_s7 + $0x40] sm:$0xff] %v2685_v43   ;;  %v2730_v30 = vpack.c.bf16 %v2060_v6, %v2059_v60  ;;  %v2735_v54 = vpack.c.bf16 %v2062_v46, %v2061_v58  ;;  %v2740_v26 = vpack.c.bf16 %v2064_v12, %v2063_v48 }
 0x374   :  { %2810 = vst [vmem:[%s5364_s7 + $0x48] sm:$0xff] %v2690_v31   ;;  %2811 = vst [vmem:[%s5364_s7 + $0x50] sm:$0xff] %v2695_v33   ;;  %v2745_v50 = vpack.c.bf16 %v2066_v41, %v2065_v47  ;;  %v2750_v45 = vpack.c.bf16 %v2068_v9, %v2067_v20  ;;  %v2755_v25 = vpack.c.bf16 %v2070_v53, %v2069_v38 }
 0x375   :  { %2812 = vst [vmem:[%s5364_s7 + $0x58] sm:$0xff] %v2700_v15   ;;  %2813 = vst [vmem:[%s5364_s7 + $0x60] sm:$0xff] %v2705_v32   ;;  %v2760_v19 = vpack.c.bf16 %v2072_v42, %v2071_v11  ;;  %v2765_v4 = vpack.c.bf16 %v2074_v55, %v2073_v57  ;;  %v2770_v0 = vpack.c.bf16 %v2076_v5, %v2075_v3 }
 0x376   :  { %2814 = vst [vmem:[%s5364_s7 + $0x68] sm:$0xff] %v2710_v62   ;;  %2815 = vst [vmem:[%s5364_s7 + $0x70] sm:$0xff] %v2715_v22   ;;  %v2775_v59 = vpack.c.bf16 %v2078_v1, %v2077_v49  ;;  %v2780_v21 = vpack.c.bf16 %v2080_v28, %v2079_v51  ;;  %v2785_v56 = vpack.c.bf16 %v2082_v63, %v2081_v18 }
 0x377   :  { %2816 = vst [vmem:[%s5364_s7 + $0x78] sm:$0xff] %v2720_v8   ;;  %2817 = vst [vmem:[%s5364_s7 + $0x80] sm:$0xff] %v2725_v16   ;;  %v2790_v2 = vpack.c.bf16 %v2084_v17, %v2083_v44  ;;  %v2795_v36 = vpack.c.bf16 %v2086_v35, %v2085_v24  ;;  %v2800_v52 = vpack.c.bf16 %v2088_v37, %v2087_v10 }
 0x378   :  { %2818 = vst [vmem:[%s5364_s7 + $0x88] sm:$0xff] %v2730_v30   ;;  %2819 = vst [vmem:[%s5364_s7 + $0x90] sm:$0xff] %v2735_v54  }
 0x379   :  { %2820 = vst [vmem:[%s5364_s7 + $0x98] sm:$0xff] %v2740_v26   ;;  %2821 = vst [vmem:[%s5364_s7 + $0xa0] sm:$0xff] %v2745_v50  }
 0x37a   :  { %2822 = vst [vmem:[%s5364_s7 + $0xa8] sm:$0xff] %v2750_v45   ;;  %2823 = vst [vmem:[%s5364_s7 + $0xb0] sm:$0xff] %v2755_v25  }
 0x37b   :  { %2824 = vst [vmem:[%s5364_s7 + $0xb8] sm:$0xff] %v2760_v19   ;;  %2825 = vst [vmem:[%s5364_s7 + $0xc0] sm:$0xff] %v2765_v4  }
 0x37c   :  { %2826 = vst [vmem:[%s5364_s7 + $0xc8] sm:$0xff] %v2770_v0   ;;  %2827 = vst [vmem:[%s5364_s7 + $0xd0] sm:$0xff] %v2775_v59  }
 0x37d   :  { %2828 = vst [vmem:[%s5364_s7 + $0xd8] sm:$0xff] %v2780_v21   ;;  %2829 = vst [vmem:[%s5364_s7 + $0xe0] sm:$0xff] %v2785_v56  }
 0x37e   :  { %2830 = vst [vmem:[%s5364_s7 + $0xe8] sm:$0xff] %v2790_v2   ;;  %2831 = vst [vmem:[%s5364_s7 + $0xf0] sm:$0xff] %v2795_v36  }
 0x37f   :  { %2832 = vst [vmem:[%s5364_s7 + $0xf8] sm:$0xff] %v2800_v52  }

// kernel: tnet_forward.4
= control target key start
LH: loop header
LB: loop body
LE: loop exit
PB: predicated region body
PF: predicated region fallthrough
CT: control target
= control target key end

     0   :  { %9 = vsyncpa [#allocation3], 0  ;;  %s7873_s0 = inlined_call_operand.vmem [shape: bf16[512,128], index: 0, kind: input, shape index: {}]   ;;  %s7874_s1 = inlined_call_operand.hbm [shape: bf16[128,1024], index: 1, kind: input, shape index: {}]   ;;  %s7875_s2 = inlined_call_operand.vmem [shape: f32[1,1024], index: 2, kind: input, shape index: {}]   ;;  %s7876_s3 = inlined_call_operand.vmem [shape: f32[1,1024], index: 3, kind: input, shape index: {}]   ;;  %s7877_s4 = inlined_call_operand.vmem [shape: f32[2,1024], index: 4, kind: output, shape index: {}]  }
   0x1   :  { %11 = vsyncpa [#allocation3 + $0x1], 0  ;;  %s3875_s15 = smov 0   ;;  %s3877_s16 = smov 0  }
   0x2   :  { %s3879_s17 = smov 0   ;;  %s3881_s18 = smov 0  }
   0x3 LB: > { %s3564_s19 = sadd.s32 4294967295, %s3841_s18   ;;  %s3895_s20 = sadd.s32 1, %s3841_s18   ;;  %s3841_s18 = sphi %s3881_s18, %s9413_s18   ;;  %s3837_s17 = sphi %s3879_s17, %s9412_s17   ;;  %s3833_s16 = sphi %s3877_s16, %s9411_s16   ;;  %s3829_s15 = sphi %s3875_s15, %s9410_s15  }
   0x4   : > { %s42_s21 = ssub.s32 %s3841_s18, %s3895_s20  ;;  %s45_s22 = sadd.s32 1, %s3837_s17 }
   0x5   : > { %p43_p0 = scmp.eq.s32.totalorder %s42_s21, 0  ;;  %p52_p1 = scmp.ne.s32.totalorder %s3837_s17, %s3833_s16 }
   0x6   : > { %p53_p2 = scmp.eq.s32.totalorder %s3841_s18, 0  ;;  %p58_p3 = scmp.ne.s32.totalorder %s3833_s16, %s3829_s15 }
   0x7   : > { %s3905_s23 = scalar_select %p43_p0, %s3837_s17, %s45_s22  }
   0x8   : > { %p54_p4 = por %p53_p2, %p52_p1  ;;  %p59_p5 = scmp.eq.s32.totalorder %s3564_s19, 0 }
   0x9   : > { %p3650_p6 = scmp.lt.s32.totalorder %s3841_s18, 2  ;;  %s163_s25 = sand.u32 1, %s3837_s17  }
   0xa   : > { %p3910_p7 = por %p59_p5, %p58_p3  ;;  %s3568_s26 = sshll.u32 %s163_s25, 8 }
   0xb   : > { %s3643_s27 = sshll.u32 %s3841_s18, 8  ;;  %s167_s5 = scalar_lea.vmem [#allocation2], %s3568_s26 }
   0xc   : > { %s3919_s30 = scalar_lea.hbm %s7874_s1, %s3643_s27  ;;  %s174_s6 = sshll.u32 %s167_s5, 4  ;;  %s3921_s6 = int_to_ptr.vmem [resolvable:$true] %s174_s6 }
   0xd   : > { %p3923_p8 = pnand %p3650_p6, %p54_p4  ;;  %s3927_s8 = scalar_lea.sflag [#allocation3], %s163_s25 }
   0xe   : > { %s3777_s9 = scalar_lea.hbm %s3919_s30, 4096  ;;  %s3782_s12 = scalar_lea.hbm %s7874_s1, 8192 }
   0xf   : > { %p3778_p9 = scmp.ne.s32.totalorder %s3919_s30, %s3777_s9  ;;  %p3779_p10 = pneg %p3923_p8 }
  0x10   : > { %p3783_p13 = scmp.lt.u32.totalorder %s3919_s30, %s7874_s1  ;;  %p3784_p0 = scmp.lt.u32.totalorder %s3782_s12, %s3777_s9 }
  0x11   : > { %p3780_p11 = pnand %p3779_p10, %p3778_p9  ;;  %p3786_p2 = scmp.lt.u32.totalorder %s3777_s9, %s3919_s30 }
  0x12   : > { %p3785_p1 = por %p3784_p0, %p3783_p13 }
  0x13   : > { %p3781_p12 = pneg %p3780_p11 }
  0x14   : > { %p3787_p3 = por %p3786_p2, %p3785_p1 }
  0x16   : > { %p3788_p4 = pnand %p3787_p3, %p3781_p12 }
  0x18   : > { %3791 = shalt.err (!%p3788_p4)
}
  0x19   : > { %s3792_s15 = scalar_lea.vmem %s3921_s6, 4096  ;;  %s3843_s21 = smov [#allocation2]  }
  0x1a   : > { %p3793_p5 = scmp.ne.s32.totalorder %s3921_s6, %s3792_s15  ;;  %s3797_s22 = sshll.u32 %s3843_s21, 4  ;;  %s3798_s22 = int_to_ptr.vmem [resolvable:$false] %s3797_s22 }
  0x1b   : > { %s3799_s25 = scalar_lea.vmem %s3798_s22, 8192  ;;  %p3800_p11 = scmp.lt.s32.totalorder %s3921_s6, %s3798_s22 }
  0x1c   : > { %p3795_p6 = pnand %p3793_p5, %p3779_p10  ;;  %p3801_p13 = scmp.lt.s32.totalorder %s3799_s25, %s3792_s15 }
  0x1e   : > { %p3796_p9 = pneg %p3795_p6  ;;  %p3802_p0 = por %p3801_p13, %p3800_p11 }
  0x20   : > { %p3803_p1 = pnand %p3802_p0, %p3796_p9 }
  0x22   : > { %3806 = shalt.err (!%p3803_p1)
}
  0x23   : > { %s3844_s26 = smov 512   ;;  %s3845_s27 = smov 256  }
  0x24   : > { %s3846_s28 = smov 16   ;;  %p3571_p10 = scmp.ge.s32.totalorder %s3841_s18, 1 }
  0x25   : > { %3649 = dma.hbm_to_vmem [thread:$0]  (!%p3923_p8), %s3919_s30, 4096, %s3921_s6, %s3927_s8, %s3844_s26, %s3845_s27, %s3846_s28  }
  0x26   : > { %p198_p12 = scmp.lt.s32.totalorder %s3841_s18, 3 }
  0x28   : > { %p199_p2 = pnand %p3571_p10, %p198_p12 }
  0x2a   : > { %202 = sbr.rel (%p199_p2) target bundleno = 992 (0x3e0), region = 36 }
  0x31   : > { %s204_s29 = sand.u32 1, %s3833_s16  }
  0x32   : > { %s3572_s5 = sshll.u32 %s204_s29, 8  ;;  %s205_s9 = scalar_lea.sflag [#allocation3], %s204_s29 }
  0x33   : > { %s3958_s10 = scalar_lea.vmem [#allocation2], %s3572_s5 }
  0x34   : > { %3824 = dma.done.wait (%p3910_p7), %s205_s9, 4096  }
  0x35   : > { %3826 = vsyncadd (%p3910_p7), %s205_s9, 4294963200  ;;  %v3847_v0 = vmov 0   ;;  %v3689_v1 = vld [vmem:[%s3958_s10 + $0x4] ss:$16 sps:$4 sm:$0xff]   ;;  %v3691_v2 = vld [vmem:[%s3958_s10 + $0xc] ss:$16 sps:$4 sm:$0xff]  }
  0x36   : > { %739 = vmatprep.mubr.bf16.mxu0 %v3847_v0  ;;  %1092 = vmatprep.mubr.bf16.mxu1 %v3847_v0  ;;  %v3693_v3 = vld [vmem:[%s3958_s10] ss:$16 sps:$4 sm:$0xff]   ;;  %v3694_v4 = vld [vmem:[%s3958_s10 + $0x8] ss:$16 sps:$4 sm:$0xff]   ;;  %v3695_v5 = vld [vmem:[%s3958_s10 + $0x24] ss:$16 sps:$4 sm:$0xff]  }
  0x37   : > { %707 = vmatprep.subr.bf16.mxu0 %v3689_v1  ;;  %1060 = vmatprep.subr.bf16.mxu1 %v3691_v2  ;;  %v3697_v6 = vld [vmem:[%s3958_s10 + $0x2c] ss:$16 sps:$4 sm:$0xff]   ;;  %v3699_v7 = vld [vmem:[%s3958_s10 + $0x20] ss:$16 sps:$4 sm:$0xff]   ;;  %v3700_v8 = vld [vmem:[%s3958_s10 + $0x28] ss:$16 sps:$4 sm:$0xff]  }
  0x38   : > { %708 = vmatpush1.bf16.msra.mxu0 %v3693_v3  ;;  %1061 = vmatpush1.bf16.msra.mxu1 %v3694_v4  ;;  %v3701_v9 = vld [vmem:[%s3958_s10 + $0x44] ss:$16 sps:$4 sm:$0xff]   ;;  %v3703_v10 = vld [vmem:[%s3958_s10 + $0x4c] ss:$16 sps:$4 sm:$0xff]   ;;  %v3705_v11 = vld [vmem:[%s3958_s10 + $0x40] ss:$16 sps:$4 sm:$0xff]  }
  0x39   : > { %709 = vmatprep.subr.bf16.mxu0 %v3695_v5  ;;  %1062 = vmatprep.subr.bf16.mxu1 %v3697_v6  ;;  %v3706_v12 = vld [vmem:[%s3958_s10 + $0x48] ss:$16 sps:$4 sm:$0xff]   ;;  %v3707_v13 = vld [vmem:[%s3958_s10 + $0x64] ss:$16 sps:$4 sm:$0xff]   ;;  %v3709_v14 = vld [vmem:[%s3958_s10 + $0x6c] ss:$16 sps:$4 sm:$0xff]  }
  0x3a   : > { %v3711_v15 = vld [vmem:[%s3958_s10 + $0x60] ss:$16 sps:$4 sm:$0xff]   ;;  %v3712_v16 = vld [vmem:[%s3958_s10 + $0x68] ss:$16 sps:$4 sm:$0xff]   ;;  %v3713_v17 = vld [vmem:[%s3958_s10 + $0x84] ss:$16 sps:$4 sm:$0xff]  }
  0x3b   : > { %v3715_v18 = vld [vmem:[%s3958_s10 + $0x8c] ss:$16 sps:$4 sm:$0xff]   ;;  %v3717_v19 = vld [vmem:[%s3958_s10 + $0x80] ss:$16 sps:$4 sm:$0xff]   ;;  %v3718_v20 = vld [vmem:[%s3958_s10 + $0x88] ss:$16 sps:$4 sm:$0xff]  }
  0x3c   : > { %710 = vmatpush1.bf16.msra.mxu0 %v3699_v7  ;;  %1063 = vmatpush1.bf16.msra.mxu1 %v3700_v8  ;;  %v3719_v21 = vld [vmem:[%s3958_s10 + $0xa4] ss:$16 sps:$4 sm:$0xff]   ;;  %v3721_v22 = vld [vmem:[%s3958_s10 + $0xac] ss:$16 sps:$4 sm:$0xff]   ;;  %v3723_v23 = vld [vmem:[%s3958_s10 + $0xa0] ss:$16 sps:$4 sm:$0xff]  }
  0x3d   : > { %711 = vmatprep.subr.bf16.mxu0 %v3701_v9  ;;  %1064 = vmatprep.subr.bf16.mxu1 %v3703_v10  ;;  %v3724_v24 = vld [vmem:[%s3958_s10 + $0xa8] ss:$16 sps:$4 sm:$0xff]   ;;  %v3725_v25 = vld [vmem:[%s3958_s10 + $0xc4] ss:$16 sps:$4 sm:$0xff]   ;;  %v3727_v26 = vld [vmem:[%s3958_s10 + $0xcc] ss:$16 sps:$4 sm:$0xff]  }
  0x3e   : > { %v3729_v27 = vld [vmem:[%s3958_s10 + $0xc0] ss:$16 sps:$4 sm:$0xff]   ;;  %v3730_v28 = vld [vmem:[%s3958_s10 + $0xc8] ss:$16 sps:$4 sm:$0xff]   ;;  %v3731_v29 = vld [vmem:[%s3958_s10 + $0xe4] ss:$16 sps:$4 sm:$0xff]  }
  0x3f   : > { %v3733_v30 = vld [vmem:[%s3958_s10 + $0xec] ss:$16 sps:$4 sm:$0xff]   ;;  %v3735_v31 = vld [vmem:[%s3958_s10 + $0xe0] ss:$16 sps:$4 sm:$0xff]   ;;  %v3736_v32 = vld [vmem:[%s3958_s10 + $0xe8] ss:$16 sps:$4 sm:$0xff]  }
  0x40   : > { %712 = vmatpush1.bf16.msra.mxu0 %v3705_v11  ;;  %1065 = vmatpush1.bf16.msra.mxu1 %v3706_v12  ;;  %v3737_v33 = vld [vmem:[%s7873_s0] sm:$0xff]   ;;  %v3738_v34 = vld [vmem:[%s7873_s0 + $0x8] sm:$0xff]   ;;  %v3739_v35 = vld [vmem:[%s7873_s0 + $0x10] sm:$0xff]   ;;  %s3573_s8 = sshll.u32 %s3564_s19, 2  ;;  %vm3469_vm0 = vcmask 1041409   ;;  %vm3471_vm1 = vcmask 1043459  }
  0x41   : > { %713 = vmatprep.subr.bf16.mxu0 %v3707_v13  ;;  %1066 = vmatprep.subr.bf16.mxu1 %v3709_v14  ;;  %v3740_v36 = vld [vmem:[%s7873_s0 + $0x18] sm:$0xff]   ;;  %v3741_v37 = vld [vmem:[%s7873_s0 + $0x20] sm:$0xff]   ;;  %v3742_v38 = vld [vmem:[%s7873_s0 + $0x28] sm:$0xff]   ;;  %p243_p7 = scmp.lt.s32.totalorder %s3573_s8, 7  ;;  %vm3473_vm2 = vcmask 1045509   ;;  %vm3475_vm3 = vcmask 1047559  }
  0x42   : > { %v3743_v39 = vld [vmem:[%s7873_s0 + $0x30] sm:$0xff]   ;;  %v3744_v40 = vld [vmem:[%s7873_s0 + $0x38] sm:$0xff]   ;;  %v3745_v41 = vld [vmem:[%s7873_s0 + $0x40] sm:$0xff]  }
  0x43   : > { %v3746_v42 = vld [vmem:[%s7873_s0 + $0x48] sm:$0xff]   ;;  %v3747_v43 = vld [vmem:[%s7873_s0 + $0x50] sm:$0xff]   ;;  %v3748_v44 = vld [vmem:[%s7873_s0 + $0x58] sm:$0xff]   ;;  %s9415_s8 = smov (!%p243_p7, %s3573_s8), 7 }
  0x44   : > { %714 = vmatpush1.bf16.msra.mxu0 %v3711_v15  ;;  %1067 = vmatpush1.bf16.msra.mxu1 %v3712_v16  ;;  %v3749_v45 = vld [vmem:[%s7873_s0 + $0x60] sm:$0xff]   ;;  %v3750_v46 = vld [vmem:[%s7873_s0 + $0x68] sm:$0xff]   ;;  %v3751_v47 = vld [vmem:[%s7873_s0 + $0x70] sm:$0xff]   ;;  %s245_s18 = scalar_lea.vmem %s7875_s2, %s9415_s8  ;;  %s250_s14 = scalar_lea.vmem %s7876_s3, %s9415_s8 }
  0x45   : > { %715 = vmatprep.subr.bf16.mxu0 %v3713_v17  ;;  %1068 = vmatprep.subr.bf16.mxu1 %v3715_v18  ;;  %v3752_v48 = vld [vmem:[%s7873_s0 + $0x78] sm:$0xff]   ;;  %v3753_v49 = vld [vmem:[%s7873_s0 + $0x80] sm:$0xff]   ;;  %v3754_v50 = vld [vmem:[%s7873_s0 + $0x88] sm:$0xff]   ;;  %s3576_s15 = sshll.u32 %s9415_s8, 1 }
  0x46   : > { %v3755_v51 = vld [vmem:[%s7873_s0 + $0x90] sm:$0xff]   ;;  %v3756_v52 = vld [vmem:[%s7873_s0 + $0x98] sm:$0xff]   ;;  %v3757_v53 = vld [vmem:[%s7873_s0 + $0xa0] sm:$0xff]   ;;  %s256_s25 = scalar_lea.vmem %s7877_s4, %s3576_s15 }
  0x47   : > { %v3758_v54 = vld [vmem:[%s7873_s0 + $0xa8] sm:$0xff]   ;;  %v3759_v55 = vld [vmem:[%s7873_s0 + $0xb0] sm:$0xff]   ;;  %v3760_v56 = vld [vmem:[%s7873_s0 + $0xb8] sm:$0xff]  }
  0x48   : > { %716 = vmatpush1.bf16.msra.mxu0 %v3717_v19  ;;  %1069 = vmatpush1.bf16.msra.mxu1 %v3718_v20  ;;  %v3761_v57 = vld [vmem:[%s7873_s0 + $0xc0] sm:$0xff]   ;;  %v3762_v58 = vld [vmem:[%s7873_s0 + $0xc8] sm:$0xff]   ;;  %v3763_v59 = vld [vmem:[%s7873_s0 + $0xd0] sm:$0xff]  }
  0x49   : > { %717 = vmatprep.subr.bf16.mxu0 %v3719_v21  ;;  %1070 = vmatprep.subr.bf16.mxu1 %v3721_v22  ;;  %v3764_v1 = vld [vmem:[%s7873_s0 + $0xd8] sm:$0xff]  }
  0x4c   : > { %718 = vmatpush1.bf16.msra.mxu0 %v3723_v23  ;;  %1071 = vmatpush1.bf16.msra.mxu1 %v3724_v24 }
  0x4d   : > { %719 = vmatprep.subr.bf16.mxu0 %v3725_v25  ;;  %1072 = vmatprep.subr.bf16.mxu1 %v3727_v26 }
  0x50   : > { %720 = vmatpush1.bf16.msra.mxu0 %v3729_v27  ;;  %1073 = vmatpush1.bf16.msra.mxu1 %v3730_v28 }
  0x51   : > { %721 = vmatprep.subr.bf16.mxu0 %v3731_v29  ;;  %1074 = vmatprep.subr.bf16.mxu1 %v3733_v30  ;;  %v3765_v30 = vld [vmem:[%s7873_s0 + $0xe0] sm:$0xff]  }
  0x54   : > { %722 = vmatpush1.bf16.msra.mxu0 %v3735_v31  ;;  %1075 = vmatpush1.bf16.msra.mxu1 %v3736_v32 }
  0x57   : > { %740 = vmatmul.mubr.bf16.vlgmr.msra.gmra.mrb[0].mxu0 %v3737_v33  ;;  %1093 = vmatmul.mubr.bf16.vlgmr.msra.gmra.mrb[0].mxu1 %v3737_v33 }
  0x58   : > { %749 = vmatprep.mubr.bf16.mxu0 %v3847_v0  ;;  %1102 = vmatprep.mubr.bf16.mxu1 %v3847_v0 }
  0x5f   : > { %750 = vmatmul.mubr.bf16.gmra.mrb[4].mxu0 %v3738_v34  ;;  %1103 = vmatmul.mubr.bf16.gmra.mrb[4].mxu1 %v3738_v34 }
  0x60   : > { %759 = vmatprep.mubr.bf16.mxu0 %v3847_v0  ;;  %1112 = vmatprep.mubr.bf16.mxu1 %v3847_v0 }
  0x67   : > { %760 = vmatmul.mubr.bf16.gmra.mrb[8].mxu0 %v3739_v35  ;;  %1113 = vmatmul.mubr.bf16.gmra.mrb[8].mxu1 %v3739_v35 }
  0x68   : > { %769 = vmatprep.mubr.bf16.mxu0 %v3847_v0  ;;  %1122 = vmatprep.mubr.bf16.mxu1 %v3847_v0 }
  0x6f   : > { %770 = vmatmul.mubr.bf16.gmra.mrb[12].mxu0 %v3740_v36  ;;  %1123 = vmatmul.mubr.bf16.gmra.mrb[12].mxu1 %v3740_v36 }
  0x70   : > { %779 = vmatprep.mubr.bf16.mxu0 %v3847_v0  ;;  %1132 = vmatprep.mubr.bf16.mxu1 %v3847_v0 }
  0x77   : > { %780 = vmatmul.mubr.bf16.gmra.mrb[16].mxu0 %v3741_v37  ;;  %1133 = vmatmul.mubr.bf16.gmra.mrb[16].mxu1 %v3741_v37 }
  0x78   : > { %789 = vmatprep.mubr.bf16.mxu0 %v3847_v0  ;;  %1142 = vmatprep.mubr.bf16.mxu1 %v3847_v0 }
  0x7f   : > { %790 = vmatmul.mubr.bf16.gmra.mrb[20].mxu0 %v3742_v38  ;;  %1143 = vmatmul.mubr.bf16.gmra.mrb[20].mxu1 %v3742_v38 }
  0x80   : > { %799 = vmatprep.mubr.bf16.mxu0 %v3847_v0  ;;  %1152 = vmatprep.mubr.bf16.mxu1 %v3847_v0 }
  0x87   : > { %800 = vmatmul.mubr.bf16.gmra.mrb[24].mxu0 %v3743_v39  ;;  %1153 = vmatmul.mubr.bf16.gmra.mrb[24].mxu1 %v3743_v39 }
  0x88   : > { %809 = vmatprep.mubr.bf16.mxu0 %v3847_v0  ;;  %1162 = vmatprep.mubr.bf16.mxu1 %v3847_v0 }
  0x8f   : > { %810 = vmatmul.mubr.bf16.gmra.mrb[28].mxu0 %v3744_v40  ;;  %1163 = vmatmul.mubr.bf16.gmra.mrb[28].mxu1 %v3744_v40 }
  0x90   : > { %819 = vmatprep.mubr.bf16.mxu0 %v3847_v0  ;;  %1172 = vmatprep.mubr.bf16.mxu1 %v3847_v0 }
  0x97   : > { %820 = vmatmul.mubr.bf16.gmra.mrb[32].mxu0 %v3745_v41  ;;  %1173 = vmatmul.mubr.bf16.gmra.mrb[32].mxu1 %v3745_v41 }
  0x98   : > { %829 = vmatprep.mubr.bf16.mxu0 %v3847_v0  ;;  %1182 = vmatprep.mubr.bf16.mxu1 %v3847_v0 }
  0x9f   : > { %830 = vmatmul.mubr.bf16.gmra.mrb[36].mxu0 %v3746_v42  ;;  %1183 = vmatmul.mubr.bf16.gmra.mrb[36].mxu1 %v3746_v42 }
  0xa0   : > { %839 = vmatprep.mubr.bf16.mxu0 %v3847_v0  ;;  %1192 = vmatprep.mubr.bf16.mxu1 %v3847_v0 }
  0xa7   : > { %840 = vmatmul.mubr.bf16.gmra.mrb[40].mxu0 %v3747_v43  ;;  %1193 = vmatmul.mubr.bf16.gmra.mrb[40].mxu1 %v3747_v43 }
  0xa8   : > { %849 = vmatprep.mubr.bf16.mxu0 %v3847_v0  ;;  %1202 = vmatprep.mubr.bf16.mxu1 %v3847_v0 }
  0xaf   : > { %850 = vmatmul.mubr.bf16.gmra.mrb[44].mxu0 %v3748_v44  ;;  %1203 = vmatmul.mubr.bf16.gmra.mrb[44].mxu1 %v3748_v44 }
  0xb0   : > { %859 = vmatprep.mubr.bf16.mxu0 %v3847_v0  ;;  %1212 = vmatprep.mubr.bf16.mxu1 %v3847_v0 }
  0xb7   : > { %860 = vmatmul.mubr.bf16.gmra.mrb[48].mxu0 %v3749_v45  ;;  %1213 = vmatmul.mubr.bf16.gmra.mrb[48].mxu1 %v3749_v45 }
  0xb8   : > { %869 = vmatprep.mubr.bf16.mxu0 %v3847_v0  ;;  %1222 = vmatprep.mubr.bf16.mxu1 %v3847_v0 }
  0xbf   : > { %870 = vmatmul.mubr.bf16.gmra.mrb[52].mxu0 %v3750_v46  ;;  %1223 = vmatmul.mubr.bf16.gmra.mrb[52].mxu1 %v3750_v46 }
  0xc0   : > { %879 = vmatprep.mubr.bf16.mxu0 %v3847_v0  ;;  %1232 = vmatprep.mubr.bf16.mxu1 %v3847_v0 }
  0xc7   : > { %880 = vmatmul.mubr.bf16.gmra.mrb[56].mxu0 %v3751_v47  ;;  %1233 = vmatmul.mubr.bf16.gmra.mrb[56].mxu1 %v3751_v47 }
  0xc8   : > { %889 = vmatprep.mubr.bf16.mxu0 %v3847_v0  ;;  %1242 = vmatprep.mubr.bf16.mxu1 %v3847_v0 }
  0xcf   : > { %890 = vmatmul.mubr.bf16.gmra.mrb[60].mxu0 %v3752_v48  ;;  %1243 = vmatmul.mubr.bf16.gmra.mrb[60].mxu1 %v3752_v48 }
  0xd0   : > { %899 = vmatprep.mubr.bf16.mxu0 %v3847_v0  ;;  %1252 = vmatprep.mubr.bf16.mxu1 %v3847_v0 }
  0xd7   : > { %900 = vmatmul.mubr.bf16.gmra.mrb[64].mxu0 %v3753_v49  ;;  %1253 = vmatmul.mubr.bf16.gmra.mrb[64].mxu1 %v3753_v49 }
  0xd8   : > { %909 = vmatprep.mubr.bf16.mxu0 %v3847_v0  ;;  %1262 = vmatprep.mubr.bf16.mxu1 %v3847_v0 }
  0xdf   : > { %910 = vmatmul.mubr.bf16.gmra.mrb[68].mxu0 %v3754_v50  ;;  %1263 = vmatmul.mubr.bf16.gmra.mrb[68].mxu1 %v3754_v50 }
  0xe0   : > { %919 = vmatprep.mubr.bf16.mxu0 %v3847_v0  ;;  %1272 = vmatprep.mubr.bf16.mxu1 %v3847_v0 }
  0xe7   : > { %920 = vmatmul.mubr.bf16.gmra.mrb[72].mxu0 %v3755_v51  ;;  %1273 = vmatmul.mubr.bf16.gmra.mrb[72].mxu1 %v3755_v51 }
  0xe8   : > { %929 = vmatprep.mubr.bf16.mxu0 %v3847_v0  ;;  %1282 = vmatprep.mubr.bf16.mxu1 %v3847_v0 }
  0xef   : > { %930 = vmatmul.mubr.bf16.gmra.mrb[76].mxu0 %v3756_v52  ;;  %1283 = vmatmul.mubr.bf16.gmra.mrb[76].mxu1 %v3756_v52 }
  0xf0   : > { %939 = vmatprep.mubr.bf16.mxu0 %v3847_v0  ;;  %1292 = vmatprep.mubr.bf16.mxu1 %v3847_v0 }
  0xf7   : > { %940 = vmatmul.mubr.bf16.gmra.mrb[80].mxu0 %v3757_v53  ;;  %1293 = vmatmul.mubr.bf16.gmra.mrb[80].mxu1 %v3757_v53 }
  0xf8   : > { %949 = vmatprep.mubr.bf16.mxu0 %v3847_v0  ;;  %1302 = vmatprep.mubr.bf16.mxu1 %v3847_v0 }
  0xff   : > { %950 = vmatmul.mubr.bf16.gmra.mrb[84].mxu0 %v3758_v54  ;;  %1303 = vmatmul.mubr.bf16.gmra.mrb[84].mxu1 %v3758_v54 }
 0x100   : > { %959 = vmatprep.mubr.bf16.mxu0 %v3847_v0  ;;  %1312 = vmatprep.mubr.bf16.mxu1 %v3847_v0 }
 0x107   : > { %960 = vmatmul.mubr.bf16.gmra.mrb[88].mxu0 %v3759_v55  ;;  %1313 = vmatmul.mubr.bf16.gmra.mrb[88].mxu1 %v3759_v55 }
 0x108   : > { %969 = vmatprep.mubr.bf16.mxu0 %v3847_v0  ;;  %1322 = vmatprep.mubr.bf16.mxu1 %v3847_v0 }
 0x10f   : > { %970 = vmatmul.mubr.bf16.gmra.mrb[92].mxu0 %v3760_v56  ;;  %1323 = vmatmul.mubr.bf16.gmra.mrb[92].mxu1 %v3760_v56 }
 0x110   : > { %979 = vmatprep.mubr.bf16.mxu0 %v3847_v0  ;;  %1332 = vmatprep.mubr.bf16.mxu1 %v3847_v0 }
 0x117   : > { %980 = vmatmul.mubr.bf16.gmra.mrb[96].mxu0 %v3761_v57  ;;  %1333 = vmatmul.mubr.bf16.gmra.mrb[96].mxu1 %v3761_v57 }
 0x118   : > { %989 = vmatprep.mubr.bf16.mxu0 %v3847_v0  ;;  %1342 = vmatprep.mubr.bf16.mxu1 %v3847_v0 }
 0x11f   : > { %990 = vmatmul.mubr.bf16.gmra.mrb[100].mxu0 %v3762_v58  ;;  %1343 = vmatmul.mubr.bf16.gmra.mrb[100].mxu1 %v3762_v58 }
 0x120   : > { %999 = vmatprep.mubr.bf16.mxu0 %v3847_v0  ;;  %1352 = vmatprep.mubr.bf16.mxu1 %v3847_v0 }
 0x127   : > { %1000 = vmatmul.mubr.bf16.gmra.mrb[104].mxu0 %v3763_v59  ;;  %1353 = vmatmul.mubr.bf16.gmra.mrb[104].mxu1 %v3763_v59 }
 0x128   : > { %1009 = vmatprep.mubr.bf16.mxu0 %v3847_v0  ;;  %1362 = vmatprep.mubr.bf16.mxu1 %v3847_v0 }
 0x12a   : > { %v4133_v60 = vpop.f32.mrb[0].mxu0  ;;  %v4135_v61 = vpop.f32.mrb[0].mxu1 }
 0x12b   : > { %v4137_v62 = vpop.f32.mrb[1].mxu0  ;;  %v4139_v63 = vpop.f32.mrb[1].mxu1  ;;  %v1696_v2 = vmul.f32 %v4133_v60, %v4133_v60  ;;  %v1698_v3 = vmul.f32 %v4135_v61, %v4135_v61 }
 0x12c   : > { %v1697_v4 = vmul.f32 %v4137_v62, %v4137_v62  ;;  %v1699_v5 = vmul.f32 %v4139_v63, %v4139_v63  ;;  %v4152_v6 = vpop.f32.mrb[2].mxu0  ;;  %v4154_v7 = vpop.f32.mrb[2].mxu1 }
 0x12d   : > { %v1415_v8 = vadd.f32 %v4152_v6, %v4133_v60  ;;  %v1700_v9 = vmul.f32 %v4152_v6, %v4152_v6  ;;  %v1553_v10 = vadd.f32 %v4154_v7, %v4135_v61  ;;  %v1702_v11 = vmul.f32 %v4154_v7, %v4154_v7  ;;  %v4164_v12 = vpop.f32.mrb[3].mxu0  ;;  %v4166_v13 = vpop.f32.mrb[3].mxu1 }
 0x12e   : > { %v1484_v14 = vadd.f32 %v4164_v12, %v4137_v62  ;;  %v1701_v15 = vmul.f32 %v4164_v12, %v4164_v12  ;;  %v1622_v16 = vadd.f32 %v4166_v13, %v4139_v63  ;;  %v1703_v17 = vmul.f32 %v4166_v13, %v4166_v13 }
 0x12f   : > { %v1952_v18 = vadd.f32 %v1700_v9, %v1696_v2  ;;  %v2090_v19 = vadd.f32 %v1702_v11, %v1698_v3  ;;  %1010 = vmatmul.mubr.bf16.gmra.mrb[108].mxu0 %v3764_v1  ;;  %1363 = vmatmul.mubr.bf16.gmra.mrb[108].mxu1 %v3764_v1 }
 0x130   : > { %v2021_v20 = vadd.f32 %v1701_v15, %v1697_v4  ;;  %v2159_v21 = vadd.f32 %v1703_v17, %v1699_v5  ;;  %1019 = vmatprep.mubr.bf16.mxu0 %v3847_v0  ;;  %1372 = vmatprep.mubr.bf16.mxu1 %v3847_v0  ;;  %v3766_v4 = vld [vmem:[%s7873_s0 + $0xe8] sm:$0xff]  }
 0x132   : > { %v4178_v22 = vpop.f32.mrb[4].mxu0  ;;  %v4180_v23 = vpop.f32.mrb[4].mxu1 }
 0x133   : > { %v1416_v24 = vadd.f32 %v1415_v8, %v4178_v22  ;;  %v1704_v25 = vmul.f32 %v4178_v22, %v4178_v22  ;;  %v1554_v26 = vadd.f32 %v1553_v10, %v4180_v23  ;;  %v1706_v27 = vmul.f32 %v4180_v23, %v4180_v23  ;;  %v4188_v28 = vpop.f32.mrb[5].mxu0  ;;  %v4190_v29 = vpop.f32.mrb[5].mxu1 }
 0x134   : > { %v1485_v31 = vadd.f32 %v1484_v14, %v4188_v28  ;;  %v1705_v32 = vmul.f32 %v4188_v28, %v4188_v28  ;;  %v1623_v33 = vadd.f32 %v1622_v16, %v4190_v29  ;;  %v1707_v34 = vmul.f32 %v4190_v29, %v4190_v29  ;;  %v4201_v35 = vpop.f32.mrb[6].mxu0  ;;  %v4203_v36 = vpop.f32.mrb[6].mxu1 }
 0x135   : > { %v1953_v37 = vadd.f32 %v1952_v18, %v1704_v25  ;;  %v2091_v38 = vadd.f32 %v2090_v19, %v1706_v27  ;;  %v1417_v39 = vadd.f32 %v1416_v24, %v4201_v35  ;;  %v1708_v40 = vmul.f32 %v4201_v35, %v4201_v35  ;;  %v4208_v41 = vpop.f32.mrb[7].mxu0  ;;  %v4210_v42 = vpop.f32.mrb[7].mxu1 }
 0x136   : > { %v2022_v43 = vadd.f32 %v2021_v20, %v1705_v32  ;;  %v2160_v44 = vadd.f32 %v2159_v21, %v1707_v34  ;;  %v1555_v45 = vadd.f32 %v1554_v26, %v4203_v36  ;;  %v1710_v46 = vmul.f32 %v4203_v36, %v4203_v36 }
 0x137   : > { %v1954_v47 = vadd.f32 %v1953_v37, %v1708_v40  ;;  %v1486_v48 = vadd.f32 %v1485_v31, %v4208_v41  ;;  %v1709_v49 = vmul.f32 %v4208_v41, %v4208_v41  ;;  %v1624_v50 = vadd.f32 %v1623_v33, %v4210_v42  ;;  %1020 = vmatmul.mubr.bf16.gmra.mrb[112].mxu0 %v3765_v30 }
 0x138   : > { %v2092_v51 = vadd.f32 %v2091_v38, %v1710_v46  ;;  %v1711_v52 = vmul.f32 %v4210_v42, %v4210_v42  ;;  %1373 = vmatmul.mubr.bf16.gmra.mrb[112].mxu1 %v3765_v30  ;;  %1029 = vmatprep.mubr.bf16.mxu0 %v3847_v0 }
 0x139   : > { %v2023_v53 = vadd.f32 %v2022_v43, %v1709_v49  ;;  %1382 = vmatprep.mubr.bf16.mxu1 %v3847_v0  ;;  %v3767_v49 = vld [vmem:[%s7873_s0 + $0xf0] sm:$0xff]  }
 0x13a   : > { %v2161_v54 = vadd.f32 %v2160_v44, %v1711_v52  ;;  %v4223_v55 = vpop.f32.mrb[8].mxu0  ;;  %v4225_v56 = vpop.f32.mrb[8].mxu1 }
 0x13b   : > { %v1418_v57 = vadd.f32 %v1417_v39, %v4223_v55  ;;  %v1712_v58 = vmul.f32 %v4223_v55, %v4223_v55  ;;  %v1556_v59 = vadd.f32 %v1555_v45, %v4225_v56  ;;  %v1714_v1 = vmul.f32 %v4225_v56, %v4225_v56  ;;  %v4233_v2 = vpop.f32.mrb[9].mxu0  ;;  %v4235_v3 = vpop.f32.mrb[9].mxu1 }
 0x13c   : > { %v1487_v5 = vadd.f32 %v1486_v48, %v4233_v2  ;;  %v1713_v8 = vmul.f32 %v4233_v2, %v4233_v2  ;;  %v1625_v9 = vadd.f32 %v1624_v50, %v4235_v3  ;;  %v1715_v10 = vmul.f32 %v4235_v3, %v4235_v3  ;;  %v4246_v11 = vpop.f32.mrb[10].mxu0  ;;  %v4248_v14 = vpop.f32.mrb[10].mxu1 }
 0x13d   : > { %v1955_v15 = vadd.f32 %v1954_v47, %v1712_v58  ;;  %v2093_v16 = vadd.f32 %v2092_v51, %v1714_v1  ;;  %v1419_v17 = vadd.f32 %v1418_v57, %v4246_v11  ;;  %v1716_v18 = vmul.f32 %v4246_v11, %v4246_v11  ;;  %v4253_v19 = vpop.f32.mrb[11].mxu0  ;;  %v4255_v20 = vpop.f32.mrb[11].mxu1 }
 0x13e   : > { %v2024_v21 = vadd.f32 %v2023_v53, %v1713_v8  ;;  %v2162_v24 = vadd.f32 %v2161_v54, %v1715_v10  ;;  %v1557_v25 = vadd.f32 %v1556_v59, %v4248_v14  ;;  %v1718_v26 = vmul.f32 %v4248_v14, %v4248_v14 }
 0x13f   : > { %v1956_v27 = vadd.f32 %v1955_v15, %v1716_v18  ;;  %v1488_v30 = vadd.f32 %v1487_v5, %v4253_v19  ;;  %v1717_v31 = vmul.f32 %v4253_v19, %v4253_v19  ;;  %v1626_v32 = vadd.f32 %v1625_v9, %v4255_v20  ;;  %1030 = vmatmul.mubr.bf16.gmra.mrb[116].mxu0 %v3766_v4 }
 0x140   : > { %v2094_v33 = vadd.f32 %v2093_v16, %v1718_v26  ;;  %v1719_v34 = vmul.f32 %v4255_v20, %v4255_v20  ;;  %1383 = vmatmul.mubr.bf16.gmra.mrb[116].mxu1 %v3766_v4  ;;  %1039 = vmatprep.mubr.bf16.mxu0 %v3847_v0 }
 0x141   : > { %v2025_v37 = vadd.f32 %v2024_v21, %v1717_v31  ;;  %1392 = vmatprep.mubr.bf16.mxu1 %v3847_v0 }
 0x142   : > { %v2163_v38 = vadd.f32 %v2162_v24, %v1719_v34  ;;  %v4268_v39 = vpop.f32.mrb[12].mxu0  ;;  %v4270_v40 = vpop.f32.mrb[12].mxu1 }
 0x143   : > { %v1420_v43 = vadd.f32 %v1419_v17, %v4268_v39  ;;  %v1720_v44 = vmul.f32 %v4268_v39, %v4268_v39  ;;  %v1558_v45 = vadd.f32 %v1557_v25, %v4270_v40  ;;  %v1722_v46 = vmul.f32 %v4270_v40, %v4270_v40  ;;  %v4278_v47 = vpop.f32.mrb[13].mxu0  ;;  %v4280_v48 = vpop.f32.mrb[13].mxu1 }
 0x144   : > { %v1489_v50 = vadd.f32 %v1488_v30, %v4278_v47  ;;  %v1721_v51 = vmul.f32 %v4278_v47, %v4278_v47  ;;  %v1627_v52 = vadd.f32 %v1626_v32, %v4280_v48  ;;  %v1723_v53 = vmul.f32 %v4280_v48, %v4280_v48  ;;  %v4291_v54 = vpop.f32.mrb[14].mxu0  ;;  %v4293_v57 = vpop.f32.mrb[14].mxu1 }
 0x145   : > { %8122 = vst [vmem:[#allocation5_spill] sm:$0xff] %v4293_v57  ;;  %v1957_v58 = vadd.f32 %v1956_v27, %v1720_v44  ;;  %v2095_v59 = vadd.f32 %v2094_v33, %v1722_v46  ;;  %v1421_v1 = vadd.f32 %v1420_v43, %v4291_v54  ;;  %v1724_v4 = vmul.f32 %v4291_v54, %v4291_v54  ;;  %v4298_v5 = vpop.f32.mrb[15].mxu0  ;;  %v4300_v8 = vpop.f32.mrb[15].mxu1 }
 0x146   : > { %8123 = vst [vmem:[#allocation6_spill] sm:$0xff] %v4300_v8  ;;  %v2026_v9 = vadd.f32 %v2025_v37, %v1721_v51  ;;  %v2164_v10 = vadd.f32 %v2163_v38, %v1723_v53  ;;  %v1559_v15 = vadd.f32 %v1558_v45, %v4293_v57  ;;  %v1726_v16 = vmul.f32 %v4293_v57, %v4293_v57 }
 0x147   : > { %v1958_v17 = vadd.f32 %v1957_v58, %v1724_v4  ;;  %v1490_v18 = vadd.f32 %v1489_v50, %v4298_v5  ;;  %v1725_v21 = vmul.f32 %v4298_v5, %v4298_v5  ;;  %v1628_v24 = vadd.f32 %v1627_v52, %v4300_v8  ;;  %1040 = vmatmul.mubr.bf16.gmra.mrb[120].mxu0 %v3767_v49 }
 0x148   : > { %v2096_v25 = vadd.f32 %v2095_v59, %v1726_v16  ;;  %v1727_v26 = vmul.f32 %v4300_v8, %v4300_v8  ;;  %1393 = vmatmul.mubr.bf16.gmra.mrb[120].mxu1 %v3767_v49  ;;  %1049 = vmatprep.mubr.bf16.mxu0 %v3847_v0 }
 0x149   : > { %v2027_v27 = vadd.f32 %v2026_v9, %v1725_v21  ;;  %1402 = vmatprep.mubr.bf16.mxu1 %v3847_v0  ;;  %v3768_v0 = vld [vmem:[%s7873_s0 + $0xf8] sm:$0xff]  }
 0x14a   : > { %v2165_v30 = vadd.f32 %v2164_v10, %v1727_v26  ;;  %v4313_v31 = vpop.f32.mrb[16].mxu0  ;;  %v4315_v32 = vpop.f32.mrb[16].mxu1 }
 0x14b   : > { %8124 = vst [vmem:[#allocation7_spill] sm:$0xff] %v4313_v31  ;;  %8125 = vst [vmem:[#allocation8_spill] sm:$0xff] %v4315_v32  ;;  %v1422_v33 = vadd.f32 %v1421_v1, %v4313_v31  ;;  %v1728_v34 = vmul.f32 %v4313_v31, %v4313_v31  ;;  %v1560_v37 = vadd.f32 %v1559_v15, %v4315_v32  ;;  %v4323_v43 = vpop.f32.mrb[17].mxu0  ;;  %v4325_v44 = vpop.f32.mrb[17].mxu1 }
 0x14c   : > { %v1730_v38 = vmul.f32 %v4315_v32, %v4315_v32  ;;  %8126 = vst [vmem:[#allocation9_spill] sm:$0xff] %v4323_v43  ;;  %8127 = vst [vmem:[#allocation10_spill] sm:$0xff] %v4325_v44  ;;  %v1491_v45 = vadd.f32 %v1490_v18, %v4323_v43  ;;  %v1729_v46 = vmul.f32 %v4323_v43, %v4323_v43  ;;  %v4336_v51 = vpop.f32.mrb[18].mxu0  ;;  %v4338_v52 = vpop.f32.mrb[18].mxu1 }
 0x14d   : > { %v1629_v49 = vadd.f32 %v1628_v24, %v4325_v44  ;;  %v1731_v50 = vmul.f32 %v4325_v44, %v4325_v44  ;;  %8128 = vst [vmem:[#allocation11_spill] sm:$0xff] %v4336_v51  ;;  %8129 = vst [vmem:[#allocation12_spill] sm:$0xff] %v4338_v52  ;;  %v1959_v53 = vadd.f32 %v1958_v17, %v1728_v34  ;;  %v4343_v4 = vpop.f32.mrb[19].mxu0  ;;  %v4345_v9 = vpop.f32.mrb[19].mxu1 }
 0x14e   : > { %v2097_v58 = vadd.f32 %v2096_v25, %v1730_v38  ;;  %v1423_v59 = vadd.f32 %v1422_v33, %v4336_v51  ;;  %v1732_v1 = vmul.f32 %v4336_v51, %v4336_v51  ;;  %8130 = vst [vmem:[#allocation13_spill] sm:$0xff] %v4343_v4  ;;  %8131 = vst [vmem:[#allocation14_spill] sm:$0xff] %v4345_v9 }
 0x14f   : > { %v2028_v10 = vadd.f32 %v2027_v27, %v1729_v46  ;;  %v2166_v15 = vadd.f32 %v2165_v30, %v1731_v50  ;;  %v1561_v16 = vadd.f32 %v1560_v37, %v4338_v52  ;;  %v1734_v18 = vmul.f32 %v4338_v52, %v4338_v52  ;;  %1050 = vmatmul.mubr.bf16.gmra.mrb[124].mxu0 %v3768_v0 }
 0x150   : > { %v1960_v21 = vadd.f32 %v1959_v53, %v1732_v1  ;;  %v1492_v17 = vadd.f32 %v1491_v45, %v4343_v4  ;;  %v1733_v24 = vmul.f32 %v4343_v4, %v4343_v4  ;;  %v1630_v25 = vadd.f32 %v1629_v49, %v4345_v9  ;;  %1403 = vmatmul.mubr.bf16.gmra.mrb[124].mxu1 %v3768_v0 }
 0x151   : > { %v2098_v26 = vadd.f32 %v2097_v58, %v1734_v18  ;;  %v1735_v33 = vmul.f32 %v4345_v9, %v4345_v9 }
 0x152   : > { %v2029_v27 = vadd.f32 %v2028_v10, %v1733_v24  ;;  %v4356_v34 = vpop.f32.mrb[20].mxu0  ;;  %v4358_v37 = vpop.f32.mrb[20].mxu1 }
 0x153   : > { %v2167_v30 = vadd.f32 %v2166_v15, %v1735_v33  ;;  %8132 = vst [vmem:[#allocation15_spill] sm:$0xff] %v4356_v34  ;;  %8133 = vst [vmem:[#allocation16_spill] sm:$0xff] %v4358_v37  ;;  %v1424_v38 = vadd.f32 %v1423_v59, %v4356_v34  ;;  %v1736_v45 = vmul.f32 %v4356_v34, %v4356_v34  ;;  %v4366_v50 = vpop.f32.mrb[21].mxu0  ;;  %v4368_v53 = vpop.f32.mrb[21].mxu1 }
 0x154   : > { %v1562_v46 = vadd.f32 %v1561_v16, %v4358_v37  ;;  %v1738_v49 = vmul.f32 %v4358_v37, %v4358_v37  ;;  %8134 = vst [vmem:[#allocation17_spill] sm:$0xff] %v4366_v50  ;;  %8135 = vst [vmem:[#allocation18_spill] sm:$0xff] %v4368_v53  ;;  %v1493_v0 = vadd.f32 %v1492_v17, %v4366_v50  ;;  %v4376_v10 = vpop.f32.mrb[22].mxu0  ;;  %v4378_v15 = vpop.f32.mrb[22].mxu1 }
 0x155   : > { %v1737_v58 = vmul.f32 %v4366_v50, %v4366_v50  ;;  %v1631_v1 = vadd.f32 %v1630_v25, %v4368_v53  ;;  %v1739_v59 = vmul.f32 %v4368_v53, %v4368_v53  ;;  %8136 = vst [vmem:[#allocation19_spill] sm:$0xff] %v4376_v10  ;;  %8137 = vst [vmem:[#allocation20_spill] sm:$0xff] %v4378_v15  ;;  %v4383_v17 = vpop.f32.mrb[23].mxu0  ;;  %v4385_v37 = vpop.f32.mrb[23].mxu1 }
 0x156   : > { %v1961_v16 = vadd.f32 %v1960_v21, %v1736_v45  ;;  %v2099_v18 = vadd.f32 %v2098_v26, %v1738_v49  ;;  %v1425_v24 = vadd.f32 %v1424_v38, %v4376_v10  ;;  %v1740_v33 = vmul.f32 %v4376_v10, %v4376_v10  ;;  %8138 = vst [vmem:[#allocation21_spill] sm:$0xff] %v4383_v17 }
 0x157   : > { %8139 = vst [vmem:[#allocation22_spill] sm:$0xff] %v4385_v37  ;;  %v2030_v50 = vadd.f32 %v2029_v27, %v1737_v58  ;;  %v2168_v25 = vadd.f32 %v2167_v30, %v1739_v59  ;;  %v1563_v34 = vadd.f32 %v1562_v46, %v4378_v15  ;;  %v1742_v53 = vmul.f32 %v4378_v15, %v4378_v15 }
 0x158   : > { %v1962_v9 = vadd.f32 %v1961_v16, %v1740_v33  ;;  %v1494_v21 = vadd.f32 %v1493_v0, %v4383_v17  ;;  %v1741_v26 = vmul.f32 %v4383_v17, %v4383_v17  ;;  %v1632_v38 = vadd.f32 %v1631_v1, %v4385_v37 }
 0x159   : > { %v2100_v45 = vadd.f32 %v2099_v18, %v1742_v53  ;;  %v1743_v49 = vmul.f32 %v4385_v37, %v4385_v37 }
 0x15a   : > { %v2031_v10 = vadd.f32 %v2030_v50, %v1741_v26  ;;  %v4396_v30 = vpop.f32.mrb[24].mxu0  ;;  %v4398_v46 = vpop.f32.mrb[24].mxu1 }
 0x15b   : > { %v2169_v27 = vadd.f32 %v2168_v25, %v1743_v49  ;;  %8140 = vst [vmem:[#allocation23_spill] sm:$0xff] %v4396_v30  ;;  %8141 = vst [vmem:[#allocation24_spill] sm:$0xff] %v4398_v46  ;;  %v1426_v58 = vadd.f32 %v1425_v24, %v4396_v30  ;;  %v1744_v0 = vmul.f32 %v4396_v30, %v4396_v30  ;;  %v4406_v53 = vpop.f32.mrb[25].mxu0  ;;  %v4408_v16 = vpop.f32.mrb[25].mxu1 }
 0x15c   : > { %v1564_v59 = vadd.f32 %v1563_v34, %v4398_v46  ;;  %v1746_v1 = vmul.f32 %v4398_v46, %v4398_v46  ;;  %8142 = vst [vmem:[#allocation25_spill] sm:$0xff] %v4406_v53  ;;  %8143 = vst [vmem:[#allocation26_spill] sm:$0xff] %v4408_v16  ;;  %v1495_v50 = vadd.f32 %v1494_v21, %v4406_v53  ;;  %v4416_v25 = vpop.f32.mrb[26].mxu0  ;;  %v4418_v34 = vpop.f32.mrb[26].mxu1 }
 0x15d   : > { %v1745_v18 = vmul.f32 %v4406_v53, %v4406_v53  ;;  %v1633_v33 = vadd.f32 %v1632_v38, %v4408_v16  ;;  %v1747_v24 = vmul.f32 %v4408_v16, %v4408_v16  ;;  %8144 = vst [vmem:[#allocation27_spill] sm:$0xff] %v4416_v25  ;;  %8145 = vst [vmem:[#allocation28_spill] sm:$0xff] %v4418_v34  ;;  %v4423_v21 = vpop.f32.mrb[27].mxu0  ;;  %v4425_v37 = vpop.f32.mrb[27].mxu1 }
 0x15e   : > { %v1963_v26 = vadd.f32 %v1962_v9, %v1744_v0  ;;  %v2101_v49 = vadd.f32 %v2100_v45, %v1746_v1  ;;  %v1427_v46 = vadd.f32 %v1426_v58, %v4416_v25  ;;  %v1748_v30 = vmul.f32 %v4416_v25, %v4416_v25  ;;  %8146 = vst [vmem:[#allocation29_spill] sm:$0xff] %v4423_v21 }
 0x15f   : > { %8147 = vst [vmem:[#allocation30_spill] sm:$0xff] %v4425_v37  ;;  %v2032_v53 = vadd.f32 %v2031_v10, %v1745_v18  ;;  %v2170_v38 = vadd.f32 %v2169_v27, %v1747_v24  ;;  %v1565_v15 = vadd.f32 %v1564_v59, %v4418_v34  ;;  %v1750_v16 = vmul.f32 %v4418_v34, %v4418_v34 }
 0x160   : > { %v1964_v17 = vadd.f32 %v1963_v26, %v1748_v30  ;;  %v1496_v9 = vadd.f32 %v1495_v50, %v4423_v21  ;;  %v1749_v45 = vmul.f32 %v4423_v21, %v4423_v21  ;;  %v1634_v58 = vadd.f32 %v1633_v33, %v4425_v37 }
 0x161   : > { %v2102_v0 = vadd.f32 %v2101_v49, %v1750_v16  ;;  %v1751_v1 = vmul.f32 %v4425_v37, %v4425_v37 }
 0x162   : > { %v2033_v25 = vadd.f32 %v2032_v53, %v1749_v45  ;;  %v4436_v27 = vpop.f32.mrb[28].mxu0  ;;  %v4438_v59 = vpop.f32.mrb[28].mxu1 }
 0x163   : > { %v2171_v10 = vadd.f32 %v2170_v38, %v1751_v1  ;;  %8148 = vst [vmem:[#allocation31_spill] sm:$0xff] %v4436_v27  ;;  %8149 = vst [vmem:[#allocation32_spill] sm:$0xff] %v4438_v59  ;;  %v1428_v18 = vadd.f32 %v1427_v46, %v4436_v27  ;;  %v1752_v30 = vmul.f32 %v4436_v27, %v4436_v27  ;;  %v4446_v16 = vpop.f32.mrb[29].mxu0  ;;  %v4448_v24 = vpop.f32.mrb[29].mxu1 }
 0x164   : > { %v1566_v50 = vadd.f32 %v1565_v15, %v4438_v59  ;;  %v1754_v33 = vmul.f32 %v4438_v59, %v4438_v59  ;;  %8150 = vst [vmem:[#allocation33_spill] sm:$0xff] %v4446_v16  ;;  %8151 = vst [vmem:[#allocation34_spill] sm:$0xff] %v4448_v24  ;;  %v1497_v53 = vadd.f32 %v1496_v9, %v4446_v16  ;;  %v4456_v38 = vpop.f32.mrb[30].mxu0  ;;  %v4458_v15 = vpop.f32.mrb[30].mxu1 }
 0x165   : > { %v1753_v26 = vmul.f32 %v4446_v16, %v4446_v16  ;;  %v1635_v49 = vadd.f32 %v1634_v58, %v4448_v24  ;;  %v1755_v46 = vmul.f32 %v4448_v24, %v4448_v24  ;;  %8152 = vst [vmem:[#allocation35_spill] sm:$0xff] %v4456_v38  ;;  %8153 = vst [vmem:[#allocation36_spill] sm:$0xff] %v4458_v15  ;;  %v4463_v9 = vpop.f32.mrb[31].mxu0  ;;  %v4465_v37 = vpop.f32.mrb[31].mxu1 }
 0x166   : > { %v1965_v45 = vadd.f32 %v1964_v17, %v1752_v30  ;;  %v2103_v1 = vadd.f32 %v2102_v0, %v1754_v33  ;;  %v1429_v59 = vadd.f32 %v1428_v18, %v4456_v38  ;;  %v1756_v27 = vmul.f32 %v4456_v38, %v4456_v38  ;;  %8154 = vst [vmem:[#allocation37_spill] sm:$0xff] %v4463_v9 }
 0x167   : > { %8155 = vst [vmem:[#allocation38_spill] sm:$0xff] %v4465_v37  ;;  %v2034_v16 = vadd.f32 %v2033_v25, %v1753_v26  ;;  %v2172_v58 = vadd.f32 %v2171_v10, %v1755_v46  ;;  %v1567_v34 = vadd.f32 %v1566_v50, %v4458_v15  ;;  %v1758_v24 = vmul.f32 %v4458_v15, %v4458_v15 }
 0x168   : > { %v1966_v21 = vadd.f32 %v1965_v45, %v1756_v27  ;;  %v1498_v17 = vadd.f32 %v1497_v53, %v4463_v9  ;;  %v1757_v0 = vmul.f32 %v4463_v9, %v4463_v9  ;;  %v1636_v18 = vadd.f32 %v1635_v49, %v4465_v37 }
 0x169   : > { %v2104_v30 = vadd.f32 %v2103_v1, %v1758_v24  ;;  %v1759_v33 = vmul.f32 %v4465_v37, %v4465_v37 }
 0x16a   : > { %v2035_v38 = vadd.f32 %v2034_v16, %v1757_v0  ;;  %v4476_v10 = vpop.f32.mrb[32].mxu0  ;;  %v4478_v50 = vpop.f32.mrb[32].mxu1 }
 0x16b   : > { %v2173_v25 = vadd.f32 %v2172_v58, %v1759_v33  ;;  %8156 = vst [vmem:[#allocation39_spill] sm:$0xff] %v4476_v10  ;;  %8157 = vst [vmem:[#allocation40_spill] sm:$0xff] %v4478_v50  ;;  %v1430_v26 = vadd.f32 %v1429_v59, %v4476_v10  ;;  %v1760_v27 = vmul.f32 %v4476_v10, %v4476_v10  ;;  %v4486_v24 = vpop.f32.mrb[33].mxu0  ;;  %v4488_v46 = vpop.f32.mrb[33].mxu1 }
 0x16c   : > { %v1568_v53 = vadd.f32 %v1567_v34, %v4478_v50  ;;  %v1762_v49 = vmul.f32 %v4478_v50, %v4478_v50  ;;  %8158 = vst [vmem:[#allocation41_spill] sm:$0xff] %v4486_v24  ;;  %8159 = vst [vmem:[#allocation42_spill] sm:$0xff] %v4488_v46  ;;  %v1499_v16 = vadd.f32 %v1498_v17, %v4486_v24  ;;  %v4496_v58 = vpop.f32.mrb[34].mxu0  ;;  %v4498_v34 = vpop.f32.mrb[34].mxu1 }
 0x16d   : > { %v1761_v45 = vmul.f32 %v4486_v24, %v4486_v24  ;;  %v1637_v1 = vadd.f32 %v1636_v18, %v4488_v46  ;;  %v1763_v59 = vmul.f32 %v4488_v46, %v4488_v46  ;;  %8160 = vst [vmem:[#allocation43_spill] sm:$0xff] %v4496_v58  ;;  %8161 = vst [vmem:[#allocation44_spill] sm:$0xff] %v4498_v34  ;;  %v4503_v17 = vpop.f32.mrb[35].mxu0  ;;  %v4505_v37 = vpop.f32.mrb[35].mxu1 }
 0x16e   : > { %v1967_v0 = vadd.f32 %v1966_v21, %v1760_v27  ;;  %v2105_v33 = vadd.f32 %v2104_v30, %v1762_v49  ;;  %v1431_v50 = vadd.f32 %v1430_v26, %v4496_v58  ;;  %v1764_v10 = vmul.f32 %v4496_v58, %v4496_v58  ;;  %8162 = vst [vmem:[#allocation45_spill] sm:$0xff] %v4503_v17 }
 0x16f   : > { %8163 = vst [vmem:[#allocation46_spill] sm:$0xff] %v4505_v37  ;;  %v2036_v24 = vadd.f32 %v2035_v38, %v1761_v45  ;;  %v2174_v18 = vadd.f32 %v2173_v25, %v1763_v59  ;;  %v1569_v15 = vadd.f32 %v1568_v53, %v4498_v34  ;;  %v1766_v46 = vmul.f32 %v4498_v34, %v4498_v34 }
 0x170   : > { %v1968_v9 = vadd.f32 %v1967_v0, %v1764_v10  ;;  %v1500_v21 = vadd.f32 %v1499_v16, %v4503_v17  ;;  %v1765_v30 = vmul.f32 %v4503_v17, %v4503_v17  ;;  %v1638_v26 = vadd.f32 %v1637_v1, %v4505_v37 }
 0x171   : > { %v2106_v27 = vadd.f32 %v2105_v33, %v1766_v46  ;;  %v1767_v49 = vmul.f32 %v4505_v37, %v4505_v37 }
 0x172   : > { %v2037_v58 = vadd.f32 %v2036_v24, %v1765_v30  ;;  %v4516_v25 = vpop.f32.mrb[36].mxu0  ;;  %v4518_v53 = vpop.f32.mrb[36].mxu1 }
 0x173   : > { %v2175_v38 = vadd.f32 %v2174_v18, %v1767_v49  ;;  %8164 = vst [vmem:[#allocation47_spill] sm:$0xff] %v4516_v25  ;;  %8165 = vst [vmem:[#allocation48_spill] sm:$0xff] %v4518_v53  ;;  %v1432_v45 = vadd.f32 %v1431_v50, %v4516_v25  ;;  %v1768_v10 = vmul.f32 %v4516_v25, %v4516_v25  ;;  %v4526_v46 = vpop.f32.mrb[37].mxu0  ;;  %v4528_v59 = vpop.f32.mrb[37].mxu1 }
 0x174   : > { %v1570_v16 = vadd.f32 %v1569_v15, %v4518_v53  ;;  %v1770_v1 = vmul.f32 %v4518_v53, %v4518_v53  ;;  %8166 = vst [vmem:[#allocation49_spill] sm:$0xff] %v4526_v46  ;;  %8167 = vst [vmem:[#allocation50_spill] sm:$0xff] %v4528_v59  ;;  %v1501_v24 = vadd.f32 %v1500_v21, %v4526_v46  ;;  %v4536_v18 = vpop.f32.mrb[38].mxu0  ;;  %v4538_v15 = vpop.f32.mrb[38].mxu1 }
 0x175   : > { %v1769_v0 = vmul.f32 %v4526_v46, %v4526_v46  ;;  %v1639_v33 = vadd.f32 %v1638_v26, %v4528_v59  ;;  %v1771_v50 = vmul.f32 %v4528_v59, %v4528_v59  ;;  %8168 = vst [vmem:[#allocation51_spill] sm:$0xff] %v4536_v18  ;;  %8169 = vst [vmem:[#allocation52_spill] sm:$0xff] %v4538_v15  ;;  %v4543_v21 = vpop.f32.mrb[39].mxu0  ;;  %v4545_v37 = vpop.f32.mrb[39].mxu1 }
 0x176   : > { %v1969_v30 = vadd.f32 %v1968_v9, %v1768_v10  ;;  %v2107_v49 = vadd.f32 %v2106_v27, %v1770_v1  ;;  %v1433_v53 = vadd.f32 %v1432_v45, %v4536_v18  ;;  %v1772_v25 = vmul.f32 %v4536_v18, %v4536_v18  ;;  %8170 = vst [vmem:[#allocation53_spill] sm:$0xff] %v4543_v21 }
 0x177   : > { %8171 = vst [vmem:[#allocation54_spill] sm:$0xff] %v4545_v37  ;;  %v2038_v46 = vadd.f32 %v2037_v58, %v1769_v0  ;;  %v2176_v26 = vadd.f32 %v2175_v38, %v1771_v50  ;;  %v1571_v34 = vadd.f32 %v1570_v16, %v4538_v15  ;;  %v1774_v59 = vmul.f32 %v4538_v15, %v4538_v15 }
 0x178   : > { %v1970_v17 = vadd.f32 %v1969_v30, %v1772_v25  ;;  %v1502_v9 = vadd.f32 %v1501_v24, %v4543_v21  ;;  %v1773_v27 = vmul.f32 %v4543_v21, %v4543_v21  ;;  %v1640_v45 = vadd.f32 %v1639_v33, %v4545_v37 }
 0x179   : > { %v2108_v10 = vadd.f32 %v2107_v49, %v1774_v59  ;;  %v1775_v1 = vmul.f32 %v4545_v37, %v4545_v37 }
 0x17a   : > { %v2039_v18 = vadd.f32 %v2038_v46, %v1773_v27  ;;  %v4556_v38 = vpop.f32.mrb[40].mxu0  ;;  %v4558_v16 = vpop.f32.mrb[40].mxu1 }
 0x17b   : > { %v2177_v58 = vadd.f32 %v2176_v26, %v1775_v1  ;;  %8172 = vst [vmem:[#allocation55_spill] sm:$0xff] %v4556_v38  ;;  %8173 = vst [vmem:[#allocation56_spill] sm:$0xff] %v4558_v16  ;;  %v1434_v0 = vadd.f32 %v1433_v53, %v4556_v38  ;;  %v1776_v25 = vmul.f32 %v4556_v38, %v4556_v38  ;;  %v4566_v59 = vpop.f32.mrb[41].mxu0  ;;  %v4568_v50 = vpop.f32.mrb[41].mxu1 }
 0x17c   : > { %v1572_v24 = vadd.f32 %v1571_v34, %v4558_v16  ;;  %v1778_v33 = vmul.f32 %v4558_v16, %v4558_v16  ;;  %8174 = vst [vmem:[#allocation57_spill] sm:$0xff] %v4566_v59  ;;  %8175 = vst [vmem:[#allocation58_spill] sm:$0xff] %v4568_v50  ;;  %v1503_v46 = vadd.f32 %v1502_v9, %v4566_v59  ;;  %v4576_v26 = vpop.f32.mrb[42].mxu0  ;;  %v4578_v34 = vpop.f32.mrb[42].mxu1 }
 0x17d   : > { %v1777_v30 = vmul.f32 %v4566_v59, %v4566_v59  ;;  %v1641_v49 = vadd.f32 %v1640_v45, %v4568_v50  ;;  %v1779_v53 = vmul.f32 %v4568_v50, %v4568_v50  ;;  %8176 = vst [vmem:[#allocation59_spill] sm:$0xff] %v4576_v26  ;;  %8177 = vst [vmem:[#allocation60_spill] sm:$0xff] %v4578_v34  ;;  %v4583_v9 = vpop.f32.mrb[43].mxu0  ;;  %v4585_v37 = vpop.f32.mrb[43].mxu1 }
 0x17e   : > { %v1971_v27 = vadd.f32 %v1970_v17, %v1776_v25  ;;  %v2109_v1 = vadd.f32 %v2108_v10, %v1778_v33  ;;  %v1435_v16 = vadd.f32 %v1434_v0, %v4576_v26  ;;  %v1780_v38 = vmul.f32 %v4576_v26, %v4576_v26  ;;  %8178 = vst [vmem:[#allocation61_spill] sm:$0xff] %v4583_v9 }
 0x17f   : > { %8179 = vst [vmem:[#allocation62_spill] sm:$0xff] %v4585_v37  ;;  %v2040_v59 = vadd.f32 %v2039_v18, %v1777_v30  ;;  %v2178_v45 = vadd.f32 %v2177_v58, %v1779_v53  ;;  %v1573_v15 = vadd.f32 %v1572_v24, %v4578_v34  ;;  %v1782_v50 = vmul.f32 %v4578_v34, %v4578_v34 }
 0x180   : > { %v1972_v21 = vadd.f32 %v1971_v27, %v1780_v38  ;;  %v1504_v17 = vadd.f32 %v1503_v46, %v4583_v9  ;;  %v1781_v10 = vmul.f32 %v4583_v9, %v4583_v9  ;;  %v1642_v0 = vadd.f32 %v1641_v49, %v4585_v37 }
 0x181   : > { %v2110_v25 = vadd.f32 %v2109_v1, %v1782_v50  ;;  %v1783_v33 = vmul.f32 %v4585_v37, %v4585_v37 }
 0x182   : > { %v2041_v26 = vadd.f32 %v2040_v59, %v1781_v10  ;;  %v4596_v58 = vpop.f32.mrb[44].mxu0  ;;  %v4598_v24 = vpop.f32.mrb[44].mxu1 }
 0x183   : > { %v2179_v18 = vadd.f32 %v2178_v45, %v1783_v33  ;;  %8180 = vst [vmem:[#allocation63_spill] sm:$0xff] %v4596_v58  ;;  %8181 = vst [vmem:[#allocation64_spill] sm:$0xff] %v4598_v24  ;;  %v1436_v30 = vadd.f32 %v1435_v16, %v4596_v58  ;;  %v1784_v38 = vmul.f32 %v4596_v58, %v4596_v58  ;;  %v4606_v50 = vpop.f32.mrb[45].mxu0  ;;  %v4608_v53 = vpop.f32.mrb[45].mxu1 }
 0x184   : > { %v1574_v46 = vadd.f32 %v1573_v15, %v4598_v24  ;;  %v1786_v49 = vmul.f32 %v4598_v24, %v4598_v24  ;;  %8182 = vst [vmem:[#allocation65_spill] sm:$0xff] %v4606_v50  ;;  %8183 = vst [vmem:[#allocation66_spill] sm:$0xff] %v4608_v53  ;;  %v1505_v59 = vadd.f32 %v1504_v17, %v4606_v50  ;;  %v4616_v45 = vpop.f32.mrb[46].mxu0  ;;  %v4618_v15 = vpop.f32.mrb[46].mxu1 }
 0x185   : > { %v1785_v27 = vmul.f32 %v4606_v50, %v4606_v50  ;;  %v1643_v1 = vadd.f32 %v1642_v0, %v4608_v53  ;;  %v1787_v16 = vmul.f32 %v4608_v53, %v4608_v53  ;;  %8184 = vst [vmem:[#allocation67_spill] sm:$0xff] %v4616_v45  ;;  %8185 = vst [vmem:[#allocation68_spill] sm:$0xff] %v4618_v15  ;;  %v4623_v17 = vpop.f32.mrb[47].mxu0  ;;  %v4625_v37 = vpop.f32.mrb[47].mxu1 }
 0x186   : > { %v1973_v10 = vadd.f32 %v1972_v21, %v1784_v38  ;;  %v2111_v33 = vadd.f32 %v2110_v25, %v1786_v49  ;;  %v1437_v24 = vadd.f32 %v1436_v30, %v4616_v45  ;;  %v1788_v58 = vmul.f32 %v4616_v45, %v4616_v45  ;;  %8186 = vst [vmem:[#allocation69_spill] sm:$0xff] %v4623_v17 }
 0x187   : > { %8187 = vst [vmem:[#allocation70_spill] sm:$0xff] %v4625_v37  ;;  %v2042_v50 = vadd.f32 %v2041_v26, %v1785_v27  ;;  %v2180_v0 = vadd.f32 %v2179_v18, %v1787_v16  ;;  %v1575_v34 = vadd.f32 %v1574_v46, %v4618_v15  ;;  %v1790_v53 = vmul.f32 %v4618_v15, %v4618_v15 }
 0x188   : > { %v1974_v9 = vadd.f32 %v1973_v10, %v1788_v58  ;;  %v1506_v21 = vadd.f32 %v1505_v59, %v4623_v17  ;;  %v1789_v25 = vmul.f32 %v4623_v17, %v4623_v17  ;;  %v1644_v30 = vadd.f32 %v1643_v1, %v4625_v37 }
 0x189   : > { %v2112_v38 = vadd.f32 %v2111_v33, %v1790_v53  ;;  %v1791_v49 = vmul.f32 %v4625_v37, %v4625_v37 }
 0x18a   : > { %v2043_v45 = vadd.f32 %v2042_v50, %v1789_v25  ;;  %v4636_v18 = vpop.f32.mrb[48].mxu0  ;;  %v4638_v46 = vpop.f32.mrb[48].mxu1 }
 0x18b   : > { %v2181_v26 = vadd.f32 %v2180_v0, %v1791_v49  ;;  %8188 = vst [vmem:[#allocation71_spill] sm:$0xff] %v4636_v18  ;;  %8189 = vst [vmem:[#allocation72_spill] sm:$0xff] %v4638_v46  ;;  %v1438_v27 = vadd.f32 %v1437_v24, %v4636_v18  ;;  %v1792_v58 = vmul.f32 %v4636_v18, %v4636_v18  ;;  %v4646_v53 = vpop.f32.mrb[49].mxu0  ;;  %v4648_v16 = vpop.f32.mrb[49].mxu1 }
 0x18c   : > { %v1576_v59 = vadd.f32 %v1575_v34, %v4638_v46  ;;  %v1794_v1 = vmul.f32 %v4638_v46, %v4638_v46  ;;  %8190 = vst [vmem:[#allocation73_spill] sm:$0xff] %v4646_v53  ;;  %8191 = vst [vmem:[#allocation74_spill] sm:$0xff] %v4648_v16  ;;  %v1507_v50 = vadd.f32 %v1506_v21, %v4646_v53  ;;  %v4656_v0 = vpop.f32.mrb[50].mxu0  ;;  %v4658_v34 = vpop.f32.mrb[50].mxu1 }
 0x18d   : > { %v1793_v10 = vmul.f32 %v4646_v53, %v4646_v53  ;;  %v1645_v33 = vadd.f32 %v1644_v30, %v4648_v16  ;;  %v1795_v24 = vmul.f32 %v4648_v16, %v4648_v16  ;;  %8192 = vst [vmem:[#allocation75_spill] sm:$0xff] %v4656_v0  ;;  %8193 = vst [vmem:[#allocation76_spill] sm:$0xff] %v4658_v34  ;;  %v4663_v21 = vpop.f32.mrb[51].mxu0  ;;  %v4665_v37 = vpop.f32.mrb[51].mxu1 }
 0x18e   : > { %v1975_v25 = vadd.f32 %v1974_v9, %v1792_v58  ;;  %v2113_v49 = vadd.f32 %v2112_v38, %v1794_v1  ;;  %v1439_v46 = vadd.f32 %v1438_v27, %v4656_v0  ;;  %v1796_v18 = vmul.f32 %v4656_v0, %v4656_v0  ;;  %8194 = vst [vmem:[#allocation77_spill] sm:$0xff] %v4663_v21 }
 0x18f   : > { %8195 = vst [vmem:[#allocation78_spill] sm:$0xff] %v4665_v37  ;;  %v2044_v53 = vadd.f32 %v2043_v45, %v1793_v10  ;;  %v2182_v30 = vadd.f32 %v2181_v26, %v1795_v24  ;;  %v1577_v15 = vadd.f32 %v1576_v59, %v4658_v34  ;;  %v1798_v16 = vmul.f32 %v4658_v34, %v4658_v34 }
 0x190   : > { %v1976_v17 = vadd.f32 %v1975_v25, %v1796_v18  ;;  %v1508_v9 = vadd.f32 %v1507_v50, %v4663_v21  ;;  %v1797_v38 = vmul.f32 %v4663_v21, %v4663_v21  ;;  %v1646_v27 = vadd.f32 %v1645_v33, %v4665_v37 }
 0x191   : > { %v2114_v58 = vadd.f32 %v2113_v49, %v1798_v16  ;;  %v1799_v1 = vmul.f32 %v4665_v37, %v4665_v37 }
 0x192   : > { %v2045_v0 = vadd.f32 %v2044_v53, %v1797_v38  ;;  %v4676_v26 = vpop.f32.mrb[52].mxu0  ;;  %v4678_v59 = vpop.f32.mrb[52].mxu1 }
 0x193   : > { %v2183_v45 = vadd.f32 %v2182_v30, %v1799_v1  ;;  %8196 = vst [vmem:[#allocation79_spill] sm:$0xff] %v4676_v26  ;;  %8197 = vst [vmem:[#allocation80_spill] sm:$0xff] %v4678_v59  ;;  %v1440_v10 = vadd.f32 %v1439_v46, %v4676_v26  ;;  %v1800_v18 = vmul.f32 %v4676_v26, %v4676_v26  ;;  %v4686_v16 = vpop.f32.mrb[53].mxu0  ;;  %v4688_v24 = vpop.f32.mrb[53].mxu1 }
 0x194   : > { %v1578_v50 = vadd.f32 %v1577_v15, %v4678_v59  ;;  %v1802_v33 = vmul.f32 %v4678_v59, %v4678_v59  ;;  %8198 = vst [vmem:[#allocation81_spill] sm:$0xff] %v4686_v16  ;;  %8199 = vst [vmem:[#allocation82_spill] sm:$0xff] %v4688_v24  ;;  %v1509_v53 = vadd.f32 %v1508_v9, %v4686_v16  ;;  %v4696_v30 = vpop.f32.mrb[54].mxu0  ;;  %v4698_v15 = vpop.f32.mrb[54].mxu1 }
 0x195   : > { %v1801_v25 = vmul.f32 %v4686_v16, %v4686_v16  ;;  %v1647_v49 = vadd.f32 %v1646_v27, %v4688_v24  ;;  %v1803_v46 = vmul.f32 %v4688_v24, %v4688_v24  ;;  %8200 = vst [vmem:[#allocation83_spill] sm:$0xff] %v4696_v30  ;;  %8201 = vst [vmem:[#allocation84_spill] sm:$0xff] %v4698_v15  ;;  %v4703_v9 = vpop.f32.mrb[55].mxu0  ;;  %v4705_v37 = vpop.f32.mrb[55].mxu1 }
 0x196   : > { %v1977_v38 = vadd.f32 %v1976_v17, %v1800_v18  ;;  %v2115_v1 = vadd.f32 %v2114_v58, %v1802_v33  ;;  %v1441_v59 = vadd.f32 %v1440_v10, %v4696_v30  ;;  %v1804_v26 = vmul.f32 %v4696_v30, %v4696_v30  ;;  %8202 = vst [vmem:[#allocation85_spill] sm:$0xff] %v4703_v9 }
 0x197   : > { %8203 = vst [vmem:[#allocation86_spill] sm:$0xff] %v4705_v37  ;;  %v2046_v16 = vadd.f32 %v2045_v0, %v1801_v25  ;;  %v2184_v27 = vadd.f32 %v2183_v45, %v1803_v46  ;;  %v1579_v34 = vadd.f32 %v1578_v50, %v4698_v15  ;;  %v1806_v24 = vmul.f32 %v4698_v15, %v4698_v15 }
 0x198   : > { %v1978_v21 = vadd.f32 %v1977_v38, %v1804_v26  ;;  %v1510_v17 = vadd.f32 %v1509_v53, %v4703_v9  ;;  %v1805_v58 = vmul.f32 %v4703_v9, %v4703_v9  ;;  %v1648_v10 = vadd.f32 %v1647_v49, %v4705_v37 }
 0x199   : > { %v2116_v18 = vadd.f32 %v2115_v1, %v1806_v24  ;;  %v1807_v33 = vmul.f32 %v4705_v37, %v4705_v37 }
 0x19a   : > { %v2047_v30 = vadd.f32 %v2046_v16, %v1805_v58  ;;  %v4716_v45 = vpop.f32.mrb[56].mxu0  ;;  %v4718_v50 = vpop.f32.mrb[56].mxu1 }
 0x19b   : > { %v2185_v0 = vadd.f32 %v2184_v27, %v1807_v33  ;;  %8204 = vst [vmem:[#allocation87_spill] sm:$0xff] %v4716_v45  ;;  %8205 = vst [vmem:[#allocation88_spill] sm:$0xff] %v4718_v50  ;;  %v1442_v25 = vadd.f32 %v1441_v59, %v4716_v45  ;;  %v1808_v26 = vmul.f32 %v4716_v45, %v4716_v45  ;;  %v4726_v24 = vpop.f32.mrb[57].mxu0  ;;  %v4728_v46 = vpop.f32.mrb[57].mxu1 }
 0x19c   : > { %v1580_v53 = vadd.f32 %v1579_v34, %v4718_v50  ;;  %v1810_v49 = vmul.f32 %v4718_v50, %v4718_v50  ;;  %8206 = vst [vmem:[#allocation89_spill] sm:$0xff] %v4726_v24  ;;  %8207 = vst [vmem:[#allocation90_spill] sm:$0xff] %v4728_v46  ;;  %v1511_v16 = vadd.f32 %v1510_v17, %v4726_v24  ;;  %v4736_v27 = vpop.f32.mrb[58].mxu0  ;;  %v4738_v34 = vpop.f32.mrb[58].mxu1 }
 0x19d   : > { %v1809_v38 = vmul.f32 %v4726_v24, %v4726_v24  ;;  %v1649_v1 = vadd.f32 %v1648_v10, %v4728_v46  ;;  %v1811_v59 = vmul.f32 %v4728_v46, %v4728_v46  ;;  %8208 = vst [vmem:[#allocation91_spill] sm:$0xff] %v4736_v27  ;;  %8209 = vst [vmem:[#allocation92_spill] sm:$0xff] %v4738_v34  ;;  %v4743_v17 = vpop.f32.mrb[59].mxu0  ;;  %v4745_v37 = vpop.f32.mrb[59].mxu1 }
 0x19e   : > { %v1979_v58 = vadd.f32 %v1978_v21, %v1808_v26  ;;  %v2117_v33 = vadd.f32 %v2116_v18, %v1810_v49  ;;  %v1443_v50 = vadd.f32 %v1442_v25, %v4736_v27  ;;  %v1812_v45 = vmul.f32 %v4736_v27, %v4736_v27  ;;  %8210 = vst [vmem:[#allocation93_spill] sm:$0xff] %v4743_v17 }
 0x19f   : > { %8211 = vst [vmem:[#allocation94_spill] sm:$0xff] %v4745_v37  ;;  %v2048_v24 = vadd.f32 %v2047_v30, %v1809_v38  ;;  %v2186_v10 = vadd.f32 %v2185_v0, %v1811_v59  ;;  %v1581_v15 = vadd.f32 %v1580_v53, %v4738_v34  ;;  %v1814_v46 = vmul.f32 %v4738_v34, %v4738_v34 }
 0x1a0   : > { %v1980_v9 = vadd.f32 %v1979_v58, %v1812_v45  ;;  %v1512_v21 = vadd.f32 %v1511_v16, %v4743_v17  ;;  %v1813_v18 = vmul.f32 %v4743_v17, %v4743_v17  ;;  %v1650_v25 = vadd.f32 %v1649_v1, %v4745_v37 }
 0x1a1   : > { %v2118_v26 = vadd.f32 %v2117_v33, %v1814_v46  ;;  %v1815_v49 = vmul.f32 %v4745_v37, %v4745_v37 }
 0x1a2   : > { %v2049_v27 = vadd.f32 %v2048_v24, %v1813_v18  ;;  %v4756_v0 = vpop.f32.mrb[60].mxu0  ;;  %v4758_v53 = vpop.f32.mrb[60].mxu1 }
 0x1a3   : > { %v2187_v30 = vadd.f32 %v2186_v10, %v1815_v49  ;;  %8212 = vst [vmem:[#allocation95_spill] sm:$0xff] %v4756_v0  ;;  %8213 = vst [vmem:[#allocation96_spill] sm:$0xff] %v4758_v53  ;;  %v1444_v38 = vadd.f32 %v1443_v50, %v4756_v0  ;;  %v1816_v45 = vmul.f32 %v4756_v0, %v4756_v0  ;;  %v4766_v46 = vpop.f32.mrb[61].mxu0  ;;  %v4768_v59 = vpop.f32.mrb[61].mxu1 }
 0x1a4   : > { %v1582_v16 = vadd.f32 %v1581_v15, %v4758_v53  ;;  %v1818_v1 = vmul.f32 %v4758_v53, %v4758_v53  ;;  %8214 = vst [vmem:[#allocation97_spill] sm:$0xff] %v4766_v46  ;;  %8215 = vst [vmem:[#allocation98_spill] sm:$0xff] %v4768_v59  ;;  %v1513_v24 = vadd.f32 %v1512_v21, %v4766_v46  ;;  %v4776_v10 = vpop.f32.mrb[62].mxu0  ;;  %v4778_v15 = vpop.f32.mrb[62].mxu1 }
 0x1a5   : > { %v1817_v58 = vmul.f32 %v4766_v46, %v4766_v46  ;;  %v1651_v33 = vadd.f32 %v1650_v25, %v4768_v59  ;;  %v1819_v50 = vmul.f32 %v4768_v59, %v4768_v59  ;;  %8216 = vst [vmem:[#allocation99_spill] sm:$0xff] %v4776_v10  ;;  %8217 = vst [vmem:[#allocation100_spill] sm:$0xff] %v4778_v15  ;;  %v4783_v21 = vpop.f32.mrb[63].mxu0  ;;  %v4785_v37 = vpop.f32.mrb[63].mxu1 }
 0x1a6   : > { %v1981_v18 = vadd.f32 %v1980_v9, %v1816_v45  ;;  %v2119_v49 = vadd.f32 %v2118_v26, %v1818_v1  ;;  %v1445_v53 = vadd.f32 %v1444_v38, %v4776_v10  ;;  %v1820_v0 = vmul.f32 %v4776_v10, %v4776_v10  ;;  %8218 = vst [vmem:[#allocation101_spill] sm:$0xff] %v4783_v21 }
 0x1a7   : > { %8219 = vst [vmem:[#allocation102_spill] sm:$0xff] %v4785_v37  ;;  %v2050_v46 = vadd.f32 %v2049_v27, %v1817_v58  ;;  %v2188_v25 = vadd.f32 %v2187_v30, %v1819_v50  ;;  %v1583_v34 = vadd.f32 %v1582_v16, %v4778_v15  ;;  %v1822_v59 = vmul.f32 %v4778_v15, %v4778_v15 }
 0x1a8   : > { %v1982_v17 = vadd.f32 %v1981_v18, %v1820_v0  ;;  %v1514_v9 = vadd.f32 %v1513_v24, %v4783_v21  ;;  %v1821_v26 = vmul.f32 %v4783_v21, %v4783_v21  ;;  %v1652_v38 = vadd.f32 %v1651_v33, %v4785_v37 }
 0x1a9   : > { %v2120_v45 = vadd.f32 %v2119_v49, %v1822_v59  ;;  %v1823_v1 = vmul.f32 %v4785_v37, %v4785_v37 }
 0x1aa   : > { %v2051_v10 = vadd.f32 %v2050_v46, %v1821_v26  ;;  %v4796_v30 = vpop.f32.mrb[64].mxu0  ;;  %v4798_v16 = vpop.f32.mrb[64].mxu1 }
 0x1ab   : > { %v2189_v27 = vadd.f32 %v2188_v25, %v1823_v1  ;;  %8220 = vst [vmem:[#allocation103_spill] sm:$0xff] %v4796_v30  ;;  %8221 = vst [vmem:[#allocation104_spill] sm:$0xff] %v4798_v16  ;;  %v1446_v58 = vadd.f32 %v1445_v53, %v4796_v30  ;;  %v1824_v0 = vmul.f32 %v4796_v30, %v4796_v30  ;;  %v4806_v59 = vpop.f32.mrb[65].mxu0  ;;  %v4808_v50 = vpop.f32.mrb[65].mxu1 }
 0x1ac   : > { %v1584_v24 = vadd.f32 %v1583_v34, %v4798_v16  ;;  %v1826_v33 = vmul.f32 %v4798_v16, %v4798_v16  ;;  %8222 = vst [vmem:[#allocation105_spill] sm:$0xff] %v4806_v59  ;;  %8223 = vst [vmem:[#allocation106_spill] sm:$0xff] %v4808_v50  ;;  %v1515_v46 = vadd.f32 %v1514_v9, %v4806_v59  ;;  %v4816_v25 = vpop.f32.mrb[66].mxu0  ;;  %v4818_v34 = vpop.f32.mrb[66].mxu1 }
 0x1ad   : > { %v1825_v18 = vmul.f32 %v4806_v59, %v4806_v59  ;;  %v1653_v49 = vadd.f32 %v1652_v38, %v4808_v50  ;;  %v1827_v53 = vmul.f32 %v4808_v50, %v4808_v50  ;;  %8224 = vst [vmem:[#allocation107_spill] sm:$0xff] %v4816_v25  ;;  %8225 = vst [vmem:[#allocation108_spill] sm:$0xff] %v4818_v34  ;;  %v4823_v9 = vpop.f32.mrb[67].mxu0  ;;  %v4825_v37 = vpop.f32.mrb[67].mxu1 }
 0x1ae   : > { %v1983_v26 = vadd.f32 %v1982_v17, %v1824_v0  ;;  %v2121_v1 = vadd.f32 %v2120_v45, %v1826_v33  ;;  %v1447_v16 = vadd.f32 %v1446_v58, %v4816_v25  ;;  %v1828_v30 = vmul.f32 %v4816_v25, %v4816_v25  ;;  %8226 = vst [vmem:[#allocation109_spill] sm:$0xff] %v4823_v9 }
 0x1af   : > { %8227 = vst [vmem:[#allocation110_spill] sm:$0xff] %v4825_v37  ;;  %v2052_v59 = vadd.f32 %v2051_v10, %v1825_v18  ;;  %v2190_v38 = vadd.f32 %v2189_v27, %v1827_v53  ;;  %v1585_v15 = vadd.f32 %v1584_v24, %v4818_v34  ;;  %v1830_v50 = vmul.f32 %v4818_v34, %v4818_v34 }
 0x1b0   : > { %v1984_v21 = vadd.f32 %v1983_v26, %v1828_v30  ;;  %v1516_v17 = vadd.f32 %v1515_v46, %v4823_v9  ;;  %v1829_v45 = vmul.f32 %v4823_v9, %v4823_v9  ;;  %v1654_v58 = vadd.f32 %v1653_v49, %v4825_v37 }
 0x1b1   : > { %v2122_v0 = vadd.f32 %v2121_v1, %v1830_v50  ;;  %v1831_v33 = vmul.f32 %v4825_v37, %v4825_v37 }
 0x1b2   : > { %v2053_v25 = vadd.f32 %v2052_v59, %v1829_v45  ;;  %v4836_v27 = vpop.f32.mrb[68].mxu0  ;;  %v4838_v24 = vpop.f32.mrb[68].mxu1 }
 0x1b3   : > { %v2191_v10 = vadd.f32 %v2190_v38, %v1831_v33  ;;  %8228 = vst [vmem:[#allocation111_spill] sm:$0xff] %v4836_v27  ;;  %8229 = vst [vmem:[#allocation112_spill] sm:$0xff] %v4838_v24  ;;  %v1448_v18 = vadd.f32 %v1447_v16, %v4836_v27  ;;  %v1832_v30 = vmul.f32 %v4836_v27, %v4836_v27  ;;  %v4846_v50 = vpop.f32.mrb[69].mxu0  ;;  %v4848_v53 = vpop.f32.mrb[69].mxu1 }
 0x1b4   : > { %v1586_v46 = vadd.f32 %v1585_v15, %v4838_v24  ;;  %v1834_v49 = vmul.f32 %v4838_v24, %v4838_v24  ;;  %8230 = vst [vmem:[#allocation113_spill] sm:$0xff] %v4846_v50  ;;  %8231 = vst [vmem:[#allocation114_spill] sm:$0xff] %v4848_v53  ;;  %v1517_v59 = vadd.f32 %v1516_v17, %v4846_v50  ;;  %v4856_v38 = vpop.f32.mrb[70].mxu0  ;;  %v4858_v15 = vpop.f32.mrb[70].mxu1 }
 0x1b5   : > { %v1833_v26 = vmul.f32 %v4846_v50, %v4846_v50  ;;  %v1655_v1 = vadd.f32 %v1654_v58, %v4848_v53  ;;  %v1835_v16 = vmul.f32 %v4848_v53, %v4848_v53  ;;  %8232 = vst [vmem:[#allocation115_spill] sm:$0xff] %v4856_v38  ;;  %8233 = vst [vmem:[#allocation116_spill] sm:$0xff] %v4858_v15  ;;  %v4863_v17 = vpop.f32.mrb[71].mxu0  ;;  %v4865_v37 = vpop.f32.mrb[71].mxu1 }
 0x1b6   : > { %v1985_v45 = vadd.f32 %v1984_v21, %v1832_v30  ;;  %v2123_v33 = vadd.f32 %v2122_v0, %v1834_v49  ;;  %v1449_v24 = vadd.f32 %v1448_v18, %v4856_v38  ;;  %v1836_v27 = vmul.f32 %v4856_v38, %v4856_v38  ;;  %8234 = vst [vmem:[#allocation117_spill] sm:$0xff] %v4863_v17 }
 0x1b7   : > { %8235 = vst [vmem:[#allocation118_spill] sm:$0xff] %v4865_v37  ;;  %v2054_v50 = vadd.f32 %v2053_v25, %v1833_v26  ;;  %v2192_v58 = vadd.f32 %v2191_v10, %v1835_v16  ;;  %v1587_v34 = vadd.f32 %v1586_v46, %v4858_v15  ;;  %v1838_v53 = vmul.f32 %v4858_v15, %v4858_v15 }
 0x1b8   : > { %v1986_v9 = vadd.f32 %v1985_v45, %v1836_v27  ;;  %v1518_v21 = vadd.f32 %v1517_v59, %v4863_v17  ;;  %v1837_v0 = vmul.f32 %v4863_v17, %v4863_v17  ;;  %v1656_v18 = vadd.f32 %v1655_v1, %v4865_v37 }
 0x1b9   : > { %v2124_v30 = vadd.f32 %v2123_v33, %v1838_v53  ;;  %v1839_v49 = vmul.f32 %v4865_v37, %v4865_v37 }
 0x1ba   : > { %v2055_v38 = vadd.f32 %v2054_v50, %v1837_v0  ;;  %v4876_v10 = vpop.f32.mrb[72].mxu0  ;;  %v4878_v46 = vpop.f32.mrb[72].mxu1 }
 0x1bb   : > { %v2193_v25 = vadd.f32 %v2192_v58, %v1839_v49  ;;  %8236 = vst [vmem:[#allocation119_spill] sm:$0xff] %v4876_v10  ;;  %8237 = vst [vmem:[#allocation120_spill] sm:$0xff] %v4878_v46  ;;  %v1450_v26 = vadd.f32 %v1449_v24, %v4876_v10  ;;  %v1840_v27 = vmul.f32 %v4876_v10, %v4876_v10  ;;  %v4886_v53 = vpop.f32.mrb[73].mxu0  ;;  %v4888_v16 = vpop.f32.mrb[73].mxu1 }
 0x1bc   : > { %v1588_v59 = vadd.f32 %v1587_v34, %v4878_v46  ;;  %v1842_v1 = vmul.f32 %v4878_v46, %v4878_v46  ;;  %8238 = vst [vmem:[#allocation121_spill] sm:$0xff] %v4886_v53  ;;  %8239 = vst [vmem:[#allocation122_spill] sm:$0xff] %v4888_v16  ;;  %v1519_v50 = vadd.f32 %v1518_v21, %v4886_v53  ;;  %v4896_v58 = vpop.f32.mrb[74].mxu0  ;;  %v4898_v34 = vpop.f32.mrb[74].mxu1 }
 0x1bd   : > { %v1841_v45 = vmul.f32 %v4886_v53, %v4886_v53  ;;  %v1657_v33 = vadd.f32 %v1656_v18, %v4888_v16  ;;  %v1843_v24 = vmul.f32 %v4888_v16, %v4888_v16  ;;  %8240 = vst [vmem:[#allocation123_spill] sm:$0xff] %v4896_v58  ;;  %8241 = vst [vmem:[#allocation124_spill] sm:$0xff] %v4898_v34  ;;  %v4903_v21 = vpop.f32.mrb[75].mxu0  ;;  %v4905_v37 = vpop.f32.mrb[75].mxu1 }
 0x1be   : > { %v1987_v0 = vadd.f32 %v1986_v9, %v1840_v27  ;;  %v2125_v49 = vadd.f32 %v2124_v30, %v1842_v1  ;;  %v1451_v46 = vadd.f32 %v1450_v26, %v4896_v58  ;;  %v1844_v10 = vmul.f32 %v4896_v58, %v4896_v58  ;;  %8242 = vst [vmem:[#allocation125_spill] sm:$0xff] %v4903_v21 }
 0x1bf   : > { %8243 = vst [vmem:[#allocation126_spill] sm:$0xff] %v4905_v37  ;;  %v2056_v53 = vadd.f32 %v2055_v38, %v1841_v45  ;;  %v2194_v18 = vadd.f32 %v2193_v25, %v1843_v24  ;;  %v1589_v15 = vadd.f32 %v1588_v59, %v4898_v34  ;;  %v1846_v16 = vmul.f32 %v4898_v34, %v4898_v34 }
 0x1c0   : > { %v1988_v17 = vadd.f32 %v1987_v0, %v1844_v10  ;;  %v1520_v9 = vadd.f32 %v1519_v50, %v4903_v21  ;;  %v1845_v30 = vmul.f32 %v4903_v21, %v4903_v21  ;;  %v1658_v26 = vadd.f32 %v1657_v33, %v4905_v37 }
 0x1c1   : > { %v2126_v27 = vadd.f32 %v2125_v49, %v1846_v16  ;;  %v1847_v1 = vmul.f32 %v4905_v37, %v4905_v37 }
 0x1c2   : > { %v2057_v58 = vadd.f32 %v2056_v53, %v1845_v30  ;;  %v4916_v25 = vpop.f32.mrb[76].mxu0  ;;  %v4918_v59 = vpop.f32.mrb[76].mxu1 }
 0x1c3   : > { %v2195_v38 = vadd.f32 %v2194_v18, %v1847_v1  ;;  %8244 = vst [vmem:[#allocation127_spill] sm:$0xff] %v4916_v25  ;;  %8245 = vst [vmem:[#allocation128_spill] sm:$0xff] %v4918_v59  ;;  %v1452_v45 = vadd.f32 %v1451_v46, %v4916_v25  ;;  %v1848_v10 = vmul.f32 %v4916_v25, %v4916_v25  ;;  %v4926_v16 = vpop.f32.mrb[77].mxu0  ;;  %v4928_v24 = vpop.f32.mrb[77].mxu1 }
 0x1c4   : > { %v1590_v50 = vadd.f32 %v1589_v15, %v4918_v59  ;;  %v1850_v33 = vmul.f32 %v4918_v59, %v4918_v59  ;;  %8246 = vst [vmem:[#allocation129_spill] sm:$0xff] %v4926_v16  ;;  %8247 = vst [vmem:[#allocation130_spill] sm:$0xff] %v4928_v24  ;;  %v1521_v53 = vadd.f32 %v1520_v9, %v4926_v16  ;;  %v4936_v18 = vpop.f32.mrb[78].mxu0  ;;  %v4938_v15 = vpop.f32.mrb[78].mxu1 }
 0x1c5   : > { %v1849_v0 = vmul.f32 %v4926_v16, %v4926_v16  ;;  %v1659_v49 = vadd.f32 %v1658_v26, %v4928_v24  ;;  %v1851_v46 = vmul.f32 %v4928_v24, %v4928_v24  ;;  %8248 = vst [vmem:[#allocation131_spill] sm:$0xff] %v4936_v18  ;;  %8249 = vst [vmem:[#allocation132_spill] sm:$0xff] %v4938_v15  ;;  %v4943_v9 = vpop.f32.mrb[79].mxu0  ;;  %v4945_v37 = vpop.f32.mrb[79].mxu1 }
 0x1c6   : > { %v1989_v30 = vadd.f32 %v1988_v17, %v1848_v10  ;;  %v2127_v1 = vadd.f32 %v2126_v27, %v1850_v33  ;;  %v1453_v59 = vadd.f32 %v1452_v45, %v4936_v18  ;;  %v1852_v25 = vmul.f32 %v4936_v18, %v4936_v18  ;;  %8250 = vst [vmem:[#allocation133_spill] sm:$0xff] %v4943_v9 }
 0x1c7   : > { %8251 = vst [vmem:[#allocation134_spill] sm:$0xff] %v4945_v37  ;;  %v2058_v16 = vadd.f32 %v2057_v58, %v1849_v0  ;;  %v2196_v26 = vadd.f32 %v2195_v38, %v1851_v46  ;;  %v1591_v34 = vadd.f32 %v1590_v50, %v4938_v15  ;;  %v1854_v24 = vmul.f32 %v4938_v15, %v4938_v15 }
 0x1c8   : > { %v1990_v21 = vadd.f32 %v1989_v30, %v1852_v25  ;;  %v1522_v17 = vadd.f32 %v1521_v53, %v4943_v9  ;;  %v1853_v27 = vmul.f32 %v4943_v9, %v4943_v9  ;;  %v1660_v45 = vadd.f32 %v1659_v49, %v4945_v37 }
 0x1c9   : > { %v2128_v10 = vadd.f32 %v2127_v1, %v1854_v24  ;;  %v1855_v33 = vmul.f32 %v4945_v37, %v4945_v37 }
 0x1ca   : > { %v2059_v18 = vadd.f32 %v2058_v16, %v1853_v27  ;;  %v4956_v38 = vpop.f32.mrb[80].mxu0  ;;  %v4958_v50 = vpop.f32.mrb[80].mxu1 }
 0x1cb   : > { %v2197_v58 = vadd.f32 %v2196_v26, %v1855_v33  ;;  %8252 = vst [vmem:[#allocation135_spill] sm:$0xff] %v4956_v38  ;;  %8253 = vst [vmem:[#allocation136_spill] sm:$0xff] %v4958_v50  ;;  %v1454_v0 = vadd.f32 %v1453_v59, %v4956_v38  ;;  %v1856_v25 = vmul.f32 %v4956_v38, %v4956_v38  ;;  %v4966_v24 = vpop.f32.mrb[81].mxu0  ;;  %v4968_v46 = vpop.f32.mrb[81].mxu1 }
 0x1cc   : > { %v1592_v53 = vadd.f32 %v1591_v34, %v4958_v50  ;;  %v1858_v49 = vmul.f32 %v4958_v50, %v4958_v50  ;;  %8254 = vst [vmem:[#allocation137_spill] sm:$0xff] %v4966_v24  ;;  %8255 = vst [vmem:[#allocation138_spill] sm:$0xff] %v4968_v46  ;;  %v1523_v16 = vadd.f32 %v1522_v17, %v4966_v24  ;;  %v4976_v26 = vpop.f32.mrb[82].mxu0  ;;  %v4978_v34 = vpop.f32.mrb[82].mxu1 }
 0x1cd   : > { %v1857_v30 = vmul.f32 %v4966_v24, %v4966_v24  ;;  %v1661_v1 = vadd.f32 %v1660_v45, %v4968_v46  ;;  %v1859_v59 = vmul.f32 %v4968_v46, %v4968_v46  ;;  %8256 = vst [vmem:[#allocation139_spill] sm:$0xff] %v4976_v26  ;;  %8257 = vst [vmem:[#allocation140_spill] sm:$0xff] %v4978_v34  ;;  %v4983_v17 = vpop.f32.mrb[83].mxu0  ;;  %v4985_v37 = vpop.f32.mrb[83].mxu1 }
 0x1ce   : > { %v1991_v27 = vadd.f32 %v1990_v21, %v1856_v25  ;;  %v2129_v33 = vadd.f32 %v2128_v10, %v1858_v49  ;;  %v1455_v50 = vadd.f32 %v1454_v0, %v4976_v26  ;;  %v1860_v38 = vmul.f32 %v4976_v26, %v4976_v26  ;;  %8258 = vst [vmem:[#allocation141_spill] sm:$0xff] %v4983_v17 }
 0x1cf   : > { %8259 = vst [vmem:[#allocation142_spill] sm:$0xff] %v4985_v37  ;;  %v2060_v24 = vadd.f32 %v2059_v18, %v1857_v30  ;;  %v2198_v45 = vadd.f32 %v2197_v58, %v1859_v59  ;;  %v1593_v15 = vadd.f32 %v1592_v53, %v4978_v34  ;;  %v1862_v46 = vmul.f32 %v4978_v34, %v4978_v34 }
 0x1d0   : > { %v1992_v9 = vadd.f32 %v1991_v27, %v1860_v38  ;;  %v1524_v21 = vadd.f32 %v1523_v16, %v4983_v17  ;;  %v1861_v10 = vmul.f32 %v4983_v17, %v4983_v17  ;;  %v1662_v0 = vadd.f32 %v1661_v1, %v4985_v37 }
 0x1d1   : > { %v2130_v25 = vadd.f32 %v2129_v33, %v1862_v46  ;;  %v1863_v49 = vmul.f32 %v4985_v37, %v4985_v37 }
 0x1d2   : > { %v2061_v26 = vadd.f32 %v2060_v24, %v1861_v10  ;;  %v4996_v58 = vpop.f32.mrb[84].mxu0  ;;  %v4998_v53 = vpop.f32.mrb[84].mxu1 }
 0x1d3   : > { %v2199_v18 = vadd.f32 %v2198_v45, %v1863_v49  ;;  %8260 = vst [vmem:[#allocation143_spill] sm:$0xff] %v4996_v58  ;;  %8261 = vst [vmem:[#allocation144_spill] sm:$0xff] %v4998_v53  ;;  %v1456_v30 = vadd.f32 %v1455_v50, %v4996_v58  ;;  %v1864_v38 = vmul.f32 %v4996_v58, %v4996_v58  ;;  %v5006_v46 = vpop.f32.mrb[85].mxu0  ;;  %v5008_v59 = vpop.f32.mrb[85].mxu1 }
 0x1d4   : > { %v1594_v16 = vadd.f32 %v1593_v15, %v4998_v53  ;;  %v1866_v1 = vmul.f32 %v4998_v53, %v4998_v53  ;;  %8262 = vst [vmem:[#allocation145_spill] sm:$0xff] %v5006_v46  ;;  %8263 = vst [vmem:[#allocation146_spill] sm:$0xff] %v5008_v59  ;;  %v1525_v24 = vadd.f32 %v1524_v21, %v5006_v46  ;;  %v5016_v45 = vpop.f32.mrb[86].mxu0  ;;  %v5018_v15 = vpop.f32.mrb[86].mxu1 }
 0x1d5   : > { %v1865_v27 = vmul.f32 %v5006_v46, %v5006_v46  ;;  %v1663_v33 = vadd.f32 %v1662_v0, %v5008_v59  ;;  %v1867_v50 = vmul.f32 %v5008_v59, %v5008_v59  ;;  %8264 = vst [vmem:[#allocation147_spill] sm:$0xff] %v5016_v45  ;;  %8265 = vst [vmem:[#allocation148_spill] sm:$0xff] %v5018_v15  ;;  %v5023_v21 = vpop.f32.mrb[87].mxu0  ;;  %v5025_v37 = vpop.f32.mrb[87].mxu1 }
 0x1d6   : > { %v1993_v10 = vadd.f32 %v1992_v9, %v1864_v38  ;;  %v2131_v49 = vadd.f32 %v2130_v25, %v1866_v1  ;;  %v1457_v53 = vadd.f32 %v1456_v30, %v5016_v45  ;;  %v1868_v58 = vmul.f32 %v5016_v45, %v5016_v45  ;;  %8266 = vst [vmem:[#allocation149_spill] sm:$0xff] %v5023_v21 }
 0x1d7   : > { %8267 = vst [vmem:[#allocation150_spill] sm:$0xff] %v5025_v37  ;;  %v2062_v46 = vadd.f32 %v2061_v26, %v1865_v27  ;;  %v2200_v0 = vadd.f32 %v2199_v18, %v1867_v50  ;;  %v1595_v34 = vadd.f32 %v1594_v16, %v5018_v15  ;;  %v1870_v59 = vmul.f32 %v5018_v15, %v5018_v15 }
 0x1d8   : > { %v1994_v17 = vadd.f32 %v1993_v10, %v1868_v58  ;;  %v1526_v9 = vadd.f32 %v1525_v24, %v5023_v21  ;;  %v1869_v25 = vmul.f32 %v5023_v21, %v5023_v21  ;;  %v1664_v30 = vadd.f32 %v1663_v33, %v5025_v37 }
 0x1d9   : > { %v2132_v38 = vadd.f32 %v2131_v49, %v1870_v59  ;;  %v1871_v1 = vmul.f32 %v5025_v37, %v5025_v37 }
 0x1da   : > { %v2063_v45 = vadd.f32 %v2062_v46, %v1869_v25  ;;  %v5036_v18 = vpop.f32.mrb[88].mxu0  ;;  %v5038_v16 = vpop.f32.mrb[88].mxu1 }
 0x1db   : > { %v2201_v26 = vadd.f32 %v2200_v0, %v1871_v1  ;;  %8268 = vst [vmem:[#allocation151_spill] sm:$0xff] %v5036_v18  ;;  %8269 = vst [vmem:[#allocation152_spill] sm:$0xff] %v5038_v16  ;;  %v1458_v27 = vadd.f32 %v1457_v53, %v5036_v18  ;;  %v1872_v58 = vmul.f32 %v5036_v18, %v5036_v18  ;;  %v5046_v59 = vpop.f32.mrb[89].mxu0  ;;  %v5048_v50 = vpop.f32.mrb[89].mxu1 }
 0x1dc   : > { %v1596_v24 = vadd.f32 %v1595_v34, %v5038_v16  ;;  %v1874_v33 = vmul.f32 %v5038_v16, %v5038_v16  ;;  %8270 = vst [vmem:[#allocation153_spill] sm:$0xff] %v5046_v59  ;;  %8271 = vst [vmem:[#allocation154_spill] sm:$0xff] %v5048_v50  ;;  %v1527_v46 = vadd.f32 %v1526_v9, %v5046_v59  ;;  %v5056_v0 = vpop.f32.mrb[90].mxu0  ;;  %v5058_v34 = vpop.f32.mrb[90].mxu1 }
 0x1dd   : > { %v1873_v10 = vmul.f32 %v5046_v59, %v5046_v59  ;;  %v1665_v49 = vadd.f32 %v1664_v30, %v5048_v50  ;;  %v1875_v53 = vmul.f32 %v5048_v50, %v5048_v50  ;;  %8272 = vst [vmem:[#allocation155_spill] sm:$0xff] %v5056_v0  ;;  %8273 = vst [vmem:[#allocation156_spill] sm:$0xff] %v5058_v34  ;;  %v5063_v9 = vpop.f32.mrb[91].mxu0  ;;  %v5065_v37 = vpop.f32.mrb[91].mxu1 }
 0x1de   : > { %v1995_v25 = vadd.f32 %v1994_v17, %v1872_v58  ;;  %v2133_v1 = vadd.f32 %v2132_v38, %v1874_v33  ;;  %v1459_v16 = vadd.f32 %v1458_v27, %v5056_v0  ;;  %v1876_v18 = vmul.f32 %v5056_v0, %v5056_v0  ;;  %8274 = vst [vmem:[#allocation157_spill] sm:$0xff] %v5063_v9 }
 0x1df   : > { %8275 = vst [vmem:[#allocation158_spill] sm:$0xff] %v5065_v37  ;;  %v2064_v59 = vadd.f32 %v2063_v45, %v1873_v10  ;;  %v2202_v30 = vadd.f32 %v2201_v26, %v1875_v53  ;;  %v1597_v15 = vadd.f32 %v1596_v24, %v5058_v34  ;;  %v1878_v50 = vmul.f32 %v5058_v34, %v5058_v34 }
 0x1e0   : > { %v1996_v21 = vadd.f32 %v1995_v25, %v1876_v18  ;;  %v1528_v17 = vadd.f32 %v1527_v46, %v5063_v9  ;;  %v1877_v38 = vmul.f32 %v5063_v9, %v5063_v9  ;;  %v1666_v27 = vadd.f32 %v1665_v49, %v5065_v37 }
 0x1e1   : > { %v2134_v58 = vadd.f32 %v2133_v1, %v1878_v50  ;;  %v1879_v33 = vmul.f32 %v5065_v37, %v5065_v37 }
 0x1e2   : > { %v2065_v0 = vadd.f32 %v2064_v59, %v1877_v38  ;;  %v5076_v26 = vpop.f32.mrb[92].mxu0  ;;  %v5078_v24 = vpop.f32.mrb[92].mxu1 }
 0x1e3   : > { %v2203_v45 = vadd.f32 %v2202_v30, %v1879_v33  ;;  %8276 = vst [vmem:[#allocation159_spill] sm:$0xff] %v5076_v26  ;;  %8277 = vst [vmem:[#allocation160_spill] sm:$0xff] %v5078_v24  ;;  %v1460_v10 = vadd.f32 %v1459_v16, %v5076_v26  ;;  %v1880_v18 = vmul.f32 %v5076_v26, %v5076_v26  ;;  %v5086_v50 = vpop.f32.mrb[93].mxu0  ;;  %v5088_v53 = vpop.f32.mrb[93].mxu1 }
 0x1e4   : > { %v1598_v46 = vadd.f32 %v1597_v15, %v5078_v24  ;;  %v1882_v49 = vmul.f32 %v5078_v24, %v5078_v24  ;;  %8278 = vst [vmem:[#allocation161_spill] sm:$0xff] %v5086_v50  ;;  %8279 = vst [vmem:[#allocation162_spill] sm:$0xff] %v5088_v53  ;;  %v1529_v59 = vadd.f32 %v1528_v17, %v5086_v50  ;;  %v5096_v30 = vpop.f32.mrb[94].mxu0  ;;  %v5098_v15 = vpop.f32.mrb[94].mxu1 }
 0x1e5   : > { %v1881_v25 = vmul.f32 %v5086_v50, %v5086_v50  ;;  %v1667_v1 = vadd.f32 %v1666_v27, %v5088_v53  ;;  %v1883_v16 = vmul.f32 %v5088_v53, %v5088_v53  ;;  %8280 = vst [vmem:[#allocation163_spill] sm:$0xff] %v5096_v30  ;;  %8281 = vst [vmem:[#allocation164_spill] sm:$0xff] %v5098_v15  ;;  %v5103_v17 = vpop.f32.mrb[95].mxu0  ;;  %v5105_v37 = vpop.f32.mrb[95].mxu1 }
 0x1e6   : > { %v1997_v38 = vadd.f32 %v1996_v21, %v1880_v18  ;;  %v2135_v33 = vadd.f32 %v2134_v58, %v1882_v49  ;;  %v1461_v24 = vadd.f32 %v1460_v10, %v5096_v30  ;;  %v1884_v26 = vmul.f32 %v5096_v30, %v5096_v30  ;;  %8282 = vst [vmem:[#allocation165_spill] sm:$0xff] %v5103_v17 }
 0x1e7   : > { %8283 = vst [vmem:[#allocation166_spill] sm:$0xff] %v5105_v37  ;;  %v2066_v50 = vadd.f32 %v2065_v0, %v1881_v25  ;;  %v2204_v27 = vadd.f32 %v2203_v45, %v1883_v16  ;;  %v1599_v34 = vadd.f32 %v1598_v46, %v5098_v15  ;;  %v1886_v53 = vmul.f32 %v5098_v15, %v5098_v15 }
 0x1e8   : > { %v1998_v9 = vadd.f32 %v1997_v38, %v1884_v26  ;;  %v1530_v21 = vadd.f32 %v1529_v59, %v5103_v17  ;;  %v1885_v58 = vmul.f32 %v5103_v17, %v5103_v17  ;;  %v1668_v10 = vadd.f32 %v1667_v1, %v5105_v37 }
 0x1e9   : > { %v2136_v18 = vadd.f32 %v2135_v33, %v1886_v53  ;;  %v1887_v49 = vmul.f32 %v5105_v37, %v5105_v37 }
 0x1ea   : > { %v2067_v30 = vadd.f32 %v2066_v50, %v1885_v58  ;;  %v5116_v45 = vpop.f32.mrb[96].mxu0  ;;  %v5118_v46 = vpop.f32.mrb[96].mxu1 }
 0x1eb   : > { %v2205_v0 = vadd.f32 %v2204_v27, %v1887_v49  ;;  %8284 = vst [vmem:[#allocation167_spill] sm:$0xff] %v5116_v45  ;;  %8285 = vst [vmem:[#allocation168_spill] sm:$0xff] %v5118_v46  ;;  %v1462_v25 = vadd.f32 %v1461_v24, %v5116_v45  ;;  %v1888_v26 = vmul.f32 %v5116_v45, %v5116_v45  ;;  %v5126_v53 = vpop.f32.mrb[97].mxu0  ;;  %v5128_v16 = vpop.f32.mrb[97].mxu1 }
 0x1ec   : > { %v1600_v59 = vadd.f32 %v1599_v34, %v5118_v46  ;;  %v1890_v1 = vmul.f32 %v5118_v46, %v5118_v46  ;;  %8286 = vst [vmem:[#allocation169_spill] sm:$0xff] %v5126_v53  ;;  %8287 = vst [vmem:[#allocation170_spill] sm:$0xff] %v5128_v16  ;;  %v1531_v50 = vadd.f32 %v1530_v21, %v5126_v53  ;;  %v5136_v27 = vpop.f32.mrb[98].mxu0  ;;  %v5138_v34 = vpop.f32.mrb[98].mxu1 }
 0x1ed   : > { %v1889_v38 = vmul.f32 %v5126_v53, %v5126_v53  ;;  %v1669_v33 = vadd.f32 %v1668_v10, %v5128_v16  ;;  %v1891_v24 = vmul.f32 %v5128_v16, %v5128_v16  ;;  %8288 = vst [vmem:[#allocation171_spill] sm:$0xff] %v5136_v27  ;;  %8289 = vst [vmem:[#allocation172_spill] sm:$0xff] %v5138_v34  ;;  %v5143_v21 = vpop.f32.mrb[99].mxu0  ;;  %v5145_v37 = vpop.f32.mrb[99].mxu1 }
 0x1ee   : > { %v1999_v58 = vadd.f32 %v1998_v9, %v1888_v26  ;;  %v2137_v49 = vadd.f32 %v2136_v18, %v1890_v1  ;;  %v1463_v46 = vadd.f32 %v1462_v25, %v5136_v27  ;;  %v1892_v45 = vmul.f32 %v5136_v27, %v5136_v27  ;;  %8290 = vst [vmem:[#allocation173_spill] sm:$0xff] %v5143_v21 }
 0x1ef   : > { %8291 = vst [vmem:[#allocation174_spill] sm:$0xff] %v5145_v37  ;;  %v2068_v53 = vadd.f32 %v2067_v30, %v1889_v38  ;;  %v2206_v10 = vadd.f32 %v2205_v0, %v1891_v24  ;;  %v1601_v15 = vadd.f32 %v1600_v59, %v5138_v34  ;;  %v1894_v16 = vmul.f32 %v5138_v34, %v5138_v34 }
 0x1f0   : > { %v2000_v17 = vadd.f32 %v1999_v58, %v1892_v45  ;;  %v1532_v9 = vadd.f32 %v1531_v50, %v5143_v21  ;;  %v1893_v18 = vmul.f32 %v5143_v21, %v5143_v21  ;;  %v1670_v25 = vadd.f32 %v1669_v33, %v5145_v37 }
 0x1f1   : > { %v2138_v26 = vadd.f32 %v2137_v49, %v1894_v16  ;;  %v1895_v1 = vmul.f32 %v5145_v37, %v5145_v37 }
 0x1f2   : > { %v2069_v27 = vadd.f32 %v2068_v53, %v1893_v18  ;;  %v5156_v0 = vpop.f32.mrb[100].mxu0  ;;  %v5158_v59 = vpop.f32.mrb[100].mxu1 }
 0x1f3   : > { %v2207_v30 = vadd.f32 %v2206_v10, %v1895_v1  ;;  %8292 = vst [vmem:[#allocation175_spill] sm:$0xff] %v5156_v0  ;;  %8293 = vst [vmem:[#allocation176_spill] sm:$0xff] %v5158_v59  ;;  %v1464_v38 = vadd.f32 %v1463_v46, %v5156_v0  ;;  %v1896_v45 = vmul.f32 %v5156_v0, %v5156_v0  ;;  %v5166_v16 = vpop.f32.mrb[101].mxu0  ;;  %v5168_v24 = vpop.f32.mrb[101].mxu1 }
 0x1f4   : > { %v1602_v50 = vadd.f32 %v1601_v15, %v5158_v59  ;;  %v1898_v33 = vmul.f32 %v5158_v59, %v5158_v59  ;;  %8294 = vst [vmem:[#allocation177_spill] sm:$0xff] %v5166_v16  ;;  %8295 = vst [vmem:[#allocation178_spill] sm:$0xff] %v5168_v24  ;;  %v1533_v53 = vadd.f32 %v1532_v9, %v5166_v16  ;;  %v5176_v10 = vpop.f32.mrb[102].mxu0  ;;  %v5178_v15 = vpop.f32.mrb[102].mxu1 }
 0x1f5   : > { %v1897_v58 = vmul.f32 %v5166_v16, %v5166_v16  ;;  %v1671_v49 = vadd.f32 %v1670_v25, %v5168_v24  ;;  %v1899_v46 = vmul.f32 %v5168_v24, %v5168_v24  ;;  %8296 = vst [vmem:[#allocation179_spill] sm:$0xff] %v5176_v10  ;;  %8297 = vst [vmem:[#allocation180_spill] sm:$0xff] %v5178_v15  ;;  %v5183_v9 = vpop.f32.mrb[103].mxu0  ;;  %v5185_v37 = vpop.f32.mrb[103].mxu1 }
 0x1f6   : > { %v2001_v18 = vadd.f32 %v2000_v17, %v1896_v45  ;;  %v2139_v1 = vadd.f32 %v2138_v26, %v1898_v33  ;;  %v1465_v59 = vadd.f32 %v1464_v38, %v5176_v10  ;;  %v1900_v0 = vmul.f32 %v5176_v10, %v5176_v10  ;;  %8298 = vst [vmem:[#allocation181_spill] sm:$0xff] %v5183_v9 }
 0x1f7   : > { %8299 = vst [vmem:[#allocation182_spill] sm:$0xff] %v5185_v37  ;;  %v2070_v16 = vadd.f32 %v2069_v27, %v1897_v58  ;;  %v2208_v25 = vadd.f32 %v2207_v30, %v1899_v46  ;;  %v1603_v34 = vadd.f32 %v1602_v50, %v5178_v15  ;;  %v1902_v24 = vmul.f32 %v5178_v15, %v5178_v15 }
 0x1f8   : > { %v2002_v21 = vadd.f32 %v2001_v18, %v1900_v0  ;;  %v1534_v17 = vadd.f32 %v1533_v53, %v5183_v9  ;;  %v1901_v26 = vmul.f32 %v5183_v9, %v5183_v9  ;;  %v1672_v38 = vadd.f32 %v1671_v49, %v5185_v37 }
 0x1f9   : > { %v2140_v45 = vadd.f32 %v2139_v1, %v1902_v24  ;;  %v1903_v33 = vmul.f32 %v5185_v37, %v5185_v37 }
 0x1fa   : > { %v2071_v10 = vadd.f32 %v2070_v16, %v1901_v26  ;;  %v5196_v30 = vpop.f32.mrb[104].mxu0  ;;  %v5198_v50 = vpop.f32.mrb[104].mxu1 }
 0x1fb   : > { %v2209_v27 = vadd.f32 %v2208_v25, %v1903_v33  ;;  %8300 = vst [vmem:[#allocation183_spill] sm:$0xff] %v5196_v30  ;;  %8301 = vst [vmem:[#allocation184_spill] sm:$0xff] %v5198_v50  ;;  %v1466_v58 = vadd.f32 %v1465_v59, %v5196_v30  ;;  %v1904_v0 = vmul.f32 %v5196_v30, %v5196_v30  ;;  %v5206_v24 = vpop.f32.mrb[105].mxu0  ;;  %v5208_v46 = vpop.f32.mrb[105].mxu1 }
 0x1fc   : > { %v1604_v53 = vadd.f32 %v1603_v34, %v5198_v50  ;;  %v1906_v49 = vmul.f32 %v5198_v50, %v5198_v50  ;;  %8302 = vst [vmem:[#allocation185_spill] sm:$0xff] %v5206_v24  ;;  %8303 = vst [vmem:[#allocation186_spill] sm:$0xff] %v5208_v46  ;;  %v1535_v16 = vadd.f32 %v1534_v17, %v5206_v24  ;;  %v5216_v25 = vpop.f32.mrb[106].mxu0  ;;  %v5218_v34 = vpop.f32.mrb[106].mxu1 }
 0x1fd   : > { %v1905_v18 = vmul.f32 %v5206_v24, %v5206_v24  ;;  %v1673_v1 = vadd.f32 %v1672_v38, %v5208_v46  ;;  %v1907_v59 = vmul.f32 %v5208_v46, %v5208_v46  ;;  %8304 = vst [vmem:[#allocation187_spill] sm:$0xff] %v5216_v25  ;;  %8305 = vst [vmem:[#allocation188_spill] sm:$0xff] %v5218_v34  ;;  %v5223_v17 = vpop.f32.mrb[107].mxu0  ;;  %v5225_v37 = vpop.f32.mrb[107].mxu1 }
 0x1fe   : > { %v2003_v26 = vadd.f32 %v2002_v21, %v1904_v0  ;;  %v2141_v33 = vadd.f32 %v2140_v45, %v1906_v49  ;;  %v1467_v50 = vadd.f32 %v1466_v58, %v5216_v25  ;;  %v1908_v30 = vmul.f32 %v5216_v25, %v5216_v25  ;;  %8306 = vst [vmem:[#allocation189_spill] sm:$0xff] %v5223_v17 }
 0x1ff   : > { %8307 = vst [vmem:[#allocation190_spill] sm:$0xff] %v5225_v37  ;;  %v2072_v24 = vadd.f32 %v2071_v10, %v1905_v18  ;;  %v2210_v38 = vadd.f32 %v2209_v27, %v1907_v59  ;;  %v1605_v15 = vadd.f32 %v1604_v53, %v5218_v34  ;;  %v1910_v46 = vmul.f32 %v5218_v34, %v5218_v34 }
 0x200   : > { %v2004_v9 = vadd.f32 %v2003_v26, %v1908_v30  ;;  %v1536_v21 = vadd.f32 %v1535_v16, %v5223_v17  ;;  %v1909_v45 = vmul.f32 %v5223_v17, %v5223_v17  ;;  %v1674_v58 = vadd.f32 %v1673_v1, %v5225_v37 }
 0x201   : > { %v2142_v0 = vadd.f32 %v2141_v33, %v1910_v46  ;;  %v1911_v49 = vmul.f32 %v5225_v37, %v5225_v37 }
 0x202   : > { %v2073_v25 = vadd.f32 %v2072_v24, %v1909_v45  ;;  %v5236_v27 = vpop.f32.mrb[108].mxu0  ;;  %v5238_v53 = vpop.f32.mrb[108].mxu1 }
 0x203   : > { %v2211_v10 = vadd.f32 %v2210_v38, %v1911_v49  ;;  %8308 = vst [vmem:[#allocation191_spill] sm:$0xff] %v5236_v27  ;;  %8309 = vst [vmem:[#allocation192_spill] sm:$0xff] %v5238_v53  ;;  %v1468_v18 = vadd.f32 %v1467_v50, %v5236_v27  ;;  %v1912_v30 = vmul.f32 %v5236_v27, %v5236_v27  ;;  %v5246_v46 = vpop.f32.mrb[109].mxu0  ;;  %v5248_v59 = vpop.f32.mrb[109].mxu1 }
 0x204   : > { %v1606_v16 = vadd.f32 %v1605_v15, %v5238_v53  ;;  %v1914_v1 = vmul.f32 %v5238_v53, %v5238_v53  ;;  %8310 = vst [vmem:[#allocation193_spill] sm:$0xff] %v5246_v46  ;;  %8311 = vst [vmem:[#allocation194_spill] sm:$0xff] %v5248_v59  ;;  %v1537_v24 = vadd.f32 %v1536_v21, %v5246_v46  ;;  %v5256_v38 = vpop.f32.mrb[110].mxu0  ;;  %v5258_v15 = vpop.f32.mrb[110].mxu1 }
 0x205   : > { %v1913_v26 = vmul.f32 %v5246_v46, %v5246_v46  ;;  %v1675_v33 = vadd.f32 %v1674_v58, %v5248_v59  ;;  %v1915_v50 = vmul.f32 %v5248_v59, %v5248_v59  ;;  %8312 = vst [vmem:[#allocation195_spill] sm:$0xff] %v5256_v38  ;;  %8313 = vst [vmem:[#allocation196_spill] sm:$0xff] %v5258_v15  ;;  %v5263_v21 = vpop.f32.mrb[111].mxu0  ;;  %v5265_v37 = vpop.f32.mrb[111].mxu1 }
 0x206   : > { %v2005_v45 = vadd.f32 %v2004_v9, %v1912_v30  ;;  %v2143_v49 = vadd.f32 %v2142_v0, %v1914_v1  ;;  %v1469_v53 = vadd.f32 %v1468_v18, %v5256_v38  ;;  %v1916_v27 = vmul.f32 %v5256_v38, %v5256_v38  ;;  %8314 = vst [vmem:[#allocation197_spill] sm:$0xff] %v5263_v21 }
 0x207   : > { %8315 = vst [vmem:[#allocation198_spill] sm:$0xff] %v5265_v37  ;;  %v2074_v46 = vadd.f32 %v2073_v25, %v1913_v26  ;;  %v2212_v58 = vadd.f32 %v2211_v10, %v1915_v50  ;;  %v1607_v34 = vadd.f32 %v1606_v16, %v5258_v15  ;;  %v1918_v59 = vmul.f32 %v5258_v15, %v5258_v15 }
 0x208   : > { %v2006_v17 = vadd.f32 %v2005_v45, %v1916_v27  ;;  %v1538_v9 = vadd.f32 %v1537_v24, %v5263_v21  ;;  %v1917_v0 = vmul.f32 %v5263_v21, %v5263_v21  ;;  %v1676_v18 = vadd.f32 %v1675_v33, %v5265_v37 }
 0x209   : > { %v2144_v30 = vadd.f32 %v2143_v49, %v1918_v59  ;;  %v1919_v1 = vmul.f32 %v5265_v37, %v5265_v37 }
 0x20a   : > { %v2075_v38 = vadd.f32 %v2074_v46, %v1917_v0  ;;  %v5276_v10 = vpop.f32.mrb[112].mxu0 }
 0x20b   : > { %v2213_v25 = vadd.f32 %v2212_v58, %v1919_v1  ;;  %8316 = vst [vmem:[#allocation199_spill] sm:$0xff] %v5276_v10  ;;  %v1470_v16 = vadd.f32 %v1469_v53, %v5276_v10  ;;  %v1920_v27 = vmul.f32 %v5276_v10, %v5276_v10  ;;  %v5281_v26 = vpop.f32.mrb[112].mxu1  ;;  %v5283_v24 = vpop.f32.mrb[113].mxu0 }
 0x20c   : > { %8317 = vst [vmem:[#allocation200_spill] sm:$0xff] %v5281_v26  ;;  %8318 = vst [vmem:[#allocation201_spill] sm:$0xff] %v5283_v24  ;;  %v1608_v50 = vadd.f32 %v1607_v34, %v5281_v26  ;;  %v1922_v59 = vmul.f32 %v5281_v26, %v5281_v26  ;;  %v1539_v33 = vadd.f32 %v1538_v9, %v5283_v24  ;;  %v5291_v45 = vpop.f32.mrb[113].mxu1  ;;  %v5293_v53 = vpop.f32.mrb[114].mxu0 }
 0x20d   : > { %v1921_v46 = vmul.f32 %v5283_v24, %v5283_v24  ;;  %8319 = vst [vmem:[#allocation202_spill] sm:$0xff] %v5291_v45  ;;  %8320 = vst [vmem:[#allocation203_spill] sm:$0xff] %v5293_v53  ;;  %v2007_v49 = vadd.f32 %v2006_v17, %v1920_v27  ;;  %v1677_v58 = vadd.f32 %v1676_v18, %v5291_v45  ;;  %v5299_v1 = vpop.f32.mrb[114].mxu1  ;;  %v5301_v26 = vpop.f32.mrb[115].mxu0 }
 0x20e   : > { %v1923_v0 = vmul.f32 %v5291_v45, %v5291_v45  ;;  %v1471_v34 = vadd.f32 %v1470_v16, %v5293_v53  ;;  %8321 = vst [vmem:[#allocation204_spill] sm:$0xff] %v5299_v1  ;;  %8322 = vst [vmem:[#allocation205_spill] sm:$0xff] %v5301_v26  ;;  %v2145_v9 = vadd.f32 %v2144_v30, %v1922_v59  ;;  %v5306_v15 = vpop.f32.mrb[115].mxu1 }
 0x20f   : > { %v2076_v10 = vadd.f32 %v2075_v38, %v1921_v46  ;;  %v1924_v24 = vmul.f32 %v5293_v53, %v5293_v53  ;;  %v1609_v37 = vadd.f32 %v1608_v50, %v5299_v1  ;;  %8323 = vst [vmem:[#allocation206_spill] sm:$0xff] %v5306_v15  ;;  %v1926_v18 = vmul.f32 %v5299_v1, %v5299_v1 }
 0x210   : > { %v2214_v17 = vadd.f32 %v2213_v25, %v1923_v0  ;;  %v1540_v27 = vadd.f32 %v1539_v33, %v5301_v26  ;;  %v1925_v16 = vmul.f32 %v5301_v26, %v5301_v26  ;;  %v1678_v30 = vadd.f32 %v1677_v58, %v5306_v15 }
 0x211   : > { %v2008_v45 = vadd.f32 %v2007_v49, %v1924_v24  ;;  %v1927_v38 = vmul.f32 %v5306_v15, %v5306_v15  ;;  %v2146_v59 = vadd.f32 %v2145_v9, %v1926_v18 }
 0x212   : > { %v2077_v46 = vadd.f32 %v2076_v10, %v1925_v16  ;;  %v5316_v53 = vpop.f32.mrb[116].mxu0 }
 0x213   : > { %v2215_v50 = vadd.f32 %v2214_v17, %v1927_v38  ;;  %8324 = vst [vmem:[#allocation207_spill] sm:$0xff] %v5316_v53  ;;  %v1472_v25 = vadd.f32 %v1471_v34, %v5316_v53  ;;  %v1928_v0 = vmul.f32 %v5316_v53, %v5316_v53  ;;  %v5321_v33 = vpop.f32.mrb[116].mxu1  ;;  %v5323_v1 = vpop.f32.mrb[117].mxu0 }
 0x214   : > { %8325 = vst [vmem:[#allocation208_spill] sm:$0xff] %v5321_v33  ;;  %8326 = vst [vmem:[#allocation209_spill] sm:$0xff] %v5323_v1  ;;  %v1610_v24 = vadd.f32 %v1609_v37, %v5321_v33  ;;  %v1930_v49 = vmul.f32 %v5321_v33, %v5321_v33  ;;  %v1541_v58 = vadd.f32 %v1540_v27, %v5323_v1  ;;  %v5331_v9 = vpop.f32.mrb[117].mxu1  ;;  %v5333_v34 = vpop.f32.mrb[118].mxu0 }
 0x215   : > { %v1929_v10 = vmul.f32 %v5323_v1, %v5323_v1  ;;  %8327 = vst [vmem:[#allocation210_spill] sm:$0xff] %v5331_v9  ;;  %8328 = vst [vmem:[#allocation211_spill] sm:$0xff] %v5333_v34  ;;  %v2009_v17 = vadd.f32 %v2008_v45, %v1928_v0  ;;  %v1679_v18 = vadd.f32 %v1678_v30, %v5331_v9  ;;  %v5339_v38 = vpop.f32.mrb[118].mxu1  ;;  %v5341_v33 = vpop.f32.mrb[119].mxu0 }
 0x216   : > { %v1931_v16 = vmul.f32 %v5331_v9, %v5331_v9  ;;  %v1473_v37 = vadd.f32 %v1472_v25, %v5333_v34  ;;  %8329 = vst [vmem:[#allocation212_spill] sm:$0xff] %v5339_v38  ;;  %8330 = vst [vmem:[#allocation213_spill] sm:$0xff] %v5341_v33  ;;  %v2147_v27 = vadd.f32 %v2146_v59, %v1930_v49  ;;  %v5346_v26 = vpop.f32.mrb[119].mxu1 }
 0x217   : > { %v2078_v53 = vadd.f32 %v2077_v46, %v1929_v10  ;;  %v1932_v1 = vmul.f32 %v5333_v34, %v5333_v34  ;;  %v1611_v15 = vadd.f32 %v1610_v24, %v5339_v38  ;;  %8331 = vst [vmem:[#allocation214_spill] sm:$0xff] %v5346_v26  ;;  %v1934_v30 = vmul.f32 %v5339_v38, %v5339_v38 }
 0x218   : > { %v2216_v45 = vadd.f32 %v2215_v50, %v1931_v16  ;;  %v1542_v0 = vadd.f32 %v1541_v58, %v5341_v33  ;;  %v1933_v25 = vmul.f32 %v5341_v33, %v5341_v33  ;;  %v1680_v59 = vadd.f32 %v1679_v18, %v5346_v26 }
 0x219   : > { %v2010_v9 = vadd.f32 %v2009_v17, %v1932_v1  ;;  %v1935_v46 = vmul.f32 %v5346_v26, %v5346_v26  ;;  %v2148_v49 = vadd.f32 %v2147_v27, %v1934_v30 }
 0x21a   : > { %v2079_v10 = vadd.f32 %v2078_v53, %v1933_v25  ;;  %v5356_v34 = vpop.f32.mrb[120].mxu0 }
 0x21b   : > { %v2217_v24 = vadd.f32 %v2216_v45, %v1935_v46  ;;  %8332 = vst [vmem:[#allocation215_spill] sm:$0xff] %v5356_v34  ;;  %v1474_v50 = vadd.f32 %v1473_v37, %v5356_v34  ;;  %v1936_v16 = vmul.f32 %v5356_v34, %v5356_v34  ;;  %v5361_v58 = vpop.f32.mrb[120].mxu1  ;;  %v5363_v38 = vpop.f32.mrb[121].mxu0 }
 0x21c   : > { %8333 = vst [vmem:[#allocation216_spill] sm:$0xff] %v5361_v58  ;;  %8334 = vst [vmem:[#allocation217_spill] sm:$0xff] %v5363_v38  ;;  %v1612_v1 = vadd.f32 %v1611_v15, %v5361_v58  ;;  %v1938_v17 = vmul.f32 %v5361_v58, %v5361_v58  ;;  %v1543_v18 = vadd.f32 %v1542_v0, %v5363_v38  ;;  %v5371_v27 = vpop.f32.mrb[121].mxu1  ;;  %v5373_v37 = vpop.f32.mrb[122].mxu0 }
 0x21d   : > { %v1937_v53 = vmul.f32 %v5363_v38, %v5363_v38  ;;  %8335 = vst [vmem:[#allocation218_spill] sm:$0xff] %v5371_v27  ;;  %8336 = vst [vmem:[#allocation219_spill] sm:$0xff] %v5373_v37  ;;  %v2011_v45 = vadd.f32 %v2010_v9, %v1936_v16  ;;  %v1681_v30 = vadd.f32 %v1680_v59, %v5371_v27  ;;  %v5379_v46 = vpop.f32.mrb[122].mxu1  ;;  %v5381_v58 = vpop.f32.mrb[123].mxu0 }
 0x21e   : > { %v1939_v25 = vmul.f32 %v5371_v27, %v5371_v27  ;;  %v1475_v15 = vadd.f32 %v1474_v50, %v5373_v37  ;;  %8337 = vst [vmem:[#allocation220_spill] sm:$0xff] %v5379_v46  ;;  %8338 = vst [vmem:[#allocation221_spill] sm:$0xff] %v5381_v58  ;;  %v2149_v0 = vadd.f32 %v2148_v49, %v1938_v17  ;;  %v5386_v33 = vpop.f32.mrb[123].mxu1 }
 0x21f   : > { %v2080_v34 = vadd.f32 %v2079_v10, %v1937_v53  ;;  %v1940_v38 = vmul.f32 %v5373_v37, %v5373_v37  ;;  %v1613_v26 = vadd.f32 %v1612_v1, %v5379_v46  ;;  %8339 = vst [vmem:[#allocation222_spill] sm:$0xff] %v5386_v33  ;;  %v1942_v59 = vmul.f32 %v5379_v46, %v5379_v46 }
 0x220   : > { %v2218_v9 = vadd.f32 %v2217_v24, %v1939_v25  ;;  %v1544_v16 = vadd.f32 %v1543_v18, %v5381_v58  ;;  %v1941_v50 = vmul.f32 %v5381_v58, %v5381_v58  ;;  %v1682_v49 = vadd.f32 %v1681_v30, %v5386_v33 }
 0x221   : > { %v2012_v27 = vadd.f32 %v2011_v45, %v1940_v38  ;;  %v1943_v10 = vmul.f32 %v5386_v33, %v5386_v33  ;;  %v2150_v17 = vadd.f32 %v2149_v0, %v1942_v59 }
 0x222   : > { %v2081_v53 = vadd.f32 %v2080_v34, %v1941_v50  ;;  %v5396_v37 = vpop.f32.mrb[124].mxu0 }
 0x223   : > { %v2219_v1 = vadd.f32 %v2218_v9, %v1943_v10  ;;  %8340 = vst [vmem:[#allocation223_spill] sm:$0xff] %v5396_v37  ;;  %v1476_v24 = vadd.f32 %v1475_v15, %v5396_v37  ;;  %v1944_v25 = vmul.f32 %v5396_v37, %v5396_v37  ;;  %v5401_v18 = vpop.f32.mrb[124].mxu1  ;;  %v5403_v46 = vpop.f32.mrb[125].mxu0 }
 0x224   : > { %8341 = vst [vmem:[#allocation224_spill] sm:$0xff] %v5401_v18  ;;  %8342 = vst [vmem:[#allocation225_spill] sm:$0xff] %v5403_v46  ;;  %v1614_v38 = vadd.f32 %v1613_v26, %v5401_v18  ;;  %v1946_v45 = vmul.f32 %v5401_v18, %v5401_v18  ;;  %v1545_v30 = vadd.f32 %v1544_v16, %v5403_v46  ;;  %v5411_v0 = vpop.f32.mrb[125].mxu1  ;;  %v5413_v15 = vpop.f32.mrb[126].mxu0 }
 0x225   : > { %v1945_v34 = vmul.f32 %v5403_v46, %v5403_v46  ;;  %8343 = vst [vmem:[#allocation226_spill] sm:$0xff] %v5411_v0  ;;  %8344 = vst [vmem:[#allocation227_spill] sm:$0xff] %v5413_v15  ;;  %v2013_v9 = vadd.f32 %v2012_v27, %v1944_v25  ;;  %v1683_v59 = vadd.f32 %v1682_v49, %v5411_v0  ;;  %v5419_v10 = vpop.f32.mrb[126].mxu1  ;;  %v5421_v18 = vpop.f32.mrb[127].mxu0 }
 0x226   : > { %v1947_v50 = vmul.f32 %v5411_v0, %v5411_v0  ;;  %v1477_v26 = vadd.f32 %v1476_v24, %v5413_v15  ;;  %8345 = vst [vmem:[#allocation228_spill] sm:$0xff] %v5419_v10  ;;  %8346 = vst [vmem:[#allocation229_spill] sm:$0xff] %v5421_v18  ;;  %v2151_v16 = vadd.f32 %v2150_v17, %v1946_v45  ;;  %v5426_v58 = vpop.f32.mrb[127].mxu1 }
 0x227   : > { %v2082_v37 = vadd.f32 %v2081_v53, %v1945_v34  ;;  %v1948_v46 = vmul.f32 %v5413_v15, %v5413_v15  ;;  %v1615_v33 = vadd.f32 %v1614_v38, %v5419_v10  ;;  %8347 = vst [vmem:[#allocation230_spill] sm:$0xff] %v5426_v58  ;;  %v1950_v25 = vmul.f32 %v5419_v10, %v5419_v10 }
 0x228   : > { %v2220_v27 = vadd.f32 %v2219_v1, %v1947_v50  ;;  %v1478_v49 = vrot.slane %v1477_v26, 4  ;;  %v1546_v24 = vadd.f32 %v1545_v30, %v5421_v18  ;;  %v1949_v17 = vmul.f32 %v5421_v18, %v5421_v18 }
 0x229   : > { %v2014_v0 = vadd.f32 %v2013_v9, %v1948_v46  ;;  %v1616_v21 = vrot.slane %v1615_v33, 4  ;;  %v1684_v53 = vadd.f32 %v1683_v59, %v5426_v58  ;;  %v2152_v34 = vadd.f32 %v2151_v16, %v1950_v25 }
 0x22a   : > { %v1479_v45 = vadd.f32 %v1478_v49, %v1477_v26  ;;  %v1547_v15 = vrot.slane %v1546_v24, 4  ;;  %v1951_v38 = vmul.f32 %v5426_v58, %v5426_v58  ;;  %v2083_v52 = vadd.f32 %v2082_v37, %v1949_v17 }
 0x22b   : > { %v2015_v1 = vrot.slane %v2014_v0, 4  ;;  %v1617_v50 = vadd.f32 %v1616_v21, %v1615_v33  ;;  %v1685_v4 = vrot.slane %v1684_v53, 4  ;;  %v2153_v51 = vrot.slane %v2152_v34, 4 }
 0x22c   : > { %v1480_v10 = vrot.slane %v1479_v45, 2  ;;  %v1548_v30 = vadd.f32 %v1547_v15, %v1546_v24  ;;  %v2221_v46 = vadd.f32 %v2220_v27, %v1951_v38  ;;  %v2084_v32 = vrot.slane %v2083_v52, 4 }
 0x22d   : > { %v2016_v9 = vadd.f32 %v2015_v1, %v2014_v0  ;;  %v1618_v44 = vrot.slane %v1617_v50, 2  ;;  %v1686_v18 = vadd.f32 %v1685_v4, %v1684_v53  ;;  %v2154_v59 = vadd.f32 %v2153_v51, %v2152_v34 }
 0x22e   : > { %v1481_v43 = vadd.f32 %v1480_v10, %v1479_v45  ;;  %v1549_v26 = vrot.slane %v1548_v30, 2  ;;  %v2222_v16 = vrot.slane %v2221_v46, 4  ;;  %v2085_v31 = vadd.f32 %v2084_v32, %v2083_v52 }
 0x22f   : > { %v2017_v49 = vrot.slane %v2016_v9, 2  ;;  %v1619_v25 = vadd.f32 %v1618_v44, %v1617_v50  ;;  %v1687_v58 = vrot.slane %v1686_v18, 2  ;;  %v2155_v21 = vrot.slane %v2154_v59, 2 }
 0x230   : > { %v1482_v8 = vrot.slane %v1481_v43, 1  ;;  %v1550_v33 = vadd.f32 %v1549_v26, %v1548_v30  ;;  %v2223_v37 = vadd.f32 %v2222_v16, %v2221_v46  ;;  %v2086_v15 = vrot.slane %v2085_v31, 2 }
 0x231   : > { %v2018_v17 = vadd.f32 %v2017_v49, %v2016_v9  ;;  %v1620_v57 = vrot.slane %v1619_v25, 1  ;;  %v1688_v27 = vadd.f32 %v1687_v58, %v1686_v18  ;;  %v2156_v24 = vadd.f32 %v2155_v21, %v2154_v59 }
 0x232   : > { %v1483_v0 = vadd.f32 %v1482_v8, %v1481_v43  ;;  %v1551_v38 = vrot.slane %v1550_v33, 1  ;;  %v2224_v4 = vrot.slane %v2223_v37, 2  ;;  %v2087_v53 = vadd.f32 %v2086_v15, %v2085_v31 }
 0x233   : > { %v2019_v10 = vrot.slane %v2018_v17, 1  ;;  %v1621_v51 = vadd.f32 %v1620_v57, %v1619_v25  ;;  %v1689_v45 = vrot.slane %v1688_v27, 1  ;;  %v2157_v32 = vrot.slane %v2156_v24, 1 }
 0x234   : > { %v5436_v34 = vmul.f32 0.001953125, %v1483_v0  ;;  %v1552_v44 = vadd.f32 %v1551_v38, %v1550_v33  ;;  %v2225_v52 = vadd.f32 %v2224_v4, %v2223_v37  ;;  %v2088_v30 = vrot.slane %v2087_v53, 1 }
 0x235   : > { %v2020_v1 = vadd.f32 %v2019_v10, %v2018_v17  ;;  %v5438_v50 = vmul.f32 0.001953125, %v1621_v51  ;;  %v1690_v46 = vadd.f32 %v1689_v45, %v1688_v27  ;;  %v2158_v43 = vadd.f32 %v2157_v32, %v2156_v24 }
 0x236   : > { %v2232_v8 = vmul.f32 %v5436_v34, %v5436_v34  ;;  %v1693_v58 = vmul.f32 0.001953125, %v1552_v44  ;;  %v2226_v18 = vrot.slane %v2225_v52, 1  ;;  %v2089_v31 = vadd.f32 %v2088_v30, %v2087_v53 }
 0x237   : > { %v2228_v9 = vmul.f32 0.001953125, %v2020_v1  ;;  %v2234_v57 = vmul.f32 %v5438_v50, %v5438_v50  ;;  %v1695_v59 = vmul.f32 0.001953125, %v1690_v46  ;;  %v2230_v26 = vmul.f32 0.001953125, %v2158_v43 }
 0x238   : > { %v2233_v16 = vmul.f32 %v1693_v58, %v1693_v58  ;;  %v2227_v49 = vadd.f32 %v2226_v18, %v2225_v52  ;;  %v2229_v21 = vmul.f32 0.001953125, %v2089_v31  ;;  %v3848_v32 = vmov 1966171168  }
 0x239   : > { %v2236_v25 = vsub.f32 %v2228_v9, %v2232_v8  ;;  %v2235_v33 = vmul.f32 %v1695_v59, %v1695_v59  ;;  %v2238_v37 = vsub.f32 %v2230_v26, %v2234_v57  ;;  %v2259_v44 = vunpack.c.l.s4 %v3848_v32 }
 0x23a   : > { %v2231_v17 = vmul.f32 0.001953125, %v2227_v49  ;;  %v2237_v27 = vsub.f32 %v2229_v21, %v2233_v16  ;;  %v2261_v52 = vlaneseq  ;;  %v1413_v21 = vld [vmem:[%s245_s18] sm:$0xf] }
 0x23b   : > { %v2240_v15 = vmax.f32 %v2236_v25, 0.0  ;;  %v2242_v0 = vmax.f32 %v2238_v37, 0.0  ;;  %v2260_v1 = vunpack.c.0.s8 %v2259_v44 }
 0x23c   : > { %v2239_v24 = vsub.f32 %v2231_v17, %v2235_v33  ;;  %v2241_v4 = vmax.f32 %v2237_v27, 0.0  ;;  %v5446_v30 = vshrl.u32 %v2261_v52, 7 }
 0x23d   : > { %v2244_v38 = vadd.f32 1e-05, %v2240_v15  ;;  %v2246_v10 = vadd.f32 1e-05, %v2242_v0 }
 0x23e   : > { %v2243_v51 = vmax.f32 %v2239_v24, 0.0  ;;  %v2245_v53 = vadd.f32 1e-05, %v2241_v4  ;;  %8348 = vst [vmem:[#allocation231_spill] sm:$0xff] %v5446_v30  ;;  %v2263_v43 = vsub.s32 %v2260_v1, %v5446_v30  ;;  %v8107_v25 = vsub.s32 0, %v5446_v30 }
 0x23f   : > { %3769 = vrsqrt.f32 %v2244_v38  ;;  %v8106_v33 = vsub.s32 1, %v5446_v30  ;;  %v8105_v37 = vsub.s32 2, %v5446_v30  ;;  %v8104_v17 = vsub.s32 3, %v5446_v30 }
 0x240   : > { %3771 = vrsqrt.f32 %v2246_v10  ;;  %v2247_v45 = vadd.f32 1e-05, %v2243_v51 }
 0x241   : > { %3773 = vrsqrt.f32 %v2245_v53 }
 0x242   : > { %3775 = vrsqrt.f32 %v2247_v45 }
 0x249   : > { %v3770_v46 = vpop.eup %3769 }
 0x24a   : > { %v3772_v8 = vpop.eup %3771 }
 0x24b   : > { %v3774_v18 = vpop.eup %3773 }
 0x24c   : > { %v3776_v9 = vpop.eup %3775  ;;  %v2256_v57 = vcombine.low %v3770_v46, %v3774_v18  ;;  %v1414_v18 = vld [vmem:[%s250_s14] sm:$0xf] }
 0x24d   : > { %v2257_v31 = vcombine.low %v3772_v8, %v3776_v9 }
 0x24e   : > { %v2264_v26 = vrot.slane %v2256_v57, %v2263_v43 }
 0x24f   : > { %v2271_v16 = vrot.slane %v2257_v31, %v2263_v43 }
 0x251   : > { %v2272_v49 = vcombine.low %v2264_v26, %v2271_v16 }
 0x253   : > { %v2279_v15 = vrot.slane %v2272_v49, %v2263_v43  ;;  %v8353_v49 = vld [vmem:[#allocation8_spill] sm:$0xff] }
 0x255   : > { %v2281_v27 = vmul.f32 %v2279_v15, %v1413_v21  ;;  %v8354_v21 = vld [vmem:[#allocation10_spill] sm:$0xff] }
 0x257   : > { %v5461_v0 = vrot.slane %v2281_v27, %v8107_v25  ;;  %v5465_v24 = vrot.slane %v2281_v27, %v8106_v33  ;;  %v5469_v38 = vrot.slane %v2281_v27, %v8105_v37  ;;  %v5473_v4 = vrot.slane %v2281_v27, %v8104_v17  ;;  %v8355_v27 = vld [vmem:[#allocation11_spill] sm:$0xff]  ;;  %v8370_v17 = vld [vmem:[#allocation25_spill] sm:$0xff]  ;;  %v8372_v37 = vld [vmem:[#allocation24_spill] sm:$0xff] }
 0x258   : > { %v8374_v33 = vld [vmem:[#allocation26_spill] sm:$0xff]  ;;  %v8376_v25 = vld [vmem:[#allocation27_spill] sm:$0xff] }
 0x259   : > { %v2303_v10 = vmul.f32 %v5461_v0, %v5436_v34  ;;  %v2304_v51 = vmul.f32 %v5465_v24, %v1693_v58  ;;  %v2305_v53 = vmul.f32 %v5469_v38, %v5438_v50  ;;  %v2306_v45 = vmul.f32 %v5473_v4, %v1695_v59 }
 0x25a   : > { %v5483_v32 = vmul.f32 %v5461_v0, %v4133_v60  ;;  %v5487_v44 = vmul.f32 %v5465_v24, %v4137_v62  ;;  %v5491_v52 = vmul.f32 %v5469_v38, %v4135_v61  ;;  %v5495_v58 = vmul.f32 %v5473_v4, %v4139_v63 }
 0x25b   : > { %v2311_v34 = vcombine.low %v2303_v10, %v2304_v51  ;;  %v2312_v1 = vcombine.low %v2305_v53, %v2306_v45  ;;  %v5499_v50 = vmul.f32 %v5461_v0, %v4152_v6  ;;  %v5503_v60 = vmul.f32 %v5465_v24, %v4164_v12  ;;  %v8356_v51 = vld [vmem:[#allocation13_spill] sm:$0xff]  ;;  %v8357_v45 = vld [vmem:[#allocation12_spill] sm:$0xff] }
 0x25c   : > { %v5507_v62 = vmul.f32 %v5469_v38, %v4154_v7  ;;  %v5511_v61 = vmul.f32 %v5473_v4, %v4166_v13  ;;  %v5515_v63 = vmul.f32 %v5461_v0, %v4178_v22  ;;  %v5523_v12 = vmul.f32 %v5465_v24, %v4188_v28 }
 0x25d   : > { %v2319_v6 = vrot.slane %v2311_v34, %v2263_v43  ;;  %v2326_v59 = vrot.slane %v2312_v1, %v2263_v43  ;;  %v5527_v7 = vmul.f32 %v5469_v38, %v4180_v23  ;;  %v5531_v13 = vmul.f32 %v5473_v4, %v4190_v29  ;;  %v8358_v1 = vld [vmem:[#allocation14_spill] sm:$0xff] }
 0x25e   : > { %v5535_v22 = vmul.f32 %v5461_v0, %v4201_v35  ;;  %v5539_v46 = vmul.f32 %v5465_v24, %v4208_v41  ;;  %v5543_v28 = vmul.f32 %v5469_v38, %v4203_v36  ;;  %v5547_v23 = vmul.f32 %v5473_v4, %v4210_v42 }
 0x25f   : > { %v2327_v8 = vcombine.low %v2319_v6, %v2326_v59  ;;  %v5551_v29 = vmul.f32 %v5461_v0, %v4223_v55  ;;  %v5555_v35 = vmul.f32 %v5465_v24, %v4233_v2  ;;  %v5559_v41 = vmul.f32 %v5469_v38, %v4225_v56  ;;  %v8359_v59 = vld [vmem:[#allocation15_spill] sm:$0xff] }
 0x260   : > { %v5563_v36 = vmul.f32 %v5473_v4, %v4235_v3  ;;  %v5567_v42 = vmul.f32 %v5461_v0, %v4246_v11  ;;  %v5571_v55 = vmul.f32 %v5465_v24, %v4253_v19  ;;  %v5575_v2 = vmul.f32 %v5469_v38, %v4248_v14 }
 0x261   : > { %v2334_v9 = vrot.slane %v2327_v8, %v2263_v43  ;;  %v5579_v56 = vmul.f32 %v5473_v4, %v4255_v20  ;;  %v5583_v3 = vmul.f32 %v5461_v0, %v4268_v39  ;;  %v5587_v11 = vmul.f32 %v5465_v24, %v4278_v47  ;;  %v8349_v47 = vld [vmem:[#allocation5_spill] sm:$0xff] }
 0x262   : > { %v5591_v19 = vmul.f32 %v5469_v38, %v4270_v40  ;;  %v5595_v14 = vmul.f32 %v5473_v4, %v4280_v48  ;;  %v5599_v20 = vmul.f32 %v5461_v0, %v4291_v54  ;;  %v5605_v39 = vmul.f32 %v5465_v24, %v4298_v5  ;;  %v8350_v40 = vld [vmem:[#allocation6_spill] sm:$0xff]  ;;  %v8351_v48 = vld [vmem:[#allocation7_spill] sm:$0xff]  ;;  %v8352_v54 = vld [vmem:[#allocation9_spill] sm:$0xff] }
 0x263   : > { %v5601_v43 = vsub.f32 %v1414_v18, %v2334_v9  ;;  %v5609_v57 = vmul.f32 %v5469_v38, %v8349_v47  ;;  %v5613_v31 = vmul.f32 %v5473_v4, %v8350_v40  ;;  %v5617_v26 = vmul.f32 %v5461_v0, %v8351_v48  ;;  %v8360_v18 = vld [vmem:[#allocation17_spill] sm:$0xff]  ;;  %v8361_v47 = vld [vmem:[#allocation16_spill] sm:$0xff]  ;;  %v8362_v48 = vld [vmem:[#allocation18_spill] sm:$0xff] }
 0x264   : > { %v5621_v16 = vmul.f32 %v5465_v24, %v8352_v54  ;;  %v5625_v5 = vmul.f32 %v5469_v38, %v8353_v49  ;;  %v5629_v15 = vmul.f32 %v5473_v4, %v8354_v21  ;;  %v5633_v10 = vmul.f32 %v5461_v0, %v8355_v27  ;;  %v8363_v49 = vld [vmem:[#allocation19_spill] sm:$0xff]  ;;  %v8364_v27 = vld [vmem:[#allocation21_spill] sm:$0xff] }
 0x265   : > { %v5637_v53 = vmul.f32 %v5465_v24, %v8356_v51  ;;  %v5641_v34 = vmul.f32 %v5469_v38, %v8357_v45  ;;  %v5645_v6 = vmul.f32 %v5473_v4, %v8358_v1  ;;  %v5649_v8 = vmul.f32 %v5461_v0, %v8359_v59  ;;  %v8365_v45 = vld [vmem:[#allocation20_spill] sm:$0xff]  ;;  %v8366_v59 = vld [vmem:[#allocation22_spill] sm:$0xff] }
 0x266   : > { %v5653_v9 = vmul.f32 %v5465_v24, %v8360_v18  ;;  %v5657_v40 = vmul.f32 %v5469_v38, %v8361_v47  ;;  %v5661_v54 = vmul.f32 %v5473_v4, %v8362_v48  ;;  %v5665_v21 = vmul.f32 %v5461_v0, %v8363_v49  ;;  %v8368_v47 = vld [vmem:[#allocation23_spill] sm:$0xff] }
 0x267   : > { %v5669_v51 = vmul.f32 %v5465_v24, %v8364_v27  ;;  %v5673_v1 = vmul.f32 %v5469_v38, %v8365_v45  ;;  %v5677_v18 = vmul.f32 %v5473_v4, %v8366_v59  ;;  %v5681_v48 = vmul.f32 %v5461_v0, %v8368_v47 }
 0x268   : > { %v5685_v49 = vmul.f32 %v5465_v24, %v8370_v17  ;;  %v5689_v27 = vmul.f32 %v5469_v38, %v8372_v37  ;;  %v5693_v45 = vmul.f32 %v5473_v4, %v8374_v33  ;;  %v5697_v59 = vmul.f32 %v5461_v0, %v8376_v25 }
 0x269   : > { %8367 = vst [vmem:[#allocation5_spill] sm:$0xff] %v5677_v18  ;;  %8369 = vst [vmem:[#allocation6_spill] sm:$0xff] %v5681_v48  ;;  %v8378_v18 = vld [vmem:[#allocation29_spill] sm:$0xff]  ;;  %v8380_v48 = vld [vmem:[#allocation28_spill] sm:$0xff] }
 0x26a   : > { %8371 = vst [vmem:[#allocation7_spill] sm:$0xff] %v5685_v49  ;;  %8373 = vst [vmem:[#allocation9_spill] sm:$0xff] %v5689_v27  ;;  %v5701_v47 = vmul.f32 %v5465_v24, %v8378_v18  ;;  %v5705_v17 = vmul.f32 %v5469_v38, %v8380_v48  ;;  %v8382_v49 = vld [vmem:[#allocation30_spill] sm:$0xff]  ;;  %v8384_v27 = vld [vmem:[#allocation31_spill] sm:$0xff] }
 0x26b   : > { %8375 = vst [vmem:[#allocation8_spill] sm:$0xff] %v5693_v45  ;;  %8377 = vst [vmem:[#allocation10_spill] sm:$0xff] %v5697_v59  ;;  %v5709_v37 = vmul.f32 %v5473_v4, %v8382_v49  ;;  %v5713_v33 = vmul.f32 %v5461_v0, %v8384_v27  ;;  %v8386_v45 = vld [vmem:[#allocation33_spill] sm:$0xff]  ;;  %v8388_v59 = vld [vmem:[#allocation32_spill] sm:$0xff] }
 0x26c   : > { %8379 = vst [vmem:[#allocation11_spill] sm:$0xff] %v5701_v47  ;;  %8381 = vst [vmem:[#allocation13_spill] sm:$0xff] %v5705_v17  ;;  %v5717_v25 = vmul.f32 %v5465_v24, %v8386_v45  ;;  %v5721_v18 = vmul.f32 %v5469_v38, %v8388_v59  ;;  %v8390_v47 = vld [vmem:[#allocation34_spill] sm:$0xff]  ;;  %v8392_v17 = vld [vmem:[#allocation35_spill] sm:$0xff] }
 0x26d   : > { %8383 = vst [vmem:[#allocation12_spill] sm:$0xff] %v5709_v37  ;;  %8385 = vst [vmem:[#allocation14_spill] sm:$0xff] %v5713_v33  ;;  %v5725_v48 = vmul.f32 %v5473_v4, %v8390_v47  ;;  %v5729_v49 = vmul.f32 %v5461_v0, %v8392_v17  ;;  %v8394_v37 = vld [vmem:[#allocation37_spill] sm:$0xff]  ;;  %v8396_v33 = vld [vmem:[#allocation36_spill] sm:$0xff] }
 0x26e   : > { %8387 = vst [vmem:[#allocation15_spill] sm:$0xff] %v5717_v25  ;;  %8389 = vst [vmem:[#allocation17_spill] sm:$0xff] %v5721_v18  ;;  %v5733_v27 = vmul.f32 %v5465_v24, %v8394_v37  ;;  %v5737_v45 = vmul.f32 %v5469_v38, %v8396_v33  ;;  %v8398_v25 = vld [vmem:[#allocation38_spill] sm:$0xff]  ;;  %v8400_v18 = vld [vmem:[#allocation39_spill] sm:$0xff] }
 0x26f   : > { %8391 = vst [vmem:[#allocation16_spill] sm:$0xff] %v5725_v48  ;;  %8393 = vst [vmem:[#allocation18_spill] sm:$0xff] %v5729_v49  ;;  %v5741_v59 = vmul.f32 %v5473_v4, %v8398_v25  ;;  %v5745_v47 = vmul.f32 %v5461_v0, %v8400_v18  ;;  %v8402_v48 = vld [vmem:[#allocation41_spill] sm:$0xff]  ;;  %v8404_v49 = vld [vmem:[#allocation40_spill] sm:$0xff] }
 0x270   : > { %8395 = vst [vmem:[#allocation19_spill] sm:$0xff] %v5733_v27  ;;  %8397 = vst [vmem:[#allocation21_spill] sm:$0xff] %v5737_v45  ;;  %v5749_v17 = vmul.f32 %v5465_v24, %v8402_v48  ;;  %v5753_v37 = vmul.f32 %v5469_v38, %v8404_v49  ;;  %v8406_v27 = vld [vmem:[#allocation42_spill] sm:$0xff]  ;;  %v8408_v45 = vld [vmem:[#allocation43_spill] sm:$0xff] }
 0x271   : > { %8399 = vst [vmem:[#allocation20_spill] sm:$0xff] %v5741_v59  ;;  %8401 = vst [vmem:[#allocation22_spill] sm:$0xff] %v5745_v47  ;;  %v5757_v33 = vmul.f32 %v5473_v4, %v8406_v27  ;;  %v5761_v25 = vmul.f32 %v5461_v0, %v8408_v45  ;;  %v8410_v59 = vld [vmem:[#allocation45_spill] sm:$0xff]  ;;  %v8412_v47 = vld [vmem:[#allocation44_spill] sm:$0xff] }
 0x272   : > { %8403 = vst [vmem:[#allocation23_spill] sm:$0xff] %v5749_v17  ;;  %8405 = vst [vmem:[#allocation25_spill] sm:$0xff] %v5753_v37  ;;  %v5765_v18 = vmul.f32 %v5465_v24, %v8410_v59  ;;  %v5769_v48 = vmul.f32 %v5469_v38, %v8412_v47  ;;  %v8414_v17 = vld [vmem:[#allocation46_spill] sm:$0xff]  ;;  %v8416_v37 = vld [vmem:[#allocation47_spill] sm:$0xff] }
 0x273   : > { %8407 = vst [vmem:[#allocation24_spill] sm:$0xff] %v5757_v33  ;;  %8409 = vst [vmem:[#allocation26_spill] sm:$0xff] %v5761_v25  ;;  %v5773_v49 = vmul.f32 %v5473_v4, %v8414_v17  ;;  %v5777_v27 = vmul.f32 %v5461_v0, %v8416_v37  ;;  %v8418_v33 = vld [vmem:[#allocation49_spill] sm:$0xff]  ;;  %v8420_v25 = vld [vmem:[#allocation48_spill] sm:$0xff] }
 0x274   : > { %8411 = vst [vmem:[#allocation27_spill] sm:$0xff] %v5765_v18  ;;  %8413 = vst [vmem:[#allocation29_spill] sm:$0xff] %v5769_v48  ;;  %v5781_v45 = vmul.f32 %v5465_v24, %v8418_v33  ;;  %v5785_v59 = vmul.f32 %v5469_v38, %v8420_v25  ;;  %v8422_v18 = vld [vmem:[#allocation50_spill] sm:$0xff]  ;;  %v8424_v48 = vld [vmem:[#allocation51_spill] sm:$0xff] }
 0x275   : > { %8415 = vst [vmem:[#allocation28_spill] sm:$0xff] %v5773_v49  ;;  %8417 = vst [vmem:[#allocation30_spill] sm:$0xff] %v5777_v27  ;;  %v5789_v47 = vmul.f32 %v5473_v4, %v8422_v18  ;;  %v5793_v17 = vmul.f32 %v5461_v0, %v8424_v48  ;;  %v8426_v49 = vld [vmem:[#allocation53_spill] sm:$0xff]  ;;  %v8428_v27 = vld [vmem:[#allocation52_spill] sm:$0xff] }
 0x276   : > { %8419 = vst [vmem:[#allocation31_spill] sm:$0xff] %v5781_v45  ;;  %8421 = vst [vmem:[#allocation33_spill] sm:$0xff] %v5785_v59  ;;  %v5797_v37 = vmul.f32 %v5465_v24, %v8426_v49  ;;  %v5801_v33 = vmul.f32 %v5469_v38, %v8428_v27  ;;  %v8430_v45 = vld [vmem:[#allocation54_spill] sm:$0xff]  ;;  %v8432_v59 = vld [vmem:[#allocation55_spill] sm:$0xff] }
 0x277   : > { %8423 = vst [vmem:[#allocation32_spill] sm:$0xff] %v5789_v47  ;;  %8425 = vst [vmem:[#allocation34_spill] sm:$0xff] %v5793_v17  ;;  %v5805_v25 = vmul.f32 %v5473_v4, %v8430_v45  ;;  %v5809_v18 = vmul.f32 %v5461_v0, %v8432_v59  ;;  %v8434_v47 = vld [vmem:[#allocation57_spill] sm:$0xff]  ;;  %v8436_v17 = vld [vmem:[#allocation56_spill] sm:$0xff] }
 0x278   : > { %8427 = vst [vmem:[#allocation35_spill] sm:$0xff] %v5797_v37  ;;  %8429 = vst [vmem:[#allocation37_spill] sm:$0xff] %v5801_v33  ;;  %v5813_v48 = vmul.f32 %v5465_v24, %v8434_v47  ;;  %v5817_v49 = vmul.f32 %v5469_v38, %v8436_v17  ;;  %v8438_v37 = vld [vmem:[#allocation58_spill] sm:$0xff]  ;;  %v8440_v33 = vld [vmem:[#allocation59_spill] sm:$0xff] }
 0x279   : > { %8431 = vst [vmem:[#allocation36_spill] sm:$0xff] %v5805_v25  ;;  %8433 = vst [vmem:[#allocation38_spill] sm:$0xff] %v5809_v18  ;;  %v5821_v27 = vmul.f32 %v5473_v4, %v8438_v37  ;;  %v5825_v45 = vmul.f32 %v5461_v0, %v8440_v33  ;;  %v8442_v25 = vld [vmem:[#allocation61_spill] sm:$0xff]  ;;  %v8444_v18 = vld [vmem:[#allocation60_spill] sm:$0xff] }
 0x27a   : > { %8435 = vst [vmem:[#allocation39_spill] sm:$0xff] %v5813_v48  ;;  %8437 = vst [vmem:[#allocation41_spill] sm:$0xff] %v5817_v49  ;;  %v5829_v59 = vmul.f32 %v5465_v24, %v8442_v25  ;;  %v5833_v47 = vmul.f32 %v5469_v38, %v8444_v18  ;;  %v8446_v48 = vld [vmem:[#allocation62_spill] sm:$0xff]  ;;  %v8448_v49 = vld [vmem:[#allocation63_spill] sm:$0xff] }
 0x27b   : > { %8439 = vst [vmem:[#allocation40_spill] sm:$0xff] %v5821_v27  ;;  %8441 = vst [vmem:[#allocation42_spill] sm:$0xff] %v5825_v45  ;;  %v5837_v17 = vmul.f32 %v5473_v4, %v8446_v48  ;;  %v5841_v37 = vmul.f32 %v5461_v0, %v8448_v49  ;;  %v8450_v27 = vld [vmem:[#allocation65_spill] sm:$0xff]  ;;  %v8452_v45 = vld [vmem:[#allocation64_spill] sm:$0xff] }
 0x27c   : > { %8443 = vst [vmem:[#allocation43_spill] sm:$0xff] %v5829_v59  ;;  %8445 = vst [vmem:[#allocation45_spill] sm:$0xff] %v5833_v47  ;;  %v5845_v33 = vmul.f32 %v5465_v24, %v8450_v27  ;;  %v5849_v25 = vmul.f32 %v5469_v38, %v8452_v45  ;;  %v8454_v59 = vld [vmem:[#allocation66_spill] sm:$0xff]  ;;  %v8456_v47 = vld [vmem:[#allocation67_spill] sm:$0xff] }
 0x27d   : > { %8447 = vst [vmem:[#allocation44_spill] sm:$0xff] %v5837_v17  ;;  %8449 = vst [vmem:[#allocation46_spill] sm:$0xff] %v5841_v37  ;;  %v5853_v18 = vmul.f32 %v5473_v4, %v8454_v59  ;;  %v5857_v48 = vmul.f32 %v5461_v0, %v8456_v47  ;;  %v8458_v17 = vld [vmem:[#allocation69_spill] sm:$0xff]  ;;  %v8460_v37 = vld [vmem:[#allocation68_spill] sm:$0xff] }
 0x27e   : > { %8451 = vst [vmem:[#allocation47_spill] sm:$0xff] %v5845_v33  ;;  %8453 = vst [vmem:[#allocation49_spill] sm:$0xff] %v5849_v25  ;;  %v5861_v49 = vmul.f32 %v5465_v24, %v8458_v17  ;;  %v5865_v27 = vmul.f32 %v5469_v38, %v8460_v37  ;;  %v8462_v33 = vld [vmem:[#allocation70_spill] sm:$0xff]  ;;  %v8464_v25 = vld [vmem:[#allocation71_spill] sm:$0xff] }
 0x27f   : > { %8455 = vst [vmem:[#allocation48_spill] sm:$0xff] %v5853_v18  ;;  %8457 = vst [vmem:[#allocation50_spill] sm:$0xff] %v5857_v48  ;;  %v5869_v45 = vmul.f32 %v5473_v4, %v8462_v33  ;;  %v5873_v59 = vmul.f32 %v5461_v0, %v8464_v25  ;;  %v8466_v18 = vld [vmem:[#allocation73_spill] sm:$0xff]  ;;  %v8468_v48 = vld [vmem:[#allocation72_spill] sm:$0xff] }
 0x280   : > { %8459 = vst [vmem:[#allocation51_spill] sm:$0xff] %v5861_v49  ;;  %8461 = vst [vmem:[#allocation53_spill] sm:$0xff] %v5865_v27  ;;  %v5877_v47 = vmul.f32 %v5465_v24, %v8466_v18  ;;  %v5881_v17 = vmul.f32 %v5469_v38, %v8468_v48  ;;  %v8470_v49 = vld [vmem:[#allocation74_spill] sm:$0xff]  ;;  %v8472_v27 = vld [vmem:[#allocation75_spill] sm:$0xff] }
 0x281   : > { %8463 = vst [vmem:[#allocation52_spill] sm:$0xff] %v5869_v45  ;;  %8465 = vst [vmem:[#allocation54_spill] sm:$0xff] %v5873_v59  ;;  %v5885_v37 = vmul.f32 %v5473_v4, %v8470_v49  ;;  %v5889_v33 = vmul.f32 %v5461_v0, %v8472_v27  ;;  %v8474_v45 = vld [vmem:[#allocation77_spill] sm:$0xff]  ;;  %v8476_v59 = vld [vmem:[#allocation76_spill] sm:$0xff] }
 0x282   : > { %8467 = vst [vmem:[#allocation55_spill] sm:$0xff] %v5877_v47  ;;  %8469 = vst [vmem:[#allocation57_spill] sm:$0xff] %v5881_v17  ;;  %v5893_v25 = vmul.f32 %v5465_v24, %v8474_v45  ;;  %v5897_v18 = vmul.f32 %v5469_v38, %v8476_v59  ;;  %v8478_v47 = vld [vmem:[#allocation78_spill] sm:$0xff]  ;;  %v8480_v17 = vld [vmem:[#allocation79_spill] sm:$0xff] }
 0x283   : > { %8471 = vst [vmem:[#allocation56_spill] sm:$0xff] %v5885_v37  ;;  %8473 = vst [vmem:[#allocation58_spill] sm:$0xff] %v5889_v33  ;;  %v5901_v48 = vmul.f32 %v5473_v4, %v8478_v47  ;;  %v5905_v49 = vmul.f32 %v5461_v0, %v8480_v17  ;;  %v8482_v37 = vld [vmem:[#allocation81_spill] sm:$0xff]  ;;  %v8484_v33 = vld [vmem:[#allocation80_spill] sm:$0xff] }
 0x284   : > { %8475 = vst [vmem:[#allocation59_spill] sm:$0xff] %v5893_v25  ;;  %8477 = vst [vmem:[#allocation61_spill] sm:$0xff] %v5897_v18  ;;  %v5909_v27 = vmul.f32 %v5465_v24, %v8482_v37  ;;  %v5913_v45 = vmul.f32 %v5469_v38, %v8484_v33  ;;  %v8486_v25 = vld [vmem:[#allocation82_spill] sm:$0xff]  ;;  %v8488_v18 = vld [vmem:[#allocation83_spill] sm:$0xff] }
 0x285   : > { %8479 = vst [vmem:[#allocation60_spill] sm:$0xff] %v5901_v48  ;;  %8481 = vst [vmem:[#allocation62_spill] sm:$0xff] %v5905_v49  ;;  %v5917_v59 = vmul.f32 %v5473_v4, %v8486_v25  ;;  %v5921_v47 = vmul.f32 %v5461_v0, %v8488_v18  ;;  %v8490_v48 = vld [vmem:[#allocation85_spill] sm:$0xff]  ;;  %v8492_v49 = vld [vmem:[#allocation84_spill] sm:$0xff] }
 0x286   : > { %8483 = vst [vmem:[#allocation63_spill] sm:$0xff] %v5909_v27  ;;  %8485 = vst [vmem:[#allocation65_spill] sm:$0xff] %v5913_v45  ;;  %v5925_v17 = vmul.f32 %v5465_v24, %v8490_v48  ;;  %v5929_v37 = vmul.f32 %v5469_v38, %v8492_v49  ;;  %v8494_v27 = vld [vmem:[#allocation86_spill] sm:$0xff]  ;;  %v8496_v45 = vld [vmem:[#allocation87_spill] sm:$0xff] }
 0x287   : > { %8487 = vst [vmem:[#allocation64_spill] sm:$0xff] %v5917_v59  ;;  %8489 = vst [vmem:[#allocation66_spill] sm:$0xff] %v5921_v47  ;;  %v5933_v33 = vmul.f32 %v5473_v4, %v8494_v27  ;;  %v5937_v25 = vmul.f32 %v5461_v0, %v8496_v45  ;;  %v8498_v59 = vld [vmem:[#allocation89_spill] sm:$0xff]  ;;  %v8500_v47 = vld [vmem:[#allocation88_spill] sm:$0xff] }
 0x288   : > { %8491 = vst [vmem:[#allocation67_spill] sm:$0xff] %v5925_v17  ;;  %8493 = vst [vmem:[#allocation69_spill] sm:$0xff] %v5929_v37  ;;  %v5941_v18 = vmul.f32 %v5465_v24, %v8498_v59  ;;  %v5945_v48 = vmul.f32 %v5469_v38, %v8500_v47  ;;  %v8502_v17 = vld [vmem:[#allocation90_spill] sm:$0xff]  ;;  %v8504_v37 = vld [vmem:[#allocation91_spill] sm:$0xff] }
 0x289   : > { %8495 = vst [vmem:[#allocation68_spill] sm:$0xff] %v5933_v33  ;;  %8497 = vst [vmem:[#allocation70_spill] sm:$0xff] %v5937_v25  ;;  %v5949_v49 = vmul.f32 %v5473_v4, %v8502_v17  ;;  %v5953_v27 = vmul.f32 %v5461_v0, %v8504_v37  ;;  %v8506_v33 = vld [vmem:[#allocation93_spill] sm:$0xff]  ;;  %v8508_v25 = vld [vmem:[#allocation92_spill] sm:$0xff] }
 0x28a   : > { %8499 = vst [vmem:[#allocation71_spill] sm:$0xff] %v5941_v18  ;;  %8501 = vst [vmem:[#allocation73_spill] sm:$0xff] %v5945_v48  ;;  %v5957_v45 = vmul.f32 %v5465_v24, %v8506_v33  ;;  %v5961_v59 = vmul.f32 %v5469_v38, %v8508_v25  ;;  %v8510_v18 = vld [vmem:[#allocation94_spill] sm:$0xff]  ;;  %v8512_v48 = vld [vmem:[#allocation95_spill] sm:$0xff] }
 0x28b   : > { %8503 = vst [vmem:[#allocation72_spill] sm:$0xff] %v5949_v49  ;;  %8505 = vst [vmem:[#allocation74_spill] sm:$0xff] %v5953_v27  ;;  %v5965_v47 = vmul.f32 %v5473_v4, %v8510_v18  ;;  %v5969_v17 = vmul.f32 %v5461_v0, %v8512_v48  ;;  %v8514_v49 = vld [vmem:[#allocation97_spill] sm:$0xff]  ;;  %v8516_v27 = vld [vmem:[#allocation96_spill] sm:$0xff] }
 0x28c   : > { %8507 = vst [vmem:[#allocation75_spill] sm:$0xff] %v5957_v45  ;;  %8509 = vst [vmem:[#allocation77_spill] sm:$0xff] %v5961_v59  ;;  %v5973_v37 = vmul.f32 %v5465_v24, %v8514_v49  ;;  %v5977_v33 = vmul.f32 %v5469_v38, %v8516_v27  ;;  %v8518_v45 = vld [vmem:[#allocation98_spill] sm:$0xff]  ;;  %v8520_v59 = vld [vmem:[#allocation99_spill] sm:$0xff] }
 0x28d   : > { %8511 = vst [vmem:[#allocation76_spill] sm:$0xff] %v5965_v47  ;;  %8513 = vst [vmem:[#allocation78_spill] sm:$0xff] %v5969_v17  ;;  %v5981_v25 = vmul.f32 %v5473_v4, %v8518_v45  ;;  %v5985_v18 = vmul.f32 %v5461_v0, %v8520_v59  ;;  %v8522_v47 = vld [vmem:[#allocation101_spill] sm:$0xff]  ;;  %v8524_v17 = vld [vmem:[#allocation100_spill] sm:$0xff] }
 0x28e   : > { %8515 = vst [vmem:[#allocation79_spill] sm:$0xff] %v5973_v37  ;;  %8517 = vst [vmem:[#allocation81_spill] sm:$0xff] %v5977_v33  ;;  %v5989_v48 = vmul.f32 %v5465_v24, %v8522_v47  ;;  %v5993_v49 = vmul.f32 %v5469_v38, %v8524_v17  ;;  %v8526_v37 = vld [vmem:[#allocation102_spill] sm:$0xff]  ;;  %v8528_v33 = vld [vmem:[#allocation103_spill] sm:$0xff] }
 0x28f   : > { %8519 = vst [vmem:[#allocation80_spill] sm:$0xff] %v5981_v25  ;;  %8521 = vst [vmem:[#allocation82_spill] sm:$0xff] %v5985_v18  ;;  %v5997_v27 = vmul.f32 %v5473_v4, %v8526_v37  ;;  %v6001_v45 = vmul.f32 %v5461_v0, %v8528_v33  ;;  %v8530_v25 = vld [vmem:[#allocation105_spill] sm:$0xff]  ;;  %v8532_v18 = vld [vmem:[#allocation104_spill] sm:$0xff] }
 0x290   : > { %8523 = vst [vmem:[#allocation83_spill] sm:$0xff] %v5989_v48  ;;  %8525 = vst [vmem:[#allocation85_spill] sm:$0xff] %v5993_v49  ;;  %v6005_v59 = vmul.f32 %v5465_v24, %v8530_v25  ;;  %v6009_v47 = vmul.f32 %v5469_v38, %v8532_v18  ;;  %v8534_v48 = vld [vmem:[#allocation106_spill] sm:$0xff]  ;;  %v8536_v49 = vld [vmem:[#allocation107_spill] sm:$0xff] }
 0x291   : > { %8527 = vst [vmem:[#allocation84_spill] sm:$0xff] %v5997_v27  ;;  %8529 = vst [vmem:[#allocation86_spill] sm:$0xff] %v6001_v45  ;;  %v6013_v17 = vmul.f32 %v5473_v4, %v8534_v48  ;;  %v6017_v37 = vmul.f32 %v5461_v0, %v8536_v49  ;;  %v8538_v27 = vld [vmem:[#allocation109_spill] sm:$0xff]  ;;  %v8540_v45 = vld [vmem:[#allocation108_spill] sm:$0xff] }
 0x292   : > { %8531 = vst [vmem:[#allocation87_spill] sm:$0xff] %v6005_v59  ;;  %8533 = vst [vmem:[#allocation89_spill] sm:$0xff] %v6009_v47  ;;  %v6021_v33 = vmul.f32 %v5465_v24, %v8538_v27  ;;  %v6025_v25 = vmul.f32 %v5469_v38, %v8540_v45  ;;  %v8542_v59 = vld [vmem:[#allocation110_spill] sm:$0xff]  ;;  %v8544_v47 = vld [vmem:[#allocation111_spill] sm:$0xff] }
 0x293   : > { %8535 = vst [vmem:[#allocation88_spill] sm:$0xff] %v6013_v17  ;;  %8537 = vst [vmem:[#allocation90_spill] sm:$0xff] %v6017_v37  ;;  %v6029_v18 = vmul.f32 %v5473_v4, %v8542_v59  ;;  %v6033_v48 = vmul.f32 %v5461_v0, %v8544_v47  ;;  %v8546_v17 = vld [vmem:[#allocation113_spill] sm:$0xff]  ;;  %v8548_v37 = vld [vmem:[#allocation112_spill] sm:$0xff] }
 0x294   : > { %8539 = vst [vmem:[#allocation91_spill] sm:$0xff] %v6021_v33  ;;  %8541 = vst [vmem:[#allocation93_spill] sm:$0xff] %v6025_v25  ;;  %v6037_v49 = vmul.f32 %v5465_v24, %v8546_v17  ;;  %v6041_v27 = vmul.f32 %v5469_v38, %v8548_v37  ;;  %v8550_v33 = vld [vmem:[#allocation114_spill] sm:$0xff]  ;;  %v8552_v25 = vld [vmem:[#allocation115_spill] sm:$0xff] }
 0x295   : > { %8543 = vst [vmem:[#allocation92_spill] sm:$0xff] %v6029_v18  ;;  %8545 = vst [vmem:[#allocation94_spill] sm:$0xff] %v6033_v48  ;;  %v6045_v45 = vmul.f32 %v5473_v4, %v8550_v33  ;;  %v6049_v59 = vmul.f32 %v5461_v0, %v8552_v25  ;;  %v8554_v18 = vld [vmem:[#allocation117_spill] sm:$0xff]  ;;  %v8556_v48 = vld [vmem:[#allocation116_spill] sm:$0xff] }
 0x296   : > { %8547 = vst [vmem:[#allocation95_spill] sm:$0xff] %v6037_v49  ;;  %8549 = vst [vmem:[#allocation97_spill] sm:$0xff] %v6041_v27  ;;  %v6053_v47 = vmul.f32 %v5465_v24, %v8554_v18  ;;  %v6057_v17 = vmul.f32 %v5469_v38, %v8556_v48  ;;  %v8558_v49 = vld [vmem:[#allocation118_spill] sm:$0xff]  ;;  %v8560_v27 = vld [vmem:[#allocation119_spill] sm:$0xff] }
 0x297   : > { %8551 = vst [vmem:[#allocation96_spill] sm:$0xff] %v6045_v45  ;;  %8553 = vst [vmem:[#allocation98_spill] sm:$0xff] %v6049_v59  ;;  %v6061_v37 = vmul.f32 %v5473_v4, %v8558_v49  ;;  %v6065_v33 = vmul.f32 %v5461_v0, %v8560_v27  ;;  %v8562_v45 = vld [vmem:[#allocation121_spill] sm:$0xff]  ;;  %v8564_v59 = vld [vmem:[#allocation120_spill] sm:$0xff] }
 0x298   : > { %8555 = vst [vmem:[#allocation99_spill] sm:$0xff] %v6053_v47  ;;  %8557 = vst [vmem:[#allocation101_spill] sm:$0xff] %v6057_v17  ;;  %v6069_v25 = vmul.f32 %v5465_v24, %v8562_v45  ;;  %v6073_v18 = vmul.f32 %v5469_v38, %v8564_v59  ;;  %v8566_v47 = vld [vmem:[#allocation122_spill] sm:$0xff]  ;;  %v8568_v17 = vld [vmem:[#allocation123_spill] sm:$0xff] }
 0x299   : > { %8559 = vst [vmem:[#allocation100_spill] sm:$0xff] %v6061_v37  ;;  %8561 = vst [vmem:[#allocation102_spill] sm:$0xff] %v6065_v33  ;;  %v6077_v48 = vmul.f32 %v5473_v4, %v8566_v47  ;;  %v6081_v49 = vmul.f32 %v5461_v0, %v8568_v17  ;;  %v8570_v37 = vld [vmem:[#allocation125_spill] sm:$0xff]  ;;  %v8572_v33 = vld [vmem:[#allocation124_spill] sm:$0xff] }
 0x29a   : > { %8563 = vst [vmem:[#allocation103_spill] sm:$0xff] %v6069_v25  ;;  %8565 = vst [vmem:[#allocation105_spill] sm:$0xff] %v6073_v18  ;;  %v6085_v27 = vmul.f32 %v5465_v24, %v8570_v37  ;;  %v6089_v45 = vmul.f32 %v5469_v38, %v8572_v33  ;;  %v8574_v25 = vld [vmem:[#allocation126_spill] sm:$0xff]  ;;  %v8576_v18 = vld [vmem:[#allocation127_spill] sm:$0xff] }
 0x29b   : > { %8567 = vst [vmem:[#allocation104_spill] sm:$0xff] %v6077_v48  ;;  %8569 = vst [vmem:[#allocation106_spill] sm:$0xff] %v6081_v49  ;;  %v6093_v59 = vmul.f32 %v5473_v4, %v8574_v25  ;;  %v6097_v47 = vmul.f32 %v5461_v0, %v8576_v18  ;;  %v8578_v48 = vld [vmem:[#allocation129_spill] sm:$0xff]  ;;  %v8580_v49 = vld [vmem:[#allocation128_spill] sm:$0xff] }
 0x29c   : > { %8571 = vst [vmem:[#allocation107_spill] sm:$0xff] %v6085_v27  ;;  %8573 = vst [vmem:[#allocation109_spill] sm:$0xff] %v6089_v45  ;;  %v6101_v17 = vmul.f32 %v5465_v24, %v8578_v48  ;;  %v6105_v37 = vmul.f32 %v5469_v38, %v8580_v49  ;;  %v8582_v27 = vld [vmem:[#allocation130_spill] sm:$0xff]  ;;  %v8584_v45 = vld [vmem:[#allocation131_spill] sm:$0xff] }
 0x29d   : > { %8575 = vst [vmem:[#allocation108_spill] sm:$0xff] %v6093_v59  ;;  %8577 = vst [vmem:[#allocation110_spill] sm:$0xff] %v6097_v47  ;;  %v6109_v33 = vmul.f32 %v5473_v4, %v8582_v27  ;;  %v6113_v25 = vmul.f32 %v5461_v0, %v8584_v45  ;;  %v8586_v59 = vld [vmem:[#allocation133_spill] sm:$0xff]  ;;  %v8588_v47 = vld [vmem:[#allocation132_spill] sm:$0xff] }
 0x29e   : > { %8579 = vst [vmem:[#allocation111_spill] sm:$0xff] %v6101_v17  ;;  %8581 = vst [vmem:[#allocation113_spill] sm:$0xff] %v6105_v37  ;;  %v6117_v18 = vmul.f32 %v5465_v24, %v8586_v59  ;;  %v6121_v48 = vmul.f32 %v5469_v38, %v8588_v47  ;;  %v8590_v17 = vld [vmem:[#allocation134_spill] sm:$0xff]  ;;  %v8592_v37 = vld [vmem:[#allocation135_spill] sm:$0xff] }
 0x29f   : > { %8583 = vst [vmem:[#allocation112_spill] sm:$0xff] %v6109_v33  ;;  %8585 = vst [vmem:[#allocation114_spill] sm:$0xff] %v6113_v25  ;;  %v6125_v49 = vmul.f32 %v5473_v4, %v8590_v17  ;;  %v6129_v27 = vmul.f32 %v5461_v0, %v8592_v37  ;;  %v8594_v33 = vld [vmem:[#allocation137_spill] sm:$0xff]  ;;  %v8596_v25 = vld [vmem:[#allocation136_spill] sm:$0xff] }
 0x2a0   : > { %8587 = vst [vmem:[#allocation115_spill] sm:$0xff] %v6117_v18  ;;  %8589 = vst [vmem:[#allocation117_spill] sm:$0xff] %v6121_v48  ;;  %v6133_v45 = vmul.f32 %v5465_v24, %v8594_v33  ;;  %v6137_v59 = vmul.f32 %v5469_v38, %v8596_v25  ;;  %v8598_v18 = vld [vmem:[#allocation138_spill] sm:$0xff]  ;;  %v8600_v48 = vld [vmem:[#allocation139_spill] sm:$0xff] }
 0x2a1   : > { %8591 = vst [vmem:[#allocation116_spill] sm:$0xff] %v6125_v49  ;;  %8593 = vst [vmem:[#allocation118_spill] sm:$0xff] %v6129_v27  ;;  %v6141_v47 = vmul.f32 %v5473_v4, %v8598_v18  ;;  %v6145_v17 = vmul.f32 %v5461_v0, %v8600_v48  ;;  %v8602_v49 = vld [vmem:[#allocation141_spill] sm:$0xff]  ;;  %v8604_v27 = vld [vmem:[#allocation140_spill] sm:$0xff] }
 0x2a2   : > { %8595 = vst [vmem:[#allocation119_spill] sm:$0xff] %v6133_v45  ;;  %8597 = vst [vmem:[#allocation121_spill] sm:$0xff] %v6137_v59  ;;  %v6149_v37 = vmul.f32 %v5465_v24, %v8602_v49  ;;  %v6153_v33 = vmul.f32 %v5469_v38, %v8604_v27  ;;  %v8606_v45 = vld [vmem:[#allocation142_spill] sm:$0xff]  ;;  %v8608_v59 = vld [vmem:[#allocation143_spill] sm:$0xff] }
 0x2a3   : > { %8599 = vst [vmem:[#allocation120_spill] sm:$0xff] %v6141_v47  ;;  %8601 = vst [vmem:[#allocation122_spill] sm:$0xff] %v6145_v17  ;;  %v6157_v25 = vmul.f32 %v5473_v4, %v8606_v45  ;;  %v6161_v18 = vmul.f32 %v5461_v0, %v8608_v59  ;;  %v8610_v47 = vld [vmem:[#allocation145_spill] sm:$0xff]  ;;  %v8612_v17 = vld [vmem:[#allocation144_spill] sm:$0xff] }
 0x2a4   : > { %8603 = vst [vmem:[#allocation123_spill] sm:$0xff] %v6149_v37  ;;  %8605 = vst [vmem:[#allocation125_spill] sm:$0xff] %v6153_v33  ;;  %v6165_v48 = vmul.f32 %v5465_v24, %v8610_v47  ;;  %v6169_v49 = vmul.f32 %v5469_v38, %v8612_v17  ;;  %v8614_v37 = vld [vmem:[#allocation146_spill] sm:$0xff]  ;;  %v8616_v33 = vld [vmem:[#allocation147_spill] sm:$0xff] }
 0x2a5   : > { %8607 = vst [vmem:[#allocation124_spill] sm:$0xff] %v6157_v25  ;;  %8609 = vst [vmem:[#allocation126_spill] sm:$0xff] %v6161_v18  ;;  %v6173_v27 = vmul.f32 %v5473_v4, %v8614_v37  ;;  %v6177_v45 = vmul.f32 %v5461_v0, %v8616_v33  ;;  %v8618_v25 = vld [vmem:[#allocation149_spill] sm:$0xff]  ;;  %v8620_v18 = vld [vmem:[#allocation148_spill] sm:$0xff] }
 0x2a6   : > { %8611 = vst [vmem:[#allocation127_spill] sm:$0xff] %v6165_v48  ;;  %8613 = vst [vmem:[#allocation129_spill] sm:$0xff] %v6169_v49  ;;  %v6181_v59 = vmul.f32 %v5465_v24, %v8618_v25  ;;  %v6185_v47 = vmul.f32 %v5469_v38, %v8620_v18  ;;  %v8622_v48 = vld [vmem:[#allocation150_spill] sm:$0xff]  ;;  %v8624_v49 = vld [vmem:[#allocation151_spill] sm:$0xff] }
 0x2a7   : > { %8615 = vst [vmem:[#allocation128_spill] sm:$0xff] %v6173_v27  ;;  %8617 = vst [vmem:[#allocation130_spill] sm:$0xff] %v6177_v45  ;;  %v6189_v17 = vmul.f32 %v5473_v4, %v8622_v48  ;;  %v6193_v37 = vmul.f32 %v5461_v0, %v8624_v49  ;;  %v8626_v27 = vld [vmem:[#allocation153_spill] sm:$0xff]  ;;  %v8628_v45 = vld [vmem:[#allocation152_spill] sm:$0xff] }
 0x2a8   : > { %8619 = vst [vmem:[#allocation131_spill] sm:$0xff] %v6181_v59  ;;  %8621 = vst [vmem:[#allocation133_spill] sm:$0xff] %v6185_v47  ;;  %v6197_v33 = vmul.f32 %v5465_v24, %v8626_v27  ;;  %v6201_v25 = vmul.f32 %v5469_v38, %v8628_v45  ;;  %v8630_v59 = vld [vmem:[#allocation154_spill] sm:$0xff]  ;;  %v8632_v47 = vld [vmem:[#allocation155_spill] sm:$0xff] }
 0x2a9   : > { %8623 = vst [vmem:[#allocation132_spill] sm:$0xff] %v6189_v17  ;;  %8625 = vst [vmem:[#allocation134_spill] sm:$0xff] %v6193_v37  ;;  %v6205_v18 = vmul.f32 %v5473_v4, %v8630_v59  ;;  %v6209_v48 = vmul.f32 %v5461_v0, %v8632_v47  ;;  %v8634_v17 = vld [vmem:[#allocation157_spill] sm:$0xff]  ;;  %v8636_v37 = vld [vmem:[#allocation156_spill] sm:$0xff] }
 0x2aa   : > { %8627 = vst [vmem:[#allocation135_spill] sm:$0xff] %v6197_v33  ;;  %8629 = vst [vmem:[#allocation137_spill] sm:$0xff] %v6201_v25  ;;  %v6213_v49 = vmul.f32 %v5465_v24, %v8634_v17  ;;  %v6217_v27 = vmul.f32 %v5469_v38, %v8636_v37  ;;  %v8638_v33 = vld [vmem:[#allocation158_spill] sm:$0xff]  ;;  %v8640_v25 = vld [vmem:[#allocation159_spill] sm:$0xff] }
 0x2ab   : > { %8631 = vst [vmem:[#allocation136_spill] sm:$0xff] %v6205_v18  ;;  %8633 = vst [vmem:[#allocation138_spill] sm:$0xff] %v6209_v48  ;;  %v6221_v45 = vmul.f32 %v5473_v4, %v8638_v33  ;;  %v6225_v59 = vmul.f32 %v5461_v0, %v8640_v25  ;;  %v8642_v18 = vld [vmem:[#allocation161_spill] sm:$0xff]  ;;  %v8644_v48 = vld [vmem:[#allocation160_spill] sm:$0xff] }
 0x2ac   : > { %8635 = vst [vmem:[#allocation139_spill] sm:$0xff] %v6213_v49  ;;  %8637 = vst [vmem:[#allocation141_spill] sm:$0xff] %v6217_v27  ;;  %v6229_v47 = vmul.f32 %v5465_v24, %v8642_v18  ;;  %v6233_v17 = vmul.f32 %v5469_v38, %v8644_v48  ;;  %v8646_v49 = vld [vmem:[#allocation162_spill] sm:$0xff]  ;;  %v8648_v27 = vld [vmem:[#allocation163_spill] sm:$0xff] }
 0x2ad   : > { %8639 = vst [vmem:[#allocation140_spill] sm:$0xff] %v6221_v45  ;;  %8641 = vst [vmem:[#allocation142_spill] sm:$0xff] %v6225_v59  ;;  %v6237_v37 = vmul.f32 %v5473_v4, %v8646_v49  ;;  %v6241_v33 = vmul.f32 %v5461_v0, %v8648_v27  ;;  %v8650_v45 = vld [vmem:[#allocation165_spill] sm:$0xff]  ;;  %v8652_v59 = vld [vmem:[#allocation164_spill] sm:$0xff] }
 0x2ae   : > { %8643 = vst [vmem:[#allocation143_spill] sm:$0xff] %v6229_v47  ;;  %8645 = vst [vmem:[#allocation145_spill] sm:$0xff] %v6233_v17  ;;  %v6245_v25 = vmul.f32 %v5465_v24, %v8650_v45  ;;  %v6249_v18 = vmul.f32 %v5469_v38, %v8652_v59  ;;  %v8654_v47 = vld [vmem:[#allocation166_spill] sm:$0xff]  ;;  %v8656_v17 = vld [vmem:[#allocation167_spill] sm:$0xff] }
 0x2af   : > { %8647 = vst [vmem:[#allocation144_spill] sm:$0xff] %v6237_v37  ;;  %8649 = vst [vmem:[#allocation146_spill] sm:$0xff] %v6241_v33  ;;  %v6253_v48 = vmul.f32 %v5473_v4, %v8654_v47  ;;  %v6257_v49 = vmul.f32 %v5461_v0, %v8656_v17  ;;  %v8658_v37 = vld [vmem:[#allocation169_spill] sm:$0xff]  ;;  %v8660_v33 = vld [vmem:[#allocation168_spill] sm:$0xff] }
 0x2b0   : > { %8651 = vst [vmem:[#allocation147_spill] sm:$0xff] %v6245_v25  ;;  %8653 = vst [vmem:[#allocation149_spill] sm:$0xff] %v6249_v18  ;;  %v6261_v27 = vmul.f32 %v5465_v24, %v8658_v37  ;;  %v6265_v45 = vmul.f32 %v5469_v38, %v8660_v33  ;;  %v8662_v25 = vld [vmem:[#allocation170_spill] sm:$0xff]  ;;  %v8664_v18 = vld [vmem:[#allocation171_spill] sm:$0xff] }
 0x2b1   : > { %8655 = vst [vmem:[#allocation148_spill] sm:$0xff] %v6253_v48  ;;  %8657 = vst [vmem:[#allocation150_spill] sm:$0xff] %v6257_v49  ;;  %v6269_v59 = vmul.f32 %v5473_v4, %v8662_v25  ;;  %v6273_v47 = vmul.f32 %v5461_v0, %v8664_v18  ;;  %v8666_v48 = vld [vmem:[#allocation173_spill] sm:$0xff]  ;;  %v8668_v49 = vld [vmem:[#allocation172_spill] sm:$0xff] }
 0x2b2   : > { %8659 = vst [vmem:[#allocation151_spill] sm:$0xff] %v6261_v27  ;;  %8661 = vst [vmem:[#allocation153_spill] sm:$0xff] %v6265_v45  ;;  %v6277_v17 = vmul.f32 %v5465_v24, %v8666_v48  ;;  %v6281_v37 = vmul.f32 %v5469_v38, %v8668_v49  ;;  %v8670_v27 = vld [vmem:[#allocation174_spill] sm:$0xff]  ;;  %v8672_v45 = vld [vmem:[#allocation175_spill] sm:$0xff] }
 0x2b3   : > { %8663 = vst [vmem:[#allocation152_spill] sm:$0xff] %v6269_v59  ;;  %8665 = vst [vmem:[#allocation154_spill] sm:$0xff] %v6273_v47  ;;  %v6285_v33 = vmul.f32 %v5473_v4, %v8670_v27  ;;  %v6289_v25 = vmul.f32 %v5461_v0, %v8672_v45  ;;  %v8674_v59 = vld [vmem:[#allocation177_spill] sm:$0xff]  ;;  %v8676_v47 = vld [vmem:[#allocation176_spill] sm:$0xff] }
 0x2b4   : > { %8667 = vst [vmem:[#allocation155_spill] sm:$0xff] %v6277_v17  ;;  %8669 = vst [vmem:[#allocation157_spill] sm:$0xff] %v6281_v37  ;;  %v6293_v18 = vmul.f32 %v5465_v24, %v8674_v59  ;;  %v6297_v48 = vmul.f32 %v5469_v38, %v8676_v47  ;;  %v8678_v17 = vld [vmem:[#allocation178_spill] sm:$0xff]  ;;  %v8680_v37 = vld [vmem:[#allocation179_spill] sm:$0xff] }
 0x2b5   : > { %8671 = vst [vmem:[#allocation156_spill] sm:$0xff] %v6285_v33  ;;  %8673 = vst [vmem:[#allocation158_spill] sm:$0xff] %v6289_v25  ;;  %v6301_v49 = vmul.f32 %v5473_v4, %v8678_v17  ;;  %v6305_v27 = vmul.f32 %v5461_v0, %v8680_v37  ;;  %v8682_v33 = vld [vmem:[#allocation181_spill] sm:$0xff]  ;;  %v8684_v25 = vld [vmem:[#allocation180_spill] sm:$0xff] }
 0x2b6   : > { %8675 = vst [vmem:[#allocation159_spill] sm:$0xff] %v6293_v18  ;;  %8677 = vst [vmem:[#allocation161_spill] sm:$0xff] %v6297_v48  ;;  %v6309_v45 = vmul.f32 %v5465_v24, %v8682_v33  ;;  %v6313_v59 = vmul.f32 %v5469_v38, %v8684_v25  ;;  %v8686_v18 = vld [vmem:[#allocation182_spill] sm:$0xff]  ;;  %v8688_v48 = vld [vmem:[#allocation183_spill] sm:$0xff] }
 0x2b7   : > { %8679 = vst [vmem:[#allocation160_spill] sm:$0xff] %v6301_v49  ;;  %8681 = vst [vmem:[#allocation162_spill] sm:$0xff] %v6305_v27  ;;  %v6317_v47 = vmul.f32 %v5473_v4, %v8686_v18  ;;  %v6321_v17 = vmul.f32 %v5461_v0, %v8688_v48  ;;  %v8690_v49 = vld [vmem:[#allocation185_spill] sm:$0xff]  ;;  %v8692_v27 = vld [vmem:[#allocation184_spill] sm:$0xff] }
 0x2b8   : > { %8683 = vst [vmem:[#allocation163_spill] sm:$0xff] %v6309_v45  ;;  %8685 = vst [vmem:[#allocation165_spill] sm:$0xff] %v6313_v59  ;;  %v6325_v37 = vmul.f32 %v5465_v24, %v8690_v49  ;;  %v6329_v33 = vmul.f32 %v5469_v38, %v8692_v27  ;;  %v8694_v45 = vld [vmem:[#allocation186_spill] sm:$0xff]  ;;  %v8696_v59 = vld [vmem:[#allocation187_spill] sm:$0xff] }
 0x2b9   : > { %8687 = vst [vmem:[#allocation164_spill] sm:$0xff] %v6317_v47  ;;  %8689 = vst [vmem:[#allocation166_spill] sm:$0xff] %v6321_v17  ;;  %v6333_v25 = vmul.f32 %v5473_v4, %v8694_v45  ;;  %v6337_v18 = vmul.f32 %v5461_v0, %v8696_v59  ;;  %v8698_v47 = vld [vmem:[#allocation189_spill] sm:$0xff]  ;;  %v8700_v17 = vld [vmem:[#allocation188_spill] sm:$0xff] }
 0x2ba   : > { %8691 = vst [vmem:[#allocation167_spill] sm:$0xff] %v6325_v37  ;;  %8693 = vst [vmem:[#allocation169_spill] sm:$0xff] %v6329_v33  ;;  %v6341_v48 = vmul.f32 %v5465_v24, %v8698_v47  ;;  %v6345_v49 = vmul.f32 %v5469_v38, %v8700_v17  ;;  %v8702_v37 = vld [vmem:[#allocation190_spill] sm:$0xff]  ;;  %v8704_v33 = vld [vmem:[#allocation191_spill] sm:$0xff] }
 0x2bb   : > { %8695 = vst [vmem:[#allocation168_spill] sm:$0xff] %v6333_v25  ;;  %8697 = vst [vmem:[#allocation170_spill] sm:$0xff] %v6337_v18  ;;  %v6349_v27 = vmul.f32 %v5473_v4, %v8702_v37  ;;  %v6353_v45 = vmul.f32 %v5461_v0, %v8704_v33  ;;  %v8706_v25 = vld [vmem:[#allocation193_spill] sm:$0xff]  ;;  %v8708_v18 = vld [vmem:[#allocation192_spill] sm:$0xff] }
 0x2bc   : > { %8699 = vst [vmem:[#allocation171_spill] sm:$0xff] %v6341_v48  ;;  %8701 = vst [vmem:[#allocation173_spill] sm:$0xff] %v6345_v49  ;;  %v6357_v59 = vmul.f32 %v5465_v24, %v8706_v25  ;;  %v6361_v47 = vmul.f32 %v5469_v38, %v8708_v18  ;;  %v8710_v48 = vld [vmem:[#allocation194_spill] sm:$0xff]  ;;  %v8712_v49 = vld [vmem:[#allocation195_spill] sm:$0xff] }
 0x2bd   : > { %8703 = vst [vmem:[#allocation172_spill] sm:$0xff] %v6349_v27  ;;  %8705 = vst [vmem:[#allocation174_spill] sm:$0xff] %v6353_v45  ;;  %v6365_v17 = vmul.f32 %v5473_v4, %v8710_v48  ;;  %v6369_v37 = vmul.f32 %v5461_v0, %v8712_v49  ;;  %v8714_v27 = vld [vmem:[#allocation197_spill] sm:$0xff]  ;;  %v8716_v45 = vld [vmem:[#allocation196_spill] sm:$0xff] }
 0x2be   : > { %8707 = vst [vmem:[#allocation175_spill] sm:$0xff] %v6357_v59  ;;  %8709 = vst [vmem:[#allocation177_spill] sm:$0xff] %v6361_v47  ;;  %v6373_v33 = vmul.f32 %v5465_v24, %v8714_v27  ;;  %v6377_v25 = vmul.f32 %v5469_v38, %v8716_v45  ;;  %v8718_v59 = vld [vmem:[#allocation198_spill] sm:$0xff]  ;;  %v8720_v47 = vld [vmem:[#allocation199_spill] sm:$0xff] }
 0x2bf   : > { %8711 = vst [vmem:[#allocation176_spill] sm:$0xff] %v6365_v17  ;;  %8713 = vst [vmem:[#allocation178_spill] sm:$0xff] %v6369_v37  ;;  %v6381_v18 = vmul.f32 %v5473_v4, %v8718_v59  ;;  %v6385_v48 = vmul.f32 %v5461_v0, %v8720_v47  ;;  %v8722_v17 = vld [vmem:[#allocation201_spill] sm:$0xff]  ;;  %v8724_v37 = vld [vmem:[#allocation200_spill] sm:$0xff] }
 0x2c0   : > { %8715 = vst [vmem:[#allocation179_spill] sm:$0xff] %v6373_v33  ;;  %8717 = vst [vmem:[#allocation181_spill] sm:$0xff] %v6377_v25  ;;  %v6389_v49 = vmul.f32 %v5465_v24, %v8722_v17  ;;  %v6393_v27 = vmul.f32 %v5469_v38, %v8724_v37  ;;  %v8726_v33 = vld [vmem:[#allocation202_spill] sm:$0xff]  ;;  %v8728_v25 = vld [vmem:[#allocation203_spill] sm:$0xff] }
 0x2c1   : > { %8719 = vst [vmem:[#allocation180_spill] sm:$0xff] %v6381_v18  ;;  %8721 = vst [vmem:[#allocation182_spill] sm:$0xff] %v6385_v48  ;;  %v6397_v45 = vmul.f32 %v5473_v4, %v8726_v33  ;;  %v6401_v59 = vmul.f32 %v5461_v0, %v8728_v25  ;;  %v8730_v18 = vld [vmem:[#allocation205_spill] sm:$0xff]  ;;  %v8732_v48 = vld [vmem:[#allocation204_spill] sm:$0xff] }
 0x2c2   : > { %8723 = vst [vmem:[#allocation183_spill] sm:$0xff] %v6389_v49  ;;  %8725 = vst [vmem:[#allocation185_spill] sm:$0xff] %v6393_v27  ;;  %v6405_v47 = vmul.f32 %v5465_v24, %v8730_v18  ;;  %v6409_v17 = vmul.f32 %v5469_v38, %v8732_v48  ;;  %v8734_v49 = vld [vmem:[#allocation206_spill] sm:$0xff]  ;;  %v8736_v27 = vld [vmem:[#allocation207_spill] sm:$0xff] }
 0x2c3   : > { %8727 = vst [vmem:[#allocation184_spill] sm:$0xff] %v6397_v45  ;;  %8729 = vst [vmem:[#allocation186_spill] sm:$0xff] %v6401_v59  ;;  %v6413_v37 = vmul.f32 %v5473_v4, %v8734_v49  ;;  %v6417_v33 = vmul.f32 %v5461_v0, %v8736_v27  ;;  %v8738_v45 = vld [vmem:[#allocation209_spill] sm:$0xff]  ;;  %v8740_v59 = vld [vmem:[#allocation208_spill] sm:$0xff] }
 0x2c4   : > { %8731 = vst [vmem:[#allocation187_spill] sm:$0xff] %v6405_v47  ;;  %8733 = vst [vmem:[#allocation189_spill] sm:$0xff] %v6409_v17  ;;  %v6421_v25 = vmul.f32 %v5465_v24, %v8738_v45  ;;  %v6425_v18 = vmul.f32 %v5469_v38, %v8740_v59  ;;  %v8742_v47 = vld [vmem:[#allocation210_spill] sm:$0xff]  ;;  %v8744_v17 = vld [vmem:[#allocation211_spill] sm:$0xff] }
 0x2c5   : > { %8735 = vst [vmem:[#allocation188_spill] sm:$0xff] %v6413_v37  ;;  %8737 = vst [vmem:[#allocation190_spill] sm:$0xff] %v6417_v33  ;;  %v6429_v48 = vmul.f32 %v5473_v4, %v8742_v47  ;;  %v6433_v49 = vmul.f32 %v5461_v0, %v8744_v17  ;;  %v8746_v37 = vld [vmem:[#allocation213_spill] sm:$0xff]  ;;  %v8748_v33 = vld [vmem:[#allocation212_spill] sm:$0xff] }
 0x2c6   : > { %8739 = vst [vmem:[#allocation191_spill] sm:$0xff] %v6421_v25  ;;  %8741 = vst [vmem:[#allocation193_spill] sm:$0xff] %v6425_v18  ;;  %v6437_v27 = vmul.f32 %v5465_v24, %v8746_v37  ;;  %v6441_v45 = vmul.f32 %v5469_v38, %v8748_v33  ;;  %v8750_v25 = vld [vmem:[#allocation214_spill] sm:$0xff]  ;;  %v8752_v18 = vld [vmem:[#allocation215_spill] sm:$0xff] }
 0x2c7   : > { %8743 = vst [vmem:[#allocation192_spill] sm:$0xff] %v6429_v48  ;;  %8745 = vst [vmem:[#allocation194_spill] sm:$0xff] %v6433_v49  ;;  %v6445_v59 = vmul.f32 %v5473_v4, %v8750_v25  ;;  %v6449_v47 = vmul.f32 %v5461_v0, %v8752_v18  ;;  %v8754_v48 = vld [vmem:[#allocation217_spill] sm:$0xff]  ;;  %v8756_v49 = vld [vmem:[#allocation216_spill] sm:$0xff] }
 0x2c8   : > { %8747 = vst [vmem:[#allocation195_spill] sm:$0xff] %v6437_v27  ;;  %8749 = vst [vmem:[#allocation197_spill] sm:$0xff] %v6441_v45  ;;  %v6453_v17 = vmul.f32 %v5465_v24, %v8754_v48  ;;  %v6457_v37 = vmul.f32 %v5469_v38, %v8756_v49  ;;  %v8758_v27 = vld [vmem:[#allocation218_spill] sm:$0xff]  ;;  %v8760_v45 = vld [vmem:[#allocation219_spill] sm:$0xff] }
 0x2c9   : > { %8751 = vst [vmem:[#allocation196_spill] sm:$0xff] %v6445_v59  ;;  %8753 = vst [vmem:[#allocation198_spill] sm:$0xff] %v6449_v47  ;;  %v6461_v33 = vmul.f32 %v5473_v4, %v8758_v27  ;;  %v6465_v25 = vmul.f32 %v5461_v0, %v8760_v45  ;;  %v8762_v59 = vld [vmem:[#allocation221_spill] sm:$0xff]  ;;  %v8764_v47 = vld [vmem:[#allocation220_spill] sm:$0xff] }
 0x2ca   : > { %8755 = vst [vmem:[#allocation199_spill] sm:$0xff] %v6453_v17  ;;  %8757 = vst [vmem:[#allocation201_spill] sm:$0xff] %v6457_v37  ;;  %v6469_v18 = vmul.f32 %v5465_v24, %v8762_v59  ;;  %v6473_v48 = vmul.f32 %v5469_v38, %v8764_v47  ;;  %v8766_v17 = vld [vmem:[#allocation222_spill] sm:$0xff]  ;;  %v8768_v37 = vld [vmem:[#allocation223_spill] sm:$0xff] }
 0x2cb   : > { %8759 = vst [vmem:[#allocation200_spill] sm:$0xff] %v6461_v33  ;;  %8761 = vst [vmem:[#allocation202_spill] sm:$0xff] %v6465_v25  ;;  %v6477_v49 = vmul.f32 %v5473_v4, %v8766_v17  ;;  %v6481_v27 = vmul.f32 %v5461_v0, %v8768_v37  ;;  %v8770_v33 = vld [vmem:[#allocation225_spill] sm:$0xff]  ;;  %v8772_v25 = vld [vmem:[#allocation224_spill] sm:$0xff] }
 0x2cc   : > { %8763 = vst [vmem:[#allocation203_spill] sm:$0xff] %v6469_v18  ;;  %8765 = vst [vmem:[#allocation205_spill] sm:$0xff] %v6473_v48  ;;  %v6485_v45 = vmul.f32 %v5465_v24, %v8770_v33  ;;  %v6489_v59 = vmul.f32 %v5469_v38, %v8772_v25  ;;  %v8774_v18 = vld [vmem:[#allocation226_spill] sm:$0xff]  ;;  %v8775_v48 = vld [vmem:[#allocation227_spill] sm:$0xff] }
 0x2cd   : > { %8767 = vst [vmem:[#allocation204_spill] sm:$0xff] %v6477_v49  ;;  %8769 = vst [vmem:[#allocation206_spill] sm:$0xff] %v6481_v27  ;;  %v6493_v47 = vmul.f32 %v5473_v4, %v8774_v18  ;;  %v6497_v17 = vmul.f32 %v5461_v0, %v8775_v48  ;;  %v8776_v49 = vld [vmem:[#allocation229_spill] sm:$0xff]  ;;  %v8777_v27 = vld [vmem:[#allocation228_spill] sm:$0xff]  ;;  %v8780_v0 = vsub.s32 1, %v5446_v30 }
 0x2ce   : > { %8771 = vst [vmem:[#allocation207_spill] sm:$0xff] %v6485_v45  ;;  %8773 = vst [vmem:[#allocation209_spill] sm:$0xff] %v6489_v59  ;;  %v6501_v37 = vmul.f32 %v5465_v24, %v8776_v49  ;;  %v6505_v33 = vmul.f32 %v5469_v38, %v8777_v27  ;;  %v8778_v45 = vsub.s32 0, %v5446_v30  ;;  %v8779_v59 = vld [vmem:[#allocation230_spill] sm:$0xff]  ;;  %v8781_v24 = vsub.s32 2, %v5446_v30 }
 0x2cf   : > { %v6514_v18 = vmul.f32 %v5473_v4, %v8779_v59  ;;  %v6519_v48 = vrot.slane %v5601_v43, %v8780_v0  ;;  %v8782_v38 = vsub.s32 3, %v5446_v30  ;;  %v8793_v30 = vld [vmem:[#allocation7_spill] sm:$0xff] }
 0x2d0   : > { %v6510_v25 = vrot.slane %v5601_v43, %v8778_v45  ;;  %v6524_v49 = vrot.slane %v5601_v43, %v8781_v24  ;;  %v8789_v24 = vld [vmem:[#allocation5_spill] sm:$0xff] }
 0x2d1   : > { %v6529_v27 = vrot.slane %v5601_v43, %v8782_v38  ;;  %v6549_v43 = vadd.f32 %v6519_v48, %v5487_v44  ;;  %v8791_v38 = vld [vmem:[#allocation6_spill] sm:$0xff] }
 0x2d2   : > { %v6533_v45 = vadd.f32 %v6510_v25, %v5483_v32  ;;  %v6537_v4 = vadd.f32 %v6510_v25, %v5499_v50  ;;  %v6541_v59 = vadd.f32 %v6510_v25, %v5515_v63  ;;  %v6545_v0 = vadd.f32 %v6510_v25, %v5535_v22 }
 0x2d3   : > { %v6553_v32 = vadd.f32 %v6524_v49, %v5491_v52  ;;  %v6557_v50 = vadd.f32 %v6529_v27, %v5495_v58  ;;  %v6561_v63 = vadd.f32 %v6519_v48, %v5503_v60  ;;  %v6565_v22 = vadd.f32 %v6524_v49, %v5507_v62 }
 0x2d4   : > { %v6569_v44 = vadd.f32 %v6529_v27, %v5511_v61  ;;  %v6573_v52 = vadd.f32 %v6519_v48, %v5523_v12  ;;  %v6577_v58 = vadd.f32 %v6524_v49, %v5527_v7  ;;  %v6581_v60 = vadd.f32 %v6529_v27, %v5531_v13 }
 0x2d5   : > { %8783 = vst [vmem:[#allocation208_spill] sm:$0xff] %v6553_v32  ;;  %8784 = vst [vmem:[#allocation210_spill] sm:$0xff] %v6557_v50  ;;  %v6585_v62 = vadd.f32 %v6519_v48, %v5539_v46  ;;  %v6589_v61 = vadd.f32 %v6524_v49, %v5543_v28  ;;  %v6593_v12 = vadd.f32 %v6529_v27, %v5547_v23 }
 0x2d6   : > { %8785 = vst [vmem:[#allocation211_spill] sm:$0xff] %v6569_v44  ;;  %v6597_v7 = vadd.f32 %v6510_v25, %v5551_v29  ;;  %v6601_v13 = vadd.f32 %v6519_v48, %v5555_v35  ;;  %v6605_v46 = vadd.f32 %v6524_v49, %v5559_v41  ;;  %v6609_v28 = vadd.f32 %v6529_v27, %v5563_v36 }
 0x2d7   : > { %v6613_v23 = vadd.f32 %v6510_v25, %v5567_v42  ;;  %v6617_v29 = vadd.f32 %v6519_v48, %v5571_v55  ;;  %v6621_v35 = vadd.f32 %v6524_v49, %v5575_v2  ;;  %v6625_v41 = vadd.f32 %v6529_v27, %v5579_v56 }
 0x2d8   : > { %v6629_v36 = vadd.f32 %v6510_v25, %v5583_v3  ;;  %v6633_v42 = vadd.f32 %v6519_v48, %v5587_v11  ;;  %v6637_v55 = vadd.f32 %v6524_v49, %v5591_v19  ;;  %v6641_v2 = vadd.f32 %v6529_v27, %v5595_v14 }
 0x2d9   : > { %v6645_v56 = vadd.f32 %v6510_v25, %v5599_v20  ;;  %v6649_v3 = vadd.f32 %v6519_v48, %v5605_v39  ;;  %v6653_v11 = vadd.f32 %v6524_v49, %v5609_v57  ;;  %v6657_v19 = vadd.f32 %v6529_v27, %v5613_v31 }
 0x2da   : > { %v6661_v14 = vadd.f32 %v6510_v25, %v5617_v26  ;;  %v6665_v20 = vadd.f32 %v6519_v48, %v5621_v16  ;;  %v6669_v39 = vadd.f32 %v6524_v49, %v5625_v5  ;;  %v6673_v57 = vadd.f32 %v6529_v27, %v5629_v15 }
 0x2db   : > { %v6677_v31 = vadd.f32 %v6510_v25, %v5633_v10  ;;  %v6681_v26 = vadd.f32 %v6519_v48, %v5637_v53  ;;  %v6685_v16 = vadd.f32 %v6524_v49, %v5641_v34  ;;  %v6689_v5 = vadd.f32 %v6529_v27, %v5645_v6 }
 0x2dc   : > { %v6693_v15 = vadd.f32 %v6510_v25, %v5649_v8  ;;  %v6697_v10 = vadd.f32 %v6519_v48, %v5653_v9  ;;  %v6701_v53 = vadd.f32 %v6524_v49, %v5657_v40  ;;  %v6705_v34 = vadd.f32 %v6529_v27, %v5661_v54 }
 0x2dd   : > { %v6709_v6 = vadd.f32 %v6510_v25, %v5665_v21  ;;  %v6713_v8 = vadd.f32 %v6519_v48, %v5669_v51  ;;  %v6717_v9 = vadd.f32 %v6524_v49, %v5673_v1  ;;  %v6721_v40 = vadd.f32 %v6529_v27, %v8789_v24 }
 0x2de   : > { %v6725_v54 = vadd.f32 %v6510_v25, %v8791_v38  ;;  %v6729_v21 = vadd.f32 %v6519_v48, %v8793_v30 }
 0x2df   : > { %8786 = vst [vmem:[#allocation213_spill] sm:$0xff] %v6709_v6  ;;  %8787 = vst [vmem:[#allocation212_spill] sm:$0xff] %v6713_v8  ;;  %v8795_v6 = vld [vmem:[#allocation9_spill] sm:$0xff]  ;;  %v8797_v8 = vld [vmem:[#allocation8_spill] sm:$0xff] }
 0x2e0   : > { %8788 = vst [vmem:[#allocation214_spill] sm:$0xff] %v6717_v9  ;;  %8790 = vst [vmem:[#allocation215_spill] sm:$0xff] %v6721_v40  ;;  %v6733_v51 = vadd.f32 %v6524_v49, %v8795_v6  ;;  %v6737_v1 = vadd.f32 %v6529_v27, %v8797_v8  ;;  %v8799_v9 = vld [vmem:[#allocation10_spill] sm:$0xff]  ;;  %v8801_v40 = vld [vmem:[#allocation11_spill] sm:$0xff] }
 0x2e1   : > { %8792 = vst [vmem:[#allocation217_spill] sm:$0xff] %v6725_v54  ;;  %8794 = vst [vmem:[#allocation216_spill] sm:$0xff] %v6729_v21  ;;  %v6741_v24 = vadd.f32 %v6510_v25, %v8799_v9  ;;  %v6745_v38 = vadd.f32 %v6519_v48, %v8801_v40  ;;  %v8803_v54 = vld [vmem:[#allocation13_spill] sm:$0xff]  ;;  %v8805_v21 = vld [vmem:[#allocation12_spill] sm:$0xff] }
 0x2e2   : > { %8796 = vst [vmem:[#allocation218_spill] sm:$0xff] %v6733_v51  ;;  %8798 = vst [vmem:[#allocation219_spill] sm:$0xff] %v6737_v1  ;;  %v6749_v30 = vadd.f32 %v6524_v49, %v8803_v54  ;;  %v6753_v6 = vadd.f32 %v6529_v27, %v8805_v21  ;;  %v8807_v51 = vld [vmem:[#allocation14_spill] sm:$0xff]  ;;  %v8809_v1 = vld [vmem:[#allocation15_spill] sm:$0xff] }
 0x2e3   : > { %8800 = vst [vmem:[#allocation221_spill] sm:$0xff] %v6741_v24  ;;  %8802 = vst [vmem:[#allocation220_spill] sm:$0xff] %v6745_v38  ;;  %v6757_v8 = vadd.f32 %v6510_v25, %v8807_v51  ;;  %v6761_v9 = vadd.f32 %v6519_v48, %v8809_v1  ;;  %v8811_v24 = vld [vmem:[#allocation17_spill] sm:$0xff]  ;;  %v8813_v38 = vld [vmem:[#allocation16_spill] sm:$0xff] }
 0x2e4   : > { %8804 = vst [vmem:[#allocation222_spill] sm:$0xff] %v6749_v30  ;;  %8806 = vst [vmem:[#allocation223_spill] sm:$0xff] %v6753_v6  ;;  %v6765_v40 = vadd.f32 %v6524_v49, %v8811_v24  ;;  %v6769_v54 = vadd.f32 %v6529_v27, %v8813_v38  ;;  %v8815_v30 = vld [vmem:[#allocation18_spill] sm:$0xff]  ;;  %v8817_v6 = vld [vmem:[#allocation19_spill] sm:$0xff] }
 0x2e5   : > { %8808 = vst [vmem:[#allocation225_spill] sm:$0xff] %v6757_v8  ;;  %8810 = vst [vmem:[#allocation224_spill] sm:$0xff] %v6761_v9  ;;  %v6773_v21 = vadd.f32 %v6510_v25, %v8815_v30  ;;  %v6777_v51 = vadd.f32 %v6519_v48, %v8817_v6  ;;  %v8819_v8 = vld [vmem:[#allocation21_spill] sm:$0xff]  ;;  %v8821_v9 = vld [vmem:[#allocation20_spill] sm:$0xff] }
 0x2e6   : > { %8812 = vst [vmem:[#allocation226_spill] sm:$0xff] %v6765_v40  ;;  %8814 = vst [vmem:[#allocation227_spill] sm:$0xff] %v6769_v54  ;;  %v6781_v1 = vadd.f32 %v6524_v49, %v8819_v8  ;;  %v6785_v24 = vadd.f32 %v6529_v27, %v8821_v9  ;;  %v8823_v40 = vld [vmem:[#allocation22_spill] sm:$0xff]  ;;  %v8825_v54 = vld [vmem:[#allocation23_spill] sm:$0xff] }
 0x2e7   : > { %8816 = vst [vmem:[#allocation229_spill] sm:$0xff] %v6773_v21  ;;  %8818 = vst [vmem:[#allocation228_spill] sm:$0xff] %v6777_v51  ;;  %v6789_v38 = vadd.f32 %v6510_v25, %v8823_v40  ;;  %v6793_v30 = vadd.f32 %v6519_v48, %v8825_v54  ;;  %v8827_v21 = vld [vmem:[#allocation25_spill] sm:$0xff]  ;;  %v8829_v51 = vld [vmem:[#allocation24_spill] sm:$0xff] }
 0x2e8   : > { %8820 = vst [vmem:[#allocation230_spill] sm:$0xff] %v6781_v1  ;;  %8822 = vst [vmem:[#allocation5_spill] sm:$0xff] %v6785_v24  ;;  %v6797_v6 = vadd.f32 %v6524_v49, %v8827_v21  ;;  %v6801_v8 = vadd.f32 %v6529_v27, %v8829_v51  ;;  %v8831_v1 = vld [vmem:[#allocation26_spill] sm:$0xff]  ;;  %v8833_v24 = vld [vmem:[#allocation27_spill] sm:$0xff] }
 0x2e9   : > { %8824 = vst [vmem:[#allocation6_spill] sm:$0xff] %v6789_v38  ;;  %8826 = vst [vmem:[#allocation7_spill] sm:$0xff] %v6793_v30  ;;  %v6805_v9 = vadd.f32 %v6510_v25, %v8831_v1  ;;  %v6809_v40 = vadd.f32 %v6519_v48, %v8833_v24  ;;  %v8835_v38 = vld [vmem:[#allocation29_spill] sm:$0xff]  ;;  %v8837_v30 = vld [vmem:[#allocation28_spill] sm:$0xff] }
 0x2ea   : > { %8828 = vst [vmem:[#allocation9_spill] sm:$0xff] %v6797_v6  ;;  %8830 = vst [vmem:[#allocation8_spill] sm:$0xff] %v6801_v8  ;;  %v6813_v54 = vadd.f32 %v6524_v49, %v8835_v38  ;;  %v6817_v21 = vadd.f32 %v6529_v27, %v8837_v30  ;;  %v8839_v6 = vld [vmem:[#allocation30_spill] sm:$0xff]  ;;  %v8841_v8 = vld [vmem:[#allocation31_spill] sm:$0xff] }
 0x2eb   : > { %8832 = vst [vmem:[#allocation10_spill] sm:$0xff] %v6805_v9  ;;  %8834 = vst [vmem:[#allocation11_spill] sm:$0xff] %v6809_v40  ;;  %v6821_v51 = vadd.f32 %v6510_v25, %v8839_v6  ;;  %v6825_v1 = vadd.f32 %v6519_v48, %v8841_v8  ;;  %v8843_v9 = vld [vmem:[#allocation33_spill] sm:$0xff]  ;;  %v8845_v40 = vld [vmem:[#allocation32_spill] sm:$0xff] }
 0x2ec   : > { %8836 = vst [vmem:[#allocation13_spill] sm:$0xff] %v6813_v54  ;;  %8838 = vst [vmem:[#allocation12_spill] sm:$0xff] %v6817_v21  ;;  %v6829_v24 = vadd.f32 %v6524_v49, %v8843_v9  ;;  %v6833_v38 = vadd.f32 %v6529_v27, %v8845_v40  ;;  %v8847_v54 = vld [vmem:[#allocation34_spill] sm:$0xff]  ;;  %v8849_v21 = vld [vmem:[#allocation35_spill] sm:$0xff] }
 0x2ed   : > { %8840 = vst [vmem:[#allocation14_spill] sm:$0xff] %v6821_v51  ;;  %8842 = vst [vmem:[#allocation15_spill] sm:$0xff] %v6825_v1  ;;  %v6837_v30 = vadd.f32 %v6510_v25, %v8847_v54  ;;  %v6841_v6 = vadd.f32 %v6519_v48, %v8849_v21  ;;  %v8851_v51 = vld [vmem:[#allocation37_spill] sm:$0xff]  ;;  %v8853_v1 = vld [vmem:[#allocation36_spill] sm:$0xff] }
 0x2ee   : > { %8844 = vst [vmem:[#allocation17_spill] sm:$0xff] %v6829_v24  ;;  %8846 = vst [vmem:[#allocation16_spill] sm:$0xff] %v6833_v38  ;;  %v6845_v8 = vadd.f32 %v6524_v49, %v8851_v51  ;;  %v6849_v9 = vadd.f32 %v6529_v27, %v8853_v1  ;;  %v8855_v24 = vld [vmem:[#allocation38_spill] sm:$0xff]  ;;  %v8857_v38 = vld [vmem:[#allocation39_spill] sm:$0xff] }
 0x2ef   : > { %8848 = vst [vmem:[#allocation18_spill] sm:$0xff] %v6837_v30  ;;  %8850 = vst [vmem:[#allocation19_spill] sm:$0xff] %v6841_v6  ;;  %v6853_v40 = vadd.f32 %v6510_v25, %v8855_v24  ;;  %v6857_v54 = vadd.f32 %v6519_v48, %v8857_v38  ;;  %v8859_v30 = vld [vmem:[#allocation41_spill] sm:$0xff]  ;;  %v8861_v6 = vld [vmem:[#allocation40_spill] sm:$0xff] }
 0x2f0   : > { %8852 = vst [vmem:[#allocation21_spill] sm:$0xff] %v6845_v8  ;;  %8854 = vst [vmem:[#allocation20_spill] sm:$0xff] %v6849_v9  ;;  %v6861_v21 = vadd.f32 %v6524_v49, %v8859_v30  ;;  %v6865_v51 = vadd.f32 %v6529_v27, %v8861_v6  ;;  %v8863_v8 = vld [vmem:[#allocation42_spill] sm:$0xff]  ;;  %v8865_v9 = vld [vmem:[#allocation43_spill] sm:$0xff] }
 0x2f1   : > { %8856 = vst [vmem:[#allocation22_spill] sm:$0xff] %v6853_v40  ;;  %8858 = vst [vmem:[#allocation23_spill] sm:$0xff] %v6857_v54  ;;  %v6869_v1 = vadd.f32 %v6510_v25, %v8863_v8  ;;  %v6873_v24 = vadd.f32 %v6519_v48, %v8865_v9  ;;  %v8867_v40 = vld [vmem:[#allocation45_spill] sm:$0xff]  ;;  %v8869_v54 = vld [vmem:[#allocation44_spill] sm:$0xff] }
 0x2f2   : > { %8860 = vst [vmem:[#allocation25_spill] sm:$0xff] %v6861_v21  ;;  %8862 = vst [vmem:[#allocation24_spill] sm:$0xff] %v6865_v51  ;;  %v6877_v38 = vadd.f32 %v6524_v49, %v8867_v40  ;;  %v6881_v30 = vadd.f32 %v6529_v27, %v8869_v54  ;;  %v8871_v21 = vld [vmem:[#allocation46_spill] sm:$0xff]  ;;  %v8873_v51 = vld [vmem:[#allocation47_spill] sm:$0xff] }
 0x2f3   : > { %8864 = vst [vmem:[#allocation26_spill] sm:$0xff] %v6869_v1  ;;  %8866 = vst [vmem:[#allocation27_spill] sm:$0xff] %v6873_v24  ;;  %v6885_v6 = vadd.f32 %v6510_v25, %v8871_v21  ;;  %v6889_v8 = vadd.f32 %v6519_v48, %v8873_v51  ;;  %v8875_v1 = vld [vmem:[#allocation49_spill] sm:$0xff]  ;;  %v8877_v24 = vld [vmem:[#allocation48_spill] sm:$0xff] }
 0x2f4   : > { %8868 = vst [vmem:[#allocation29_spill] sm:$0xff] %v6877_v38  ;;  %8870 = vst [vmem:[#allocation28_spill] sm:$0xff] %v6881_v30  ;;  %v6893_v9 = vadd.f32 %v6524_v49, %v8875_v1  ;;  %v6897_v40 = vadd.f32 %v6529_v27, %v8877_v24  ;;  %v8879_v38 = vld [vmem:[#allocation50_spill] sm:$0xff]  ;;  %v8881_v30 = vld [vmem:[#allocation51_spill] sm:$0xff] }
 0x2f5   : > { %8872 = vst [vmem:[#allocation30_spill] sm:$0xff] %v6885_v6  ;;  %8874 = vst [vmem:[#allocation31_spill] sm:$0xff] %v6889_v8  ;;  %v6901_v54 = vadd.f32 %v6510_v25, %v8879_v38  ;;  %v6905_v21 = vadd.f32 %v6519_v48, %v8881_v30  ;;  %v8883_v6 = vld [vmem:[#allocation53_spill] sm:$0xff]  ;;  %v8885_v8 = vld [vmem:[#allocation52_spill] sm:$0xff] }
 0x2f6   : > { %8876 = vst [vmem:[#allocation33_spill] sm:$0xff] %v6893_v9  ;;  %8878 = vst [vmem:[#allocation32_spill] sm:$0xff] %v6897_v40  ;;  %v6909_v51 = vadd.f32 %v6524_v49, %v8883_v6  ;;  %v6913_v1 = vadd.f32 %v6529_v27, %v8885_v8  ;;  %v8887_v9 = vld [vmem:[#allocation54_spill] sm:$0xff]  ;;  %v8889_v40 = vld [vmem:[#allocation55_spill] sm:$0xff] }
 0x2f7   : > { %8880 = vst [vmem:[#allocation34_spill] sm:$0xff] %v6901_v54  ;;  %8882 = vst [vmem:[#allocation35_spill] sm:$0xff] %v6905_v21  ;;  %v6917_v24 = vadd.f32 %v6510_v25, %v8887_v9  ;;  %v6921_v38 = vadd.f32 %v6519_v48, %v8889_v40  ;;  %v8891_v54 = vld [vmem:[#allocation57_spill] sm:$0xff]  ;;  %v8893_v21 = vld [vmem:[#allocation56_spill] sm:$0xff] }
 0x2f8   : > { %8884 = vst [vmem:[#allocation37_spill] sm:$0xff] %v6909_v51  ;;  %8886 = vst [vmem:[#allocation36_spill] sm:$0xff] %v6913_v1  ;;  %v6925_v30 = vadd.f32 %v6524_v49, %v8891_v54  ;;  %v6929_v6 = vadd.f32 %v6529_v27, %v8893_v21  ;;  %v8895_v51 = vld [vmem:[#allocation58_spill] sm:$0xff]  ;;  %v8897_v1 = vld [vmem:[#allocation59_spill] sm:$0xff] }
 0x2f9   : > { %8888 = vst [vmem:[#allocation38_spill] sm:$0xff] %v6917_v24  ;;  %8890 = vst [vmem:[#allocation39_spill] sm:$0xff] %v6921_v38  ;;  %v6933_v8 = vadd.f32 %v6510_v25, %v8895_v51  ;;  %v6937_v9 = vadd.f32 %v6519_v48, %v8897_v1  ;;  %v8899_v24 = vld [vmem:[#allocation61_spill] sm:$0xff]  ;;  %v8901_v38 = vld [vmem:[#allocation60_spill] sm:$0xff] }
 0x2fa   : > { %8892 = vst [vmem:[#allocation41_spill] sm:$0xff] %v6925_v30  ;;  %8894 = vst [vmem:[#allocation40_spill] sm:$0xff] %v6929_v6  ;;  %v6941_v40 = vadd.f32 %v6524_v49, %v8899_v24  ;;  %v6945_v54 = vadd.f32 %v6529_v27, %v8901_v38  ;;  %v8903_v30 = vld [vmem:[#allocation62_spill] sm:$0xff]  ;;  %v8905_v6 = vld [vmem:[#allocation63_spill] sm:$0xff] }
 0x2fb   : > { %8896 = vst [vmem:[#allocation42_spill] sm:$0xff] %v6933_v8  ;;  %8898 = vst [vmem:[#allocation43_spill] sm:$0xff] %v6937_v9  ;;  %v6949_v21 = vadd.f32 %v6510_v25, %v8903_v30  ;;  %v6953_v51 = vadd.f32 %v6519_v48, %v8905_v6  ;;  %v8907_v8 = vld [vmem:[#allocation65_spill] sm:$0xff]  ;;  %v8909_v9 = vld [vmem:[#allocation64_spill] sm:$0xff] }
 0x2fc   : > { %8900 = vst [vmem:[#allocation45_spill] sm:$0xff] %v6941_v40  ;;  %8902 = vst [vmem:[#allocation44_spill] sm:$0xff] %v6945_v54  ;;  %v6957_v1 = vadd.f32 %v6524_v49, %v8907_v8  ;;  %v6961_v24 = vadd.f32 %v6529_v27, %v8909_v9  ;;  %v8911_v40 = vld [vmem:[#allocation66_spill] sm:$0xff]  ;;  %v8913_v54 = vld [vmem:[#allocation67_spill] sm:$0xff] }
 0x2fd   : > { %8904 = vst [vmem:[#allocation46_spill] sm:$0xff] %v6949_v21  ;;  %8906 = vst [vmem:[#allocation47_spill] sm:$0xff] %v6953_v51  ;;  %v6965_v38 = vadd.f32 %v6510_v25, %v8911_v40  ;;  %v6969_v30 = vadd.f32 %v6519_v48, %v8913_v54  ;;  %v8915_v21 = vld [vmem:[#allocation69_spill] sm:$0xff]  ;;  %v8917_v51 = vld [vmem:[#allocation68_spill] sm:$0xff] }
 0x2fe   : > { %8908 = vst [vmem:[#allocation49_spill] sm:$0xff] %v6957_v1  ;;  %8910 = vst [vmem:[#allocation48_spill] sm:$0xff] %v6961_v24  ;;  %v6973_v6 = vadd.f32 %v6524_v49, %v8915_v21  ;;  %v6977_v8 = vadd.f32 %v6529_v27, %v8917_v51  ;;  %v8919_v1 = vld [vmem:[#allocation70_spill] sm:$0xff]  ;;  %v8921_v24 = vld [vmem:[#allocation71_spill] sm:$0xff] }
 0x2ff   : > { %8912 = vst [vmem:[#allocation50_spill] sm:$0xff] %v6965_v38  ;;  %8914 = vst [vmem:[#allocation51_spill] sm:$0xff] %v6969_v30  ;;  %v6981_v9 = vadd.f32 %v6510_v25, %v8919_v1  ;;  %v6985_v40 = vadd.f32 %v6519_v48, %v8921_v24  ;;  %v8923_v38 = vld [vmem:[#allocation73_spill] sm:$0xff]  ;;  %v8925_v30 = vld [vmem:[#allocation72_spill] sm:$0xff] }
 0x300   : > { %8916 = vst [vmem:[#allocation53_spill] sm:$0xff] %v6973_v6  ;;  %8918 = vst [vmem:[#allocation52_spill] sm:$0xff] %v6977_v8  ;;  %v6989_v54 = vadd.f32 %v6524_v49, %v8923_v38  ;;  %v6993_v21 = vadd.f32 %v6529_v27, %v8925_v30  ;;  %v8927_v6 = vld [vmem:[#allocation74_spill] sm:$0xff]  ;;  %v8929_v8 = vld [vmem:[#allocation75_spill] sm:$0xff] }
 0x301   : > { %8920 = vst [vmem:[#allocation54_spill] sm:$0xff] %v6981_v9  ;;  %8922 = vst [vmem:[#allocation55_spill] sm:$0xff] %v6985_v40  ;;  %v6997_v51 = vadd.f32 %v6510_v25, %v8927_v6  ;;  %v7001_v1 = vadd.f32 %v6519_v48, %v8929_v8  ;;  %v8931_v9 = vld [vmem:[#allocation77_spill] sm:$0xff]  ;;  %v8933_v40 = vld [vmem:[#allocation76_spill] sm:$0xff] }
 0x302   : > { %8924 = vst [vmem:[#allocation57_spill] sm:$0xff] %v6989_v54  ;;  %8926 = vst [vmem:[#allocation56_spill] sm:$0xff] %v6993_v21  ;;  %v7005_v24 = vadd.f32 %v6524_v49, %v8931_v9  ;;  %v7009_v38 = vadd.f32 %v6529_v27, %v8933_v40  ;;  %v8935_v54 = vld [vmem:[#allocation78_spill] sm:$0xff]  ;;  %v8937_v21 = vld [vmem:[#allocation79_spill] sm:$0xff] }
 0x303   : > { %8928 = vst [vmem:[#allocation58_spill] sm:$0xff] %v6997_v51  ;;  %8930 = vst [vmem:[#allocation59_spill] sm:$0xff] %v7001_v1  ;;  %v7013_v30 = vadd.f32 %v6510_v25, %v8935_v54  ;;  %v7017_v6 = vadd.f32 %v6519_v48, %v8937_v21  ;;  %v8939_v51 = vld [vmem:[#allocation81_spill] sm:$0xff]  ;;  %v8941_v1 = vld [vmem:[#allocation80_spill] sm:$0xff] }
 0x304   : > { %8932 = vst [vmem:[#allocation61_spill] sm:$0xff] %v7005_v24  ;;  %8934 = vst [vmem:[#allocation60_spill] sm:$0xff] %v7009_v38  ;;  %v7021_v8 = vadd.f32 %v6524_v49, %v8939_v51  ;;  %v7025_v9 = vadd.f32 %v6529_v27, %v8941_v1  ;;  %v8943_v24 = vld [vmem:[#allocation82_spill] sm:$0xff]  ;;  %v8945_v38 = vld [vmem:[#allocation83_spill] sm:$0xff] }
 0x305   : > { %8936 = vst [vmem:[#allocation62_spill] sm:$0xff] %v7013_v30  ;;  %8938 = vst [vmem:[#allocation63_spill] sm:$0xff] %v7017_v6  ;;  %v7029_v40 = vadd.f32 %v6510_v25, %v8943_v24  ;;  %v7033_v54 = vadd.f32 %v6519_v48, %v8945_v38  ;;  %v8947_v30 = vld [vmem:[#allocation85_spill] sm:$0xff]  ;;  %v8949_v6 = vld [vmem:[#allocation84_spill] sm:$0xff] }
 0x306   : > { %8940 = vst [vmem:[#allocation65_spill] sm:$0xff] %v7021_v8  ;;  %8942 = vst [vmem:[#allocation64_spill] sm:$0xff] %v7025_v9  ;;  %v7037_v21 = vadd.f32 %v6524_v49, %v8947_v30  ;;  %v7041_v51 = vadd.f32 %v6529_v27, %v8949_v6  ;;  %v8951_v8 = vld [vmem:[#allocation86_spill] sm:$0xff]  ;;  %v8953_v9 = vld [vmem:[#allocation87_spill] sm:$0xff] }
 0x307   : > { %8944 = vst [vmem:[#allocation66_spill] sm:$0xff] %v7029_v40  ;;  %8946 = vst [vmem:[#allocation67_spill] sm:$0xff] %v7033_v54  ;;  %v7045_v1 = vadd.f32 %v6510_v25, %v8951_v8  ;;  %v7049_v24 = vadd.f32 %v6519_v48, %v8953_v9  ;;  %v8955_v40 = vld [vmem:[#allocation89_spill] sm:$0xff]  ;;  %v8957_v54 = vld [vmem:[#allocation88_spill] sm:$0xff] }
 0x308   : > { %8948 = vst [vmem:[#allocation69_spill] sm:$0xff] %v7037_v21  ;;  %8950 = vst [vmem:[#allocation68_spill] sm:$0xff] %v7041_v51  ;;  %v7053_v38 = vadd.f32 %v6524_v49, %v8955_v40  ;;  %v7057_v30 = vadd.f32 %v6529_v27, %v8957_v54  ;;  %v8959_v21 = vld [vmem:[#allocation90_spill] sm:$0xff]  ;;  %v8961_v51 = vld [vmem:[#allocation91_spill] sm:$0xff] }
 0x309   : > { %8952 = vst [vmem:[#allocation70_spill] sm:$0xff] %v7045_v1  ;;  %8954 = vst [vmem:[#allocation71_spill] sm:$0xff] %v7049_v24  ;;  %v7061_v6 = vadd.f32 %v6510_v25, %v8959_v21  ;;  %v7065_v8 = vadd.f32 %v6519_v48, %v8961_v51  ;;  %v8963_v1 = vld [vmem:[#allocation93_spill] sm:$0xff]  ;;  %v8965_v24 = vld [vmem:[#allocation92_spill] sm:$0xff] }
 0x30a   : > { %8956 = vst [vmem:[#allocation73_spill] sm:$0xff] %v7053_v38  ;;  %8958 = vst [vmem:[#allocation72_spill] sm:$0xff] %v7057_v30  ;;  %v7069_v9 = vadd.f32 %v6524_v49, %v8963_v1  ;;  %v7073_v40 = vadd.f32 %v6529_v27, %v8965_v24  ;;  %v8967_v38 = vld [vmem:[#allocation94_spill] sm:$0xff]  ;;  %v8969_v30 = vld [vmem:[#allocation95_spill] sm:$0xff] }
 0x30b   : > { %8960 = vst [vmem:[#allocation74_spill] sm:$0xff] %v7061_v6  ;;  %8962 = vst [vmem:[#allocation75_spill] sm:$0xff] %v7065_v8  ;;  %v7077_v54 = vadd.f32 %v6510_v25, %v8967_v38  ;;  %v7081_v21 = vadd.f32 %v6519_v48, %v8969_v30  ;;  %v8971_v6 = vld [vmem:[#allocation97_spill] sm:$0xff]  ;;  %v8973_v8 = vld [vmem:[#allocation96_spill] sm:$0xff] }
 0x30c   : > { %8964 = vst [vmem:[#allocation77_spill] sm:$0xff] %v7069_v9  ;;  %8966 = vst [vmem:[#allocation76_spill] sm:$0xff] %v7073_v40  ;;  %v7085_v51 = vadd.f32 %v6524_v49, %v8971_v6  ;;  %v7089_v1 = vadd.f32 %v6529_v27, %v8973_v8  ;;  %v8975_v9 = vld [vmem:[#allocation98_spill] sm:$0xff]  ;;  %v8977_v40 = vld [vmem:[#allocation99_spill] sm:$0xff] }
 0x30d   : > { %8968 = vst [vmem:[#allocation78_spill] sm:$0xff] %v7077_v54  ;;  %8970 = vst [vmem:[#allocation79_spill] sm:$0xff] %v7081_v21  ;;  %v7093_v24 = vadd.f32 %v6510_v25, %v8975_v9  ;;  %v7097_v38 = vadd.f32 %v6519_v48, %v8977_v40  ;;  %v8979_v54 = vld [vmem:[#allocation101_spill] sm:$0xff]  ;;  %v8981_v21 = vld [vmem:[#allocation100_spill] sm:$0xff] }
 0x30e   : > { %8972 = vst [vmem:[#allocation81_spill] sm:$0xff] %v7085_v51  ;;  %8974 = vst [vmem:[#allocation80_spill] sm:$0xff] %v7089_v1  ;;  %v7101_v30 = vadd.f32 %v6524_v49, %v8979_v54  ;;  %v7105_v6 = vadd.f32 %v6529_v27, %v8981_v21  ;;  %v8983_v51 = vld [vmem:[#allocation102_spill] sm:$0xff]  ;;  %v8985_v1 = vld [vmem:[#allocation103_spill] sm:$0xff] }
 0x30f   : > { %8976 = vst [vmem:[#allocation82_spill] sm:$0xff] %v7093_v24  ;;  %8978 = vst [vmem:[#allocation83_spill] sm:$0xff] %v7097_v38  ;;  %v7109_v8 = vadd.f32 %v6510_v25, %v8983_v51  ;;  %v7113_v9 = vadd.f32 %v6519_v48, %v8985_v1  ;;  %v8987_v24 = vld [vmem:[#allocation105_spill] sm:$0xff]  ;;  %v8989_v38 = vld [vmem:[#allocation104_spill] sm:$0xff] }
 0x310   : > { %8980 = vst [vmem:[#allocation85_spill] sm:$0xff] %v7101_v30  ;;  %8982 = vst [vmem:[#allocation84_spill] sm:$0xff] %v7105_v6  ;;  %v7117_v40 = vadd.f32 %v6524_v49, %v8987_v24  ;;  %v7121_v54 = vadd.f32 %v6529_v27, %v8989_v38  ;;  %v8991_v30 = vld [vmem:[#allocation106_spill] sm:$0xff]  ;;  %v8993_v6 = vld [vmem:[#allocation107_spill] sm:$0xff] }
 0x311   : > { %8984 = vst [vmem:[#allocation86_spill] sm:$0xff] %v7109_v8  ;;  %8986 = vst [vmem:[#allocation87_spill] sm:$0xff] %v7113_v9  ;;  %v7125_v21 = vadd.f32 %v6510_v25, %v8991_v30  ;;  %v7129_v51 = vadd.f32 %v6519_v48, %v8993_v6  ;;  %v8995_v8 = vld [vmem:[#allocation109_spill] sm:$0xff]  ;;  %v8997_v9 = vld [vmem:[#allocation108_spill] sm:$0xff] }
 0x312   : > { %8988 = vst [vmem:[#allocation89_spill] sm:$0xff] %v7117_v40  ;;  %8990 = vst [vmem:[#allocation88_spill] sm:$0xff] %v7121_v54  ;;  %v7133_v1 = vadd.f32 %v6524_v49, %v8995_v8  ;;  %v7137_v24 = vadd.f32 %v6529_v27, %v8997_v9  ;;  %v8999_v40 = vld [vmem:[#allocation110_spill] sm:$0xff]  ;;  %v9001_v54 = vld [vmem:[#allocation111_spill] sm:$0xff] }
 0x313   : > { %8992 = vst [vmem:[#allocation90_spill] sm:$0xff] %v7125_v21  ;;  %8994 = vst [vmem:[#allocation91_spill] sm:$0xff] %v7129_v51  ;;  %v7141_v38 = vadd.f32 %v6510_v25, %v8999_v40  ;;  %v7145_v30 = vadd.f32 %v6519_v48, %v9001_v54  ;;  %v9003_v21 = vld [vmem:[#allocation113_spill] sm:$0xff]  ;;  %v9005_v51 = vld [vmem:[#allocation112_spill] sm:$0xff] }
 0x314   : > { %8996 = vst [vmem:[#allocation93_spill] sm:$0xff] %v7133_v1  ;;  %8998 = vst [vmem:[#allocation92_spill] sm:$0xff] %v7137_v24  ;;  %v7149_v6 = vadd.f32 %v6524_v49, %v9003_v21  ;;  %v7153_v8 = vadd.f32 %v6529_v27, %v9005_v51  ;;  %v9007_v1 = vld [vmem:[#allocation114_spill] sm:$0xff]  ;;  %v9009_v24 = vld [vmem:[#allocation115_spill] sm:$0xff] }
 0x315   : > { %9000 = vst [vmem:[#allocation94_spill] sm:$0xff] %v7141_v38  ;;  %9002 = vst [vmem:[#allocation95_spill] sm:$0xff] %v7145_v30  ;;  %v7157_v9 = vadd.f32 %v6510_v25, %v9007_v1  ;;  %v7161_v40 = vadd.f32 %v6519_v48, %v9009_v24  ;;  %v9011_v38 = vld [vmem:[#allocation117_spill] sm:$0xff]  ;;  %v9013_v30 = vld [vmem:[#allocation116_spill] sm:$0xff] }
 0x316   : > { %9004 = vst [vmem:[#allocation97_spill] sm:$0xff] %v7149_v6  ;;  %9006 = vst [vmem:[#allocation96_spill] sm:$0xff] %v7153_v8  ;;  %v7165_v54 = vadd.f32 %v6524_v49, %v9011_v38  ;;  %v7169_v21 = vadd.f32 %v6529_v27, %v9013_v30  ;;  %v9015_v6 = vld [vmem:[#allocation118_spill] sm:$0xff]  ;;  %v9017_v8 = vld [vmem:[#allocation119_spill] sm:$0xff] }
 0x317   : > { %9008 = vst [vmem:[#allocation98_spill] sm:$0xff] %v7157_v9  ;;  %9010 = vst [vmem:[#allocation99_spill] sm:$0xff] %v7161_v40  ;;  %v7173_v51 = vadd.f32 %v6510_v25, %v9015_v6  ;;  %v7177_v1 = vadd.f32 %v6519_v48, %v9017_v8  ;;  %v9019_v9 = vld [vmem:[#allocation121_spill] sm:$0xff]  ;;  %v9021_v40 = vld [vmem:[#allocation120_spill] sm:$0xff] }
 0x318   : > { %9012 = vst [vmem:[#allocation101_spill] sm:$0xff] %v7165_v54  ;;  %9014 = vst [vmem:[#allocation100_spill] sm:$0xff] %v7169_v21  ;;  %v7181_v24 = vadd.f32 %v6524_v49, %v9019_v9  ;;  %v7185_v38 = vadd.f32 %v6529_v27, %v9021_v40  ;;  %v9023_v54 = vld [vmem:[#allocation122_spill] sm:$0xff]  ;;  %v9025_v21 = vld [vmem:[#allocation123_spill] sm:$0xff] }
 0x319   : > { %9016 = vst [vmem:[#allocation102_spill] sm:$0xff] %v7173_v51  ;;  %9018 = vst [vmem:[#allocation103_spill] sm:$0xff] %v7177_v1  ;;  %v7189_v30 = vadd.f32 %v6510_v25, %v9023_v54  ;;  %v7193_v6 = vadd.f32 %v6519_v48, %v9025_v21  ;;  %v9027_v51 = vld [vmem:[#allocation125_spill] sm:$0xff]  ;;  %v9029_v1 = vld [vmem:[#allocation124_spill] sm:$0xff] }
 0x31a   : > { %9020 = vst [vmem:[#allocation105_spill] sm:$0xff] %v7181_v24  ;;  %9022 = vst [vmem:[#allocation104_spill] sm:$0xff] %v7185_v38  ;;  %v7197_v8 = vadd.f32 %v6524_v49, %v9027_v51  ;;  %v7201_v9 = vadd.f32 %v6529_v27, %v9029_v1  ;;  %v9031_v24 = vld [vmem:[#allocation126_spill] sm:$0xff]  ;;  %v9033_v38 = vld [vmem:[#allocation127_spill] sm:$0xff] }
 0x31b   : > { %9024 = vst [vmem:[#allocation106_spill] sm:$0xff] %v7189_v30  ;;  %9026 = vst [vmem:[#allocation107_spill] sm:$0xff] %v7193_v6  ;;  %v7205_v40 = vadd.f32 %v6510_v25, %v9031_v24  ;;  %v7209_v54 = vadd.f32 %v6519_v48, %v9033_v38  ;;  %v9035_v30 = vld [vmem:[#allocation129_spill] sm:$0xff]  ;;  %v9037_v6 = vld [vmem:[#allocation128_spill] sm:$0xff] }
 0x31c   : > { %9028 = vst [vmem:[#allocation109_spill] sm:$0xff] %v7197_v8  ;;  %9030 = vst [vmem:[#allocation108_spill] sm:$0xff] %v7201_v9  ;;  %v7213_v21 = vadd.f32 %v6524_v49, %v9035_v30  ;;  %v7217_v51 = vadd.f32 %v6529_v27, %v9037_v6  ;;  %v9039_v8 = vld [vmem:[#allocation130_spill] sm:$0xff]  ;;  %v9041_v9 = vld [vmem:[#allocation131_spill] sm:$0xff] }
 0x31d   : > { %9032 = vst [vmem:[#allocation110_spill] sm:$0xff] %v7205_v40  ;;  %9034 = vst [vmem:[#allocation111_spill] sm:$0xff] %v7209_v54  ;;  %v7221_v1 = vadd.f32 %v6510_v25, %v9039_v8  ;;  %v7225_v24 = vadd.f32 %v6519_v48, %v9041_v9  ;;  %v9043_v40 = vld [vmem:[#allocation133_spill] sm:$0xff]  ;;  %v9045_v54 = vld [vmem:[#allocation132_spill] sm:$0xff] }
 0x31e   : > { %9036 = vst [vmem:[#allocation113_spill] sm:$0xff] %v7213_v21  ;;  %9038 = vst [vmem:[#allocation112_spill] sm:$0xff] %v7217_v51  ;;  %v7229_v38 = vadd.f32 %v6524_v49, %v9043_v40  ;;  %v7233_v30 = vadd.f32 %v6529_v27, %v9045_v54  ;;  %v9047_v21 = vld [vmem:[#allocation134_spill] sm:$0xff]  ;;  %v9049_v51 = vld [vmem:[#allocation135_spill] sm:$0xff] }
 0x31f   : > { %9040 = vst [vmem:[#allocation114_spill] sm:$0xff] %v7221_v1  ;;  %9042 = vst [vmem:[#allocation115_spill] sm:$0xff] %v7225_v24  ;;  %v7237_v6 = vadd.f32 %v6510_v25, %v9047_v21  ;;  %v7241_v8 = vadd.f32 %v6519_v48, %v9049_v51  ;;  %v9051_v1 = vld [vmem:[#allocation137_spill] sm:$0xff]  ;;  %v9053_v24 = vld [vmem:[#allocation136_spill] sm:$0xff] }
 0x320   : > { %9044 = vst [vmem:[#allocation117_spill] sm:$0xff] %v7229_v38  ;;  %9046 = vst [vmem:[#allocation116_spill] sm:$0xff] %v7233_v30  ;;  %v7245_v9 = vadd.f32 %v6524_v49, %v9051_v1  ;;  %v7249_v40 = vadd.f32 %v6529_v27, %v9053_v24  ;;  %v9055_v38 = vld [vmem:[#allocation138_spill] sm:$0xff]  ;;  %v9057_v30 = vld [vmem:[#allocation139_spill] sm:$0xff] }
 0x321   : > { %9048 = vst [vmem:[#allocation118_spill] sm:$0xff] %v7237_v6  ;;  %9050 = vst [vmem:[#allocation119_spill] sm:$0xff] %v7241_v8  ;;  %v7253_v54 = vadd.f32 %v6510_v25, %v9055_v38  ;;  %v7257_v21 = vadd.f32 %v6519_v48, %v9057_v30  ;;  %v9059_v6 = vld [vmem:[#allocation141_spill] sm:$0xff]  ;;  %v9061_v8 = vld [vmem:[#allocation140_spill] sm:$0xff] }
 0x322   : > { %9052 = vst [vmem:[#allocation121_spill] sm:$0xff] %v7245_v9  ;;  %9054 = vst [vmem:[#allocation120_spill] sm:$0xff] %v7249_v40  ;;  %v7261_v51 = vadd.f32 %v6524_v49, %v9059_v6  ;;  %v7265_v1 = vadd.f32 %v6529_v27, %v9061_v8  ;;  %v9063_v9 = vld [vmem:[#allocation142_spill] sm:$0xff]  ;;  %v9065_v40 = vld [vmem:[#allocation143_spill] sm:$0xff] }
 0x323   : > { %9056 = vst [vmem:[#allocation122_spill] sm:$0xff] %v7253_v54  ;;  %9058 = vst [vmem:[#allocation123_spill] sm:$0xff] %v7257_v21  ;;  %v7269_v24 = vadd.f32 %v6510_v25, %v9063_v9  ;;  %v7273_v38 = vadd.f32 %v6519_v48, %v9065_v40  ;;  %v9067_v54 = vld [vmem:[#allocation145_spill] sm:$0xff]  ;;  %v9069_v21 = vld [vmem:[#allocation144_spill] sm:$0xff] }
 0x324   : > { %9060 = vst [vmem:[#allocation125_spill] sm:$0xff] %v7261_v51  ;;  %9062 = vst [vmem:[#allocation124_spill] sm:$0xff] %v7265_v1  ;;  %v7277_v30 = vadd.f32 %v6524_v49, %v9067_v54  ;;  %v7281_v6 = vadd.f32 %v6529_v27, %v9069_v21  ;;  %v9071_v51 = vld [vmem:[#allocation146_spill] sm:$0xff]  ;;  %v9073_v1 = vld [vmem:[#allocation147_spill] sm:$0xff] }
 0x325   : > { %9064 = vst [vmem:[#allocation126_spill] sm:$0xff] %v7269_v24  ;;  %9066 = vst [vmem:[#allocation127_spill] sm:$0xff] %v7273_v38  ;;  %v7285_v8 = vadd.f32 %v6510_v25, %v9071_v51  ;;  %v7289_v9 = vadd.f32 %v6519_v48, %v9073_v1  ;;  %v9075_v24 = vld [vmem:[#allocation149_spill] sm:$0xff]  ;;  %v9077_v38 = vld [vmem:[#allocation148_spill] sm:$0xff] }
 0x326   : > { %9068 = vst [vmem:[#allocation129_spill] sm:$0xff] %v7277_v30  ;;  %9070 = vst [vmem:[#allocation128_spill] sm:$0xff] %v7281_v6  ;;  %v7293_v40 = vadd.f32 %v6524_v49, %v9075_v24  ;;  %v7297_v54 = vadd.f32 %v6529_v27, %v9077_v38  ;;  %v9079_v30 = vld [vmem:[#allocation150_spill] sm:$0xff]  ;;  %v9081_v6 = vld [vmem:[#allocation151_spill] sm:$0xff] }
 0x327   : > { %9072 = vst [vmem:[#allocation130_spill] sm:$0xff] %v7285_v8  ;;  %9074 = vst [vmem:[#allocation131_spill] sm:$0xff] %v7289_v9  ;;  %v7301_v21 = vadd.f32 %v6510_v25, %v9079_v30  ;;  %v7305_v51 = vadd.f32 %v6519_v48, %v9081_v6  ;;  %v9083_v8 = vld [vmem:[#allocation153_spill] sm:$0xff]  ;;  %v9085_v9 = vld [vmem:[#allocation152_spill] sm:$0xff] }
 0x328   : > { %9076 = vst [vmem:[#allocation133_spill] sm:$0xff] %v7293_v40  ;;  %9078 = vst [vmem:[#allocation132_spill] sm:$0xff] %v7297_v54  ;;  %v7309_v1 = vadd.f32 %v6524_v49, %v9083_v8  ;;  %v7313_v24 = vadd.f32 %v6529_v27, %v9085_v9  ;;  %v9087_v40 = vld [vmem:[#allocation154_spill] sm:$0xff]  ;;  %v9089_v54 = vld [vmem:[#allocation155_spill] sm:$0xff] }
 0x329   : > { %9080 = vst [vmem:[#allocation134_spill] sm:$0xff] %v7301_v21  ;;  %9082 = vst [vmem:[#allocation135_spill] sm:$0xff] %v7305_v51  ;;  %v7317_v38 = vadd.f32 %v6510_v25, %v9087_v40  ;;  %v7321_v30 = vadd.f32 %v6519_v48, %v9089_v54  ;;  %v9091_v21 = vld [vmem:[#allocation157_spill] sm:$0xff]  ;;  %v9093_v51 = vld [vmem:[#allocation156_spill] sm:$0xff] }
 0x32a   : > { %9084 = vst [vmem:[#allocation137_spill] sm:$0xff] %v7309_v1  ;;  %9086 = vst [vmem:[#allocation136_spill] sm:$0xff] %v7313_v24  ;;  %v7325_v6 = vadd.f32 %v6524_v49, %v9091_v21  ;;  %v7329_v8 = vadd.f32 %v6529_v27, %v9093_v51  ;;  %v9095_v1 = vld [vmem:[#allocation158_spill] sm:$0xff]  ;;  %v9097_v24 = vld [vmem:[#allocation159_spill] sm:$0xff] }
 0x32b   : > { %9088 = vst [vmem:[#allocation138_spill] sm:$0xff] %v7317_v38  ;;  %9090 = vst [vmem:[#allocation139_spill] sm:$0xff] %v7321_v30  ;;  %v7333_v9 = vadd.f32 %v6510_v25, %v9095_v1  ;;  %v7337_v40 = vadd.f32 %v6519_v48, %v9097_v24  ;;  %v9099_v38 = vld [vmem:[#allocation161_spill] sm:$0xff]  ;;  %v9101_v30 = vld [vmem:[#allocation160_spill] sm:$0xff] }
 0x32c   : > { %9092 = vst [vmem:[#allocation141_spill] sm:$0xff] %v7325_v6  ;;  %9094 = vst [vmem:[#allocation140_spill] sm:$0xff] %v7329_v8  ;;  %v7341_v54 = vadd.f32 %v6524_v49, %v9099_v38  ;;  %v7345_v21 = vadd.f32 %v6529_v27, %v9101_v30  ;;  %v9103_v6 = vld [vmem:[#allocation162_spill] sm:$0xff]  ;;  %v9105_v8 = vld [vmem:[#allocation163_spill] sm:$0xff] }
 0x32d   : > { %9096 = vst [vmem:[#allocation142_spill] sm:$0xff] %v7333_v9  ;;  %9098 = vst [vmem:[#allocation143_spill] sm:$0xff] %v7337_v40  ;;  %v7349_v51 = vadd.f32 %v6510_v25, %v9103_v6  ;;  %v7353_v1 = vadd.f32 %v6519_v48, %v9105_v8  ;;  %v9107_v9 = vld [vmem:[#allocation165_spill] sm:$0xff]  ;;  %v9109_v40 = vld [vmem:[#allocation164_spill] sm:$0xff] }
 0x32e   : > { %9100 = vst [vmem:[#allocation145_spill] sm:$0xff] %v7341_v54  ;;  %9102 = vst [vmem:[#allocation144_spill] sm:$0xff] %v7345_v21  ;;  %v7357_v24 = vadd.f32 %v6524_v49, %v9107_v9  ;;  %v7361_v38 = vadd.f32 %v6529_v27, %v9109_v40  ;;  %v9111_v54 = vld [vmem:[#allocation166_spill] sm:$0xff]  ;;  %v9113_v21 = vld [vmem:[#allocation167_spill] sm:$0xff] }
 0x32f   : > { %9104 = vst [vmem:[#allocation146_spill] sm:$0xff] %v7349_v51  ;;  %9106 = vst [vmem:[#allocation147_spill] sm:$0xff] %v7353_v1  ;;  %v7365_v30 = vadd.f32 %v6510_v25, %v9111_v54  ;;  %v7369_v6 = vadd.f32 %v6519_v48, %v9113_v21  ;;  %v9115_v51 = vld [vmem:[#allocation169_spill] sm:$0xff]  ;;  %v9117_v1 = vld [vmem:[#allocation168_spill] sm:$0xff] }
 0x330   : > { %9108 = vst [vmem:[#allocation149_spill] sm:$0xff] %v7357_v24  ;;  %9110 = vst [vmem:[#allocation148_spill] sm:$0xff] %v7361_v38  ;;  %v7373_v8 = vadd.f32 %v6524_v49, %v9115_v51  ;;  %v7377_v9 = vadd.f32 %v6529_v27, %v9117_v1  ;;  %v9119_v24 = vld [vmem:[#allocation170_spill] sm:$0xff]  ;;  %v9121_v38 = vld [vmem:[#allocation171_spill] sm:$0xff] }
 0x331   : > { %9112 = vst [vmem:[#allocation150_spill] sm:$0xff] %v7365_v30  ;;  %9114 = vst [vmem:[#allocation151_spill] sm:$0xff] %v7369_v6  ;;  %v7381_v40 = vadd.f32 %v6510_v25, %v9119_v24  ;;  %v7385_v54 = vadd.f32 %v6519_v48, %v9121_v38  ;;  %v9123_v30 = vld [vmem:[#allocation173_spill] sm:$0xff]  ;;  %v9125_v6 = vld [vmem:[#allocation172_spill] sm:$0xff] }
 0x332   : > { %9116 = vst [vmem:[#allocation153_spill] sm:$0xff] %v7373_v8  ;;  %9118 = vst [vmem:[#allocation152_spill] sm:$0xff] %v7377_v9  ;;  %v7389_v21 = vadd.f32 %v6524_v49, %v9123_v30  ;;  %v7393_v51 = vadd.f32 %v6529_v27, %v9125_v6  ;;  %v9127_v8 = vld [vmem:[#allocation174_spill] sm:$0xff]  ;;  %v9129_v9 = vld [vmem:[#allocation175_spill] sm:$0xff] }
 0x333   : > { %9120 = vst [vmem:[#allocation154_spill] sm:$0xff] %v7381_v40  ;;  %9122 = vst [vmem:[#allocation155_spill] sm:$0xff] %v7385_v54  ;;  %v7397_v1 = vadd.f32 %v6510_v25, %v9127_v8  ;;  %v7401_v24 = vadd.f32 %v6519_v48, %v9129_v9  ;;  %v9131_v40 = vld [vmem:[#allocation177_spill] sm:$0xff]  ;;  %v9133_v54 = vld [vmem:[#allocation176_spill] sm:$0xff] }
 0x334   : > { %9124 = vst [vmem:[#allocation157_spill] sm:$0xff] %v7389_v21  ;;  %9126 = vst [vmem:[#allocation156_spill] sm:$0xff] %v7393_v51  ;;  %v7405_v38 = vadd.f32 %v6524_v49, %v9131_v40  ;;  %v7409_v30 = vadd.f32 %v6529_v27, %v9133_v54  ;;  %v9135_v21 = vld [vmem:[#allocation178_spill] sm:$0xff]  ;;  %v9137_v51 = vld [vmem:[#allocation179_spill] sm:$0xff] }
 0x335   : > { %9128 = vst [vmem:[#allocation158_spill] sm:$0xff] %v7397_v1  ;;  %9130 = vst [vmem:[#allocation159_spill] sm:$0xff] %v7401_v24  ;;  %v7413_v6 = vadd.f32 %v6510_v25, %v9135_v21  ;;  %v7417_v8 = vadd.f32 %v6519_v48, %v9137_v51  ;;  %v9139_v1 = vld [vmem:[#allocation181_spill] sm:$0xff]  ;;  %v9141_v24 = vld [vmem:[#allocation180_spill] sm:$0xff] }
 0x336   : > { %9132 = vst [vmem:[#allocation161_spill] sm:$0xff] %v7405_v38  ;;  %9134 = vst [vmem:[#allocation160_spill] sm:$0xff] %v7409_v30  ;;  %v7421_v9 = vadd.f32 %v6524_v49, %v9139_v1  ;;  %v7425_v40 = vadd.f32 %v6529_v27, %v9141_v24  ;;  %v9143_v38 = vld [vmem:[#allocation182_spill] sm:$0xff]  ;;  %v9145_v30 = vld [vmem:[#allocation183_spill] sm:$0xff] }
 0x337   : > { %9136 = vst [vmem:[#allocation162_spill] sm:$0xff] %v7413_v6  ;;  %9138 = vst [vmem:[#allocation163_spill] sm:$0xff] %v7417_v8  ;;  %v7429_v54 = vadd.f32 %v6510_v25, %v9143_v38  ;;  %v7433_v21 = vadd.f32 %v6519_v48, %v9145_v30  ;;  %v9147_v6 = vld [vmem:[#allocation185_spill] sm:$0xff]  ;;  %v9149_v8 = vld [vmem:[#allocation184_spill] sm:$0xff] }
 0x338   : > { %9140 = vst [vmem:[#allocation165_spill] sm:$0xff] %v7421_v9  ;;  %9142 = vst [vmem:[#allocation164_spill] sm:$0xff] %v7425_v40  ;;  %v7437_v51 = vadd.f32 %v6524_v49, %v9147_v6  ;;  %v7441_v1 = vadd.f32 %v6529_v27, %v9149_v8  ;;  %v9151_v9 = vld [vmem:[#allocation186_spill] sm:$0xff]  ;;  %v9153_v40 = vld [vmem:[#allocation187_spill] sm:$0xff] }
 0x339   : > { %9144 = vst [vmem:[#allocation166_spill] sm:$0xff] %v7429_v54  ;;  %9146 = vst [vmem:[#allocation167_spill] sm:$0xff] %v7433_v21  ;;  %v7445_v24 = vadd.f32 %v6510_v25, %v9151_v9  ;;  %v7449_v38 = vadd.f32 %v6519_v48, %v9153_v40  ;;  %v9155_v54 = vld [vmem:[#allocation189_spill] sm:$0xff]  ;;  %v9157_v21 = vld [vmem:[#allocation188_spill] sm:$0xff] }
 0x33a   : > { %9148 = vst [vmem:[#allocation169_spill] sm:$0xff] %v7437_v51  ;;  %9150 = vst [vmem:[#allocation168_spill] sm:$0xff] %v7441_v1  ;;  %v7453_v30 = vadd.f32 %v6524_v49, %v9155_v54  ;;  %v7457_v6 = vadd.f32 %v6529_v27, %v9157_v21  ;;  %v9159_v51 = vld [vmem:[#allocation190_spill] sm:$0xff]  ;;  %v9161_v1 = vld [vmem:[#allocation191_spill] sm:$0xff] }
 0x33b   : > { %9152 = vst [vmem:[#allocation170_spill] sm:$0xff] %v7445_v24  ;;  %9154 = vst [vmem:[#allocation171_spill] sm:$0xff] %v7449_v38  ;;  %v7461_v8 = vadd.f32 %v6510_v25, %v9159_v51  ;;  %v7465_v9 = vadd.f32 %v6519_v48, %v9161_v1  ;;  %v9163_v24 = vld [vmem:[#allocation193_spill] sm:$0xff]  ;;  %v9165_v38 = vld [vmem:[#allocation192_spill] sm:$0xff] }
 0x33c   : > { %9156 = vst [vmem:[#allocation173_spill] sm:$0xff] %v7453_v30  ;;  %9158 = vst [vmem:[#allocation172_spill] sm:$0xff] %v7457_v6  ;;  %v7469_v40 = vadd.f32 %v6524_v49, %v9163_v24  ;;  %v7473_v54 = vadd.f32 %v6529_v27, %v9165_v38  ;;  %v9167_v30 = vld [vmem:[#allocation194_spill] sm:$0xff]  ;;  %v9169_v6 = vld [vmem:[#allocation195_spill] sm:$0xff] }
 0x33d   : > { %9160 = vst [vmem:[#allocation174_spill] sm:$0xff] %v7461_v8  ;;  %9162 = vst [vmem:[#allocation175_spill] sm:$0xff] %v7465_v9  ;;  %v7477_v21 = vadd.f32 %v6510_v25, %v9167_v30  ;;  %v7481_v51 = vadd.f32 %v6519_v48, %v9169_v6  ;;  %v9171_v8 = vld [vmem:[#allocation197_spill] sm:$0xff]  ;;  %v9173_v9 = vld [vmem:[#allocation196_spill] sm:$0xff] }
 0x33e   : > { %9164 = vst [vmem:[#allocation177_spill] sm:$0xff] %v7469_v40  ;;  %9166 = vst [vmem:[#allocation176_spill] sm:$0xff] %v7473_v54  ;;  %v7485_v1 = vadd.f32 %v6524_v49, %v9171_v8  ;;  %v7489_v24 = vadd.f32 %v6529_v27, %v9173_v9  ;;  %v9175_v40 = vld [vmem:[#allocation198_spill] sm:$0xff]  ;;  %v9177_v54 = vld [vmem:[#allocation199_spill] sm:$0xff] }
 0x33f   : > { %9168 = vst [vmem:[#allocation178_spill] sm:$0xff] %v7477_v21  ;;  %9170 = vst [vmem:[#allocation179_spill] sm:$0xff] %v7481_v51  ;;  %v7493_v38 = vadd.f32 %v6510_v25, %v9175_v40  ;;  %v7497_v30 = vadd.f32 %v6519_v48, %v9177_v54  ;;  %v9179_v21 = vld [vmem:[#allocation201_spill] sm:$0xff]  ;;  %v9181_v51 = vld [vmem:[#allocation200_spill] sm:$0xff] }
 0x340   : > { %9172 = vst [vmem:[#allocation181_spill] sm:$0xff] %v7485_v1  ;;  %9174 = vst [vmem:[#allocation180_spill] sm:$0xff] %v7489_v24  ;;  %v7501_v6 = vadd.f32 %v6524_v49, %v9179_v21  ;;  %v7505_v8 = vadd.f32 %v6529_v27, %v9181_v51  ;;  %v9183_v1 = vld [vmem:[#allocation202_spill] sm:$0xff]  ;;  %v9185_v24 = vld [vmem:[#allocation203_spill] sm:$0xff] }
 0x341   : > { %9176 = vst [vmem:[#allocation182_spill] sm:$0xff] %v7493_v38  ;;  %9178 = vst [vmem:[#allocation183_spill] sm:$0xff] %v7497_v30  ;;  %v7509_v9 = vadd.f32 %v6510_v25, %v9183_v1  ;;  %v7513_v40 = vadd.f32 %v6519_v48, %v9185_v24  ;;  %v9186_v38 = vld [vmem:[#allocation205_spill] sm:$0xff]  ;;  %v9187_v30 = vld [vmem:[#allocation204_spill] sm:$0xff] }
 0x342   : > { %9180 = vst [vmem:[#allocation185_spill] sm:$0xff] %v7501_v6  ;;  %9182 = vst [vmem:[#allocation184_spill] sm:$0xff] %v7505_v8  ;;  %v7517_v54 = vadd.f32 %v6524_v49, %v9186_v38  ;;  %v7521_v21 = vadd.f32 %v6529_v27, %v9187_v30  ;;  %v9188_v6 = vld [vmem:[#allocation206_spill] sm:$0xff]  ;;  %v9189_v8 = vld [vmem:[#allocation207_spill] sm:$0xff]  ;;  %v7537_v38 = vadd.f32 %v6529_v27, %v6493_v47  ;;  %v2881_v47 = vmax.f32 %v6581_v60, 0.0 }
 0x343   : > { %9184 = vst [vmem:[#allocation186_spill] sm:$0xff] %v7509_v9  ;;  %v7525_v51 = vadd.f32 %v6510_v25, %v9188_v6  ;;  %v7529_v1 = vadd.f32 %v6519_v48, %v9189_v8  ;;  %v9190_v9 = vld [vmem:[#allocation209_spill] sm:$0xff]  ;;  %v7541_v30 = vadd.f32 %v6510_v25, %v6497_v17  ;;  %v7545_v6 = vadd.f32 %v6519_v48, %v6501_v37 }
 0x344   : > { %v7533_v24 = vadd.f32 %v6524_v49, %v9190_v9  ;;  %9192 = vst [vmem:[#allocation189_spill] sm:$0xff] %v7537_v38  ;;  %v7549_v8 = vadd.f32 %v6524_v49, %v6505_v33  ;;  %v7553_v9 = vadd.f32 %v6529_v27, %v6514_v18  ;;  %v2878_v49 = vmax.f32 %v6541_v59, 0.0 }
 0x345   : > { %v2879_v18 = vmax.f32 %v6573_v52, 0.0  ;;  %v2880_v27 = vmax.f32 %v6577_v58, 0.0  ;;  %v2882_v38 = vmax.f32 %v6545_v0, 0.0  ;;  %v2883_v17 = vmax.f32 %v6585_v62, 0.0 }
 0x346   : > { %9191 = vst [vmem:[#allocation187_spill] sm:$0xff] %v7533_v24  ;;  %v2884_v24 = vmax.f32 %v6589_v61, 0.0  ;;  %v2885_v37 = vmax.f32 %v6593_v12, 0.0  ;;  %v2886_v48 = vmax.f32 %v6597_v7, 0.0  ;;  %v2887_v33 = vmax.f32 %v6601_v13, 0.0 }
 0x347   : > { %v2888_v59 = vmax.f32 %v6605_v46, 0.0  ;;  %v2889_v52 = vmax.f32 %v6609_v28, 0.0  ;;  %v3127_v25 = vmax.f32 %v2882_v38, %v2878_v49  ;;  %v3164_v58 = vmax.f32 %v2883_v17, %v2879_v18 }
 0x348   : > { %v3201_v50 = vmax.f32 %v2884_v24, %v2880_v27  ;;  %v3238_v60 = vmax.f32 %v2885_v37, %v2881_v47  ;;  %v2890_v0 = vmax.f32 %v6613_v23, 0.0  ;;  %v2891_v62 = vmax.f32 %v6617_v29, 0.0 }
 0x349   : > { %v2892_v61 = vmax.f32 %v6621_v35, 0.0  ;;  %v2893_v12 = vmax.f32 %v6625_v41, 0.0  ;;  %v3128_v44 = vmax.f32 %v3127_v25, %v2886_v48  ;;  %v3165_v7 = vmax.f32 %v3164_v58, %v2887_v33 }
 0x34a   : > { %v3202_v32 = vmax.f32 %v3201_v50, %v2888_v59  ;;  %v3239_v13 = vmax.f32 %v3238_v60, %v2889_v52  ;;  %v2894_v46 = vmax.f32 %v6629_v36, 0.0  ;;  %v2895_v28 = vmax.f32 %v6633_v42, 0.0 }
 0x34b   : > { %v2896_v38 = vmax.f32 %v6637_v55, 0.0  ;;  %v2897_v24 = vmax.f32 %v6641_v2, 0.0  ;;  %v3129_v47 = vmax.f32 %v3128_v44, %v2890_v0  ;;  %v3166_v23 = vmax.f32 %v3165_v7, %v2891_v62  ;;  %v9195_v7 = vld [vmem:[#allocation214_spill] sm:$0xff] }
 0x34c   : > { %v3203_v17 = vmax.f32 %v3202_v32, %v2892_v61  ;;  %v3240_v29 = vmax.f32 %v3239_v13, %v2893_v12  ;;  %v2898_v35 = vmax.f32 %v6645_v56, 0.0  ;;  %v2899_v41 = vmax.f32 %v6649_v3, 0.0  ;;  %v9193_v61 = vld [vmem:[#allocation213_spill] sm:$0xff]  ;;  %v9194_v12 = vld [vmem:[#allocation212_spill] sm:$0xff] }
 0x34d   : > { %v2900_v25 = vmax.f32 %v6653_v11, 0.0  ;;  %v2901_v50 = vmax.f32 %v6657_v19, 0.0  ;;  %v3130_v37 = vmax.f32 %v3129_v47, %v2894_v46  ;;  %v3167_v36 = vmax.f32 %v3166_v23, %v2895_v28  ;;  %v9196_v46 = vld [vmem:[#allocation215_spill] sm:$0xff]  ;;  %v9197_v47 = vld [vmem:[#allocation217_spill] sm:$0xff]  ;;  %v9198_v23 = vld [vmem:[#allocation216_spill] sm:$0xff] }
 0x34e   : > { %v3204_v48 = vmax.f32 %v3203_v17, %v2896_v38  ;;  %v3241_v42 = vmax.f32 %v3240_v29, %v2897_v24  ;;  %v2902_v55 = vmax.f32 %v6661_v14, 0.0  ;;  %v2903_v2 = vmax.f32 %v6665_v20, 0.0  ;;  %v9199_v17 = vld [vmem:[#allocation218_spill] sm:$0xff] }
 0x34f   : > { %v2904_v44 = vmax.f32 %v6669_v39, 0.0  ;;  %v2905_v32 = vmax.f32 %v6673_v57, 0.0  ;;  %v3131_v33 = vmax.f32 %v3130_v37, %v2898_v35  ;;  %v3168_v56 = vmax.f32 %v3167_v36, %v2899_v41  ;;  %v9200_v35 = vld [vmem:[#allocation219_spill] sm:$0xff] }
 0x350   : > { %v3205_v49 = vmax.f32 %v3204_v48, %v2900_v25  ;;  %v3242_v3 = vmax.f32 %v3241_v42, %v2901_v50  ;;  %v2906_v11 = vmax.f32 %v6677_v31, 0.0  ;;  %v2907_v19 = vmax.f32 %v6681_v26, 0.0  ;;  %v9201_v48 = vld [vmem:[#allocation221_spill] sm:$0xff] }
 0x351   : > { %v2908_v18 = vmax.f32 %v6685_v16, 0.0  ;;  %v2909_v27 = vmax.f32 %v6689_v5, 0.0  ;;  %v3132_v59 = vmax.f32 %v3131_v33, %v2902_v55  ;;  %v3169_v14 = vmax.f32 %v3168_v56, %v2903_v2  ;;  %v9202_v55 = vld [vmem:[#allocation220_spill] sm:$0xff]  ;;  %v9204_v33 = vld [vmem:[#allocation223_spill] sm:$0xff] }
 0x352   : > { %v3206_v52 = vmax.f32 %v3205_v49, %v2904_v44  ;;  %v3243_v20 = vmax.f32 %v3242_v3, %v2905_v32  ;;  %v2910_v39 = vmax.f32 %v6693_v15, 0.0  ;;  %v2911_v57 = vmax.f32 %v6697_v10, 0.0  ;;  %v9203_v44 = vld [vmem:[#allocation222_spill] sm:$0xff] }
 0x353   : > { %v2912_v58 = vmax.f32 %v6701_v53, 0.0  ;;  %v2913_v60 = vmax.f32 %v6705_v34, 0.0  ;;  %v3133_v0 = vmax.f32 %v3132_v59, %v2906_v11  ;;  %v3170_v31 = vmax.f32 %v3169_v14, %v2907_v19  ;;  %v9206_v59 = vld [vmem:[#allocation224_spill] sm:$0xff] }
 0x354   : > { %v3207_v62 = vmax.f32 %v3206_v52, %v2908_v18  ;;  %v3244_v26 = vmax.f32 %v3243_v20, %v2909_v27  ;;  %v2914_v16 = vmax.f32 %v9193_v61, 0.0  ;;  %v2915_v5 = vmax.f32 %v9194_v12, 0.0  ;;  %v9205_v18 = vld [vmem:[#allocation225_spill] sm:$0xff]  ;;  %v9207_v52 = vld [vmem:[#allocation226_spill] sm:$0xff]  ;;  %v9210_v61 = vld [vmem:[#allocation228_spill] sm:$0xff] }
 0x355   : > { %v2916_v13 = vmax.f32 %v9195_v7, 0.0  ;;  %v2917_v28 = vmax.f32 %v9196_v46, 0.0  ;;  %v3134_v38 = vmax.f32 %v3133_v0, %v2910_v39  ;;  %v3171_v15 = vmax.f32 %v3170_v31, %v2911_v57  ;;  %v9208_v39 = vld [vmem:[#allocation227_spill] sm:$0xff]  ;;  %v9211_v12 = vld [vmem:[#allocation230_spill] sm:$0xff]  ;;  %v9212_v7 = vld [vmem:[#allocation5_spill] sm:$0xff] }
 0x356   : > { %v3208_v24 = vmax.f32 %v3207_v62, %v2912_v58  ;;  %v3245_v10 = vmax.f32 %v3244_v26, %v2913_v60  ;;  %v2918_v53 = vmax.f32 %v9197_v47, 0.0  ;;  %v2919_v34 = vmax.f32 %v9198_v23, 0.0  ;;  %v9209_v62 = vld [vmem:[#allocation229_spill] sm:$0xff]  ;;  %v9214_v47 = vld [vmem:[#allocation7_spill] sm:$0xff] }
 0x357   : > { %v2920_v29 = vmax.f32 %v9199_v17, 0.0  ;;  %v2921_v41 = vmax.f32 %v9200_v35, 0.0  ;;  %v3135_v25 = vmax.f32 %v3134_v38, %v2914_v16  ;;  %v3172_v50 = vmax.f32 %v3171_v15, %v2915_v5  ;;  %v9215_v23 = vld [vmem:[#allocation9_spill] sm:$0xff]  ;;  %v9216_v17 = vld [vmem:[#allocation8_spill] sm:$0xff] }
 0x358   : > { %v3209_v37 = vmax.f32 %v3208_v24, %v2916_v13  ;;  %v3246_v36 = vmax.f32 %v3245_v10, %v2917_v28  ;;  %v2922_v42 = vmax.f32 %v9201_v48, 0.0  ;;  %v2923_v2 = vmax.f32 %v9202_v55, 0.0  ;;  %v9213_v24 = vld [vmem:[#allocation6_spill] sm:$0xff]  ;;  %v9218_v48 = vld [vmem:[#allocation11_spill] sm:$0xff]  ;;  %v9219_v55 = vld [vmem:[#allocation13_spill] sm:$0xff] }
 0x359   : > { %v2924_v32 = vmax.f32 %v9203_v44, 0.0  ;;  %v2925_v56 = vmax.f32 %v9204_v33, 0.0  ;;  %v3136_v49 = vmax.f32 %v3135_v25, %v2918_v53  ;;  %v3173_v3 = vmax.f32 %v3172_v50, %v2919_v34  ;;  %v9220_v44 = vld [vmem:[#allocation12_spill] sm:$0xff] }
 0x35a   : > { %v3210_v11 = vmax.f32 %v3209_v37, %v2920_v29  ;;  %v3247_v19 = vmax.f32 %v3246_v36, %v2921_v41  ;;  %v2926_v27 = vmax.f32 %v9205_v18, 0.0  ;;  %v2927_v14 = vmax.f32 %v9206_v59, 0.0  ;;  %v9217_v37 = vld [vmem:[#allocation10_spill] sm:$0xff]  ;;  %v9222_v18 = vld [vmem:[#allocation15_spill] sm:$0xff]  ;;  %v9223_v59 = vld [vmem:[#allocation17_spill] sm:$0xff] }
 0x35b   : > { %v2928_v20 = vmax.f32 %v9207_v52, 0.0  ;;  %v2929_v57 = vmax.f32 %v9208_v39, 0.0  ;;  %v3137_v58 = vmax.f32 %v3136_v49, %v2922_v42  ;;  %v3174_v60 = vmax.f32 %v3173_v3, %v2923_v2  ;;  %v9224_v52 = vld [vmem:[#allocation16_spill] sm:$0xff] }
 0x35c   : > { %v3211_v0 = vmax.f32 %v3210_v11, %v2924_v32  ;;  %v3248_v31 = vmax.f32 %v3247_v19, %v2925_v56  ;;  %v2930_v26 = vmax.f32 %v9209_v62, 0.0  ;;  %v2931_v16 = vmax.f32 %v9210_v61, 0.0  ;;  %v9221_v11 = vld [vmem:[#allocation14_spill] sm:$0xff]  ;;  %v9226_v62 = vld [vmem:[#allocation19_spill] sm:$0xff]  ;;  %v9227_v61 = vld [vmem:[#allocation21_spill] sm:$0xff] }
 0x35d   : > { %v2932_v5 = vmax.f32 %v9211_v12, 0.0  ;;  %v2933_v13 = vmax.f32 %v9212_v7, 0.0  ;;  %v3138_v46 = vmax.f32 %v3137_v58, %v2926_v27  ;;  %v3175_v28 = vmax.f32 %v3174_v60, %v2927_v14  ;;  %v9228_v12 = vld [vmem:[#allocation20_spill] sm:$0xff] }
 0x35e   : > { %v3212_v38 = vmax.f32 %v3211_v0, %v2928_v20  ;;  %v3249_v15 = vmax.f32 %v3248_v31, %v2929_v57  ;;  %v2934_v10 = vmax.f32 %v9213_v24, 0.0  ;;  %v2935_v53 = vmax.f32 %v9214_v47, 0.0  ;;  %v9225_v0 = vld [vmem:[#allocation18_spill] sm:$0xff]  ;;  %v9230_v24 = vld [vmem:[#allocation23_spill] sm:$0xff]  ;;  %v9231_v47 = vld [vmem:[#allocation25_spill] sm:$0xff] }
 0x35f   : > { %v2936_v34 = vmax.f32 %v9215_v23, 0.0  ;;  %v2937_v29 = vmax.f32 %v9216_v17, 0.0  ;;  %v3139_v35 = vmax.f32 %v3138_v46, %v2930_v26  ;;  %v3176_v41 = vmax.f32 %v3175_v28, %v2931_v16  ;;  %v9232_v23 = vld [vmem:[#allocation24_spill] sm:$0xff] }
 0x360   : > { %v3213_v25 = vmax.f32 %v3212_v38, %v2932_v5  ;;  %v3250_v50 = vmax.f32 %v3249_v15, %v2933_v13  ;;  %v2938_v36 = vmax.f32 %v9217_v37, 0.0  ;;  %v2939_v42 = vmax.f32 %v9218_v48, 0.0  ;;  %v9229_v38 = vld [vmem:[#allocation22_spill] sm:$0xff]  ;;  %v9234_v37 = vld [vmem:[#allocation27_spill] sm:$0xff]  ;;  %v9235_v48 = vld [vmem:[#allocation29_spill] sm:$0xff] }
 0x361   : > { %v2940_v2 = vmax.f32 %v9219_v55, 0.0  ;;  %v2941_v32 = vmax.f32 %v9220_v44, 0.0  ;;  %v3140_v33 = vmax.f32 %v3139_v35, %v2934_v10  ;;  %v3177_v56 = vmax.f32 %v3176_v41, %v2935_v53  ;;  %v9236_v55 = vld [vmem:[#allocation28_spill] sm:$0xff] }
 0x362   : > { %v3214_v49 = vmax.f32 %v3213_v25, %v2936_v34  ;;  %v3251_v3 = vmax.f32 %v3250_v50, %v2937_v29  ;;  %v2942_v19 = vmax.f32 %v9221_v11, 0.0  ;;  %v2943_v27 = vmax.f32 %v9222_v18, 0.0  ;;  %v9233_v25 = vld [vmem:[#allocation26_spill] sm:$0xff]  ;;  %v9238_v11 = vld [vmem:[#allocation31_spill] sm:$0xff]  ;;  %v9239_v18 = vld [vmem:[#allocation33_spill] sm:$0xff] }
 0x363   : > { %v2944_v14 = vmax.f32 %v9223_v59, 0.0  ;;  %v2945_v20 = vmax.f32 %v9224_v52, 0.0  ;;  %v3141_v39 = vmax.f32 %v3140_v33, %v2938_v36  ;;  %v3178_v57 = vmax.f32 %v3177_v56, %v2939_v42  ;;  %v9240_v59 = vld [vmem:[#allocation32_spill] sm:$0xff] }
 0x364   : > { %v3215_v58 = vmax.f32 %v3214_v49, %v2940_v2  ;;  %v3252_v60 = vmax.f32 %v3251_v3, %v2941_v32  ;;  %v2946_v31 = vmax.f32 %v9225_v0, 0.0  ;;  %v2947_v26 = vmax.f32 %v9226_v62, 0.0  ;;  %v9237_v49 = vld [vmem:[#allocation30_spill] sm:$0xff]  ;;  %v9242_v0 = vld [vmem:[#allocation35_spill] sm:$0xff]  ;;  %v9243_v62 = vld [vmem:[#allocation37_spill] sm:$0xff] }
 0x365   : > { %v2948_v16 = vmax.f32 %v9227_v61, 0.0  ;;  %v2949_v5 = vmax.f32 %v9228_v12, 0.0  ;;  %v3142_v7 = vmax.f32 %v3141_v39, %v2942_v19  ;;  %v3179_v13 = vmax.f32 %v3178_v57, %v2943_v27  ;;  %v9244_v61 = vld [vmem:[#allocation36_spill] sm:$0xff] }
 0x366   : > { %v3216_v46 = vmax.f32 %v3215_v58, %v2944_v14  ;;  %v3253_v28 = vmax.f32 %v3252_v60, %v2945_v20  ;;  %v2950_v15 = vmax.f32 %v9229_v38, 0.0  ;;  %v2951_v10 = vmax.f32 %v9230_v24, 0.0  ;;  %v9241_v58 = vld [vmem:[#allocation34_spill] sm:$0xff]  ;;  %v9246_v38 = vld [vmem:[#allocation39_spill] sm:$0xff]  ;;  %v9247_v24 = vld [vmem:[#allocation41_spill] sm:$0xff] }
 0x367   : > { %v2952_v53 = vmax.f32 %v9231_v47, 0.0  ;;  %v2953_v34 = vmax.f32 %v9232_v23, 0.0  ;;  %v3143_v17 = vmax.f32 %v3142_v7, %v2946_v31  ;;  %v3180_v29 = vmax.f32 %v3179_v13, %v2947_v26  ;;  %v9248_v47 = vld [vmem:[#allocation40_spill] sm:$0xff] }
 0x368   : > { %v3217_v35 = vmax.f32 %v3216_v46, %v2948_v16  ;;  %v3254_v41 = vmax.f32 %v3253_v28, %v2949_v5  ;;  %v2954_v50 = vmax.f32 %v9233_v25, 0.0  ;;  %v2955_v36 = vmax.f32 %v9234_v37, 0.0  ;;  %v9245_v46 = vld [vmem:[#allocation38_spill] sm:$0xff]  ;;  %v9250_v25 = vld [vmem:[#allocation43_spill] sm:$0xff]  ;;  %v9251_v37 = vld [vmem:[#allocation45_spill] sm:$0xff] }
 0x369   : > { %v2956_v42 = vmax.f32 %v9235_v48, 0.0  ;;  %v2957_v2 = vmax.f32 %v9236_v55, 0.0  ;;  %v3144_v44 = vmax.f32 %v3143_v17, %v2950_v15  ;;  %v3181_v32 = vmax.f32 %v3180_v29, %v2951_v10  ;;  %v9252_v48 = vld [vmem:[#allocation44_spill] sm:$0xff] }
 0x36a   : > { %v3218_v33 = vmax.f32 %v3217_v35, %v2952_v53  ;;  %v3255_v56 = vmax.f32 %v3254_v41, %v2953_v34  ;;  %v2958_v3 = vmax.f32 %v9237_v49, 0.0  ;;  %v2959_v19 = vmax.f32 %v9238_v11, 0.0  ;;  %v9249_v35 = vld [vmem:[#allocation42_spill] sm:$0xff]  ;;  %v9254_v49 = vld [vmem:[#allocation47_spill] sm:$0xff]  ;;  %v9255_v11 = vld [vmem:[#allocation49_spill] sm:$0xff] }
 0x36b   : > { %v2960_v27 = vmax.f32 %v9239_v18, 0.0  ;;  %v2961_v14 = vmax.f32 %v9240_v59, 0.0  ;;  %v3145_v52 = vmax.f32 %v3144_v44, %v2954_v50  ;;  %v3182_v20 = vmax.f32 %v3181_v32, %v2955_v36  ;;  %v9256_v18 = vld [vmem:[#allocation48_spill] sm:$0xff] }
 0x36c   : > { %v3219_v39 = vmax.f32 %v3218_v33, %v2956_v42  ;;  %v3256_v57 = vmax.f32 %v3255_v56, %v2957_v2  ;;  %v2962_v60 = vmax.f32 %v9241_v58, 0.0  ;;  %v2963_v31 = vmax.f32 %v9242_v0, 0.0  ;;  %v9253_v33 = vld [vmem:[#allocation46_spill] sm:$0xff]  ;;  %v9258_v58 = vld [vmem:[#allocation51_spill] sm:$0xff]  ;;  %v9259_v0 = vld [vmem:[#allocation53_spill] sm:$0xff] }
 0x36d   : > { %v2964_v26 = vmax.f32 %v9243_v62, 0.0  ;;  %v2965_v16 = vmax.f32 %v9244_v61, 0.0  ;;  %v3146_v12 = vmax.f32 %v3145_v52, %v2958_v3  ;;  %v3183_v5 = vmax.f32 %v3182_v20, %v2959_v19  ;;  %v9260_v62 = vld [vmem:[#allocation52_spill] sm:$0xff] }
 0x36e   : > { %v3220_v7 = vmax.f32 %v3219_v39, %v2960_v27  ;;  %v3257_v13 = vmax.f32 %v3256_v57, %v2961_v14  ;;  %v2966_v28 = vmax.f32 %v9245_v46, 0.0  ;;  %v2967_v15 = vmax.f32 %v9246_v38, 0.0  ;;  %v9257_v39 = vld [vmem:[#allocation50_spill] sm:$0xff]  ;;  %v9262_v46 = vld [vmem:[#allocation55_spill] sm:$0xff]  ;;  %v9263_v38 = vld [vmem:[#allocation57_spill] sm:$0xff] }
 0x36f   : > { %v2968_v10 = vmax.f32 %v9247_v24, 0.0  ;;  %v2969_v53 = vmax.f32 %v9248_v47, 0.0  ;;  %v3147_v23 = vmax.f32 %v3146_v12, %v2962_v60  ;;  %v3184_v34 = vmax.f32 %v3183_v5, %v2963_v31  ;;  %v9264_v24 = vld [vmem:[#allocation56_spill] sm:$0xff] }
 0x370   : > { %v3221_v17 = vmax.f32 %v3220_v7, %v2964_v26  ;;  %v3258_v29 = vmax.f32 %v3257_v13, %v2965_v16  ;;  %v2970_v41 = vmax.f32 %v9249_v35, 0.0  ;;  %v2971_v50 = vmax.f32 %v9250_v25, 0.0  ;;  %v9261_v7 = vld [vmem:[#allocation54_spill] sm:$0xff]  ;;  %v9266_v35 = vld [vmem:[#allocation59_spill] sm:$0xff]  ;;  %v9267_v25 = vld [vmem:[#allocation61_spill] sm:$0xff] }
 0x371   : > { %v2972_v36 = vmax.f32 %v9251_v37, 0.0  ;;  %v2973_v42 = vmax.f32 %v9252_v48, 0.0  ;;  %v3148_v55 = vmax.f32 %v3147_v23, %v2966_v28  ;;  %v3185_v2 = vmax.f32 %v3184_v34, %v2967_v15  ;;  %v9268_v37 = vld [vmem:[#allocation60_spill] sm:$0xff] }
 0x372   : > { %v3222_v44 = vmax.f32 %v3221_v17, %v2968_v10  ;;  %v3259_v32 = vmax.f32 %v3258_v29, %v2969_v53  ;;  %v2974_v56 = vmax.f32 %v9253_v33, 0.0  ;;  %v2975_v3 = vmax.f32 %v9254_v49, 0.0  ;;  %v9265_v17 = vld [vmem:[#allocation58_spill] sm:$0xff]  ;;  %v9270_v33 = vld [vmem:[#allocation63_spill] sm:$0xff]  ;;  %v9271_v49 = vld [vmem:[#allocation65_spill] sm:$0xff] }
 0x373   : > { %v2976_v19 = vmax.f32 %v9255_v11, 0.0  ;;  %v2977_v27 = vmax.f32 %v9256_v18, 0.0  ;;  %v3149_v59 = vmax.f32 %v3148_v55, %v2970_v41  ;;  %v3186_v14 = vmax.f32 %v3185_v2, %v2971_v50  ;;  %v9272_v11 = vld [vmem:[#allocation64_spill] sm:$0xff] }
 0x374   : > { %v3223_v52 = vmax.f32 %v3222_v44, %v2972_v36  ;;  %v3260_v20 = vmax.f32 %v3259_v32, %v2973_v42  ;;  %v2978_v57 = vmax.f32 %v9257_v39, 0.0  ;;  %v2979_v60 = vmax.f32 %v9258_v58, 0.0  ;;  %v9269_v44 = vld [vmem:[#allocation62_spill] sm:$0xff]  ;;  %v9274_v39 = vld [vmem:[#allocation67_spill] sm:$0xff]  ;;  %v9275_v58 = vld [vmem:[#allocation69_spill] sm:$0xff] }
 0x375   : > { %v2980_v31 = vmax.f32 %v9259_v0, 0.0  ;;  %v2981_v26 = vmax.f32 %v9260_v62, 0.0  ;;  %v3150_v61 = vmax.f32 %v3149_v59, %v2974_v56  ;;  %v3187_v16 = vmax.f32 %v3186_v14, %v2975_v3  ;;  %v9276_v0 = vld [vmem:[#allocation68_spill] sm:$0xff] }
 0x376   : > { %v3224_v12 = vmax.f32 %v3223_v52, %v2976_v19  ;;  %v3261_v5 = vmax.f32 %v3260_v20, %v2977_v27  ;;  %v2982_v13 = vmax.f32 %v9261_v7, 0.0  ;;  %v2983_v28 = vmax.f32 %v9262_v46, 0.0  ;;  %v9273_v52 = vld [vmem:[#allocation66_spill] sm:$0xff]  ;;  %v9278_v7 = vld [vmem:[#allocation71_spill] sm:$0xff]  ;;  %v9279_v46 = vld [vmem:[#allocation73_spill] sm:$0xff] }
 0x377   : > { %v2984_v15 = vmax.f32 %v9263_v38, 0.0  ;;  %v2985_v10 = vmax.f32 %v9264_v24, 0.0  ;;  %v3151_v47 = vmax.f32 %v3150_v61, %v2978_v57  ;;  %v3188_v53 = vmax.f32 %v3187_v16, %v2979_v60  ;;  %v9280_v38 = vld [vmem:[#allocation72_spill] sm:$0xff] }
 0x378   : > { %v3225_v23 = vmax.f32 %v3224_v12, %v2980_v31  ;;  %v3262_v34 = vmax.f32 %v3261_v5, %v2981_v26  ;;  %v2986_v29 = vmax.f32 %v9265_v17, 0.0  ;;  %v2987_v41 = vmax.f32 %v9266_v35, 0.0  ;;  %v9277_v12 = vld [vmem:[#allocation70_spill] sm:$0xff]  ;;  %v9282_v17 = vld [vmem:[#allocation75_spill] sm:$0xff]  ;;  %v9283_v35 = vld [vmem:[#allocation77_spill] sm:$0xff] }
 0x379   : > { %v2988_v50 = vmax.f32 %v9267_v25, 0.0  ;;  %v2989_v36 = vmax.f32 %v9268_v37, 0.0  ;;  %v3152_v48 = vmax.f32 %v3151_v47, %v2982_v13  ;;  %v3189_v42 = vmax.f32 %v3188_v53, %v2983_v28  ;;  %v9284_v25 = vld [vmem:[#allocation76_spill] sm:$0xff]  ;;  %v9285_v37 = vld [vmem:[#allocation78_spill] sm:$0xff] }
 0x37a   : > { %v3226_v55 = vmax.f32 %v3225_v23, %v2984_v15  ;;  %v3263_v2 = vmax.f32 %v3262_v34, %v2985_v10  ;;  %v2990_v32 = vmax.f32 %v9269_v44, 0.0  ;;  %v2991_v56 = vmax.f32 %v9270_v33, 0.0  ;;  %v9281_v23 = vld [vmem:[#allocation74_spill] sm:$0xff]  ;;  %v9288_v44 = vld [vmem:[#allocation80_spill] sm:$0xff] }
 0x37b   : > { %v2992_v3 = vmax.f32 %v9271_v49, 0.0  ;;  %v2993_v19 = vmax.f32 %v9272_v11, 0.0  ;;  %v3153_v18 = vmax.f32 %v3152_v48, %v2986_v29  ;;  %v3190_v27 = vmax.f32 %v3189_v42, %v2987_v41  ;;  %v9286_v48 = vld [vmem:[#allocation79_spill] sm:$0xff]  ;;  %v9289_v33 = vld [vmem:[#allocation82_spill] sm:$0xff]  ;;  %v9291_v11 = vld [vmem:[#allocation85_spill] sm:$0xff] }
 0x37c   : > { %v3227_v59 = vmax.f32 %v3226_v55, %v2988_v50  ;;  %v3264_v14 = vmax.f32 %v3263_v2, %v2989_v36  ;;  %v2994_v20 = vmax.f32 %v9273_v52, 0.0  ;;  %v2995_v57 = vmax.f32 %v9274_v39, 0.0  ;;  %v9287_v55 = vld [vmem:[#allocation81_spill] sm:$0xff]  ;;  %v9290_v49 = vld [vmem:[#allocation83_spill] sm:$0xff]  ;;  %v9301_v15 = vld [vmem:[#allocation94_spill] sm:$0xff] }
 0x37d   : > { %v2996_v60 = vmax.f32 %v9275_v58, 0.0  ;;  %v2997_v31 = vmax.f32 %v9276_v0, 0.0  ;;  %v3154_v62 = vmax.f32 %v3153_v18, %v2990_v32  ;;  %v3191_v26 = vmax.f32 %v3190_v27, %v2991_v56  ;;  %v9292_v18 = vld [vmem:[#allocation84_spill] sm:$0xff]  ;;  %v9294_v52 = vld [vmem:[#allocation87_spill] sm:$0xff]  ;;  %v9295_v39 = vld [vmem:[#allocation89_spill] sm:$0xff] }
 0x37e   : > { %v3228_v61 = vmax.f32 %v3227_v59, %v2992_v3  ;;  %v3265_v16 = vmax.f32 %v3264_v14, %v2993_v19  ;;  %v2998_v5 = vmax.f32 %v9277_v12, 0.0  ;;  %v2999_v13 = vmax.f32 %v9278_v7, 0.0  ;;  %v9293_v59 = vld [vmem:[#allocation86_spill] sm:$0xff]  ;;  %v9296_v58 = vld [vmem:[#allocation88_spill] sm:$0xff]  ;;  %v9302_v50 = vld [vmem:[#allocation95_spill] sm:$0xff] }
 0x37f   : > { %v3000_v28 = vmax.f32 %v9279_v46, 0.0  ;;  %v7687_v24 = vmax.f32 %v3154_v62, %v2994_v20  ;;  %v7689_v10 = vmax.f32 %v3191_v26, %v2995_v57  ;;  %v3002_v34 = vmax.f32 %v9281_v23, 0.0 }
 0x380   : > { %v7691_v47 = vmax.f32 %v3228_v61, %v2996_v60  ;;  %v7693_v53 = vmax.f32 %v3265_v16, %v2997_v31  ;;  %v3003_v29 = vmax.f32 %v9282_v17, 0.0  ;;  %v3004_v41 = vmax.f32 %v9283_v35, 0.0  ;;  %v9297_v61 = vld [vmem:[#allocation90_spill] sm:$0xff] }
 0x381   : > { %v3006_v36 = vmax.f32 %v9285_v37, 0.0  ;;  %v3007_v42 = vmax.f32 %v9286_v48, 0.0  ;;  %v3008_v2 = vmax.f32 %v9287_v55, 0.0  ;;  %v3009_v32 = vmax.f32 %v9288_v44, 0.0  ;;  %v9298_v37 = vld [vmem:[#allocation91_spill] sm:$0xff]  ;;  %v9299_v55 = vld [vmem:[#allocation93_spill] sm:$0xff] }
 0x382   : > { %v3010_v56 = vmax.f32 %v9289_v33, 0.0  ;;  %v3011_v3 = vmax.f32 %v9290_v49, 0.0  ;;  %v3012_v19 = vmax.f32 %v9291_v11, 0.0  ;;  %v3013_v27 = vmax.f32 %v9292_v18, 0.0  ;;  %v9300_v33 = vld [vmem:[#allocation92_spill] sm:$0xff] }
 0x383   : > { %v3014_v14 = vmax.f32 %v9293_v59, 0.0  ;;  %v3015_v20 = vmax.f32 %v9294_v52, 0.0  ;;  %v3016_v57 = vmax.f32 %v9295_v39, 0.0  ;;  %v3017_v60 = vmax.f32 %v9296_v58, 0.0 }
 0x384   : > { %v3275_v0 = vmax.f32 %v3010_v56, %v3006_v36  ;;  %v3312_v31 = vmax.f32 %v3011_v3, %v3007_v42  ;;  %v3349_v62 = vmax.f32 %v3012_v19, %v3008_v2  ;;  %v3386_v26 = vmax.f32 %v3013_v27, %v3009_v32  ;;  %v9303_v36 = vld [vmem:[#allocation97_spill] sm:$0xff]  ;;  %v9304_v2 = vld [vmem:[#allocation96_spill] sm:$0xff] }
 0x385   : > { %v3018_v16 = vmax.f32 %v9297_v61, 0.0  ;;  %v3019_v48 = vmax.f32 %v9298_v37, 0.0  ;;  %v3020_v44 = vmax.f32 %v9299_v55, 0.0  ;;  %v3021_v49 = vmax.f32 %v9300_v33, 0.0  ;;  %v9305_v61 = vld [vmem:[#allocation98_spill] sm:$0xff]  ;;  %v9306_v55 = vld [vmem:[#allocation99_spill] sm:$0xff] }
 0x386   : > { %v3276_v11 = vmax.f32 %v3275_v0, %v3014_v14  ;;  %v3313_v18 = vmax.f32 %v3312_v31, %v3015_v20  ;;  %v3350_v59 = vmax.f32 %v3349_v62, %v3016_v57  ;;  %v3387_v52 = vmax.f32 %v3386_v26, %v3017_v60  ;;  %v9307_v14 = vld [vmem:[#allocation101_spill] sm:$0xff]  ;;  %v9308_v57 = vld [vmem:[#allocation100_spill] sm:$0xff]  ;;  %v9309_v62 = vld [vmem:[#allocation102_spill] sm:$0xff] }
 0x387   : > { %v3022_v39 = vmax.f32 %v9301_v15, 0.0  ;;  %v3023_v58 = vmax.f32 %v9302_v50, 0.0  ;;  %v3024_v42 = vmax.f32 %v9303_v36, 0.0  ;;  %v3025_v32 = vmax.f32 %v9304_v2, 0.0  ;;  %v9310_v36 = vld [vmem:[#allocation103_spill] sm:$0xff] }
 0x388   : > { %v3277_v56 = vmax.f32 %v3276_v11, %v3018_v16  ;;  %v3314_v3 = vmax.f32 %v3313_v18, %v3019_v48  ;;  %v3351_v19 = vmax.f32 %v3350_v59, %v3020_v44  ;;  %v3388_v27 = vmax.f32 %v3387_v52, %v3021_v49  ;;  %v9311_v16 = vld [vmem:[#allocation105_spill] sm:$0xff]  ;;  %v9312_v44 = vld [vmem:[#allocation104_spill] sm:$0xff] }
 0x389   : > { %v3026_v37 = vmax.f32 %v9305_v61, 0.0  ;;  %v3027_v33 = vmax.f32 %v9306_v55, 0.0  ;;  %v3028_v20 = vmax.f32 %v9307_v14, 0.0  ;;  %v3029_v60 = vmax.f32 %v9308_v57, 0.0  ;;  %v9313_v61 = vld [vmem:[#allocation106_spill] sm:$0xff]  ;;  %v9314_v14 = vld [vmem:[#allocation107_spill] sm:$0xff] }
 0x38a   : > { %v3278_v0 = vmax.f32 %v3277_v56, %v3022_v39  ;;  %v3315_v15 = vmax.f32 %v3314_v3, %v3023_v58  ;;  %v3352_v31 = vmax.f32 %v3351_v19, %v3024_v42  ;;  %v3389_v50 = vmax.f32 %v3388_v27, %v3025_v32  ;;  %v9315_v39 = vld [vmem:[#allocation109_spill] sm:$0xff]  ;;  %v9316_v42 = vld [vmem:[#allocation108_spill] sm:$0xff] }
 0x38b   : > { %v3030_v26 = vmax.f32 %v9309_v62, 0.0  ;;  %v3031_v2 = vmax.f32 %v9310_v36, 0.0  ;;  %v3032_v48 = vmax.f32 %v9311_v16, 0.0  ;;  %v3033_v49 = vmax.f32 %v9312_v44, 0.0  ;;  %v9317_v62 = vld [vmem:[#allocation110_spill] sm:$0xff]  ;;  %v9318_v16 = vld [vmem:[#allocation111_spill] sm:$0xff] }
 0x38c   : > { %v3279_v11 = vmax.f32 %v3278_v0, %v3026_v37  ;;  %v3316_v18 = vmax.f32 %v3315_v15, %v3027_v33  ;;  %v3353_v59 = vmax.f32 %v3352_v31, %v3028_v20  ;;  %v3390_v52 = vmax.f32 %v3389_v50, %v3029_v60  ;;  %v9319_v37 = vld [vmem:[#allocation113_spill] sm:$0xff]  ;;  %v9320_v20 = vld [vmem:[#allocation112_spill] sm:$0xff] }
 0x38d   : > { %v3034_v55 = vmax.f32 %v9313_v61, 0.0  ;;  %v3035_v57 = vmax.f32 %v9314_v14, 0.0  ;;  %v3036_v58 = vmax.f32 %v9315_v39, 0.0  ;;  %v3037_v32 = vmax.f32 %v9316_v42, 0.0  ;;  %v9321_v61 = vld [vmem:[#allocation114_spill] sm:$0xff]  ;;  %v9322_v39 = vld [vmem:[#allocation115_spill] sm:$0xff] }
 0x38e   : > { %v3280_v56 = vmax.f32 %v3279_v11, %v3030_v26  ;;  %v3317_v3 = vmax.f32 %v3316_v18, %v3031_v2  ;;  %v3354_v19 = vmax.f32 %v3353_v59, %v3032_v48  ;;  %v3391_v27 = vmax.f32 %v3390_v52, %v3033_v49  ;;  %v9323_v26 = vld [vmem:[#allocation117_spill] sm:$0xff]  ;;  %v9324_v48 = vld [vmem:[#allocation116_spill] sm:$0xff] }
 0x38f   : > { %v3038_v36 = vmax.f32 %v9317_v62, 0.0  ;;  %v3039_v44 = vmax.f32 %v9318_v16, 0.0  ;;  %v3040_v33 = vmax.f32 %v9319_v37, 0.0  ;;  %v3041_v60 = vmax.f32 %v9320_v20, 0.0  ;;  %v9325_v62 = vld [vmem:[#allocation118_spill] sm:$0xff]  ;;  %v9326_v37 = vld [vmem:[#allocation119_spill] sm:$0xff] }
 0x390   : > { %v3281_v0 = vmax.f32 %v3280_v56, %v3034_v55  ;;  %v3318_v15 = vmax.f32 %v3317_v3, %v3035_v57  ;;  %v3355_v31 = vmax.f32 %v3354_v19, %v3036_v58  ;;  %v3392_v50 = vmax.f32 %v3391_v27, %v3037_v32  ;;  %v9327_v55 = vld [vmem:[#allocation121_spill] sm:$0xff]  ;;  %v9328_v58 = vld [vmem:[#allocation120_spill] sm:$0xff] }
 0x391   : > { %v3042_v14 = vmax.f32 %v9321_v61, 0.0  ;;  %v3043_v42 = vmax.f32 %v9322_v39, 0.0  ;;  %v3044_v2 = vmax.f32 %v9323_v26, 0.0  ;;  %v3045_v49 = vmax.f32 %v9324_v48, 0.0  ;;  %v9329_v61 = vld [vmem:[#allocation122_spill] sm:$0xff]  ;;  %v9330_v26 = vld [vmem:[#allocation123_spill] sm:$0xff] }
 0x392   : > { %v3282_v11 = vmax.f32 %v3281_v0, %v3038_v36  ;;  %v3319_v18 = vmax.f32 %v3318_v15, %v3039_v44  ;;  %v3356_v59 = vmax.f32 %v3355_v31, %v3040_v33  ;;  %v3393_v52 = vmax.f32 %v3392_v50, %v3041_v60  ;;  %v9331_v36 = vld [vmem:[#allocation125_spill] sm:$0xff]  ;;  %v9332_v33 = vld [vmem:[#allocation124_spill] sm:$0xff] }
 0x393   : > { %v3046_v16 = vmax.f32 %v9325_v62, 0.0  ;;  %v3047_v20 = vmax.f32 %v9326_v37, 0.0  ;;  %v3048_v57 = vmax.f32 %v9327_v55, 0.0  ;;  %v3049_v32 = vmax.f32 %v9328_v58, 0.0  ;;  %v9333_v62 = vld [vmem:[#allocation126_spill] sm:$0xff]  ;;  %v9334_v55 = vld [vmem:[#allocation127_spill] sm:$0xff] }
 0x394   : > { %v3283_v56 = vmax.f32 %v3282_v11, %v3042_v14  ;;  %v3320_v3 = vmax.f32 %v3319_v18, %v3043_v42  ;;  %v3357_v19 = vmax.f32 %v3356_v59, %v3044_v2  ;;  %v3394_v27 = vmax.f32 %v3393_v52, %v3045_v49  ;;  %v9335_v14 = vld [vmem:[#allocation129_spill] sm:$0xff]  ;;  %v9336_v2 = vld [vmem:[#allocation128_spill] sm:$0xff] }
 0x395   : > { %v3050_v39 = vmax.f32 %v9329_v61, 0.0  ;;  %v3051_v48 = vmax.f32 %v9330_v26, 0.0  ;;  %v3052_v44 = vmax.f32 %v9331_v36, 0.0  ;;  %v3053_v60 = vmax.f32 %v9332_v33, 0.0  ;;  %v9337_v61 = vld [vmem:[#allocation130_spill] sm:$0xff]  ;;  %v9338_v36 = vld [vmem:[#allocation131_spill] sm:$0xff] }
 0x396   : > { %v3284_v0 = vmax.f32 %v3283_v56, %v3046_v16  ;;  %v3321_v15 = vmax.f32 %v3320_v3, %v3047_v20  ;;  %v3358_v31 = vmax.f32 %v3357_v19, %v3048_v57  ;;  %v3395_v50 = vmax.f32 %v3394_v27, %v3049_v32  ;;  %v9339_v16 = vld [vmem:[#allocation133_spill] sm:$0xff]  ;;  %v9340_v57 = vld [vmem:[#allocation132_spill] sm:$0xff] }
 0x397   : > { %v3054_v37 = vmax.f32 %v9333_v62, 0.0  ;;  %v3055_v58 = vmax.f32 %v9334_v55, 0.0  ;;  %v3056_v42 = vmax.f32 %v9335_v14, 0.0  ;;  %v3057_v49 = vmax.f32 %v9336_v2, 0.0  ;;  %v9341_v62 = vld [vmem:[#allocation134_spill] sm:$0xff]  ;;  %v9342_v14 = vld [vmem:[#allocation135_spill] sm:$0xff] }
 0x398   : > { %v3285_v11 = vmax.f32 %v3284_v0, %v3050_v39  ;;  %v3322_v18 = vmax.f32 %v3321_v15, %v3051_v48  ;;  %v3359_v59 = vmax.f32 %v3358_v31, %v3052_v44  ;;  %v3396_v52 = vmax.f32 %v3395_v50, %v3053_v60  ;;  %v9343_v39 = vld [vmem:[#allocation137_spill] sm:$0xff]  ;;  %v9344_v44 = vld [vmem:[#allocation136_spill] sm:$0xff] }
 0x399   : > { %v3058_v26 = vmax.f32 %v9337_v61, 0.0  ;;  %v3059_v33 = vmax.f32 %v9338_v36, 0.0  ;;  %v3060_v20 = vmax.f32 %v9339_v16, 0.0  ;;  %v3061_v32 = vmax.f32 %v9340_v57, 0.0  ;;  %v9345_v61 = vld [vmem:[#allocation138_spill] sm:$0xff]  ;;  %v9346_v16 = vld [vmem:[#allocation139_spill] sm:$0xff] }
 0x39a   : > { %v3286_v56 = vmax.f32 %v3285_v11, %v3054_v37  ;;  %v3323_v3 = vmax.f32 %v3322_v18, %v3055_v58  ;;  %v3360_v19 = vmax.f32 %v3359_v59, %v3056_v42  ;;  %v3397_v27 = vmax.f32 %v3396_v52, %v3057_v49  ;;  %v9347_v37 = vld [vmem:[#allocation141_spill] sm:$0xff]  ;;  %v9348_v42 = vld [vmem:[#allocation140_spill] sm:$0xff] }
 0x39b   : > { %v3062_v55 = vmax.f32 %v9341_v62, 0.0  ;;  %v3063_v2 = vmax.f32 %v9342_v14, 0.0  ;;  %v3064_v48 = vmax.f32 %v9343_v39, 0.0  ;;  %v3065_v60 = vmax.f32 %v9344_v44, 0.0  ;;  %v9349_v62 = vld [vmem:[#allocation142_spill] sm:$0xff]  ;;  %v9350_v39 = vld [vmem:[#allocation143_spill] sm:$0xff] }
 0x39c   : > { %v3287_v0 = vmax.f32 %v3286_v56, %v3058_v26  ;;  %v3324_v15 = vmax.f32 %v3323_v3, %v3059_v33  ;;  %v3361_v31 = vmax.f32 %v3360_v19, %v3060_v20  ;;  %v3398_v50 = vmax.f32 %v3397_v27, %v3061_v32  ;;  %v9351_v26 = vld [vmem:[#allocation145_spill] sm:$0xff]  ;;  %v9352_v20 = vld [vmem:[#allocation144_spill] sm:$0xff] }
 0x39d   : > { %v3066_v36 = vmax.f32 %v9345_v61, 0.0  ;;  %v3067_v57 = vmax.f32 %v9346_v16, 0.0  ;;  %v3068_v58 = vmax.f32 %v9347_v37, 0.0  ;;  %v3069_v49 = vmax.f32 %v9348_v42, 0.0  ;;  %v9353_v61 = vld [vmem:[#allocation146_spill] sm:$0xff]  ;;  %v9354_v37 = vld [vmem:[#allocation147_spill] sm:$0xff] }
 0x39e   : > { %v3288_v11 = vmax.f32 %v3287_v0, %v3062_v55  ;;  %v3325_v18 = vmax.f32 %v3324_v15, %v3063_v2  ;;  %v3362_v59 = vmax.f32 %v3361_v31, %v3064_v48  ;;  %v3399_v52 = vmax.f32 %v3398_v50, %v3065_v60  ;;  %v9355_v55 = vld [vmem:[#allocation149_spill] sm:$0xff]  ;;  %v9356_v48 = vld [vmem:[#allocation148_spill] sm:$0xff] }
 0x39f   : > { %v3070_v14 = vmax.f32 %v9349_v62, 0.0  ;;  %v3071_v44 = vmax.f32 %v9350_v39, 0.0  ;;  %v3072_v33 = vmax.f32 %v9351_v26, 0.0  ;;  %v3073_v32 = vmax.f32 %v9352_v20, 0.0  ;;  %v9357_v62 = vld [vmem:[#allocation150_spill] sm:$0xff]  ;;  %v9358_v26 = vld [vmem:[#allocation151_spill] sm:$0xff] }
 0x3a0   : > { %v3289_v56 = vmax.f32 %v3288_v11, %v3066_v36  ;;  %v3326_v3 = vmax.f32 %v3325_v18, %v3067_v57  ;;  %v3363_v19 = vmax.f32 %v3362_v59, %v3068_v58  ;;  %v3400_v27 = vmax.f32 %v3399_v52, %v3069_v49  ;;  %v9359_v36 = vld [vmem:[#allocation153_spill] sm:$0xff]  ;;  %v9360_v58 = vld [vmem:[#allocation152_spill] sm:$0xff] }
 0x3a1   : > { %v3074_v16 = vmax.f32 %v9353_v61, 0.0  ;;  %v3075_v42 = vmax.f32 %v9354_v37, 0.0  ;;  %v3076_v2 = vmax.f32 %v9355_v55, 0.0  ;;  %v3077_v60 = vmax.f32 %v9356_v48, 0.0  ;;  %v9361_v61 = vld [vmem:[#allocation154_spill] sm:$0xff]  ;;  %v9362_v55 = vld [vmem:[#allocation155_spill] sm:$0xff] }
 0x3a2   : > { %v3290_v0 = vmax.f32 %v3289_v56, %v3070_v14  ;;  %v3327_v15 = vmax.f32 %v3326_v3, %v3071_v44  ;;  %v3364_v31 = vmax.f32 %v3363_v19, %v3072_v33  ;;  %v3401_v50 = vmax.f32 %v3400_v27, %v3073_v32  ;;  %v9363_v14 = vld [vmem:[#allocation157_spill] sm:$0xff]  ;;  %v9364_v33 = vld [vmem:[#allocation156_spill] sm:$0xff] }
 0x3a3   : > { %v3078_v39 = vmax.f32 %v9357_v62, 0.0  ;;  %v3079_v20 = vmax.f32 %v9358_v26, 0.0  ;;  %v3080_v57 = vmax.f32 %v9359_v36, 0.0  ;;  %v3081_v49 = vmax.f32 %v9360_v58, 0.0  ;;  %v9365_v62 = vld [vmem:[#allocation158_spill] sm:$0xff]  ;;  %v9366_v36 = vld [vmem:[#allocation159_spill] sm:$0xff] }
 0x3a4   : > { %v3291_v11 = vmax.f32 %v3290_v0, %v3074_v16  ;;  %v3328_v18 = vmax.f32 %v3327_v15, %v3075_v42  ;;  %v3365_v59 = vmax.f32 %v3364_v31, %v3076_v2  ;;  %v3402_v52 = vmax.f32 %v3401_v50, %v3077_v60  ;;  %v9367_v16 = vld [vmem:[#allocation161_spill] sm:$0xff]  ;;  %v9368_v2 = vld [vmem:[#allocation160_spill] sm:$0xff] }
 0x3a5   : > { %v3082_v37 = vmax.f32 %v9361_v61, 0.0  ;;  %v3083_v48 = vmax.f32 %v9362_v55, 0.0  ;;  %v3084_v44 = vmax.f32 %v9363_v14, 0.0  ;;  %v3085_v32 = vmax.f32 %v9364_v33, 0.0  ;;  %v9369_v61 = vld [vmem:[#allocation162_spill] sm:$0xff]  ;;  %v9370_v14 = vld [vmem:[#allocation163_spill] sm:$0xff] }
 0x3a6   : > { %v3292_v56 = vmax.f32 %v3291_v11, %v3078_v39  ;;  %v3329_v3 = vmax.f32 %v3328_v18, %v3079_v20  ;;  %v3366_v19 = vmax.f32 %v3365_v59, %v3080_v57  ;;  %v3403_v27 = vmax.f32 %v3402_v52, %v3081_v49  ;;  %v9371_v39 = vld [vmem:[#allocation165_spill] sm:$0xff]  ;;  %v9372_v57 = vld [vmem:[#allocation164_spill] sm:$0xff] }
 0x3a7   : > { %v3086_v26 = vmax.f32 %v9365_v62, 0.0  ;;  %v3087_v58 = vmax.f32 %v9366_v36, 0.0  ;;  %v3088_v42 = vmax.f32 %v9367_v16, 0.0  ;;  %v3089_v60 = vmax.f32 %v9368_v2, 0.0  ;;  %v9373_v62 = vld [vmem:[#allocation166_spill] sm:$0xff]  ;;  %v9374_v16 = vld [vmem:[#allocation167_spill] sm:$0xff] }
 0x3a8   : > { %v3293_v0 = vmax.f32 %v3292_v56, %v3082_v37  ;;  %v3330_v15 = vmax.f32 %v3329_v3, %v3083_v48  ;;  %v3367_v31 = vmax.f32 %v3366_v19, %v3084_v44  ;;  %v3404_v50 = vmax.f32 %v3403_v27, %v3085_v32  ;;  %v9375_v37 = vld [vmem:[#allocation169_spill] sm:$0xff]  ;;  %v9376_v44 = vld [vmem:[#allocation168_spill] sm:$0xff] }
 0x3a9   : > { %v3090_v55 = vmax.f32 %v9369_v61, 0.0  ;;  %v3091_v33 = vmax.f32 %v9370_v14, 0.0  ;;  %v3092_v20 = vmax.f32 %v9371_v39, 0.0  ;;  %v3093_v49 = vmax.f32 %v9372_v57, 0.0  ;;  %v9377_v61 = vld [vmem:[#allocation170_spill] sm:$0xff]  ;;  %v9378_v39 = vld [vmem:[#allocation171_spill] sm:$0xff] }
 0x3aa   : > { %v3294_v11 = vmax.f32 %v3293_v0, %v3086_v26  ;;  %v3331_v18 = vmax.f32 %v3330_v15, %v3087_v58  ;;  %v3368_v59 = vmax.f32 %v3367_v31, %v3088_v42  ;;  %v3405_v52 = vmax.f32 %v3404_v50, %v3089_v60  ;;  %v9379_v26 = vld [vmem:[#allocation173_spill] sm:$0xff]  ;;  %v9380_v42 = vld [vmem:[#allocation172_spill] sm:$0xff] }
 0x3ab   : > { %v3094_v36 = vmax.f32 %v9373_v62, 0.0  ;;  %v3095_v2 = vmax.f32 %v9374_v16, 0.0  ;;  %v3096_v48 = vmax.f32 %v9375_v37, 0.0  ;;  %v3097_v32 = vmax.f32 %v9376_v44, 0.0  ;;  %v9381_v62 = vld [vmem:[#allocation174_spill] sm:$0xff]  ;;  %v9382_v37 = vld [vmem:[#allocation175_spill] sm:$0xff] }
 0x3ac   : > { %v3295_v56 = vmax.f32 %v3294_v11, %v3090_v55  ;;  %v3332_v3 = vmax.f32 %v3331_v18, %v3091_v33  ;;  %v3369_v19 = vmax.f32 %v3368_v59, %v3092_v20  ;;  %v3406_v27 = vmax.f32 %v3405_v52, %v3093_v49  ;;  %v9383_v55 = vld [vmem:[#allocation177_spill] sm:$0xff]  ;;  %v9384_v20 = vld [vmem:[#allocation176_spill] sm:$0xff] }
 0x3ad   : > { %v3098_v14 = vmax.f32 %v9377_v61, 0.0  ;;  %v3099_v57 = vmax.f32 %v9378_v39, 0.0  ;;  %v3100_v58 = vmax.f32 %v9379_v26, 0.0  ;;  %v3101_v60 = vmax.f32 %v9380_v42, 0.0  ;;  %v9385_v61 = vld [vmem:[#allocation178_spill] sm:$0xff]  ;;  %v9386_v26 = vld [vmem:[#allocation179_spill] sm:$0xff] }
 0x3ae   : > { %v3296_v0 = vmax.f32 %v3295_v56, %v3094_v36  ;;  %v3333_v15 = vmax.f32 %v3332_v3, %v3095_v2  ;;  %v3370_v31 = vmax.f32 %v3369_v19, %v3096_v48  ;;  %v3407_v50 = vmax.f32 %v3406_v27, %v3097_v32  ;;  %v9387_v36 = vld [vmem:[#allocation181_spill] sm:$0xff]  ;;  %v9388_v48 = vld [vmem:[#allocation180_spill] sm:$0xff] }
 0x3af   : > { %v3102_v16 = vmax.f32 %v9381_v62, 0.0  ;;  %v3103_v44 = vmax.f32 %v9382_v37, 0.0  ;;  %v3104_v33 = vmax.f32 %v9383_v55, 0.0  ;;  %v3105_v49 = vmax.f32 %v9384_v20, 0.0  ;;  %v9389_v62 = vld [vmem:[#allocation182_spill] sm:$0xff]  ;;  %v9390_v55 = vld [vmem:[#allocation183_spill] sm:$0xff] }
 0x3b0   : > { %v3297_v11 = vmax.f32 %v3296_v0, %v3098_v14  ;;  %v3334_v18 = vmax.f32 %v3333_v15, %v3099_v57  ;;  %v3371_v59 = vmax.f32 %v3370_v31, %v3100_v58  ;;  %v3408_v52 = vmax.f32 %v3407_v50, %v3101_v60  ;;  %v9391_v14 = vld [vmem:[#allocation185_spill] sm:$0xff]  ;;  %v9392_v58 = vld [vmem:[#allocation184_spill] sm:$0xff] }
 0x3b1   : > { %v3106_v39 = vmax.f32 %v9385_v61, 0.0  ;;  %v3107_v42 = vmax.f32 %v9386_v26, 0.0  ;;  %v3108_v2 = vmax.f32 %v9387_v36, 0.0  ;;  %v3109_v32 = vmax.f32 %v9388_v48, 0.0  ;;  %v9393_v61 = vld [vmem:[#allocation186_spill] sm:$0xff] }
 0x3b2   : > { %v3298_v56 = vmax.f32 %v3297_v11, %v3102_v16  ;;  %v3335_v3 = vmax.f32 %v3334_v18, %v3103_v44  ;;  %v3372_v19 = vmax.f32 %v3371_v59, %v3104_v33  ;;  %v3409_v27 = vmax.f32 %v3408_v52, %v3105_v49 }
 0x3b3   : > { %v3110_v37 = vmax.f32 %v9389_v62, 0.0  ;;  %v3111_v20 = vmax.f32 %v9390_v55, 0.0  ;;  %v3112_v57 = vmax.f32 %v9391_v14, 0.0  ;;  %v3113_v60 = vmax.f32 %v9392_v58, 0.0 }
 0x3b4   : > { %v3299_v0 = vmax.f32 %v3298_v56, %v3106_v39  ;;  %v3336_v15 = vmax.f32 %v3335_v3, %v3107_v42  ;;  %v3373_v31 = vmax.f32 %v3372_v19, %v3108_v2  ;;  %v3410_v50 = vmax.f32 %v3409_v27, %v3109_v32  ;;  %v9394_v39 = vld [vmem:[#allocation187_spill] sm:$0xff]  ;;  %v9395_v2 = vld [vmem:[#allocation189_spill] sm:$0xff] }
 0x3b5   : > { %v3114_v26 = vmax.f32 %v9393_v61, 0.0  ;;  %v3115_v36 = vmax.f32 %v7513_v40, 0.0  ;;  %v3116_v16 = vmax.f32 %v7517_v54, 0.0  ;;  %v3117_v44 = vmax.f32 %v7521_v21, 0.0 }
 0x3b6   : > { %v3300_v33 = vmax.f32 %v3299_v0, %v3110_v37  ;;  %v3337_v49 = vmax.f32 %v3336_v15, %v3111_v20  ;;  %v3374_v11 = vmax.f32 %v3373_v31, %v3112_v57  ;;  %v3411_v18 = vmax.f32 %v3410_v50, %v3113_v60  ;;  %v9401_v60 = vld [vmem:[#allocation208_spill] sm:$0xff]  ;;  %v9405_v31 = vld [vmem:[#allocation210_spill] sm:$0xff] }
 0x3b7   : > { %v3118_v59 = vmax.f32 %v7525_v51, 0.0  ;;  %v3119_v52 = vmax.f32 %v7529_v1, 0.0  ;;  %v3120_v42 = vmax.f32 %v9394_v39, 0.0  ;;  %v3121_v48 = vmax.f32 %v9395_v2, 0.0 }
 0x3b8   : > { %v3301_v32 = vmax.f32 %v3300_v33, %v3114_v26  ;;  %v3338_v56 = vmax.f32 %v3337_v49, %v3115_v36  ;;  %v3375_v3 = vmax.f32 %v3374_v11, %v3116_v16  ;;  %v3412_v40 = vmax.f32 %v3411_v18, %v3117_v44 }
 0x3b9   : > { %v3122_v54 = vmax.f32 %v7541_v30, 0.0  ;;  %v3123_v21 = vmax.f32 %v7545_v6, 0.0  ;;  %v3124_v19 = vmax.f32 %v7549_v8, 0.0  ;;  %v3125_v27 = vmax.f32 %v7553_v9, 0.0  ;;  %v9403_v9 = vld [vmem:[#allocation211_spill] sm:$0xff] }
 0x3ba   : > { %v3302_v62 = vmax.f32 %v3301_v32, %v3118_v59  ;;  %v3339_v51 = vmax.f32 %v3338_v56, %v3119_v52  ;;  %v3376_v37 = vmax.f32 %v3375_v3, %v3120_v42  ;;  %v3413_v1 = vmax.f32 %v3412_v40, %v3121_v48 }
 0x3bb   : > { %v9396_v55 = vmax.f32 %v6537_v4, 0.0  ;;  %v9397_v20 = vmax.f32 %v6533_v45, 0.0  ;;  %v9398_v57 = vmax.f32 %v6561_v63, 0.0  ;;  %v9399_v58 = vmax.f32 %v6549_v43, 0.0 }
 0x3bc   : > { %v9400_v6 = vmax.f32 %v6565_v22, 0.0  ;;  %v9402_v8 = vmax.f32 %v9401_v60, 0.0  ;;  %v9404_v15 = vmax.f32 %v9403_v9, 0.0  ;;  %v9406_v50 = vmax.f32 %v9405_v31, 0.0 }
 0x3bd   : > { %v3126_v14 = vmax.f32 %v9397_v20, %v9396_v55  ;;  %v3163_v30 = vmax.f32 %v9399_v58, %v9398_v57  ;;  %v3303_v26 = vmax.f32 %v3302_v62, %v3122_v54  ;;  %v3340_v4 = vmax.f32 %v3339_v51, %v3123_v21 }
 0x3be   : > { %v3200_v0 = vmax.f32 %v9402_v8, %v9400_v6  ;;  %v3237_v61 = vmax.f32 %v9406_v50, %v9404_v15  ;;  %v3377_v36 = vmax.f32 %v3376_v37, %v3124_v19  ;;  %v3414_v45 = vmax.f32 %v3413_v1, %v3125_v27 }
 0x3bf   : > { %v3156_v16 = vmax.f32 %v7687_v24, %v3126_v14  ;;  %v3193_v63 = vmax.f32 %v7689_v10, %v3163_v30  ;;  %v3274_v44 = vmax.f32 %v2998_v5, %v3002_v34  ;;  %v3311_v33 = vmax.f32 %v2999_v13, %v3003_v29 }
 0x3c0   : > { %v3230_v43 = vmax.f32 %v7691_v47, %v3200_v0  ;;  %v3267_v22 = vmax.f32 %v7693_v53, %v3237_v61  ;;  %v3348_v24 = vmax.f32 %v3000_v28, %v3004_v41  ;;  %v9407_v10 = vmax.f32 %v9284_v25, 0.0 }
 0x3c1   : > { %v9408_v47 = vmax.f32 %v9280_v38, 0.0  ;;  %v3157_v49 = vrot.slane %v3156_v16, 4  ;;  %v3194_v23 = vrot.slane %v3193_v63, 4  ;;  %v3304_v5 = vmax.f32 %v3303_v26, %v3274_v44 }
 0x3c2   : > { %v3231_v11 = vrot.slane %v3230_v43, 4  ;;  %v3268_v12 = vrot.slane %v3267_v22, 4  ;;  %v3341_v34 = vmax.f32 %v3340_v4, %v3311_v33  ;;  %v3378_v17 = vmax.f32 %v3377_v36, %v3348_v24  ;;  %v9409_v33 = vld [vmem:[#allocation231_spill] sm:$0xff] }
 0x3c3   : > { %v3385_v53 = vmax.f32 %v9408_v47, %v9407_v10  ;;  %v3158_v7 = vmax.f32 %v3156_v16, %v3157_v49  ;;  %v3195_v13 = vmax.f32 %v3193_v63, %v3194_v23  ;;  %v3305_v59 = vrot.slane %v3304_v5, 4 }
 0x3c4   : > { %v3232_v29 = vmax.f32 %v3230_v43, %v3231_v11  ;;  %v3269_v35 = vmax.f32 %v3267_v22, %v3268_v12  ;;  %v3342_v46 = vrot.slane %v3341_v34, 4  ;;  %v3379_v28 = vrot.slane %v3378_v17, 4 }
 0x3c5   : > { %v3415_v18 = vmax.f32 %v3414_v45, %v3385_v53  ;;  %v3159_v25 = vrot.slane %v3158_v7, 2  ;;  %v3196_v52 = vrot.slane %v3195_v13, 2  ;;  %v3306_v42 = vmax.f32 %v3304_v5, %v3305_v59 }
 0x3c6   : > { %v3233_v38 = vrot.slane %v3232_v29, 2  ;;  %v3270_v39 = vrot.slane %v3269_v35, 2  ;;  %v3343_v2 = vmax.f32 %v3341_v34, %v3342_v46  ;;  %v3380_v48 = vmax.f32 %v3378_v17, %v3379_v28 }
 0x3c7   : > { %v3416_v41 = vrot.slane %v3415_v18, 4  ;;  %v3160_v56 = vmax.f32 %v3158_v7, %v3159_v25  ;;  %v3197_v3 = vmax.f32 %v3195_v13, %v3196_v52  ;;  %v3307_v21 = vrot.slane %v3306_v42, 2 }
 0x3c8   : > { %v3234_v40 = vmax.f32 %v3232_v29, %v3233_v38  ;;  %v3271_v54 = vmax.f32 %v3269_v35, %v3270_v39  ;;  %v3344_v19 = vrot.slane %v3343_v2, 2  ;;  %v3381_v27 = vrot.slane %v3380_v48, 2 }
 0x3c9   : > { %v3417_v32 = vmax.f32 %v3415_v18, %v3416_v41  ;;  %v3161_v51 = vrot.slane %v3160_v56, 1  ;;  %v3198_v37 = vrot.slane %v3197_v3, 1  ;;  %v3308_v20 = vmax.f32 %v3306_v42, %v3307_v21 }
 0x3ca   : > { %v3235_v1 = vrot.slane %v3234_v40, 1  ;;  %v3272_v55 = vrot.slane %v3271_v54, 1  ;;  %v3345_v14 = vmax.f32 %v3343_v2, %v3344_v19  ;;  %v3382_v57 = vmax.f32 %v3380_v48, %v3381_v27 }
 0x3cb   : > { %v3418_v62 = vrot.slane %v3417_v32, 2  ;;  %v3162_v30 = vmax.f32 %v3160_v56, %v3161_v51  ;;  %v3199_v6 = vmax.f32 %v3197_v3, %v3198_v37  ;;  %v3309_v0 = vrot.slane %v3308_v20, 1 }
 0x3cc   : > { %v3236_v60 = vmax.f32 %v3234_v40, %v3235_v1  ;;  %v3273_v8 = vmax.f32 %v3271_v54, %v3272_v55  ;;  %v3346_v9 = vrot.slane %v3345_v14, 1  ;;  %v3383_v15 = vrot.slane %v3382_v57, 1 }
 0x3cd   : > { %v3419_v58 = vmax.f32 %v3417_v32, %v3418_v62  ;;  %v3430_v50 = vcombine.low %v3162_v30, %v3199_v6  ;;  %v3310_v26 = vmax.f32 %v3308_v20, %v3309_v0  ;;  %v3849_v16 = vmov 1983009808  }
 0x3ce   : > { %v3431_v61 = vcombine.low %v3236_v60, %v3273_v8  ;;  %v3347_v4 = vmax.f32 %v3345_v14, %v3346_v9  ;;  %v3384_v36 = vmax.f32 %v3382_v57, %v3383_v15  ;;  %v3433_v63 = vunpack.c.l.s4 %v3849_v16 }
 0x3cf   : > { %v3420_v31 = vrot.slane %v3419_v58, 1 }
 0x3d0   : > { %v3447_v43 = vcombine.low %v3310_v26, %v3347_v4  ;;  %v3434_v44 = vunpack.c.0.s8 %v3433_v63 }
 0x3d1   : > { %v3421_v45 = vmax.f32 %v3419_v58, %v3420_v31 }
 0x3d2   : > { %v3437_v24 = vsub.s32 %v3434_v44, %v9409_v33 }
 0x3d3   : > { %v3448_v22 = vcombine.low %v3384_v36, %v3421_v45 }
 0x3d4   : > { %v3438_v10 = vrot.slane %v3430_v50, %v3437_v24  ;;  %v3445_v47 = vrot.slane %v3431_v61, %v3437_v24  ;;  %v3455_v53 = vrot.slane %v3447_v43, %v3437_v24 }
 0x3d5   : > { %v3462_v49 = vrot.slane %v3448_v22, %v3437_v24 }
 0x3d6   : > { %v3446_v23 = vcombine.low %v3438_v10, %v3445_v47 }
 0x3d7   : > { %v3463_v11 = vcombine.low %v3455_v53, %v3462_v49 }
 0x3d9   : > { %v3468_v12 = vrot.slane %v3463_v11, 7 }
 0x3db   : > { %v3470_v5 = vsel %vm3469_vm0, %v3468_v12, %v3446_v23 }
 0x3dc   : > { %v3472_v34 = vsel %vm3471_vm1, %v3468_v12, %v3470_v5 }
 0x3dd   : > { %v3474_v17 = vsel %vm3473_vm2, %v3468_v12, %v3472_v34 }
 0x3de   : > { %v3476_v18 = vsel %vm3475_vm3, %v3468_v12, %v3474_v17 }
 0x3df   : > { %3478 = vst [vmem:[%s256_s25] sm:$0xff] %v3476_v18 }
 0x3e0 PF: > { %p14_p8 = scmp.ge.s32.totalorder %s3895_s20, 4   ;;  %s9410_s15 = smov %s3833_s16 }
 0x3e1   : > { %s9411_s16 = smov %s3837_s17  ;;  %s9412_s17 = smov %s3905_s23 }
 0x3e2   : > { %s9413_s18 = smov %s3895_s20  ;;  %16 = sbr.rel (!%p14_p8) target bundleno = 3 (0x3), region = 82 }
 0x3e9   :  { %3501 = vsyncpa [#allocation3], 1 }
 0x3ea   :  { %3503 = vsyncpa [#allocation3 + $0x1], 1 }

// kernel: tnet_forward.5
= control target key start
LH: loop header
LB: loop body
LE: loop exit
PB: predicated region body
PF: predicated region fallthrough
CT: control target
= control target key end

     0   :  { %14 = vsyncpa [#allocation3], 0  ;;  %s3811_s30 = smov [#allocation2]   ;;  %s4907_s0 = inlined_call_operand.vmem [shape: f32[2,1024], index: 0, kind: input, shape index: {}]   ;;  %s4908_s1 = inlined_call_operand.vmem [shape: bf16[1024,512], index: 1, kind: input, shape index: {}]   ;;  %s4909_s2 = inlined_call_operand.vmem [shape: f32[1,512], index: 2, kind: input, shape index: {}]   ;;  %s4910_s3 = inlined_call_operand.vmem [shape: f32[1,512], index: 3, kind: input, shape index: {}]   ;;  %s4911_s4 = inlined_call_operand.hbm [shape: bf16[512,256], index: 4, kind: input, shape index: {}]   ;;  %s4912_s5 = inlined_call_operand.vmem [shape: f32[1,256], index: 5, kind: input, shape index: {}]   ;;  %s4913_s6 = inlined_call_operand.vmem [shape: f32[1,256], index: 6, kind: input, shape index: {}]   ;;  %s4914_s7 = inlined_call_operand.vmem [shape: f32[256,9], index: 7, kind: input, shape index: {}]   ;;  %s4915_s8 = inlined_call_operand.vmem [shape: f32[1,9], index: 8, kind: input, shape index: {}]   ;;  %s4916_s9 = inlined_call_operand.vmem [shape: f32[2,9], index: 9, kind: output, shape index: {}]  }
   0x1   :  { %s28_s10 = sshll.u32 %s3811_s30, 4  ;;  %s3787_s13 = scalar_lea.hbm %s4911_s4, 8192  ;;  %s29_s10 = int_to_ptr.vmem [resolvable:$true] %s28_s10 }
   0x2   :  { %p3788_p0 = scmp.ne.s32.totalorder %s4911_s4, %s3787_s13  ;;  %p3791_p1 = scmp.lt.u32.totalorder %s3787_s13, %s4911_s4 }
   0x4   :  { %p3793_p2 = pnand %p3791_p1, %p3788_p0 }
   0x6   :  { %3796 = shalt.err (!%p3793_p2)
}
   0x7   :  { %s3797_s18 = scalar_lea.vmem %s29_s10, 8192  ;;  %p3802_p4 = scmp.lt.s32.totalorder %s29_s10, %s29_s10 }
   0x8   :  { %p3798_p3 = scmp.ne.s32.totalorder %s29_s10, %s3797_s18  ;;  %p3803_p5 = scmp.lt.s32.totalorder %s3797_s18, %s3797_s18 }
   0xa   :  { %p3804_p6 = por %p3803_p5, %p3802_p4 }
   0xc   :  { %p3805_p7 = pnand %p3804_p6, %p3798_p3 }
   0xe   :  { %3808 = shalt.err (!%p3805_p7)
}
   0xf   :  { %s3812_s19 = smov 128   ;;  %s3813_s20 = smov 8  }
  0x10   :  { %34 = dma.hbm_to_vmem [thread:$0]  %s4911_s4, 8192, %s29_s10, [#allocation3], %s3812_s19, %s3812_s19, %s3813_s20  }
  0x11   :  { %3809 = dma.done.wait [#allocation3], 8192  }
  0x12   :  { %3810 = vsyncadd [#allocation3], 4294959104  ;;  %v3293_v0 = vld [vmem:[%s4908_s1 + $0x4] ss:$16 sps:$4 sm:$0xff]   ;;  %v3297_v2 = vld [vmem:[%s4908_s1] ss:$16 sps:$4 sm:$0xff]   ;;  %v54_v38 = vlaneseq }
  0x13   :  { %v3295_v1 = vld [vmem:[%s4908_s1 + $0x204] ss:$16 sps:$4 sm:$0xff]   ;;  %1636 = vmatprep.subr.bf16.mxu1 %v3293_v0  ;;  %v3298_v3 = vld [vmem:[%s4908_s1 + $0x200] ss:$16 sps:$4 sm:$0xff]   ;;  %v3814_v36 = vmov 1983009808  }
  0x14   :  { %1677 = vmatprep.subr.bf16.mxu0 %v3295_v1  ;;  %v3299_v4 = vld [vmem:[%s4908_s1 + $0x24] ss:$16 sps:$4 sm:$0xff]   ;;  %1637 = vmatpush1.bf16.msra.mxu1 %v3297_v2  ;;  %v3303_v6 = vld [vmem:[%s4908_s1 + $0x20] ss:$16 sps:$4 sm:$0xff]   ;;  %v52_v37 = vunpack.c.l.s4 %v3814_v36  ;;  %v3995_v43 = vshrl.u32 %v54_v38, 7  ;;  %vm1966_vm0 = vcmask 1041408  }
  0x15   :  { %1678 = vmatpush1.bf16.msra.mxu0 %v3298_v3  ;;  %v3301_v5 = vld [vmem:[%s4908_s1 + $0x224] ss:$16 sps:$4 sm:$0xff]   ;;  %1638 = vmatprep.subr.bf16.mxu1 %v3299_v4  ;;  %v3304_v7 = vld [vmem:[%s4908_s1 + $0x220] ss:$16 sps:$4 sm:$0xff]   ;;  %vm2867_vm1 = vcmask 66560  }
  0x16   :  { %1679 = vmatprep.subr.bf16.mxu0 %v3301_v5  ;;  %v3305_v8 = vld [vmem:[%s4908_s1 + $0x44] ss:$16 sps:$4 sm:$0xff]   ;;  %v3309_v10 = vld [vmem:[%s4908_s1 + $0x40] ss:$16 sps:$4 sm:$0xff]   ;;  %v53_v42 = vunpack.c.0.s8 %v52_v37  ;;  %v3425_v37 = vld [vmem:[%s4908_s1 + $0xac] ss:$16 sps:$4 sm:$0xff]  }
  0x17   :  { %v3307_v9 = vld [vmem:[%s4908_s1 + $0x244] ss:$16 sps:$4 sm:$0xff]   ;;  %v3310_v11 = vld [vmem:[%s4908_s1 + $0x240] ss:$16 sps:$4 sm:$0xff]  }
  0x18   :  { %1639 = vmatpush1.bf16.msra.mxu1 %v3303_v6  ;;  %v3311_v12 = vld [vmem:[%s4908_s1 + $0x64] ss:$16 sps:$4 sm:$0xff]   ;;  %v3315_v14 = vld [vmem:[%s4908_s1 + $0x60] ss:$16 sps:$4 sm:$0xff]   ;;  %v4013_v49 = vsub.s32 %v53_v42, %v3995_v43  ;;  %v4170_v42 = vld [vmem:[%s4907_s0 + $0x8] sm:$0xff] }
  0x19   :  { %1680 = vmatpush1.bf16.msra.mxu0 %v3304_v7  ;;  %1640 = vmatprep.subr.bf16.mxu1 %v3305_v8  ;;  %v3313_v13 = vld [vmem:[%s4908_s1 + $0x264] ss:$16 sps:$4 sm:$0xff]   ;;  %v3316_v15 = vld [vmem:[%s4908_s1 + $0x260] ss:$16 sps:$4 sm:$0xff]  }
  0x1a   :  { %1681 = vmatprep.subr.bf16.mxu0 %v3307_v9  ;;  %v3317_v16 = vld [vmem:[%s4908_s1 + $0x84] ss:$16 sps:$4 sm:$0xff]   ;;  %v3321_v18 = vld [vmem:[%s4908_s1 + $0x80] ss:$16 sps:$4 sm:$0xff]  }
  0x1b   :  { %v3319_v17 = vld [vmem:[%s4908_s1 + $0x284] ss:$16 sps:$4 sm:$0xff]   ;;  %v3322_v19 = vld [vmem:[%s4908_s1 + $0x280] ss:$16 sps:$4 sm:$0xff]  }
  0x1c   :  { %1641 = vmatpush1.bf16.msra.mxu1 %v3309_v10  ;;  %v3323_v20 = vld [vmem:[%s4908_s1 + $0xa4] ss:$16 sps:$4 sm:$0xff]   ;;  %v3327_v22 = vld [vmem:[%s4908_s1 + $0xa0] ss:$16 sps:$4 sm:$0xff]  }
  0x1d   :  { %1682 = vmatpush1.bf16.msra.mxu0 %v3310_v11  ;;  %1642 = vmatprep.subr.bf16.mxu1 %v3311_v12  ;;  %v3325_v21 = vld [vmem:[%s4908_s1 + $0x2a4] ss:$16 sps:$4 sm:$0xff]   ;;  %v3328_v23 = vld [vmem:[%s4908_s1 + $0x2a0] ss:$16 sps:$4 sm:$0xff]  }
  0x1e   :  { %1683 = vmatprep.subr.bf16.mxu0 %v3313_v13  ;;  %v3329_v24 = vld [vmem:[%s4908_s1 + $0xc4] ss:$16 sps:$4 sm:$0xff]   ;;  %v3333_v26 = vld [vmem:[%s4908_s1 + $0xc0] ss:$16 sps:$4 sm:$0xff]  }
  0x1f   :  { %v3331_v25 = vld [vmem:[%s4908_s1 + $0x2c4] ss:$16 sps:$4 sm:$0xff]   ;;  %v3334_v27 = vld [vmem:[%s4908_s1 + $0x2c0] ss:$16 sps:$4 sm:$0xff]  }
  0x20   :  { %1643 = vmatpush1.bf16.msra.mxu1 %v3315_v14  ;;  %v3335_v28 = vld [vmem:[%s4908_s1 + $0xe4] ss:$16 sps:$4 sm:$0xff]   ;;  %v3339_v30 = vld [vmem:[%s4908_s1 + $0xe0] ss:$16 sps:$4 sm:$0xff]  }
  0x21   :  { %1684 = vmatpush1.bf16.msra.mxu0 %v3316_v15  ;;  %1644 = vmatprep.subr.bf16.mxu1 %v3317_v16  ;;  %v3337_v29 = vld [vmem:[%s4908_s1 + $0x2e4] ss:$16 sps:$4 sm:$0xff]   ;;  %v3340_v31 = vld [vmem:[%s4908_s1 + $0x2e0] ss:$16 sps:$4 sm:$0xff]   ;;  %v3395_v15 = vld [vmem:[%s4908_s1 + $0xc] ss:$16 sps:$4 sm:$0xff]  }
  0x22   :  { %1685 = vmatprep.subr.bf16.mxu0 %v3319_v17  ;;  %v3341_v32 = vld [vmem:[%s4908_s1 + $0x104] ss:$16 sps:$4 sm:$0xff]   ;;  %v3345_v34 = vld [vmem:[%s4908_s1 + $0x100] ss:$16 sps:$4 sm:$0xff]  }
  0x23   :  { %v3343_v33 = vld [vmem:[%s4908_s1 + $0x304] ss:$16 sps:$4 sm:$0xff]   ;;  %v3346_v35 = vld [vmem:[%s4908_s1 + $0x300] ss:$16 sps:$4 sm:$0xff]  }
  0x24   :  { %1645 = vmatpush1.bf16.msra.mxu1 %v3321_v18  ;;  %v3347_v39 = vld [vmem:[%s4908_s1 + $0x124] ss:$16 sps:$4 sm:$0xff]   ;;  %v3351_v41 = vld [vmem:[%s4908_s1 + $0x120] ss:$16 sps:$4 sm:$0xff]  }
  0x25   :  { %1686 = vmatpush1.bf16.msra.mxu0 %v3322_v19  ;;  %1646 = vmatprep.subr.bf16.mxu1 %v3323_v20  ;;  %v3349_v40 = vld [vmem:[%s4908_s1 + $0x324] ss:$16 sps:$4 sm:$0xff]   ;;  %v3352_v44 = vld [vmem:[%s4908_s1 + $0x320] ss:$16 sps:$4 sm:$0xff]   ;;  %v3393_v19 = vld [vmem:[%s4908_s1 + $0x8] ss:$16 sps:$4 sm:$0xff]  }
  0x26   :  { %1687 = vmatprep.subr.bf16.mxu0 %v3325_v21  ;;  %v3353_v45 = vld [vmem:[%s4908_s1 + $0x144] ss:$16 sps:$4 sm:$0xff]   ;;  %v3357_v47 = vld [vmem:[%s4908_s1 + $0x140] ss:$16 sps:$4 sm:$0xff]   ;;  %v3401_v21 = vld [vmem:[%s4908_s1 + $0x2c] ss:$16 sps:$4 sm:$0xff]  }
  0x27   :  { %v3355_v46 = vld [vmem:[%s4908_s1 + $0x344] ss:$16 sps:$4 sm:$0xff]   ;;  %v3358_v48 = vld [vmem:[%s4908_s1 + $0x340] ss:$16 sps:$4 sm:$0xff]  }
  0x28   :  { %1647 = vmatpush1.bf16.msra.mxu1 %v3327_v22  ;;  %v3359_v50 = vld [vmem:[%s4908_s1 + $0x164] ss:$16 sps:$4 sm:$0xff]   ;;  %v3363_v53 = vld [vmem:[%s4908_s1 + $0x160] ss:$16 sps:$4 sm:$0xff]  }
  0x29   :  { %1688 = vmatpush1.bf16.msra.mxu0 %v3328_v23  ;;  %1648 = vmatprep.subr.bf16.mxu1 %v3329_v24  ;;  %v3361_v51 = vld [vmem:[%s4908_s1 + $0x364] ss:$16 sps:$4 sm:$0xff]   ;;  %v3364_v56 = vld [vmem:[%s4908_s1 + $0x360] ss:$16 sps:$4 sm:$0xff]   ;;  %v3399_v23 = vld [vmem:[%s4908_s1 + $0x28] ss:$16 sps:$4 sm:$0xff]  }
  0x2a   :  { %1689 = vmatprep.subr.bf16.mxu0 %v3331_v25  ;;  %v46_v52 = vld [vmem:[%s4907_s0] sm:$0xff]  ;;  %v3407_v25 = vld [vmem:[%s4908_s1 + $0x4c] ss:$16 sps:$4 sm:$0xff]  }
  0x2b   :  { %v57_v54 = vrot.slane %v46_v52, %v4013_v49  ;;  %v50_v55 = vcombine.high %v46_v52, %v46_v52  ;;  %v3365_v57 = vld [vmem:[%s4908_s1 + $0x184] ss:$16 sps:$4 sm:$0xff]   ;;  %v3369_v61 = vld [vmem:[%s4908_s1 + $0x180] ss:$16 sps:$4 sm:$0xff]  }
  0x2c   :  { %1649 = vmatpush1.bf16.msra.mxu1 %v3333_v26  ;;  %v3367_v58 = vld [vmem:[%s4908_s1 + $0x384] ss:$16 sps:$4 sm:$0xff]   ;;  %v3370_v0 = vld [vmem:[%s4908_s1 + $0x380] ss:$16 sps:$4 sm:$0xff]  }
  0x2d   :  { %1690 = vmatpush1.bf16.msra.mxu0 %v3334_v27  ;;  %1650 = vmatprep.subr.bf16.mxu1 %v3335_v28  ;;  %v65_v59 = vcombine.high %v57_v54, %v57_v54  ;;  %v64_v60 = vrot.slane %v50_v55, %v4013_v49  ;;  %v3371_v1 = vld [vmem:[%s4908_s1 + $0x1a4] ss:$16 sps:$4 sm:$0xff]   ;;  %v3375_v4 = vld [vmem:[%s4908_s1 + $0x1a0] ss:$16 sps:$4 sm:$0xff]   ;;  %v4089_v16 = vpack.c.bf16 %v57_v54, %v57_v54  ;;  %v3405_v27 = vld [vmem:[%s4908_s1 + $0x48] ss:$16 sps:$4 sm:$0xff]  }
  0x2e   :  { %1691 = vmatprep.subr.bf16.mxu0 %v3337_v29  ;;  %v3373_v2 = vld [vmem:[%s4908_s1 + $0x3a4] ss:$16 sps:$4 sm:$0xff]   ;;  %v3376_v5 = vld [vmem:[%s4908_s1 + $0x3a0] ss:$16 sps:$4 sm:$0xff]   ;;  %v3413_v29 = vld [vmem:[%s4908_s1 + $0x6c] ss:$16 sps:$4 sm:$0xff]  }
  0x2f   :  { %v93_v62 = vpack.c.bf16 %v65_v59, %v65_v59  ;;  %v66_v63 = vcombine.high %v64_v60, %v64_v60  ;;  %v3377_v6 = vld [vmem:[%s4908_s1 + $0x1c4] ss:$16 sps:$4 sm:$0xff]   ;;  %v3381_v8 = vld [vmem:[%s4908_s1 + $0x1c0] ss:$16 sps:$4 sm:$0xff]   ;;  %v4094_v18 = vpack.c.bf16 %v64_v60, %v64_v60  ;;  %v3443_v55 = vld [vmem:[%s4908_s1 + $0x10c] ss:$16 sps:$4 sm:$0xff]  }
  0x30   :  { %1651 = vmatpush1.bf16.msra.mxu1 %v3339_v30  ;;  %v3379_v7 = vld [vmem:[%s4908_s1 + $0x3c4] ss:$16 sps:$4 sm:$0xff]   ;;  %v3382_v9 = vld [vmem:[%s4908_s1 + $0x3c0] ss:$16 sps:$4 sm:$0xff]   ;;  %v3449_v59 = vld [vmem:[%s4908_s1 + $0x12c] ss:$16 sps:$4 sm:$0xff]  }
  0x31   :  { %1692 = vmatpush1.bf16.msra.mxu0 %v3340_v31  ;;  %1652 = vmatprep.subr.bf16.mxu1 %v3341_v32  ;;  %v4050_v3 = vpack.c.bf16 %v66_v63, %v66_v63  ;;  %v3383_v10 = vld [vmem:[%s4908_s1 + $0x1e4] ss:$16 sps:$4 sm:$0xff]   ;;  %v3387_v12 = vld [vmem:[%s4908_s1 + $0x1e0] ss:$16 sps:$4 sm:$0xff]   ;;  %v3411_v31 = vld [vmem:[%s4908_s1 + $0x68] ss:$16 sps:$4 sm:$0xff]  }
  0x32   :  { %1693 = vmatprep.subr.bf16.mxu0 %v3343_v33  ;;  %1668 = vmatprep.mubr.bf16.mxu1 %v93_v62  ;;  %v3385_v11 = vld [vmem:[%s4908_s1 + $0x3e4] ss:$16 sps:$4 sm:$0xff]   ;;  %v3388_v13 = vld [vmem:[%s4908_s1 + $0x3e0] ss:$16 sps:$4 sm:$0xff]   ;;  %v3419_v33 = vld [vmem:[%s4908_s1 + $0x8c] ss:$16 sps:$4 sm:$0xff]  }
  0x33   :  { %1709 = vmatprep.mubr.bf16.mxu0 %v4050_v3  ;;  %v3392_v14 = vld [vmem:[%s4908_s1 + $0x404] ss:$16 sps:$4 sm:$0xff]   ;;  %v3390_v17 = vld [vmem:[%s4908_s1 + $0x400] ss:$16 sps:$4 sm:$0xff]   ;;  %v3455_v63 = vld [vmem:[%s4908_s1 + $0x14c] ss:$16 sps:$4 sm:$0xff]  }
  0x34   :  { %1653 = vmatpush1.bf16.msra.mxu1 %v3345_v34  ;;  %v3398_v20 = vld [vmem:[%s4908_s1 + $0x424] ss:$16 sps:$4 sm:$0xff]   ;;  %v3396_v22 = vld [vmem:[%s4908_s1 + $0x420] ss:$16 sps:$4 sm:$0xff]  }
  0x35   :  { %1694 = vmatpush1.bf16.msra.mxu0 %v3346_v35  ;;  %1654 = vmatprep.subr.bf16.mxu1 %v3347_v39  ;;  %v3404_v24 = vld [vmem:[%s4908_s1 + $0x444] ss:$16 sps:$4 sm:$0xff]   ;;  %v3402_v26 = vld [vmem:[%s4908_s1 + $0x440] ss:$16 sps:$4 sm:$0xff]   ;;  %v3417_v35 = vld [vmem:[%s4908_s1 + $0x88] ss:$16 sps:$4 sm:$0xff]  }
  0x36   :  { %1695 = vmatprep.subr.bf16.mxu0 %v3349_v40  ;;  %v3410_v28 = vld [vmem:[%s4908_s1 + $0x464] ss:$16 sps:$4 sm:$0xff]   ;;  %v3408_v30 = vld [vmem:[%s4908_s1 + $0x460] ss:$16 sps:$4 sm:$0xff]   ;;  %v3423_v39 = vld [vmem:[%s4908_s1 + $0xa8] ss:$16 sps:$4 sm:$0xff]  }
  0x37   :  { %v3416_v32 = vld [vmem:[%s4908_s1 + $0x484] ss:$16 sps:$4 sm:$0xff]   ;;  %v3414_v34 = vld [vmem:[%s4908_s1 + $0x480] ss:$16 sps:$4 sm:$0xff]  }
  0x38   :  { %1655 = vmatpush1.bf16.msra.mxu1 %v3351_v41  ;;  %v3422_v36 = vld [vmem:[%s4908_s1 + $0x4a4] ss:$16 sps:$4 sm:$0xff]   ;;  %v3420_v38 = vld [vmem:[%s4908_s1 + $0x4a0] ss:$16 sps:$4 sm:$0xff]   ;;  %v3431_v41 = vld [vmem:[%s4908_s1 + $0xcc] ss:$16 sps:$4 sm:$0xff]  }
  0x39   :  { %1696 = vmatpush1.bf16.msra.mxu0 %v3352_v44  ;;  %1656 = vmatprep.subr.bf16.mxu1 %v3353_v45  ;;  %v3428_v40 = vld [vmem:[%s4908_s1 + $0x4c4] ss:$16 sps:$4 sm:$0xff]   ;;  %v4174_v44 = vrot.slane %v4170_v42, %v4013_v49  ;;  %v3426_v45 = vld [vmem:[%s4908_s1 + $0x4c0] ss:$16 sps:$4 sm:$0xff]  }
  0x3a   :  { %1697 = vmatprep.subr.bf16.mxu0 %v3355_v46  ;;  %v3429_v46 = vld [vmem:[%s4908_s1 + $0xc8] ss:$16 sps:$4 sm:$0xff]   ;;  %v3432_v52 = vld [vmem:[%s4908_s1 + $0x4e0] ss:$16 sps:$4 sm:$0xff]   ;;  %v3440_v54 = vld [vmem:[%s4908_s1 + $0x504] ss:$16 sps:$4 sm:$0xff]  }
  0x3b   :  { %v3444_v60 = vld [vmem:[%s4908_s1 + $0x520] ss:$16 sps:$4 sm:$0xff]  }
  0x3c   :  { %1657 = vmatpush1.bf16.msra.mxu1 %v3357_v47  ;;  %v82_v47 = vcombine.high %v4174_v44, %v4174_v44 }
  0x3d   :  { %1698 = vmatpush1.bf16.msra.mxu0 %v3358_v48  ;;  %1658 = vmatprep.subr.bf16.mxu1 %v3359_v50  ;;  %v3434_v48 = vld [vmem:[%s4908_s1 + $0x4e4] ss:$16 sps:$4 sm:$0xff]   ;;  %v3437_v50 = vld [vmem:[%s4908_s1 + $0xec] ss:$16 sps:$4 sm:$0xff]  }
  0x3e   :  { %1699 = vmatprep.subr.bf16.mxu0 %v3361_v51  ;;  %v4190_v51 = vpack.c.bf16 %v82_v47, %v82_v47  ;;  %v3513_v47 = vld [vmem:[%s4908_s1 + $0x288] ss:$16 sps:$4 sm:$0xff]  }
  0x40   :  { %1659 = vmatpush1.bf16.msra.mxu1 %v3363_v53  ;;  %v3435_v53 = vld [vmem:[%s4908_s1 + $0xe8] ss:$16 sps:$4 sm:$0xff]  }
  0x41   :  { %1700 = vmatpush1.bf16.msra.mxu0 %v3364_v56  ;;  %1660 = vmatprep.subr.bf16.mxu1 %v3365_v57  ;;  %v3438_v56 = vld [vmem:[%s4908_s1 + $0x500] ss:$16 sps:$4 sm:$0xff]   ;;  %v3441_v57 = vld [vmem:[%s4908_s1 + $0x108] ss:$16 sps:$4 sm:$0xff]  }
  0x42   :  { %1701 = vmatprep.subr.bf16.mxu0 %v3367_v58  ;;  %v3446_v58 = vld [vmem:[%s4908_s1 + $0x524] ss:$16 sps:$4 sm:$0xff]  }
  0x44   :  { %1661 = vmatpush1.bf16.msra.mxu1 %v3369_v61  ;;  %v3447_v61 = vld [vmem:[%s4908_s1 + $0x128] ss:$16 sps:$4 sm:$0xff]  }
  0x45   :  { %1702 = vmatpush1.bf16.msra.mxu0 %v3370_v0  ;;  %1662 = vmatprep.subr.bf16.mxu1 %v3371_v1  ;;  %v3450_v0 = vld [vmem:[%s4908_s1 + $0x540] ss:$16 sps:$4 sm:$0xff]   ;;  %v3453_v1 = vld [vmem:[%s4908_s1 + $0x148] ss:$16 sps:$4 sm:$0xff]  }
  0x46   :  { %1703 = vmatprep.subr.bf16.mxu0 %v3373_v2  ;;  %v3458_v2 = vld [vmem:[%s4908_s1 + $0x564] ss:$16 sps:$4 sm:$0xff]  }
  0x48   :  { %1663 = vmatpush1.bf16.msra.mxu1 %v3375_v4  ;;  %v3461_v4 = vld [vmem:[%s4908_s1 + $0x16c] ss:$16 sps:$4 sm:$0xff]  }
  0x49   :  { %1704 = vmatpush1.bf16.msra.mxu0 %v3376_v5  ;;  %1664 = vmatprep.subr.bf16.mxu1 %v3377_v6  ;;  %v3456_v5 = vld [vmem:[%s4908_s1 + $0x560] ss:$16 sps:$4 sm:$0xff]   ;;  %v3459_v6 = vld [vmem:[%s4908_s1 + $0x168] ss:$16 sps:$4 sm:$0xff]  }
  0x4a   :  { %1705 = vmatprep.subr.bf16.mxu0 %v3379_v7  ;;  %v3464_v7 = vld [vmem:[%s4908_s1 + $0x584] ss:$16 sps:$4 sm:$0xff]  }
  0x4c   :  { %1665 = vmatpush1.bf16.msra.mxu1 %v3381_v8  ;;  %v3467_v8 = vld [vmem:[%s4908_s1 + $0x18c] ss:$16 sps:$4 sm:$0xff]  }
  0x4d   :  { %1706 = vmatpush1.bf16.msra.mxu0 %v3382_v9  ;;  %1666 = vmatprep.subr.bf16.mxu1 %v3383_v10  ;;  %v3462_v9 = vld [vmem:[%s4908_s1 + $0x580] ss:$16 sps:$4 sm:$0xff]   ;;  %v3465_v10 = vld [vmem:[%s4908_s1 + $0x188] ss:$16 sps:$4 sm:$0xff]  }
  0x4e   :  { %1707 = vmatprep.subr.bf16.mxu0 %v3385_v11  ;;  %v3470_v11 = vld [vmem:[%s4908_s1 + $0x5a4] ss:$16 sps:$4 sm:$0xff]  }
  0x50   :  { %1667 = vmatpush1.bf16.msra.mxu1 %v3387_v12  ;;  %v3473_v12 = vld [vmem:[%s4908_s1 + $0x1ac] ss:$16 sps:$4 sm:$0xff]  }
  0x51   :  { %1708 = vmatpush1.bf16.msra.mxu0 %v3388_v13  ;;  %1800 = vmatprep.subr.bf16.mxu1 %v3395_v15  ;;  %v3468_v13 = vld [vmem:[%s4908_s1 + $0x5a0] ss:$16 sps:$4 sm:$0xff]   ;;  %v3476_v15 = vld [vmem:[%s4908_s1 + $0x5c4] ss:$16 sps:$4 sm:$0xff]  }
  0x52   :  { %1718 = vmatprep.subr.bf16.mxu0 %v3392_v14  ;;  %v3471_v14 = vld [vmem:[%s4908_s1 + $0x1a8] ss:$16 sps:$4 sm:$0xff]  }
  0x53   :  { %1669 = vmatmul.mubr.bf16.vlgmr.msra.gmra.mrb[0].mxu1 %v4089_v16 }
  0x54   :  { %1710 = vmatmul.mubr.bf16.vlgmr.msra.gmra.mrb[0].mxu0 %v4094_v18  ;;  %1801 = vmatpush1.bf16.msra.mxu1 %v3393_v19  ;;  %v67_v19 = vcombine.high %v4170_v42, %v4170_v42  ;;  %v3507_v42 = vld [vmem:[%s4908_s1 + $0x268] ss:$16 sps:$4 sm:$0xff]  }
  0x55   :  { %1719 = vmatpush1.bf16.msra.mxu0 %v3390_v17  ;;  %1802 = vmatprep.subr.bf16.mxu1 %v3401_v21  ;;  %v3479_v17 = vld [vmem:[%s4908_s1 + $0x1cc] ss:$16 sps:$4 sm:$0xff]   ;;  %v3477_v21 = vld [vmem:[%s4908_s1 + $0x1c8] ss:$16 sps:$4 sm:$0xff]  }
  0x56   :  { %1720 = vmatprep.subr.bf16.mxu0 %v3398_v20  ;;  %1832 = vmatprep.mubr.bf16.mxu1 %v93_v62  ;;  %v3452_v62 = vld [vmem:[%s4908_s1 + $0x544] ss:$16 sps:$4 sm:$0xff]   ;;  %v3474_v20 = vld [vmem:[%s4908_s1 + $0x5c0] ss:$16 sps:$4 sm:$0xff]  }
  0x57   :  { %1750 = vmatprep.mubr.bf16.mxu0 %v4190_v51 }
  0x58   :  { %1803 = vmatpush1.bf16.msra.mxu1 %v3399_v23  ;;  %v3485_v23 = vld [vmem:[%s4908_s1 + $0x1ec] ss:$16 sps:$4 sm:$0xff]  }
  0x59   :  { %1721 = vmatpush1.bf16.msra.mxu0 %v3396_v22  ;;  %1804 = vmatprep.subr.bf16.mxu1 %v3407_v25  ;;  %v3482_v22 = vld [vmem:[%s4908_s1 + $0x5e4] ss:$16 sps:$4 sm:$0xff]   ;;  %v3480_v25 = vld [vmem:[%s4908_s1 + $0x5e0] ss:$16 sps:$4 sm:$0xff]  }
  0x5a   :  { %1722 = vmatprep.subr.bf16.mxu0 %v3404_v24  ;;  %v4292_v24 = vrot.slane %v67_v19, %v4013_v49  ;;  %v3491_v49 = vld [vmem:[%s4908_s1 + $0x20c] ss:$16 sps:$4 sm:$0xff]   ;;  %v3558_v19 = vld [vmem:[%s4908_s1 + $0x780] ss:$16 sps:$4 sm:$0xff]  }
  0x5c   :  { %1805 = vmatpush1.bf16.msra.mxu1 %v3405_v27  ;;  %v3488_v27 = vld [vmem:[%s4908_s1 + $0x604] ss:$16 sps:$4 sm:$0xff]  }
  0x5d   :  { %1723 = vmatpush1.bf16.msra.mxu0 %v3402_v26  ;;  %1806 = vmatprep.subr.bf16.mxu1 %v3413_v29  ;;  %v3483_v26 = vld [vmem:[%s4908_s1 + $0x1e8] ss:$16 sps:$4 sm:$0xff]   ;;  %v4310_v29 = vpack.c.bf16 %v4174_v44, %v4174_v44  ;;  %v3512_v44 = vld [vmem:[%s4908_s1 + $0x684] ss:$16 sps:$4 sm:$0xff]  }
  0x5e   :  { %1724 = vmatprep.subr.bf16.mxu0 %v3410_v28  ;;  %v83_v28 = vcombine.high %v4292_v24, %v4292_v24 }
  0x60   :  { %1807 = vmatpush1.bf16.msra.mxu1 %v3411_v31  ;;  %v3489_v31 = vld [vmem:[%s4908_s1 + $0x208] ss:$16 sps:$4 sm:$0xff]  }
  0x61   :  { %1725 = vmatpush1.bf16.msra.mxu0 %v3408_v30  ;;  %1808 = vmatprep.subr.bf16.mxu1 %v3419_v33  ;;  %v3486_v30 = vld [vmem:[%s4908_s1 + $0x600] ss:$16 sps:$4 sm:$0xff]   ;;  %v3497_v33 = vld [vmem:[%s4908_s1 + $0x22c] ss:$16 sps:$4 sm:$0xff]  }
  0x62   :  { %1726 = vmatprep.subr.bf16.mxu0 %v3416_v32  ;;  %v3494_v32 = vld [vmem:[%s4908_s1 + $0x624] ss:$16 sps:$4 sm:$0xff]  }
  0x64   :  { %1809 = vmatpush1.bf16.msra.mxu1 %v3417_v35  ;;  %v3492_v35 = vld [vmem:[%s4908_s1 + $0x620] ss:$16 sps:$4 sm:$0xff]  }
  0x65   :  { %1727 = vmatpush1.bf16.msra.mxu0 %v3414_v34  ;;  %1810 = vmatprep.subr.bf16.mxu1 %v3425_v37  ;;  %v4324_v34 = vpack.c.bf16 %v83_v28, %v83_v28  ;;  %v3500_v37 = vld [vmem:[%s4908_s1 + $0x644] ss:$16 sps:$4 sm:$0xff]   ;;  %v3573_v28 = vld [vmem:[%s4908_s1 + $0x3c8] ss:$16 sps:$4 sm:$0xff]  }
  0x66   :  { %1728 = vmatprep.subr.bf16.mxu0 %v3422_v36  ;;  %v3495_v36 = vld [vmem:[%s4908_s1 + $0x228] ss:$16 sps:$4 sm:$0xff]  }
  0x68   :  { %1811 = vmatpush1.bf16.msra.mxu1 %v3423_v39  ;;  %v3501_v39 = vld [vmem:[%s4908_s1 + $0x248] ss:$16 sps:$4 sm:$0xff]  }
  0x69   :  { %1729 = vmatpush1.bf16.msra.mxu0 %v3420_v38  ;;  %1812 = vmatprep.subr.bf16.mxu1 %v3431_v41  ;;  %v3498_v38 = vld [vmem:[%s4908_s1 + $0x640] ss:$16 sps:$4 sm:$0xff]  }
  0x6a   :  { %1730 = vmatprep.subr.bf16.mxu0 %v3428_v40  ;;  %v3506_v40 = vld [vmem:[%s4908_s1 + $0x664] ss:$16 sps:$4 sm:$0xff]   ;;  %v3504_v41 = vld [vmem:[%s4908_s1 + $0x660] ss:$16 sps:$4 sm:$0xff]  }
  0x6c   :  { %1813 = vmatpush1.bf16.msra.mxu1 %v3429_v46  ;;  %v3510_v46 = vld [vmem:[%s4908_s1 + $0x680] ss:$16 sps:$4 sm:$0xff]  }
  0x6d   :  { %1731 = vmatpush1.bf16.msra.mxu0 %v3426_v45  ;;  %1814 = vmatprep.subr.bf16.mxu1 %v3437_v50  ;;  %v3515_v45 = vld [vmem:[%s4908_s1 + $0x28c] ss:$16 sps:$4 sm:$0xff]  }
  0x6e   :  { %1732 = vmatprep.subr.bf16.mxu0 %v3434_v48  ;;  %v3518_v48 = vld [vmem:[%s4908_s1 + $0x6a4] ss:$16 sps:$4 sm:$0xff]   ;;  %v3521_v50 = vld [vmem:[%s4908_s1 + $0x2ac] ss:$16 sps:$4 sm:$0xff]  }
  0x70   :  { %1815 = vmatpush1.bf16.msra.mxu1 %v3435_v53  ;;  %v3519_v53 = vld [vmem:[%s4908_s1 + $0x2a8] ss:$16 sps:$4 sm:$0xff]  }
  0x71   :  { %1733 = vmatpush1.bf16.msra.mxu0 %v3432_v52  ;;  %1816 = vmatprep.subr.bf16.mxu1 %v3443_v55  ;;  %v3516_v52 = vld [vmem:[%s4908_s1 + $0x6a0] ss:$16 sps:$4 sm:$0xff]   ;;  %v3527_v55 = vld [vmem:[%s4908_s1 + $0x2cc] ss:$16 sps:$4 sm:$0xff]  }
  0x72   :  { %1734 = vmatprep.subr.bf16.mxu0 %v3440_v54  ;;  %v3524_v54 = vld [vmem:[%s4908_s1 + $0x6c4] ss:$16 sps:$4 sm:$0xff]  }
  0x74   :  { %1817 = vmatpush1.bf16.msra.mxu1 %v3441_v57  ;;  %v3525_v57 = vld [vmem:[%s4908_s1 + $0x2c8] ss:$16 sps:$4 sm:$0xff]  }
  0x75   :  { %1735 = vmatpush1.bf16.msra.mxu0 %v3438_v56  ;;  %1818 = vmatprep.subr.bf16.mxu1 %v3449_v59  ;;  %v3522_v56 = vld [vmem:[%s4908_s1 + $0x6c0] ss:$16 sps:$4 sm:$0xff]   ;;  %v3533_v59 = vld [vmem:[%s4908_s1 + $0x2ec] ss:$16 sps:$4 sm:$0xff]  }
  0x76   :  { %1736 = vmatprep.subr.bf16.mxu0 %v3446_v58  ;;  %v3530_v58 = vld [vmem:[%s4908_s1 + $0x6e4] ss:$16 sps:$4 sm:$0xff]  }
  0x78   :  { %1819 = vmatpush1.bf16.msra.mxu1 %v3447_v61  ;;  %v3531_v61 = vld [vmem:[%s4908_s1 + $0x2e8] ss:$16 sps:$4 sm:$0xff]  }
  0x79   :  { %1737 = vmatpush1.bf16.msra.mxu0 %v3444_v60  ;;  %1820 = vmatprep.subr.bf16.mxu1 %v3455_v63  ;;  %v3528_v60 = vld [vmem:[%s4908_s1 + $0x6e0] ss:$16 sps:$4 sm:$0xff]   ;;  %v3539_v63 = vld [vmem:[%s4908_s1 + $0x30c] ss:$16 sps:$4 sm:$0xff]  }
  0x7a   :  { %1738 = vmatprep.subr.bf16.mxu0 %v3452_v62  ;;  %v3536_v62 = vld [vmem:[%s4908_s1 + $0x704] ss:$16 sps:$4 sm:$0xff]  }
  0x7c   :  { %1821 = vmatpush1.bf16.msra.mxu1 %v3453_v1  ;;  %v3537_v1 = vld [vmem:[%s4908_s1 + $0x308] ss:$16 sps:$4 sm:$0xff]  }
  0x7d   :  { %1739 = vmatpush1.bf16.msra.mxu0 %v3450_v0  ;;  %1822 = vmatprep.subr.bf16.mxu1 %v3461_v4  ;;  %v3534_v0 = vld [vmem:[%s4908_s1 + $0x700] ss:$16 sps:$4 sm:$0xff]   ;;  %v3545_v4 = vld [vmem:[%s4908_s1 + $0x32c] ss:$16 sps:$4 sm:$0xff]  }
  0x7e   :  { %1740 = vmatprep.subr.bf16.mxu0 %v3458_v2  ;;  %v3542_v2 = vld [vmem:[%s4908_s1 + $0x724] ss:$16 sps:$4 sm:$0xff]  }
  0x80   :  { %1823 = vmatpush1.bf16.msra.mxu1 %v3459_v6  ;;  %v3543_v6 = vld [vmem:[%s4908_s1 + $0x328] ss:$16 sps:$4 sm:$0xff]  }
  0x81   :  { %1741 = vmatpush1.bf16.msra.mxu0 %v3456_v5  ;;  %1824 = vmatprep.subr.bf16.mxu1 %v3467_v8  ;;  %v3540_v5 = vld [vmem:[%s4908_s1 + $0x720] ss:$16 sps:$4 sm:$0xff]   ;;  %v3551_v8 = vld [vmem:[%s4908_s1 + $0x34c] ss:$16 sps:$4 sm:$0xff]  }
  0x82   :  { %1742 = vmatprep.subr.bf16.mxu0 %v3464_v7  ;;  %v3548_v7 = vld [vmem:[%s4908_s1 + $0x744] ss:$16 sps:$4 sm:$0xff]  }
  0x84   :  { %1825 = vmatpush1.bf16.msra.mxu1 %v3465_v10  ;;  %v3549_v10 = vld [vmem:[%s4908_s1 + $0x348] ss:$16 sps:$4 sm:$0xff]  }
  0x85   :  { %1743 = vmatpush1.bf16.msra.mxu0 %v3462_v9  ;;  %1826 = vmatprep.subr.bf16.mxu1 %v3473_v12  ;;  %v3546_v9 = vld [vmem:[%s4908_s1 + $0x740] ss:$16 sps:$4 sm:$0xff]   ;;  %v3557_v12 = vld [vmem:[%s4908_s1 + $0x36c] ss:$16 sps:$4 sm:$0xff]  }
  0x86   :  { %1744 = vmatprep.subr.bf16.mxu0 %v3470_v11  ;;  %v3554_v11 = vld [vmem:[%s4908_s1 + $0x764] ss:$16 sps:$4 sm:$0xff]  }
  0x88   :  { %1827 = vmatpush1.bf16.msra.mxu1 %v3471_v14  ;;  %v3555_v14 = vld [vmem:[%s4908_s1 + $0x368] ss:$16 sps:$4 sm:$0xff]  }
  0x89   :  { %1745 = vmatpush1.bf16.msra.mxu0 %v3468_v13  ;;  %1828 = vmatprep.subr.bf16.mxu1 %v3479_v17  ;;  %v3552_v13 = vld [vmem:[%s4908_s1 + $0x760] ss:$16 sps:$4 sm:$0xff]   ;;  %v3563_v17 = vld [vmem:[%s4908_s1 + $0x38c] ss:$16 sps:$4 sm:$0xff]  }
  0x8a   :  { %1746 = vmatprep.subr.bf16.mxu0 %v3476_v15  ;;  %v3560_v15 = vld [vmem:[%s4908_s1 + $0x784] ss:$16 sps:$4 sm:$0xff]  }
  0x8c   :  { %1829 = vmatpush1.bf16.msra.mxu1 %v3477_v21  ;;  %v3566_v21 = vld [vmem:[%s4908_s1 + $0x7a4] ss:$16 sps:$4 sm:$0xff]  }
  0x8d   :  { %1747 = vmatpush1.bf16.msra.mxu0 %v3474_v20  ;;  %1830 = vmatprep.subr.bf16.mxu1 %v3485_v23  ;;  %v3561_v20 = vld [vmem:[%s4908_s1 + $0x388] ss:$16 sps:$4 sm:$0xff]   ;;  %v3564_v23 = vld [vmem:[%s4908_s1 + $0x7a0] ss:$16 sps:$4 sm:$0xff]  }
  0x8e   :  { %1748 = vmatprep.subr.bf16.mxu0 %v3482_v22  ;;  %v3569_v22 = vld [vmem:[%s4908_s1 + $0x3ac] ss:$16 sps:$4 sm:$0xff]  }
  0x90   :  { %1831 = vmatpush1.bf16.msra.mxu1 %v3483_v26  ;;  %v3572_v26 = vld [vmem:[%s4908_s1 + $0x7c4] ss:$16 sps:$4 sm:$0xff]  }
  0x91   :  { %1749 = vmatpush1.bf16.msra.mxu0 %v3480_v25  ;;  %1841 = vmatprep.subr.bf16.mxu1 %v3491_v49  ;;  %v3567_v25 = vld [vmem:[%s4908_s1 + $0x3a8] ss:$16 sps:$4 sm:$0xff]   ;;  %v3570_v49 = vld [vmem:[%s4908_s1 + $0x7c0] ss:$16 sps:$4 sm:$0xff]  }
  0x92   :  { %1759 = vmatprep.subr.bf16.mxu0 %v3488_v27  ;;  %v3575_v27 = vld [vmem:[%s4908_s1 + $0x3cc] ss:$16 sps:$4 sm:$0xff]  }
  0x93   :  { %1833 = vmatmul.mubr.bf16.vlgmr.msra.gmra.mrb[4].mxu1 %v4089_v16  ;;  %v3503_v16 = vld [vmem:[%s4908_s1 + $0x24c] ss:$16 sps:$4 sm:$0xff]  }
  0x94   :  { %1751 = vmatmul.mubr.bf16.vlgmr.msra.gmra.mrb[0].mxu0 %v4310_v29  ;;  %1842 = vmatpush1.bf16.msra.mxu1 %v3489_v31  ;;  %v3581_v31 = vld [vmem:[%s4908_s1 + $0x3ec] ss:$16 sps:$4 sm:$0xff]  }
  0x95   :  { %1760 = vmatpush1.bf16.msra.mxu0 %v3486_v30  ;;  %1843 = vmatprep.subr.bf16.mxu1 %v3497_v33  ;;  %v3578_v30 = vld [vmem:[%s4908_s1 + $0x7e4] ss:$16 sps:$4 sm:$0xff]   ;;  %v3579_v33 = vld [vmem:[%s4908_s1 + $0x3e8] ss:$16 sps:$4 sm:$0xff]  }
  0x96   :  { %1761 = vmatprep.subr.bf16.mxu0 %v3494_v32  ;;  %1791 = vmatprep.mubr.bf16.mxu0 %v4324_v34  ;;  %v3576_v32 = vld [vmem:[%s4908_s1 + $0x7e0] ss:$16 sps:$4 sm:$0xff]  }
  0x97   :  { %1873 = vmatprep.mubr.bf16.mxu1 %v4050_v3  ;;  %v3509_v3 = vld [vmem:[%s4908_s1 + $0x26c] ss:$16 sps:$4 sm:$0xff]  }
  0x98   :  { %1844 = vmatpush1.bf16.msra.mxu1 %v3495_v36  ;;  %v4509_v36 = vpack.c.bf16 %v4292_v24, %v4292_v24  ;;  %v3586_v24 = vld [vmem:[%s4908_s1 + $0x428] ss:$16 sps:$4 sm:$0xff]  }
  0x99   :  { %1762 = vmatpush1.bf16.msra.mxu0 %v3492_v35  ;;  %1845 = vmatprep.subr.bf16.mxu1 %v3503_v16  ;;  %v3585_v35 = vld [vmem:[%s4908_s1 + $0x40c] ss:$16 sps:$4 sm:$0xff]  }
  0x9a   :  { %1763 = vmatprep.subr.bf16.mxu0 %v3500_v37  ;;  %v3583_v37 = vld [vmem:[%s4908_s1 + $0x408] ss:$16 sps:$4 sm:$0xff]   ;;  %v3588_v16 = vld [vmem:[%s4908_s1 + $0x42c] ss:$16 sps:$4 sm:$0xff]  }
  0x9c   :  { %1846 = vmatpush1.bf16.msra.mxu1 %v3501_v39  ;;  %v3589_v39 = vld [vmem:[%s4908_s1 + $0x448] ss:$16 sps:$4 sm:$0xff]  }
  0x9d   :  { %1764 = vmatpush1.bf16.msra.mxu0 %v3498_v38  ;;  %1847 = vmatprep.subr.bf16.mxu1 %v3509_v3  ;;  %v3591_v38 = vld [vmem:[%s4908_s1 + $0x44c] ss:$16 sps:$4 sm:$0xff]   ;;  %v3595_v3 = vld [vmem:[%s4908_s1 + $0x488] ss:$16 sps:$4 sm:$0xff]  }
  0x9e   :  { %1765 = vmatprep.subr.bf16.mxu0 %v3506_v40  ;;  %v3597_v40 = vld [vmem:[%s4908_s1 + $0x48c] ss:$16 sps:$4 sm:$0xff]  }
  0xa0   :  { %1848 = vmatpush1.bf16.msra.mxu1 %v3507_v42  ;;  %v3598_v42 = vld [vmem:[%s4908_s1 + $0x4a8] ss:$16 sps:$4 sm:$0xff]  }
  0xa1   :  { %1766 = vmatpush1.bf16.msra.mxu0 %v3504_v41  ;;  %1849 = vmatprep.subr.bf16.mxu1 %v3515_v45  ;;  %v3600_v41 = vld [vmem:[%s4908_s1 + $0x4ac] ss:$16 sps:$4 sm:$0xff]   ;;  %v3601_v45 = vld [vmem:[%s4908_s1 + $0x4c8] ss:$16 sps:$4 sm:$0xff]  }
  0xa2   :  { %1767 = vmatprep.subr.bf16.mxu0 %v3512_v44  ;;  %v3603_v44 = vld [vmem:[%s4908_s1 + $0x4cc] ss:$16 sps:$4 sm:$0xff]  }
  0xa4   :  { %1850 = vmatpush1.bf16.msra.mxu1 %v3513_v47  ;;  %v3604_v47 = vld [vmem:[%s4908_s1 + $0x4e8] ss:$16 sps:$4 sm:$0xff]  }
  0xa5   :  { %1768 = vmatpush1.bf16.msra.mxu0 %v3510_v46  ;;  %1851 = vmatprep.subr.bf16.mxu1 %v3521_v50  ;;  %v3606_v46 = vld [vmem:[%s4908_s1 + $0x4ec] ss:$16 sps:$4 sm:$0xff]   ;;  %v3607_v50 = vld [vmem:[%s4908_s1 + $0x508] ss:$16 sps:$4 sm:$0xff]  }
  0xa6   :  { %1769 = vmatprep.subr.bf16.mxu0 %v3518_v48  ;;  %v3609_v48 = vld [vmem:[%s4908_s1 + $0x50c] ss:$16 sps:$4 sm:$0xff]  }
  0xa8   :  { %1852 = vmatpush1.bf16.msra.mxu1 %v3519_v53  ;;  %v3610_v53 = vld [vmem:[%s4908_s1 + $0x528] ss:$16 sps:$4 sm:$0xff]  }
  0xa9   :  { %1770 = vmatpush1.bf16.msra.mxu0 %v3516_v52  ;;  %1853 = vmatprep.subr.bf16.mxu1 %v3527_v55  ;;  %v3612_v52 = vld [vmem:[%s4908_s1 + $0x52c] ss:$16 sps:$4 sm:$0xff]   ;;  %v3613_v55 = vld [vmem:[%s4908_s1 + $0x548] ss:$16 sps:$4 sm:$0xff]  }
  0xaa   :  { %1771 = vmatprep.subr.bf16.mxu0 %v3524_v54  ;;  %v3615_v54 = vld [vmem:[%s4908_s1 + $0x54c] ss:$16 sps:$4 sm:$0xff]  }
  0xac   :  { %1854 = vmatpush1.bf16.msra.mxu1 %v3525_v57  ;;  %v3616_v57 = vld [vmem:[%s4908_s1 + $0x568] ss:$16 sps:$4 sm:$0xff]  }
  0xad   :  { %1772 = vmatpush1.bf16.msra.mxu0 %v3522_v56  ;;  %1855 = vmatprep.subr.bf16.mxu1 %v3533_v59  ;;  %v3618_v56 = vld [vmem:[%s4908_s1 + $0x56c] ss:$16 sps:$4 sm:$0xff]   ;;  %v3619_v59 = vld [vmem:[%s4908_s1 + $0x588] ss:$16 sps:$4 sm:$0xff]  }
  0xae   :  { %1773 = vmatprep.subr.bf16.mxu0 %v3530_v58  ;;  %v3621_v58 = vld [vmem:[%s4908_s1 + $0x58c] ss:$16 sps:$4 sm:$0xff]  }
  0xb0   :  { %1856 = vmatpush1.bf16.msra.mxu1 %v3531_v61  ;;  %v3622_v61 = vld [vmem:[%s4908_s1 + $0x5a8] ss:$16 sps:$4 sm:$0xff]  }
  0xb1   :  { %1774 = vmatpush1.bf16.msra.mxu0 %v3528_v60  ;;  %1857 = vmatprep.subr.bf16.mxu1 %v3539_v63  ;;  %v3624_v60 = vld [vmem:[%s4908_s1 + $0x5ac] ss:$16 sps:$4 sm:$0xff]   ;;  %v3625_v63 = vld [vmem:[%s4908_s1 + $0x5c8] ss:$16 sps:$4 sm:$0xff]  }
  0xb2   :  { %1775 = vmatprep.subr.bf16.mxu0 %v3536_v62  ;;  %v3627_v62 = vld [vmem:[%s4908_s1 + $0x5cc] ss:$16 sps:$4 sm:$0xff]  }
  0xb4   :  { %1858 = vmatpush1.bf16.msra.mxu1 %v3537_v1  ;;  %v3628_v1 = vld [vmem:[%s4908_s1 + $0x5e8] ss:$16 sps:$4 sm:$0xff]  }
  0xb5   :  { %1776 = vmatpush1.bf16.msra.mxu0 %v3534_v0  ;;  %1859 = vmatprep.subr.bf16.mxu1 %v3545_v4  ;;  %v3630_v0 = vld [vmem:[%s4908_s1 + $0x5ec] ss:$16 sps:$4 sm:$0xff]   ;;  %v3631_v4 = vld [vmem:[%s4908_s1 + $0x608] ss:$16 sps:$4 sm:$0xff]  }
  0xb6   :  { %1777 = vmatprep.subr.bf16.mxu0 %v3542_v2  ;;  %v3633_v2 = vld [vmem:[%s4908_s1 + $0x60c] ss:$16 sps:$4 sm:$0xff]  }
  0xb8   :  { %1860 = vmatpush1.bf16.msra.mxu1 %v3543_v6  ;;  %v3634_v6 = vld [vmem:[%s4908_s1 + $0x628] ss:$16 sps:$4 sm:$0xff]  }
  0xb9   :  { %1778 = vmatpush1.bf16.msra.mxu0 %v3540_v5  ;;  %1861 = vmatprep.subr.bf16.mxu1 %v3551_v8  ;;  %v3636_v5 = vld [vmem:[%s4908_s1 + $0x62c] ss:$16 sps:$4 sm:$0xff]   ;;  %v3637_v8 = vld [vmem:[%s4908_s1 + $0x648] ss:$16 sps:$4 sm:$0xff]  }
  0xba   :  { %1779 = vmatprep.subr.bf16.mxu0 %v3548_v7  ;;  %v3639_v7 = vld [vmem:[%s4908_s1 + $0x64c] ss:$16 sps:$4 sm:$0xff]  }
  0xbc   :  { %1862 = vmatpush1.bf16.msra.mxu1 %v3549_v10  ;;  %v3643_v10 = vld [vmem:[%s4908_s1 + $0x688] ss:$16 sps:$4 sm:$0xff]  }
  0xbd   :  { %1780 = vmatpush1.bf16.msra.mxu0 %v3546_v9  ;;  %1863 = vmatprep.subr.bf16.mxu1 %v3557_v12  ;;  %v3645_v9 = vld [vmem:[%s4908_s1 + $0x68c] ss:$16 sps:$4 sm:$0xff]   ;;  %v3646_v12 = vld [vmem:[%s4908_s1 + $0x6a8] ss:$16 sps:$4 sm:$0xff]  }
  0xbe   :  { %1781 = vmatprep.subr.bf16.mxu0 %v3554_v11  ;;  %v3648_v11 = vld [vmem:[%s4908_s1 + $0x6ac] ss:$16 sps:$4 sm:$0xff]  }
  0xc0   :  { %1864 = vmatpush1.bf16.msra.mxu1 %v3555_v14 }
  0xc1   :  { %1782 = vmatpush1.bf16.msra.mxu0 %v3552_v13  ;;  %1865 = vmatprep.subr.bf16.mxu1 %v3563_v17  ;;  %v3651_v13 = vld [vmem:[%s4908_s1 + $0x6cc] ss:$16 sps:$4 sm:$0xff]  }
  0xc2   :  { %1783 = vmatprep.subr.bf16.mxu0 %v3560_v15 }
  0xc4   :  { %1866 = vmatpush1.bf16.msra.mxu1 %v3561_v20 }
  0xc5   :  { %1784 = vmatpush1.bf16.msra.mxu0 %v3558_v19  ;;  %1867 = vmatprep.subr.bf16.mxu1 %v3569_v22  ;;  %v3649_v19 = vld [vmem:[%s4908_s1 + $0x6c8] ss:$16 sps:$4 sm:$0xff]  }
  0xc6   :  { %1785 = vmatprep.subr.bf16.mxu0 %v3566_v21  ;;  %v3654_v21 = vld [vmem:[%s4908_s1 + $0x6ec] ss:$16 sps:$4 sm:$0xff]   ;;  %v3652_v22 = vld [vmem:[%s4908_s1 + $0x6e8] ss:$16 sps:$4 sm:$0xff]  }
  0xc8   :  { %1868 = vmatpush1.bf16.msra.mxu1 %v3567_v25  ;;  %v3655_v25 = vld [vmem:[%s4908_s1 + $0x708] ss:$16 sps:$4 sm:$0xff]  }
  0xc9   :  { %1786 = vmatpush1.bf16.msra.mxu0 %v3564_v23  ;;  %1869 = vmatprep.subr.bf16.mxu1 %v3575_v27  ;;  %v3657_v23 = vld [vmem:[%s4908_s1 + $0x70c] ss:$16 sps:$4 sm:$0xff]   ;;  %v3658_v27 = vld [vmem:[%s4908_s1 + $0x728] ss:$16 sps:$4 sm:$0xff]  }
  0xca   :  { %1787 = vmatprep.subr.bf16.mxu0 %v3572_v26  ;;  %v3660_v26 = vld [vmem:[%s4908_s1 + $0x72c] ss:$16 sps:$4 sm:$0xff]  }
  0xcc   :  { %1870 = vmatpush1.bf16.msra.mxu1 %v3573_v28  ;;  %v3661_v28 = vld [vmem:[%s4908_s1 + $0x748] ss:$16 sps:$4 sm:$0xff]  }
  0xcd   :  { %1788 = vmatpush1.bf16.msra.mxu0 %v3570_v49  ;;  %1871 = vmatprep.subr.bf16.mxu1 %v3581_v31  ;;  %v3663_v49 = vld [vmem:[%s4908_s1 + $0x74c] ss:$16 sps:$4 sm:$0xff]   ;;  %v3664_v31 = vld [vmem:[%s4908_s1 + $0x768] ss:$16 sps:$4 sm:$0xff]  }
  0xce   :  { %1789 = vmatprep.subr.bf16.mxu0 %v3578_v30  ;;  %v3666_v30 = vld [vmem:[%s4908_s1 + $0x76c] ss:$16 sps:$4 sm:$0xff]  }
  0xd0   :  { %1872 = vmatpush1.bf16.msra.mxu1 %v3579_v33  ;;  %v3667_v33 = vld [vmem:[%s4908_s1 + $0x788] ss:$16 sps:$4 sm:$0xff]  }
  0xd1   :  { %1790 = vmatpush1.bf16.msra.mxu0 %v3576_v32  ;;  %1882 = vmatprep.subr.bf16.mxu1 %v3585_v35  ;;  %v3669_v32 = vld [vmem:[%s4908_s1 + $0x78c] ss:$16 sps:$4 sm:$0xff]  }
  0xd2   :  { %v3672_v35 = vld [vmem:[%s4908_s1 + $0x7ac] ss:$16 sps:$4 sm:$0xff]  }
  0xd3   :  { %1874 = vmatmul.mubr.bf16.vlgmr.msra.gmra.mrb[4].mxu1 %v4094_v18  ;;  %v3594_v18 = vld [vmem:[%s4908_s1 + $0x46c] ss:$16 sps:$4 sm:$0xff]  }
  0xd4   :  { %1792 = vmatmul.mubr.bf16.vlgmr.msra.gmra.mrb[0].mxu0 %v4509_v36  ;;  %1883 = vmatpush1.bf16.msra.mxu1 %v3583_v37  ;;  %v3670_v37 = vld [vmem:[%s4908_s1 + $0x7a8] ss:$16 sps:$4 sm:$0xff]  }
  0xd5   :  { %1914 = vmatprep.mubr.bf16.mxu1 %v4190_v51  ;;  %1884 = vmatprep.subr.bf16.mxu1 %v3588_v16  ;;  %v3592_v51 = vld [vmem:[%s4908_s1 + $0x468] ss:$16 sps:$4 sm:$0xff]   ;;  %v3675_v16 = vld [vmem:[%s4908_s1 + $0x7cc] ss:$16 sps:$4 sm:$0xff]  }
  0xd8   :  { %1885 = vmatpush1.bf16.msra.mxu1 %v3586_v24  ;;  %v3673_v24 = vld [vmem:[%s4908_s1 + $0x7c8] ss:$16 sps:$4 sm:$0xff]  }
  0xd9   :  { %1886 = vmatprep.subr.bf16.mxu1 %v3591_v38  ;;  %v3678_v38 = vld [vmem:[%s4908_s1 + $0x7ec] ss:$16 sps:$4 sm:$0xff]  }
  0xdc   :  { %1887 = vmatpush1.bf16.msra.mxu1 %v3589_v39  ;;  %v3676_v39 = vld [vmem:[%s4908_s1 + $0x7e8] ss:$16 sps:$4 sm:$0xff]  }
  0xdd   :  { %1888 = vmatprep.subr.bf16.mxu1 %v3594_v18 }
  0xe0   :  { %1889 = vmatpush1.bf16.msra.mxu1 %v3592_v51 }
  0xe1   :  { %1890 = vmatprep.subr.bf16.mxu1 %v3597_v40 }
  0xe4   :  { %1891 = vmatpush1.bf16.msra.mxu1 %v3595_v3 }
  0xe5   :  { %1892 = vmatprep.subr.bf16.mxu1 %v3600_v41 }
  0xe8   :  { %1893 = vmatpush1.bf16.msra.mxu1 %v3598_v42  ;;  %v3681_v42 = vld [vmem:[#allocation2 + $0x4] ss:$8 sps:$4 sm:$0xff]  }
  0xe9   :  { %1894 = vmatprep.subr.bf16.mxu1 %v3603_v44  ;;  %2562 = vmatprep.subr.bf16.mxu0 %v3681_v42 }
  0xec   :  { %1895 = vmatpush1.bf16.msra.mxu1 %v3601_v45 }
  0xed   :  { %1896 = vmatprep.subr.bf16.mxu1 %v3606_v46 }
  0xf0   :  { %1897 = vmatpush1.bf16.msra.mxu1 %v3604_v47  ;;  %v3679_v47 = vld [vmem:[#allocation2] ss:$8 sps:$4 sm:$0xff]  }
  0xf1   :  { %1898 = vmatprep.subr.bf16.mxu1 %v3609_v48  ;;  %2563 = vmatpush1.bf16.msra.mxu0 %v3679_v47  ;;  %v3706_v47 = vld [vmem:[#allocation2 + $0x90] ss:$8 sps:$4 sm:$0xff]  }
  0xf4   :  { %1899 = vmatpush1.bf16.msra.mxu1 %v3607_v50 }
  0xf5   :  { %1900 = vmatprep.subr.bf16.mxu1 %v3612_v52 }
  0xf8   :  { %1901 = vmatpush1.bf16.msra.mxu1 %v3610_v53 }
  0xf9   :  { %1902 = vmatprep.subr.bf16.mxu1 %v3615_v54 }
  0xfc   :  { %1903 = vmatpush1.bf16.msra.mxu1 %v3613_v55 }
  0xfd   :  { %1904 = vmatprep.subr.bf16.mxu1 %v3618_v56 }
 0x100   :  { %1905 = vmatpush1.bf16.msra.mxu1 %v3616_v57  ;;  %v3684_v57 = vld [vmem:[#allocation2 + $0x14] ss:$8 sps:$4 sm:$0xff]  }
 0x101   :  { %1906 = vmatprep.subr.bf16.mxu1 %v3621_v58  ;;  %2564 = vmatprep.subr.bf16.mxu0 %v3684_v57  ;;  %v3723_v57 = vld [vmem:[#allocation2 + $0xe4] ss:$8 sps:$4 sm:$0xff]  }
 0x104   :  { %1907 = vmatpush1.bf16.msra.mxu1 %v3619_v59 }
 0x105   :  { %1908 = vmatprep.subr.bf16.mxu1 %v3624_v60  ;;  %v3682_v60 = vld [vmem:[#allocation2 + $0x10] ss:$8 sps:$4 sm:$0xff]  }
 0x106   :  { %2565 = vmatpush1.bf16.msra.mxu0 %v3682_v60  ;;  %v3724_v60 = vld [vmem:[#allocation2 + $0xf0] ss:$8 sps:$4 sm:$0xff]  }
 0x108   :  { %1909 = vmatpush1.bf16.msra.mxu1 %v3622_v61 }
 0x109   :  { %1910 = vmatprep.subr.bf16.mxu1 %v3627_v62 }
 0x10c   :  { %1911 = vmatpush1.bf16.msra.mxu1 %v3625_v63 }
 0x10d   :  { %1912 = vmatprep.subr.bf16.mxu1 %v3630_v0 }
 0x110   :  { %1913 = vmatpush1.bf16.msra.mxu1 %v3628_v1 }
 0x111   :  { %1923 = vmatprep.subr.bf16.mxu1 %v3633_v2 }
 0x113   :  { %1915 = vmatmul.mubr.bf16.vlgmr.msra.gmra.mrb[4].mxu1 %v4310_v29  ;;  %v3642_v29 = vld [vmem:[%s4908_s1 + $0x66c] ss:$16 sps:$4 sm:$0xff]  }
 0x114   :  { %1924 = vmatpush1.bf16.msra.mxu1 %v3631_v4  ;;  %1955 = vmatprep.mubr.bf16.mxu1 %v4324_v34  ;;  %v3640_v34 = vld [vmem:[%s4908_s1 + $0x668] ss:$16 sps:$4 sm:$0xff]   ;;  %v3687_v4 = vld [vmem:[#allocation2 + $0x24] ss:$8 sps:$4 sm:$0xff]  }
 0x115   :  { %1925 = vmatprep.subr.bf16.mxu1 %v3636_v5  ;;  %2566 = vmatprep.subr.bf16.mxu0 %v3687_v4 }
 0x118   :  { %1926 = vmatpush1.bf16.msra.mxu1 %v3634_v6 }
 0x119   :  { %1927 = vmatprep.subr.bf16.mxu1 %v3639_v7  ;;  %v3685_v7 = vld [vmem:[#allocation2 + $0x20] ss:$8 sps:$4 sm:$0xff]  }
 0x11a   :  { %2567 = vmatpush1.bf16.msra.mxu0 %v3685_v7 }
 0x11c   :  { %1928 = vmatpush1.bf16.msra.mxu1 %v3637_v8 }
 0x11d   :  { %1929 = vmatprep.subr.bf16.mxu1 %v3642_v29 }
 0x120   :  { %1930 = vmatpush1.bf16.msra.mxu1 %v3640_v34 }
 0x121   :  { %1931 = vmatprep.subr.bf16.mxu1 %v3645_v9 }
 0x124   :  { %1932 = vmatpush1.bf16.msra.mxu1 %v3643_v10 }
 0x125   :  { %1933 = vmatprep.subr.bf16.mxu1 %v3648_v11 }
 0x126   :  { %v1670_v14 = vpop.f32.mrb[0].mxu1 }
 0x127   :  { %v1672_v15 = vpop.f32.mrb[1].mxu1 }
 0x128   :  { %v1674_v17 = vpop.f32.mrb[2].mxu1  ;;  %1934 = vmatpush1.bf16.msra.mxu1 %v3646_v12  ;;  %v3690_v12 = vld [vmem:[#allocation2 + $0x34] ss:$8 sps:$4 sm:$0xff]  }
 0x129   :  { %v1675_v20 = vpop.f32.mrb[3].mxu1  ;;  %1935 = vmatprep.subr.bf16.mxu1 %v3651_v13  ;;  %2568 = vmatprep.subr.bf16.mxu0 %v3690_v12 }
 0x12c   :  { %1936 = vmatpush1.bf16.msra.mxu1 %v3649_v19 }
 0x12d   :  { %1937 = vmatprep.subr.bf16.mxu1 %v3654_v21 }
 0x130   :  { %1938 = vmatpush1.bf16.msra.mxu1 %v3652_v22 }
 0x131   :  { %1939 = vmatprep.subr.bf16.mxu1 %v3657_v23 }
 0x134   :  { %1940 = vmatpush1.bf16.msra.mxu1 %v3655_v25  ;;  %v3693_v25 = vld [vmem:[#allocation2 + $0x44] ss:$8 sps:$4 sm:$0xff]  }
 0x135   :  { %1941 = vmatprep.subr.bf16.mxu1 %v3660_v26 }
 0x138   :  { %1942 = vmatpush1.bf16.msra.mxu1 %v3658_v27 }
 0x139   :  { %1943 = vmatprep.subr.bf16.mxu1 %v3663_v49  ;;  %v3691_v49 = vld [vmem:[#allocation2 + $0x40] ss:$8 sps:$4 sm:$0xff]  }
 0x13c   :  { %1944 = vmatpush1.bf16.msra.mxu1 %v3661_v28 }
 0x13d   :  { %1945 = vmatprep.subr.bf16.mxu1 %v3666_v30 }
 0x140   :  { %1946 = vmatpush1.bf16.msra.mxu1 %v3664_v31 }
 0x141   :  { %1947 = vmatprep.subr.bf16.mxu1 %v3669_v32  ;;  %v3696_v32 = vld [vmem:[#allocation2 + $0x54] ss:$8 sps:$4 sm:$0xff]  }
 0x144   :  { %1948 = vmatpush1.bf16.msra.mxu1 %v3667_v33 }
 0x145   :  { %1949 = vmatprep.subr.bf16.mxu1 %v3672_v35  ;;  %v3694_v35 = vld [vmem:[#allocation2 + $0x50] ss:$8 sps:$4 sm:$0xff]  }
 0x148   :  { %1950 = vmatpush1.bf16.msra.mxu1 %v3670_v37 }
 0x149   :  { %1951 = vmatprep.subr.bf16.mxu1 %v3675_v16 }
 0x14c   :  { %1952 = vmatpush1.bf16.msra.mxu1 %v3673_v24  ;;  %v3699_v24 = vld [vmem:[#allocation2 + $0x64] ss:$8 sps:$4 sm:$0xff]  }
 0x14d   :  { %1953 = vmatprep.subr.bf16.mxu1 %v3678_v38  ;;  %v3697_v38 = vld [vmem:[#allocation2 + $0x60] ss:$8 sps:$4 sm:$0xff]  }
 0x150   :  { %1954 = vmatpush1.bf16.msra.mxu1 %v3676_v39  ;;  %v3702_v39 = vld [vmem:[#allocation2 + $0x74] ss:$8 sps:$4 sm:$0xff]  }
 0x153   :  { %1956 = vmatmul.mubr.bf16.vlgmr.msra.gmra.mrb[4].mxu1 %v4509_v36 }
 0x1a7   :  { %v1793_v18 = vpop.f32.mrb[0].mxu0 }
 0x1a8   :  { %v4706_v51 = vadd.f32 %v1793_v18, %v1670_v14  ;;  %v1795_v40 = vpop.f32.mrb[1].mxu0  ;;  %v3700_v18 = vld [vmem:[#allocation2 + $0x70] ss:$8 sps:$4 sm:$0xff]  }
 0x1a9   :  { %v4708_v3 = vadd.f32 %v1795_v40, %v1672_v15  ;;  %v1797_v41 = vpop.f32.mrb[2].mxu0  ;;  %v3688_v15 = vld [vmem:[#allocation2 + $0x30] ss:$8 sps:$4 sm:$0xff]   ;;  %v3705_v40 = vld [vmem:[#allocation2 + $0x84] ss:$8 sps:$4 sm:$0xff]  }
 0x1aa   :  { %v1967_v44 = vsel %vm1966_vm0, %v4706_v51, 0.0  ;;  %v2000_v45 = vmul.f32 %v4706_v51, %v4706_v51  ;;  %v1798_v46 = vpop.f32.mrb[3].mxu0  ;;  %2569 = vmatpush1.bf16.msra.mxu0 %v3688_v15  ;;  %v3703_v41 = vld [vmem:[#allocation2 + $0x80] ss:$8 sps:$4 sm:$0xff]  }
 0x1ab   :  { %v1968_v48 = vrot.slane %v1967_v44, 4  ;;  %v1974_v36 = vsel %vm1966_vm0, %v4708_v3, 0.0  ;;  %v2001_v50 = vmul.f32 %v4708_v3, %v4708_v3  ;;  %2570 = vmatprep.subr.bf16.mxu0 %v3693_v25  ;;  %v3708_v46 = vld [vmem:[#allocation2 + $0x94] ss:$8 sps:$4 sm:$0xff]  }
 0x1ac   :  { %v2004_v52 = vsel %vm1966_vm0, %v2000_v45, 0.0  ;;  %v1975_v53 = vrot.slane %v1974_v36, 4 }
 0x1ad   :  { %v1969_v54 = vadd.f32 %v1968_v48, %v1967_v44  ;;  %v2005_v55 = vrot.slane %v2004_v52, 4  ;;  %v2011_v56 = vsel %vm1966_vm0, %v2001_v50, 0.0  ;;  %v3711_v48 = vld [vmem:[#allocation2 + $0xa4] ss:$8 sps:$4 sm:$0xff]   ;;  %v3714_v50 = vld [vmem:[#allocation2 + $0xb4] ss:$8 sps:$4 sm:$0xff]  }
 0x1ae   :  { %v1976_v58 = vadd.f32 %v1975_v53, %v1974_v36  ;;  %v2012_v59 = vrot.slane %v2011_v56, 4  ;;  %2571 = vmatpush1.bf16.msra.mxu0 %v3691_v49  ;;  %v3709_v36 = vld [vmem:[#allocation2 + $0xa0] ss:$8 sps:$4 sm:$0xff]   ;;  %v3717_v53 = vld [vmem:[#allocation2 + $0xc4] ss:$8 sps:$4 sm:$0xff]  }
 0x1af   :  { %v1970_v61 = vrot.slane %v1969_v54, 2  ;;  %v2006_v62 = vadd.f32 %v2005_v55, %v2004_v52  ;;  %2572 = vmatprep.subr.bf16.mxu0 %v3696_v32  ;;  %v3712_v52 = vld [vmem:[#allocation2 + $0xb0] ss:$8 sps:$4 sm:$0xff]   ;;  %v3720_v55 = vld [vmem:[#allocation2 + $0xd4] ss:$8 sps:$4 sm:$0xff]  }
 0x1b0   :  { %v1977_v63 = vrot.slane %v1976_v58, 2  ;;  %v2013_v0 = vadd.f32 %v2012_v59, %v2011_v56  ;;  %v3718_v56 = vld [vmem:[#allocation2 + $0xd0] ss:$8 sps:$4 sm:$0xff]   ;;  %v3726_v59 = vld [vmem:[#allocation2 + $0xf4] ss:$8 sps:$4 sm:$0xff]  }
 0x1b1   :  { %v1971_v1 = vadd.f32 %v1970_v61, %v1969_v54  ;;  %v2007_v2 = vrot.slane %v2006_v62, 2  ;;  %v3715_v54 = vld [vmem:[#allocation2 + $0xc0] ss:$8 sps:$4 sm:$0xff]   ;;  %v3729_v61 = vld [vmem:[#allocation2 + $0x104] ss:$8 sps:$4 sm:$0xff]  }
 0x1b2   :  { %v1978_v5 = vadd.f32 %v1977_v63, %v1976_v58  ;;  %v2014_v6 = vrot.slane %v2013_v0, 2  ;;  %2573 = vmatpush1.bf16.msra.mxu0 %v3694_v35  ;;  %v3721_v58 = vld [vmem:[#allocation2 + $0xe0] ss:$8 sps:$4 sm:$0xff]  }
 0x1b3   :  { %v1972_v8 = vrot.slane %v1971_v1, 1  ;;  %v2008_v29 = vadd.f32 %v2007_v2, %v2006_v62  ;;  %2574 = vmatprep.subr.bf16.mxu0 %v3699_v24 }
 0x1b4   :  { %v1979_v34 = vrot.slane %v1978_v5, 1  ;;  %v2015_v9 = vadd.f32 %v2014_v6, %v2013_v0 }
 0x1b5   :  { %v1973_v10 = vadd.f32 %v1972_v8, %v1971_v1  ;;  %v2009_v11 = vrot.slane %v2008_v29, 1 }
 0x1b6   :  { %v1980_v13 = vadd.f32 %v1979_v34, %v1978_v5  ;;  %v2016_v14 = vrot.slane %v2015_v9, 1  ;;  %2575 = vmatpush1.bf16.msra.mxu0 %v3697_v38 }
 0x1b7   :  { %v4720_v17 = vmul.f32 0.5, %v1973_v10  ;;  %v2010_v19 = vadd.f32 %v2009_v11, %v2008_v29  ;;  %2576 = vmatprep.subr.bf16.mxu0 %v3702_v39 }
 0x1b8   :  { %v4722_v20 = vmul.f32 0.5, %v1980_v13  ;;  %v2017_v21 = vadd.f32 %v2016_v14, %v2015_v9 }
 0x1b9   :  { %v2032_v22 = vmul.f32 0.5, %v2010_v19  ;;  %v2036_v23 = vmul.f32 %v4720_v17, %v4720_v17 }
 0x1ba   :  { %v2033_v26 = vmul.f32 0.5, %v2017_v21  ;;  %v2037_v27 = vmul.f32 %v4722_v20, %v4722_v20  ;;  %2577 = vmatpush1.bf16.msra.mxu0 %v3700_v18 }
 0x1bb   :  { %v2040_v28 = vsub.f32 %v2032_v22, %v2036_v23  ;;  %2578 = vmatprep.subr.bf16.mxu0 %v3705_v40 }
 0x1bc   :  { %v2041_v30 = vsub.f32 %v2033_v26, %v2037_v27 }
 0x1bd   :  { %v2044_v31 = vmax.f32 %v2040_v28, 0.0 }
 0x1be   :  { %v2045_v33 = vmax.f32 %v2041_v30, 0.0  ;;  %2579 = vmatpush1.bf16.msra.mxu0 %v3703_v41 }
 0x1bf   :  { %v2048_v37 = vadd.f32 1e-05, %v2044_v31  ;;  %2580 = vmatprep.subr.bf16.mxu0 %v3708_v46 }
 0x1c0   :  { %v2049_v16 = vadd.f32 1e-05, %v2045_v33 }
 0x1c1   :  { %3775 = vrsqrt.f32 %v2048_v37 }
 0x1c2   :  { %3777 = vrsqrt.f32 %v2049_v16  ;;  %2581 = vmatpush1.bf16.msra.mxu0 %v3706_v47 }
 0x1c3   :  { %2582 = vmatprep.subr.bf16.mxu0 %v3711_v48 }
 0x1c6   :  { %2583 = vmatpush1.bf16.msra.mxu0 %v3709_v36 }
 0x1c7   :  { %2584 = vmatprep.subr.bf16.mxu0 %v3714_v50 }
 0x1ca   :  { %2585 = vmatpush1.bf16.msra.mxu0 %v3712_v52  ;;  %v3815_v52 = vmov 1966171168  }
 0x1cb   :  { %v4728_v42 = vpop.eup %3775  ;;  %2586 = vmatprep.subr.bf16.mxu0 %v3717_v53  ;;  %v2063_v53 = vunpack.c.l.s4 %v3815_v52  ;;  %v3750_v52 = vld [vmem:[#allocation2 + $0x174] ss:$8 sps:$4 sm:$0xff]  }
 0x1cc   :  { %v4730_v44 = vpop.eup %3777 }
 0x1cd   :  { %v2060_v45 = vcombine.low %v4728_v42, %v4730_v44 }
 0x1ce   :  { %2587 = vmatpush1.bf16.msra.mxu0 %v3715_v54  ;;  %v2064_v54 = vunpack.c.0.s8 %v2063_v53  ;;  %v3748_v53 = vld [vmem:[#allocation2 + $0x170] ss:$8 sps:$4 sm:$0xff]  }
 0x1cf   :  { %2588 = vmatprep.subr.bf16.mxu0 %v3720_v55 }
 0x1d2   :  { %2589 = vmatpush1.bf16.msra.mxu0 %v3718_v56  ;;  %v4749_v56 = vsub.s32 %v2064_v54, %v3995_v43  ;;  %v3753_v54 = vld [vmem:[#allocation2 + $0x184] ss:$8 sps:$4 sm:$0xff]  }
 0x1d3   :  { %2590 = vmatprep.subr.bf16.mxu0 %v3723_v57 }
 0x1d6   :  { %2591 = vmatpush1.bf16.msra.mxu0 %v3721_v58 }
 0x1d7   :  { %2592 = vmatprep.subr.bf16.mxu0 %v3726_v59  ;;  %v2068_v59 = vrot.slane %v2060_v45, %v4749_v56 }
 0x1da   :  { %2593 = vmatpush1.bf16.msra.mxu0 %v3724_v60 }
 0x1db   :  { %2603 = vmatprep.subr.bf16.mxu0 %v3729_v61 }
 0x226   :  { %v4734_v62 = vpop.f32.mrb[4].mxu1 }
 0x227   :  { %v1981_v63 = vsel %vm1966_vm0, %v4734_v62, 0.0  ;;  %v2002_v0 = vmul.f32 %v4734_v62, %v4734_v62  ;;  %v4740_v1 = vpop.f32.mrb[5].mxu1 }
 0x228   :  { %v1982_v2 = vrot.slane %v1981_v63, 4  ;;  %v1988_v4 = vsel %vm1966_vm0, %v4740_v1, 0.0  ;;  %v2003_v5 = vmul.f32 %v4740_v1, %v4740_v1  ;;  %v1961_v6 = vpop.f32.mrb[6].mxu1 }
 0x229   :  { %v2018_v7 = vsel %vm1966_vm0, %v2002_v0, 0.0  ;;  %v1989_v8 = vrot.slane %v1988_v4, 4  ;;  %v1962_v29 = vpop.f32.mrb[7].mxu1  ;;  %v2097_v0 = vsub.s32 2, %v3995_v43  ;;  %v4766_v6 = vsub.s32 1, %v3995_v43 }
 0x22a   :  { %v1983_v34 = vadd.f32 %v1982_v2, %v1981_v63  ;;  %v2019_v9 = vrot.slane %v2018_v7, 4  ;;  %v2025_v10 = vsel %vm1966_vm0, %v2003_v5, 0.0  ;;  %v1964_v63 = vld [vmem:[%s4909_s2] sm:$0xf]  ;;  %v4763_v5 = vsub.s32 0, %v3995_v43 }
 0x22b   :  { %v1990_v11 = vadd.f32 %v1989_v8, %v1988_v4  ;;  %v2026_v12 = vrot.slane %v2025_v10, 4  ;;  %v2101_v4 = vsub.s32 3, %v3995_v43 }
 0x22c   :  { %v1984_v13 = vrot.slane %v1983_v34, 2  ;;  %v2020_v14 = vadd.f32 %v2019_v9, %v2018_v7 }
 0x22d   :  { %v1991_v15 = vrot.slane %v1990_v11, 2  ;;  %v2027_v19 = vadd.f32 %v2026_v12, %v2025_v10 }
 0x22e   :  { %v1985_v21 = vadd.f32 %v1984_v13, %v1983_v34  ;;  %v2021_v22 = vrot.slane %v2020_v14, 2 }
 0x22f   :  { %v1992_v23 = vadd.f32 %v1991_v15, %v1990_v11  ;;  %v2028_v25 = vrot.slane %v2027_v19, 2 }
 0x230   :  { %v1986_v26 = vrot.slane %v1985_v21, 1  ;;  %v2022_v27 = vadd.f32 %v2021_v22, %v2020_v14 }
 0x231   :  { %v1993_v49 = vrot.slane %v1992_v23, 1  ;;  %v2029_v28 = vadd.f32 %v2028_v25, %v2027_v19 }
 0x232   :  { %v1987_v30 = vadd.f32 %v1986_v26, %v1985_v21  ;;  %v2023_v31 = vrot.slane %v2022_v27, 1 }
 0x233   :  { %v1994_v32 = vadd.f32 %v1993_v49, %v1992_v23  ;;  %v2030_v33 = vrot.slane %v2029_v28, 1 }
 0x234   :  { %v1998_v35 = vmul.f32 0.5, %v1987_v30  ;;  %v2024_v37 = vadd.f32 %v2023_v31, %v2022_v27 }
 0x235   :  { %v1999_v16 = vmul.f32 0.5, %v1994_v32  ;;  %v2031_v24 = vadd.f32 %v2030_v33, %v2029_v28  ;;  %v3727_v33 = vld [vmem:[#allocation2 + $0x100] ss:$8 sps:$4 sm:$0xff]  }
 0x236   :  { %v2034_v38 = vmul.f32 0.5, %v2024_v37  ;;  %v2038_v39 = vmul.f32 %v1998_v35, %v1998_v35  ;;  %v3732_v37 = vld [vmem:[#allocation2 + $0x114] ss:$8 sps:$4 sm:$0xff]  }
 0x237   :  { %v2035_v18 = vmul.f32 0.5, %v2031_v24  ;;  %v2039_v40 = vmul.f32 %v1999_v16, %v1999_v16  ;;  %v3730_v24 = vld [vmem:[#allocation2 + $0x110] ss:$8 sps:$4 sm:$0xff]  }
 0x238   :  { %v2042_v41 = vsub.f32 %v2034_v38, %v2038_v39  ;;  %v3735_v38 = vld [vmem:[#allocation2 + $0x124] ss:$8 sps:$4 sm:$0xff]   ;;  %v3733_v39 = vld [vmem:[#allocation2 + $0x120] ss:$8 sps:$4 sm:$0xff]  }
 0x239   :  { %v2043_v46 = vsub.f32 %v2035_v18, %v2039_v40  ;;  %v3738_v18 = vld [vmem:[#allocation2 + $0x134] ss:$8 sps:$4 sm:$0xff]   ;;  %v3736_v40 = vld [vmem:[#allocation2 + $0x130] ss:$8 sps:$4 sm:$0xff]  }
 0x23a   :  { %v2046_v47 = vmax.f32 %v2042_v41, 0.0  ;;  %v3741_v41 = vld [vmem:[#allocation2 + $0x144] ss:$8 sps:$4 sm:$0xff]  }
 0x23b   :  { %v2047_v48 = vmax.f32 %v2043_v46, 0.0  ;;  %v3739_v46 = vld [vmem:[#allocation2 + $0x140] ss:$8 sps:$4 sm:$0xff]  }
 0x23c   :  { %v2050_v36 = vadd.f32 1e-05, %v2046_v47  ;;  %v3744_v47 = vld [vmem:[#allocation2 + $0x154] ss:$8 sps:$4 sm:$0xff]  }
 0x23d   :  { %v2051_v50 = vadd.f32 1e-05, %v2047_v48  ;;  %v3742_v48 = vld [vmem:[#allocation2 + $0x150] ss:$8 sps:$4 sm:$0xff]  }
 0x23e   :  { %3779 = vrsqrt.f32 %v2050_v36  ;;  %v3747_v36 = vld [vmem:[#allocation2 + $0x164] ss:$8 sps:$4 sm:$0xff]  }
 0x23f   :  { %3781 = vrsqrt.f32 %v2051_v50  ;;  %v3745_v50 = vld [vmem:[#allocation2 + $0x160] ss:$8 sps:$4 sm:$0xff]  }
 0x248   :  { %v3780_v55 = vpop.eup %3779 }
 0x249   :  { %v3782_v57 = vpop.eup %3781 }
 0x24a   :  { %v2061_v58 = vcombine.low %v3780_v55, %v3782_v57  ;;  %v3751_v55 = vld [vmem:[#allocation2 + $0x180] ss:$8 sps:$4 sm:$0xff]   ;;  %v3756_v57 = vld [vmem:[#allocation2 + $0x194] ss:$8 sps:$4 sm:$0xff]  }
 0x24c   :  { %v2075_v60 = vrot.slane %v2061_v58, %v4749_v56  ;;  %v3754_v58 = vld [vmem:[#allocation2 + $0x190] ss:$8 sps:$4 sm:$0xff]  }
 0x24e   :  { %v2076_v61 = vcombine.low %v2068_v59, %v2075_v60  ;;  %v3759_v59 = vld [vmem:[#allocation2 + $0x1a4] ss:$8 sps:$4 sm:$0xff]   ;;  %v3757_v60 = vld [vmem:[#allocation2 + $0x1a0] ss:$8 sps:$4 sm:$0xff]  }
 0x250   :  { %v2083_v2 = vrot.slane %v2076_v61, %v4749_v56  ;;  %v3762_v61 = vld [vmem:[#allocation2 + $0x1b4] ss:$8 sps:$4 sm:$0xff]  }
 0x252   :  { %v2085_v42 = vmul.f32 %v2083_v2, %v1964_v63  ;;  %v3760_v63 = vld [vmem:[#allocation2 + $0x1b0] ss:$8 sps:$4 sm:$0xff]   ;;  %v3763_v2 = vld [vmem:[#allocation2 + $0x1c0] ss:$8 sps:$4 sm:$0xff]  }
 0x254   :  { %v2098_v44 = vrot.slane %v2085_v42, %v2097_v0  ;;  %v2102_v45 = vrot.slane %v2085_v42, %v2101_v4  ;;  %v2090_v7 = vrot.slane %v2085_v42, %v4763_v5  ;;  %v2094_v8 = vrot.slane %v2085_v42, %v4766_v6  ;;  %v3766_v42 = vld [vmem:[#allocation2 + $0x1d0] ss:$8 sps:$4 sm:$0xff]  }
 0x256   :  { %v2109_v29 = vmul.f32 %v2098_v44, %v1998_v35  ;;  %v2110_v34 = vmul.f32 %v2102_v45, %v1999_v16  ;;  %v2144_v9 = vmul.f32 %v2102_v45, %v4740_v1  ;;  %v2107_v10 = vmul.f32 %v2090_v7, %v4720_v17  ;;  %v1965_v1 = vld [vmem:[%s4910_s3] sm:$0xf] }
 0x257   :  { %v2108_v11 = vmul.f32 %v2094_v8, %v4722_v20  ;;  %v2142_v12 = vmul.f32 %v4708_v3, %v2094_v8  ;;  %v2141_v43 = vmul.f32 %v4706_v51, %v2090_v7  ;;  %v2143_v13 = vmul.f32 %v2098_v44, %v4734_v62  ;;  %v3771_v44 = vld [vmem:[#allocation2 + $0x1e4] ss:$8 sps:$4 sm:$0xff]   ;;  %v3769_v45 = vld [vmem:[#allocation2 + $0x1e0] ss:$8 sps:$4 sm:$0xff]   ;;  %v3774_v7 = vld [vmem:[#allocation2 + $0x1f4] ss:$8 sps:$4 sm:$0xff]  }
 0x258   :  { %v2116_v14 = vcombine.low %v2109_v29, %v2110_v34  ;;  %v3772_v8 = vld [vmem:[#allocation2 + $0x1f0] ss:$8 sps:$4 sm:$0xff]  }
 0x259   :  { %v2115_v15 = vcombine.low %v2107_v10, %v2108_v11  ;;  %v2775_v10 = vld [vmem:[%s4914_s7 + $0x88] sm:$0xff] }
 0x25a   :  { %v2130_v19 = vrot.slane %v2116_v14, %v4749_v56  ;;  %v2776_v14 = vld [vmem:[%s4914_s7 + $0x90] sm:$0xff] }
 0x25b   :  { %v2123_v21 = vrot.slane %v2115_v15, %v4749_v56  ;;  %v2777_v15 = vld [vmem:[%s4914_s7 + $0x98] sm:$0xff] }
 0x25d   :  { %v2131_v22 = vcombine.low %v2123_v21, %v2130_v19  ;;  %v3234_v19 = vpack.c.bf16 %v2777_v15, %v2776_v14  ;;  %v2760_v21 = vld [vmem:[%s4914_s7 + $0x10] sm:$0xff] }
 0x25f   :  { %v2138_v17 = vrot.slane %v2131_v22, %v4749_v56  ;;  %v2761_v22 = vld [vmem:[%s4914_s7 + $0x18] sm:$0xff] }
 0x261   :  { %v2140_v20 = vsub.f32 %v1965_v1, %v2138_v17  ;;  %v3236_v1 = vpack.c.bf16 %v2761_v22, %v2760_v21  ;;  %v2778_v17 = vld [vmem:[%s4914_s7 + $0xa0] sm:$0xff] }
 0x263   :  { %v2153_v3 = vrot.slane %v2140_v20, %v4766_v6  ;;  %v2149_v51 = vrot.slane %v2140_v20, %v4763_v5  ;;  %v2161_v23 = vrot.slane %v2140_v20, %v2101_v4  ;;  %v2157_v62 = vrot.slane %v2140_v20, %v2097_v0  ;;  %v3765_v0 = vld [vmem:[#allocation2 + $0x1c4] ss:$8 sps:$4 sm:$0xff]   ;;  %v3768_v4 = vld [vmem:[#allocation2 + $0x1d4] ss:$8 sps:$4 sm:$0xff]  }
 0x264   :  { %v2779_v20 = vld [vmem:[%s4914_s7 + $0xa8] sm:$0xff] }
 0x265   :  { %v2167_v25 = vadd.f32 %v2153_v3, %v2142_v12  ;;  %v2166_v26 = vadd.f32 %v2149_v51, %v2141_v43  ;;  %v2169_v27 = vadd.f32 %v2161_v23, %v2144_v9  ;;  %v4784_v49 = vadd.f32 %v2157_v62, %v2143_v13  ;;  %v2774_v9 = vld [vmem:[%s4914_s7 + $0x80] sm:$0xff]  ;;  %v2759_v43 = vld [vmem:[%s4914_s7 + $0x8] sm:$0xff] }
 0x266   :  { %v3230_v11 = vpack.c.bf16 %v2775_v10, %v2774_v9  ;;  %v2758_v12 = vld [vmem:[%s4914_s7] sm:$0xff]  ;;  %v3238_v3 = vpack.c.bf16 %v2779_v20, %v2778_v17  ;;  %v2763_v23 = vld [vmem:[%s4914_s7 + $0x28] sm:$0xff] }
 0x267   :  { %v2171_v28 = vmax.f32 %v2167_v25, 0.0  ;;  %v2170_v30 = vmax.f32 %v2166_v26, 0.0  ;;  %v2173_v31 = vmax.f32 %v2169_v27, 0.0  ;;  %v2172_v29 = vmax.f32 %v4784_v49, 0.0  ;;  %v2762_v51 = vld [vmem:[%s4914_s7 + $0x20] sm:$0xff]  ;;  %v2780_v25 = vld [vmem:[%s4914_s7 + $0xb0] sm:$0xff] }
 0x268   :  { %v3232_v13 = vpack.c.bf16 %v2759_v43, %v2758_v12  ;;  %3231 = vmatprep.subr.bf16.mxu1 %v3230_v11  ;;  %v3240_v62 = vpack.c.bf16 %v2763_v23, %v2762_v51  ;;  %v2781_v26 = vld [vmem:[%s4914_s7 + $0xb8] sm:$0xff]  ;;  %v2764_v49 = vld [vmem:[%s4914_s7 + $0x30] sm:$0xff] }
 0x269   :  { %v2175_v32 = vpack.c.bf16 %v2171_v28, %v2171_v28  ;;  %v2174_v35 = vpack.c.bf16 %v2170_v30, %v2170_v30  ;;  %v2177_v16 = vpack.c.bf16 %v2173_v31, %v2173_v31  ;;  %v2176_v34 = vpack.c.bf16 %v2172_v29, %v2172_v29  ;;  %v2765_v28 = vld [vmem:[%s4914_s7 + $0x38] sm:$0xff]  ;;  %v2782_v31 = vld [vmem:[%s4914_s7 + $0xc0] sm:$0xff] }
 0x26a   :  { %3233 = vmatpush3.bf16.msra.mxu1 %v3232_v13  ;;  %v3242_v27 = vpack.c.bf16 %v2781_v26, %v2780_v25  ;;  %v3244_v30 = vpack.c.bf16 %v2765_v28, %v2764_v49 }
 0x26b   :  { %2594 = vmatprep.mubr.bf16.mxu0 %v2175_v32  ;;  %3235 = vmatprep.subr.bf16.mxu1 %v3234_v19  ;;  %v2783_v32 = vld [vmem:[%s4914_s7 + $0xc8] sm:$0xff] }
 0x26c   :  { %2595 = vmatmul.mubr.bf16.vlgmr.msra.gmra.mrb[4].mxu0 %v2174_v35  ;;  %v2766_v35 = vld [vmem:[%s4914_s7 + $0x40] sm:$0xff] }
 0x26d   :  { %2604 = vmatpush1.bf16.msra.mxu0 %v3727_v33  ;;  %2635 = vmatprep.mubr.bf16.mxu0 %v2177_v16  ;;  %v3246_v33 = vpack.c.bf16 %v2783_v32, %v2782_v31 }
 0x26e   :  { %2605 = vmatprep.subr.bf16.mxu0 %v3732_v37  ;;  %3237 = vmatpush3.bf16.msra.mxu1 %v3236_v1  ;;  %v2767_v37 = vld [vmem:[%s4914_s7 + $0x48] sm:$0xff] }
 0x26f   :  { %3239 = vmatprep.subr.bf16.mxu1 %v3238_v3  ;;  %v3248_v16 = vpack.c.bf16 %v2767_v37, %v2766_v35 }
 0x271   :  { %2606 = vmatpush1.bf16.msra.mxu0 %v3730_v24  ;;  %v2784_v24 = vld [vmem:[%s4914_s7 + $0xd0] sm:$0xff] }
 0x272   :  { %2607 = vmatprep.subr.bf16.mxu0 %v3735_v38  ;;  %3241 = vmatpush3.bf16.msra.mxu1 %v3240_v62  ;;  %v2785_v38 = vld [vmem:[%s4914_s7 + $0xd8] sm:$0xff] }
 0x273   :  { %3243 = vmatprep.subr.bf16.mxu1 %v3242_v27 }
 0x275   :  { %2608 = vmatpush1.bf16.msra.mxu0 %v3733_v39  ;;  %v3250_v39 = vpack.c.bf16 %v2785_v38, %v2784_v24 }
 0x276   :  { %2609 = vmatprep.subr.bf16.mxu0 %v3738_v18  ;;  %3245 = vmatpush3.bf16.msra.mxu1 %v3244_v30  ;;  %v2768_v18 = vld [vmem:[%s4914_s7 + $0x50] sm:$0xff] }
 0x277   :  { %3247 = vmatprep.subr.bf16.mxu1 %v3246_v33 }
 0x279   :  { %2610 = vmatpush1.bf16.msra.mxu0 %v3736_v40  ;;  %v2769_v40 = vld [vmem:[%s4914_s7 + $0x58] sm:$0xff] }
 0x27a   :  { %2611 = vmatprep.subr.bf16.mxu0 %v3741_v41  ;;  %3249 = vmatpush3.bf16.msra.mxu1 %v3248_v16  ;;  %v3252_v41 = vpack.c.bf16 %v2769_v40, %v2768_v18 }
 0x27b   :  { %3251 = vmatprep.subr.bf16.mxu1 %v3250_v39 }
 0x27d   :  { %2612 = vmatpush1.bf16.msra.mxu0 %v3739_v46  ;;  %v2786_v46 = vld [vmem:[%s4914_s7 + $0xe0] sm:$0xff] }
 0x27e   :  { %2613 = vmatprep.subr.bf16.mxu0 %v3744_v47  ;;  %v2787_v47 = vld [vmem:[%s4914_s7 + $0xe8] sm:$0xff]  ;;  %3253 = vmatpush3.bf16.msra.mxu1 %v3252_v41 }
 0x281   :  { %2614 = vmatpush1.bf16.msra.mxu0 %v3742_v48  ;;  %v2770_v48 = vld [vmem:[%s4914_s7 + $0x60] sm:$0xff] }
 0x282   :  { %2615 = vmatprep.subr.bf16.mxu0 %v3747_v36  ;;  %v3254_v36 = vpack.c.bf16 %v2787_v47, %v2786_v46  ;;  %v2644_v47 = vld [vmem:[%s4912_s5] sm:$0x3] }
 0x284   :  { %3255 = vmatprep.subr.bf16.mxu1 %v3254_v36 }
 0x285   :  { %2616 = vmatpush1.bf16.msra.mxu0 %v3745_v50  ;;  %v2771_v50 = vld [vmem:[%s4914_s7 + $0x68] sm:$0xff] }
 0x286   :  { %2617 = vmatprep.subr.bf16.mxu0 %v3750_v52  ;;  %v2788_v52 = vld [vmem:[%s4914_s7 + $0xf0] sm:$0xff] }
 0x289   :  { %2618 = vmatpush1.bf16.msra.mxu0 %v3748_v53  ;;  %v2789_v53 = vld [vmem:[%s4914_s7 + $0xf8] sm:$0xff] }
 0x28a   :  { %2619 = vmatprep.subr.bf16.mxu0 %v3753_v54  ;;  %v3256_v54 = vpack.c.bf16 %v2771_v50, %v2770_v48 }
 0x28c   :  { %3257 = vmatpush3.bf16.msra.mxu1 %v3256_v54 }
 0x28d   :  { %2620 = vmatpush1.bf16.msra.mxu0 %v3751_v55  ;;  %v3258_v55 = vpack.c.bf16 %v2789_v53, %v2788_v52 }
 0x28e   :  { %2621 = vmatprep.subr.bf16.mxu0 %v3756_v57  ;;  %v2772_v57 = vld [vmem:[%s4914_s7 + $0x70] sm:$0xff] }
 0x28f   :  { %3259 = vmatprep.subr.bf16.mxu1 %v3258_v55 }
 0x291   :  { %2622 = vmatpush1.bf16.msra.mxu0 %v3754_v58  ;;  %v2773_v58 = vld [vmem:[%s4914_s7 + $0x78] sm:$0xff] }
 0x292   :  { %2623 = vmatprep.subr.bf16.mxu0 %v3759_v59  ;;  %v3260_v59 = vpack.c.bf16 %v2773_v58, %v2772_v57 }
 0x294   :  { %3261 = vmatpush3.bf16.msra.mxu1 %v3260_v59 }
 0x295   :  { %2624 = vmatpush1.bf16.msra.mxu0 %v3757_v60 }
 0x296   :  { %2625 = vmatprep.subr.bf16.mxu0 %v3762_v61 }
 0x299   :  { %2626 = vmatpush1.bf16.msra.mxu0 %v3760_v63 }
 0x29a   :  { %2627 = vmatprep.subr.bf16.mxu0 %v3765_v0 }
 0x29d   :  { %2628 = vmatpush1.bf16.msra.mxu0 %v3763_v2 }
 0x29e   :  { %2629 = vmatprep.subr.bf16.mxu0 %v3768_v4 }
 0x2a1   :  { %2630 = vmatpush1.bf16.msra.mxu0 %v3766_v42 }
 0x2a2   :  { %2631 = vmatprep.subr.bf16.mxu0 %v3771_v44 }
 0x2a5   :  { %2632 = vmatpush1.bf16.msra.mxu0 %v3769_v45 }
 0x2a6   :  { %2633 = vmatprep.subr.bf16.mxu0 %v3774_v7 }
 0x2a9   :  { %2634 = vmatpush1.bf16.msra.mxu0 %v3772_v8 }
 0x2ac   :  { %2636 = vmatmul.mubr.bf16.vlgmr.msra.gmra.mrb[4].mxu0 %v2176_v34 }
 0x37f   :  { %v2637_v60 = vpop.f32.mrb[4].mxu0 }
 0x380   :  { %v2646_v61 = vsel %vm1966_vm0, %v2637_v60, 0.0  ;;  %v2662_v63 = vmul.f32 %v2637_v60, %v2637_v60  ;;  %v2639_v0 = vpop.f32.mrb[5].mxu0 }
 0x381   :  { %v2647_v2 = vrot.slane %v2646_v61, 4  ;;  %v2653_v4 = vsel %vm1966_vm0, %v2639_v0, 0.0  ;;  %v2663_v42 = vmul.f32 %v2639_v0, %v2639_v0  ;;  %v2641_v44 = vpop.f32.mrb[6].mxu0 }
 0x382   :  { %v2664_v45 = vsel %vm1966_vm0, %v2662_v63, 0.0  ;;  %v2654_v7 = vrot.slane %v2653_v4, 4  ;;  %v2642_v8 = vpop.f32.mrb[7].mxu0 }
 0x383   :  { %v2648_v29 = vadd.f32 %v2647_v2, %v2646_v61  ;;  %v2665_v34 = vrot.slane %v2664_v45, 4  ;;  %v2671_v9 = vsel %vm1966_vm0, %v2663_v42, 0.0  ;;  %v2645_v61 = vld [vmem:[%s4913_s6] sm:$0x3] }
 0x384   :  { %v2655_v10 = vadd.f32 %v2654_v7, %v2653_v4  ;;  %v2672_v11 = vrot.slane %v2671_v9, 4 }
 0x385   :  { %v2649_v12 = vrot.slane %v2648_v29, 2  ;;  %v2666_v43 = vadd.f32 %v2665_v34, %v2664_v45 }
 0x386   :  { %v2656_v13 = vrot.slane %v2655_v10, 2  ;;  %v2673_v14 = vadd.f32 %v2672_v11, %v2671_v9 }
 0x387   :  { %v2650_v15 = vadd.f32 %v2649_v12, %v2648_v29  ;;  %v2667_v19 = vrot.slane %v2666_v43, 2 }
 0x388   :  { %v2657_v21 = vadd.f32 %v2656_v13, %v2655_v10  ;;  %v2674_v22 = vrot.slane %v2673_v14, 2 }
 0x389   :  { %v2651_v1 = vrot.slane %v2650_v15, 1  ;;  %v2668_v17 = vadd.f32 %v2667_v19, %v2666_v43 }
 0x38a   :  { %v2658_v20 = vrot.slane %v2657_v21, 1  ;;  %v2675_v3 = vadd.f32 %v2674_v22, %v2673_v14 }
 0x38b   :  { %v2652_v51 = vadd.f32 %v2651_v1, %v2650_v15  ;;  %v2669_v23 = vrot.slane %v2668_v17, 1 }
 0x38c   :  { %v2659_v62 = vadd.f32 %v2658_v20, %v2657_v21  ;;  %v2676_v25 = vrot.slane %v2675_v3, 1 }
 0x38d   :  { %v2660_v26 = vmul.f32 0.5, %v2652_v51  ;;  %v2670_v27 = vadd.f32 %v2669_v23, %v2668_v17 }
 0x38e   :  { %v2661_v49 = vmul.f32 0.5, %v2659_v62  ;;  %v2677_v28 = vadd.f32 %v2676_v25, %v2675_v3 }
 0x38f   :  { %v2678_v30 = vmul.f32 0.5, %v2670_v27  ;;  %v2680_v31 = vmul.f32 %v2660_v26, %v2660_v26 }
 0x390   :  { %v2679_v32 = vmul.f32 0.5, %v2677_v28  ;;  %v2681_v33 = vmul.f32 %v2661_v49, %v2661_v49 }
 0x391   :  { %v2682_v35 = vsub.f32 %v2678_v30, %v2680_v31 }
 0x392   :  { %v2683_v37 = vsub.f32 %v2679_v32, %v2681_v33 }
 0x393   :  { %v2684_v16 = vmax.f32 %v2682_v35, 0.0 }
 0x394   :  { %v2685_v24 = vmax.f32 %v2683_v37, 0.0 }
 0x395   :  { %v2686_v38 = vadd.f32 1e-05, %v2684_v16 }
 0x396   :  { %v2687_v39 = vadd.f32 1e-05, %v2685_v24 }
 0x397   :  { %3783 = vrsqrt.f32 %v2686_v38 }
 0x398   :  { %3785 = vrsqrt.f32 %v2687_v39 }
 0x3a1   :  { %v3784_v18 = vpop.eup %3783 }
 0x3a2   :  { %v3786_v40 = vpop.eup %3785 }
 0x3a3   :  { %v2692_v41 = vcombine.low %v3784_v18, %v3786_v40 }
 0x3a5   :  { %v2699_v46 = vrot.slane %v2692_v41, %v4749_v56 }
 0x3a7   :  { %v2706_v48 = vrot.slane %v2699_v46, %v4749_v56 }
 0x3a9   :  { %v2708_v36 = vmul.f32 %v2706_v48, %v2644_v47 }
 0x3ab   :  { %v2713_v50 = vrot.slane %v2708_v36, %v4763_v5  ;;  %v2717_v52 = vrot.slane %v2708_v36, %v4766_v6 }
 0x3ad   :  { %v2720_v53 = vmul.f32 %v2713_v50, %v2660_v26  ;;  %v2721_v54 = vmul.f32 %v2717_v52, %v2661_v49  ;;  %v2742_v55 = vmul.f32 %v2717_v52, %v2639_v0  ;;  %v2741_v57 = vmul.f32 %v2713_v50, %v2637_v60  ;;  %v3194_v0 = vld [vmem:[%s4915_s8] ss:$0 sm:$0xff] }
 0x3af   :  { %v2724_v58 = vcombine.low %v2720_v53, %v2721_v54 }
 0x3b1   :  { %v2731_v59 = vrot.slane %v2724_v58, %v4749_v56 }
 0x3b3   :  { %v2738_v63 = vrot.slane %v2731_v59, %v4749_v56 }
 0x3b5   :  { %v2740_v2 = vsub.f32 %v2645_v61, %v2738_v63 }
 0x3b7   :  { %v2751_v4 = vrot.slane %v2740_v2, %v4766_v6  ;;  %v2747_v42 = vrot.slane %v2740_v2, %v4763_v5 }
 0x3b9   :  { %v2755_v44 = vadd.f32 %v2751_v4, %v2742_v55  ;;  %v2754_v45 = vadd.f32 %v2747_v42, %v2741_v57 }
 0x3bb   :  { %v2757_v7 = vmax.f32 %v2755_v44, 0.0  ;;  %v2756_v8 = vmax.f32 %v2754_v45, 0.0 }
 0x3bd   :  { %2861 = vmatprep.mubr.f32.mxu1 %v2757_v7 }
 0x3be   :  { %2862 = vmatmul.mubr.f32.vlgmr.msra.gmra.mrb[8].mxu1 %v2756_v8 }
 0x491   :  { %v3227_v60 = vpop.f32.mrb[8].mxu1 }
 0x492   :  { %v3228_v29 = vpop.f32.mrb[9].mxu1 }
 0x493   :  { %v3229_v34 = vadd.f32 %v3228_v29, %v3227_v60 }
 0x495   :  { %v2864_v56 = vadd.f32 %v3229_v34, %v3194_v0 }
 0x497   :  { %2868 = vst.msk [vmem:[%s4916_s9] sm:$0x3] %vm2867_vm1, %v2864_v56 }
 0x498   :  { %2873 = vsyncpa [#allocation3], 1 }

</bundles_post_ra>
